<compile_context>
chip_gen: v5e
topology: v5e:2x2
jax: 0.10.0
libtpu: 0.0.40
codegen_flags: <defaults>
</compile_context>

<pallas_src>
import math
import numpy as np
import jax
import jax.numpy as jnp
from jax.experimental import pallas as pl
from jax.experimental.pallas import tpu as pltpu

D_MODEL = 20          # matches the module's global d_model
NUM_FEATURES = 32     # "input_dim" for the src embedding (small synthetic size)
SEQ = 8               # sequence length
BATCH = 64            # independent sequences folded into one kernel call
EPS = 1e-6
LANE = 128            # lane width of the (padded) final-matmul result
OUT_ROWS = 8          # sublane-padded output channel count (2 real + 6 zero)


def encoder_kernel(x_ref, w1_ref, b1_ref, w2_ref, bias_t_ref, o_ref):
    # src_embed: Linear(num_features -> d_model)   (MXU, f32 accumulate)
    x = x_ref[...]                                                          # (tm, F)
    h = jnp.dot(x, w1_ref[...], preferred_element_type=jnp.float32) + b1_ref[...]

    # src_embed: LayerNorm core (torch custom LN: unbiased std, divide by (std + eps)).
    # gamma/beta (and pe/b2) are folded into W2' / the transposed bias outside the kernel.
    d = h.shape[-1]
    mean = jnp.mean(h, axis=-1, keepdims=True)
    centered = h - mean
    var_unbiased = jnp.sum(centered * centered, axis=-1, keepdims=True) * (1.0 / (d - 1))
    inv = 1.0 / (jnp.sqrt(var_unbiased) + EPS)       # exact (matches torch to f32 precision)
    norm = centered * inv                            # (tm, D)

    # TODO(synk): encoder `layer` class is undefined in the provided source; layer stack is identity.

    # final fc (gamma folded into W2'; pe/beta/b2 folded into the transposed bias).
    y = jnp.dot(norm, w2_ref[...], preferred_element_type=jnp.float32)     # (tm, LANE), cols>=2 zero
    # Compact the output: aligned sublane->lane shuffle (2-D transpose on the XLU),
    # keep the first OUT_ROWS rows -> lane-dense (OUT_ROWS, tm) store, ~16x fewer HBM bytes.
    y_t = y.T                                                               # (LANE, tm)
    o_ref[...] = y_t[:OUT_ROWS, :] + bias_t_ref[...]                        # (OUT_ROWS, tm)


def make_positional_encoding(max_len, d_model):
    position = np.arange(max_len, dtype=np.float32)[:, None]
    div_term = np.exp(np.arange(0, d_model, 2, dtype=np.float32)
                      * (-np.log(10000.0) / d_model))
    pe = np.zeros((max_len, d_model), dtype=np.float32)
    pe[:, 0::2] = np.sin(position * div_term)
    pe[:, 1::2] = np.cos(position * div_term)
    return jnp.asarray(pe)


def _num_tensorcores():
    # v7x has 2 TensorCores per chip; v5e/v6e have 1.  On single-TC chips a multi-step
    # grid is a pure serial-overhead loop, so collapse to one step there.
    try:
        kind = jax.devices()[0].device_kind.lower().replace(" ", "")
    except Exception:
        return 1
    return 2 if ("v7" in kind or "tpu7" in kind) else 1


def _choose_tiling(rows, seq, n_cores):
    # tm must be a multiple of seq (positional-bias periodicity) and of 128
    # (lane-dense blocks on the output/ bias side).
    unit = seq * 128 // math.gcd(seq, 128)
    rows_pad = ((rows + unit - 1) // unit) * unit          # == rows for the default shapes
    n_tiles = n_cores if rows_pad % (n_cores * unit) == 0 else 1
    tm = rows_pad // n_tiles
    # VMEM guard (only matters for very large batches): keep the double-buffered
    # x-tile + out-tile well under v5e's 16 MiB scoped default / v7x's per-core budget.
    max_tm = 16384
    while tm > max_tm and tm % (2 * unit) == 0:
        tm //= 2
        n_tiles *= 2
    return tm, n_tiles, rows_pad


def encoder_forward(x, params):
    """x: (S, F) or (B, S, F).  Returns (1, S, 2) or (B, S, 2).

    For a 2-D input this matches the original module's (1, S, 2) output; for a
    3-D batch, out[b] equals the module applied to x[b].
    """
    w1, b1, gamma, beta, pe, w2, b2 = params
    if x.ndim == 2:
        x = x[None]
    B, S, F = x.shape
    D = w1.shape[1]

    # ---- constant folding (valid while the encoder layer stack is identity) ----
    #   y = norm_core @ (gamma ⊙ W2)  +  (pe + beta) @ W2 + b2
    w2g = gamma.reshape(D, 1) * w2                                          # (D, 2)
    bias_row = pe[:S] @ w2 + beta.reshape(1, D) @ w2 + b2.reshape(1, 2)     # (S, 2)

    # Lane-pad the final weight to 128 so the in-kernel matmul / transpose stay aligned.
    w2g_pad = jnp.zeros((D, LANE), jnp.float32).at[:, :2].set(w2g)

    rows = B * S
    tm, n_tiles, rows_pad = _choose_tiling(rows, S, _num_tensorcores())

    # Transposed, position-tiled bias: bias_t[c, r] = bias_row[r % S, c] (c < 2, else 0).
    bias_t = jnp.zeros((OUT_ROWS, S), jnp.float32).at[:2, :].set(bias_row.T)
    bias_t = jnp.tile(bias_t, (1, tm // S))                                 # (OUT_ROWS, tm)

    # Flatten batch*seq onto the M (sublane) axis; pad only if B*S is ragged (not taken here).
    x2 = x.reshape(rows, F)
    if rows_pad != rows:
        x2 = jnp.pad(x2, ((0, rows_pad - rows), (0, 0)))

    out_t = pl.pallas_call(
        encoder_kernel,
        out_shape=jax.ShapeDtypeStruct((OUT_ROWS, rows_pad), jnp.float32),
        grid=(n_tiles,),
        in_specs=[
            pl.BlockSpec((tm, F), lambda i: (i, 0)),          # x rows (streamed)
            pl.BlockSpec((F, D), lambda i: (0, 0)),           # W1 (resident)
            pl.BlockSpec((1, D), lambda i: (0, 0)),           # b1 (resident)
            pl.BlockSpec((D, LANE), lambda i: (0, 0)),        # W2' lane-padded (resident)
            pl.BlockSpec((OUT_ROWS, tm), lambda i: (0, 0)),   # folded transposed bias (resident)
        ],
        out_specs=pl.BlockSpec((OUT_ROWS, tm), lambda i: (0, i)),
        compiler_params=pltpu.CompilerParams(
            dimension_semantics=("parallel",)),
        cost_estimate=pl.CostEstimate(
            flops=2 * rows_pad * (F * D + D * LANE),
            transcendentals=rows_pad,
            bytes_accessed=4 * (rows_pad * (F + OUT_ROWS)
                                + F * D + D + D * LANE + OUT_ROWS * tm)),
    )(x2, w1, b1, w2g_pad, bias_t)

    # Only the compact (2, rows) slab is touched here (no 64x-padded slice pass).
    return out_t[:2, :rows].T.reshape(B, S, 2)


def init_params(key, num_features, d_model):
    k1, k2, k3, k4 = jax.random.split(key, 4)
    w1 = jax.random.normal(k1, (num_features, d_model), jnp.float32) * 0.1
    b1 = jax.random.normal(k2, (1, d_model), jnp.float32) * 0.1
    gamma = jnp.ones((1, d_model), jnp.float32)   # LayerNorm a_2
    beta = jnp.zeros((1, d_model), jnp.float32)   # LayerNorm b_2
    pe = make_positional_encoding(64, d_model)
    w2 = jax.random.normal(k3, (d_model, 2), jnp.float32) * 0.1
    b2 = jax.random.normal(k4, (1, 2), jnp.float32) * 0.1
    return (w1, b1, gamma, beta, pe, w2, b2)


if __name__ == "__main__":
    key = jax.random.PRNGKey(0)
    kx, kp = jax.random.split(key)
    x = jax.random.normal(kx, (BATCH, SEQ, NUM_FEATURES), jnp.float32)
    params = init_params(kp, NUM_FEATURES, D_MODEL)

    fwd = jax.jit(lambda xx: encoder_forward(xx, params))
    y = fwd(x)
    jax.block_until_ready(y)
    assert y.shape == (BATCH, SEQ, 2), y.shape
    assert bool(jnp.all(jnp.isfinite(y)))
    print("KERNEL_OK")
</pallas_src>

<mosaic_0001>
module attributes {stable_mosaic.version = 11 : i64} {
  func.func @encoder_kernel(%arg0: i32, %arg1: memref<512x32xf32, #tpu.memory_space<vmem>>, %arg2: memref<32x20xf32, #tpu.memory_space<vmem>>, %arg3: memref<1x20xf32, #tpu.memory_space<vmem>>, %arg4: memref<20x128xf32, #tpu.memory_space<vmem>>, %arg5: memref<8x512xf32, #tpu.memory_space<vmem>>, %arg6: memref<8x512xf32, #tpu.memory_space<vmem>>) attributes {dimension_semantics = [#tpu.dimension_semantics<parallel>], iteration_bounds = array<i64: 1>, scalar_prefetch = 0 : i64, scratch_operands = 0 : i64, tpu.core_type = #tpu.core_type<tc>, window_params = [{transform_indices = @transform_0, window_bounds = array<i64: 512, 32>}, {pipeline_mode = #tpu.pipeline_mode<synchronous>, transform_indices = @transform_1, window_bounds = array<i64: 32, 20>}, {pipeline_mode = #tpu.pipeline_mode<synchronous>, transform_indices = @transform_2, window_bounds = array<i64: 1, 20>}, {pipeline_mode = #tpu.pipeline_mode<synchronous>, transform_indices = @transform_3, window_bounds = array<i64: 20, 128>}, {pipeline_mode = #tpu.pipeline_mode<synchronous>, transform_indices = @transform_4, window_bounds = array<i64: 8, 512>}, {transform_indices = @transform_5, window_bounds = array<i64: 8, 512>}]} {
    %c0 = arith.constant 0 : index
    %c0_0 = arith.constant 0 : index
    %0 = vector.load %arg1[%c0, %c0_0] : memref<512x32xf32, #tpu.memory_space<vmem>>, vector<512x32xf32>
    %c0_1 = arith.constant 0 : index
    %c0_2 = arith.constant 0 : index
    %1 = vector.load %arg2[%c0_1, %c0_2] : memref<32x20xf32, #tpu.memory_space<vmem>>, vector<32x20xf32>
    %cst = arith.constant dense<0.000000e+00> : vector<512x20xf32>
    %2 = tpu.matmul %0, %1, %cst {dimension_numbers = #tpu.dot_dimension_numbers<[1], [0], [0], [1], [0, 0, 1, 1], [], []>} : vector<512x32xf32>, vector<32x20xf32>, vector<512x20xf32> -> vector<512x20xf32>
    %c0_3 = arith.constant 0 : index
    %c0_4 = arith.constant 0 : index
    %3 = vector.load %arg3[%c0_3, %c0_4] : memref<1x20xf32, #tpu.memory_space<vmem>>, vector<1x20xf32>
    %4 = vector.broadcast %3 : vector<1x20xf32> to vector<512x20xf32>
    %5 = arith.addf %2, %4 : vector<512x20xf32>
    %cst_5 = arith.constant dense<0.000000e+00> : vector<512xf32>
    %6 = vector.multi_reduction <add>, %5, %cst_5 [1] : vector<512x20xf32> to vector<512xf32>
    %7 = vector.shape_cast %6 : vector<512xf32> to vector<512x1xf32>
    %cst_6 = arith.constant 2.000000e+01 : f32
    %8 = vector.broadcast %cst_6 : f32 to vector<512x1xf32>
    %9 = arith.divf %7, %8 : vector<512x1xf32>
    %10 = vector.broadcast %9 : vector<512x1xf32> to vector<512x20xf32>
    %11 = arith.subf %5, %10 : vector<512x20xf32>
    %12 = arith.mulf %11, %11 : vector<512x20xf32>
    %cst_7 = arith.constant dense<0.000000e+00> : vector<512xf32>
    %13 = vector.multi_reduction <add>, %12, %cst_7 [1] : vector<512x20xf32> to vector<512xf32>
    %14 = vector.shape_cast %13 : vector<512xf32> to vector<512x1xf32>
    %cst_8 = arith.constant 0.0526315793 : f32
    %15 = vector.broadcast %cst_8 : f32 to vector<512x1xf32>
    %16 = arith.mulf %14, %15 : vector<512x1xf32>
    %17 = math.sqrt %16 : vector<512x1xf32>
    %cst_9 = arith.constant 9.99999997E-7 : f32
    %18 = vector.broadcast %cst_9 : f32 to vector<512x1xf32>
    %19 = arith.addf %17, %18 : vector<512x1xf32>
    %cst_10 = arith.constant 1.000000e+00 : f32
    %20 = vector.broadcast %cst_10 : f32 to vector<512x1xf32>
    %21 = arith.divf %20, %19 : vector<512x1xf32>
    %22 = vector.broadcast %21 : vector<512x1xf32> to vector<512x20xf32>
    %23 = arith.mulf %11, %22 : vector<512x20xf32>
    %c0_11 = arith.constant 0 : index
    %c0_12 = arith.constant 0 : index
    %24 = vector.load %arg4[%c0_11, %c0_12] : memref<20x128xf32, #tpu.memory_space<vmem>>, vector<20x128xf32>
    %cst_13 = arith.constant dense<0.000000e+00> : vector<512x128xf32>
    %25 = tpu.matmul %23, %24, %cst_13 {dimension_numbers = #tpu.dot_dimension_numbers<[1], [0], [0], [1], [0, 0, 1, 1], [], []>} : vector<512x20xf32>, vector<20x128xf32>, vector<512x128xf32> -> vector<512x128xf32>
    %26 = tpu.transpose %25, [1, 0] : vector<512x128xf32> -> vector<128x512xf32>
    %27 = vector.extract_strided_slice %26 {offsets = [0, 0], sizes = [8, 512], strides = [1, 1]} : vector<128x512xf32> to vector<8x512xf32>
    %c0_14 = arith.constant 0 : index
    %c0_15 = arith.constant 0 : index
    %28 = vector.load %arg5[%c0_14, %c0_15] : memref<8x512xf32, #tpu.memory_space<vmem>>, vector<8x512xf32>
    %29 = arith.addf %27, %28 : vector<8x512xf32>
    %c0_16 = arith.constant 0 : index
    %c0_17 = arith.constant 0 : index
    %30 = vector.load %arg6[%c0_16, %c0_17] : memref<8x512xf32, #tpu.memory_space<vmem>>, vector<8x512xf32>
    tpu.vector_store %arg6[%c0_16, %c0_17], %29 {strides = array<i32>} : memref<8x512xf32, #tpu.memory_space<vmem>>, vector<8x512xf32>,
    return
  }
  func.func @transform_0(%arg0: i32) -> (i32, i32) {
    %c0_i32 = arith.constant 0 : i32
    %c0_i32_0 = arith.constant 0 : i32
    return %arg0, %c0_i32 : i32, i32
  }
  func.func @transform_1(%arg0: i32) -> (i32, i32) {
    %c0_i32 = arith.constant 0 : i32
    %c0_i32_0 = arith.constant 0 : i32
    %c0_i32_1 = arith.constant 0 : i32
    return %c0_i32, %c0_i32_0 : i32, i32
  }
  func.func @transform_2(%arg0: i32) -> (i32, i32) {
    %c0_i32 = arith.constant 0 : i32
    %c0_i32_0 = arith.constant 0 : i32
    %c0_i32_1 = arith.constant 0 : i32
    return %c0_i32, %c0_i32_0 : i32, i32
  }
  func.func @transform_3(%arg0: i32) -> (i32, i32) {
    %c0_i32 = arith.constant 0 : i32
    %c0_i32_0 = arith.constant 0 : i32
    %c0_i32_1 = arith.constant 0 : i32
    return %c0_i32, %c0_i32_0 : i32, i32
  }
  func.func @transform_4(%arg0: i32) -> (i32, i32) {
    %c0_i32 = arith.constant 0 : i32
    %c0_i32_0 = arith.constant 0 : i32
    %c0_i32_1 = arith.constant 0 : i32
    return %c0_i32, %c0_i32_0 : i32, i32
  }
  func.func @transform_5(%arg0: i32) -> (i32, i32) {
    %c0_i32 = arith.constant 0 : i32
    %c0_i32_0 = arith.constant 0 : i32
    return %c0_i32, %arg0 : i32, i32
  }
}

</mosaic_0001>

<bundles_post_ra>
// kernel: tile.9
= control target key start
LH: loop header
LB: loop body
LE: loop exit
PB: predicated region body
PF: predicated region fallthrough
CT: control target
= control target key end

     0   :  { %vm93_vm0 = vcmask 1041409   ;;  %vm97_vm1 = vcmask 1042434   ;;  %vm101_vm2 = vcmask 1043459   ;;  %vm105_vm3 = vcmask 1044484   ;;  %s2733_s25 = smov 120   ;;  %s2734_s3 = smov 112   ;;  %s5016_s0 = inlined_call_operand.vmem [shape: f32[8,64,8], index: 0, kind: input, shape index: {}]   ;;  %s5017_s1 = inlined_call_operand.vmem [shape: f32[8,512], index: 1, kind: output, shape index: {}]  }
   0x1   :  { %vm109_vm4 = vcmask 1045509   ;;  %v2210_v0 = vld [vmem:[%s5016_s0 + $0x2f] sm:$0x1]   ;;  %vm113_vm5 = vcmask 1046534   ;;  %vm117_vm6 = vcmask 1047559   ;;  %s2735_s24 = smov 104  }
   0x2   :  { %v2211_v1 = vld [vmem:[%s5016_s0 + $0x6e] sm:$0x2]   ;;  %v2219_v23 = vld [vmem:[%s5016_s0 + $0x3f] sm:$0x1]   ;;  %v2254_v52 = vld [vmem:[%s5016_s0 + $0x3e] sm:$0x1]  }
   0x3   :  { %v2212_v2 = vld [vmem:[%s5016_s0 + $0xad] sm:$0x4]   ;;  %v163_v4 = vsel %vm93_vm0, %v2211_v1, %v2210_v0  ;;  %v2220_v24 = vld [vmem:[%s5016_s0 + $0x7e] sm:$0x2]   ;;  %v2255_v53 = vld [vmem:[%s5016_s0 + $0x7d] sm:$0x2]  }
   0x4   :  { %v2213_v3 = vld [vmem:[%s5016_s0 + $0xec] sm:$0x8]   ;;  %v167_v7 = vsel %vm97_vm1, %v2212_v2, %v163_v4  ;;  %v2221_v25 = vld [vmem:[%s5016_s0 + $0xbd] sm:$0x4]   ;;  %v198_v29 = vsel %vm93_vm0, %v2220_v24, %v2219_v23  ;;  %v337_v56 = vsel %vm93_vm0, %v2255_v53, %v2254_v52  ;;  %v2256_v57 = vld [vmem:[%s5016_s0 + $0xbc] sm:$0x4]  }
   0x5   :  { %v2214_v5 = vld [vmem:[%s5016_s0 + $0x12b] sm:$0x10]   ;;  %v171_v11 = vsel %vm101_vm2, %v2213_v3, %v167_v7  ;;  %v2222_v30 = vld [vmem:[%s5016_s0 + $0xfc] sm:$0x8]   ;;  %v202_v34 = vsel %vm97_vm1, %v2221_v25, %v198_v29  ;;  %v2257_v58 = vld [vmem:[%s5016_s0 + $0xfb] sm:$0x8]   ;;  %v341_v62 = vsel %vm97_vm1, %v2256_v57, %v337_v56 }
   0x6   :  { %v2215_v6 = vld [vmem:[%s5016_s0 + $0x16a] sm:$0x20]   ;;  %v175_v16 = vsel %vm105_vm3, %v2214_v5, %v171_v11  ;;  %v2223_v31 = vld [vmem:[%s5016_s0 + $0x13b] sm:$0x10]   ;;  %v206_v39 = vsel %vm101_vm2, %v2222_v30, %v202_v34  ;;  %v2258_v59 = vld [vmem:[%s5016_s0 + $0x13a] sm:$0x10]   ;;  %v345_v2 = vsel %vm101_vm2, %v2257_v58, %v341_v62 }
   0x7   :  { %v2216_v8 = vld [vmem:[%s5016_s0 + $0x1a9] sm:$0x40]   ;;  %v179_v21 = vsel %vm109_vm4, %v2215_v6, %v175_v16  ;;  %v2224_v35 = vld [vmem:[%s5016_s0 + $0x17a] sm:$0x20]   ;;  %v210_v44 = vsel %vm105_vm3, %v2223_v31, %v206_v39  ;;  %v2259_v63 = vld [vmem:[%s5016_s0 + $0x179] sm:$0x20]   ;;  %v349_v7 = vsel %vm105_vm3, %v2258_v59, %v345_v2 }
   0x8   :  { %v2193_v9 = vld [vmem:[%s5016_s0 + $0xf] sm:$0x1]   ;;  %v183_v26 = vsel %vm113_vm5, %v2216_v8, %v179_v21  ;;  %v2225_v36 = vld [vmem:[%s5016_s0 + $0x1b9] sm:$0x40]   ;;  %v214_v49 = vsel %vm109_vm4, %v2224_v35, %v210_v44  ;;  %v2245_v3 = vld [vmem:[%s5016_s0 + $0x2e] sm:$0x1]  }
   0x9   :  { %v2194_v10 = vld [vmem:[%s5016_s0 + $0x4e] sm:$0x2]   ;;  %v2201_v37 = vld [vmem:[%s5016_s0 + $0x1f] sm:$0x1]   ;;  %v218_v54 = vsel %vm113_vm5, %v2225_v36, %v214_v49  ;;  %v2246_v4 = vld [vmem:[%s5016_s0 + $0x6d] sm:$0x2]  }
   0xa   :  { %v94_v12 = vsel %vm93_vm0, %v2194_v10, %v2193_v9  ;;  %v2195_v13 = vld [vmem:[%s5016_s0 + $0x8d] sm:$0x4]   ;;  %v2202_v40 = vld [vmem:[%s5016_s0 + $0x5e] sm:$0x2]   ;;  %v2247_v5 = vld [vmem:[%s5016_s0 + $0xac] sm:$0x4]   ;;  %v302_v8 = vsel %vm93_vm0, %v2246_v4, %v2245_v3 }
   0xb   :  { %v2196_v14 = vld [vmem:[%s5016_s0 + $0xcc] sm:$0x8]   ;;  %v98_v18 = vsel %vm97_vm1, %v2195_v13, %v94_v12  ;;  %v2203_v41 = vld [vmem:[%s5016_s0 + $0x9d] sm:$0x4]   ;;  %v128_v46 = vsel %vm93_vm0, %v2202_v40, %v2201_v37  ;;  %v2248_v9 = vld [vmem:[%s5016_s0 + $0xeb] sm:$0x8]   ;;  %v353_v12 = vsel %vm109_vm4, %v2259_v63, %v349_v7 }
   0xc   :  { %v2197_v15 = vld [vmem:[%s5016_s0 + $0x10b] sm:$0x10]   ;;  %v102_v22 = vsel %vm101_vm2, %v2196_v14, %v98_v18  ;;  %v2204_v42 = vld [vmem:[%s5016_s0 + $0xdc] sm:$0x8]   ;;  %v132_v50 = vsel %vm97_vm1, %v2203_v41, %v128_v46  ;;  %v2249_v10 = vld [vmem:[%s5016_s0 + $0x12a] sm:$0x10]   ;;  %v306_v14 = vsel %vm97_vm1, %v2247_v5, %v302_v8 }
   0xd   :  { %v2217_v17 = vld [vmem:[%s5016_s0 + $0x1e8] sm:$0x80]   ;;  %v106_v27 = vsel %vm105_vm3, %v2197_v15, %v102_v22  ;;  %v2226_v45 = vld [vmem:[%s5016_s0 + $0x1f8] sm:$0x80]   ;;  %v136_v55 = vsel %vm101_vm2, %v2204_v42, %v132_v50  ;;  %v2260_v13 = vld [vmem:[%s5016_s0 + $0x1b8] sm:$0x40]   ;;  %v310_v18 = vsel %vm101_vm2, %v2248_v9, %v306_v14 }
   0xe   :  { %v2198_v19 = vld [vmem:[%s5016_s0 + $0x14a] sm:$0x20]   ;;  %v187_v32 = vsel %vm117_vm6, %v2217_v17, %v183_v26  ;;  %v2205_v47 = vld [vmem:[%s5016_s0 + $0x11b] sm:$0x10]   ;;  %v222_v0 = vsel %vm117_vm6, %v2226_v45, %v218_v54  ;;  %v2250_v15 = vld [vmem:[%s5016_s0 + $0x169] sm:$0x20]   ;;  %v314_v22 = vsel %vm105_vm3, %v2249_v10, %v310_v18 }
   0xf   :  { %v2199_v20 = vld [vmem:[%s5016_s0 + $0x189] sm:$0x40]   ;;  %v110_v33 = vsel %vm109_vm4, %v2198_v19, %v106_v27  ;;  %188 = vrot.lane.b32.xlu1 %v187_v32, %s2733_s25  ;;  %v2206_v48 = vld [vmem:[%s5016_s0 + $0x15a] sm:$0x20]   ;;  %v140_v60 = vsel %vm105_vm3, %v2205_v47, %v136_v55  ;;  %v2228_v16 = vld [vmem:[%s5016_s0 + $0xe] sm:$0x1]   ;;  %v357_v27 = vsel %vm113_vm5, %v2260_v13, %v353_v12 }
  0x10   :  { %v2200_v28 = vld [vmem:[%s5016_s0 + $0x1c8] sm:$0x80]   ;;  %v114_v38 = vsel %vm113_vm5, %v2199_v20, %v110_v33  ;;  %v2207_v51 = vld [vmem:[%s5016_s0 + $0x199] sm:$0x40]   ;;  %v144_v1 = vsel %vm109_vm4, %v2206_v48, %v140_v60  ;;  %v2261_v17 = vld [vmem:[%s5016_s0 + $0x1f7] sm:$0x80]  }
  0x11   :  { %v118_v43 = vsel %vm117_vm6, %v2200_v28, %v114_v38  ;;  %v2208_v61 = vld [vmem:[%s5016_s0 + $0x1d8] sm:$0x80]   ;;  %v148_v6 = vsel %vm113_vm5, %v2207_v51, %v144_v1  ;;  %v2229_v19 = vld [vmem:[%s5016_s0 + $0x4d] sm:$0x2]   ;;  %v318_v28 = vsel %vm109_vm4, %v2250_v15, %v314_v22  ;;  %v2280_v31 = vld [vmem:[%s5016_s0 + $0x2d] sm:$0x1]   ;;  %v361_v44 = vsel %vm117_vm6, %v2261_v17, %v357_v27 }
  0x12   :  { %119 = vrot.lane.b32.xlu0 %v118_v43, %s2733_s25  ;;  %v152_v11 = vsel %vm117_vm6, %v2208_v61, %v148_v6  ;;  %v2230_v20 = vld [vmem:[%s5016_s0 + $0x8c] sm:$0x4]   ;;  %v233_v24 = vsel %vm93_vm0, %v2229_v19, %v2228_v16  ;;  %v2281_v32 = vld [vmem:[%s5016_s0 + $0x6c] sm:$0x2]   ;;  %v2271_v47 = vld [vmem:[%s5016_s0 + $0x1d] sm:$0x1]  }
  0x13   :  { %v2231_v21 = vld [vmem:[%s5016_s0 + $0xcb] sm:$0x8]   ;;  %v237_v29 = vsel %vm97_vm1, %v2230_v20, %v233_v24  ;;  %v441_v34 = vsel %vm93_vm0, %v2281_v32, %v2280_v31  ;;  %v2282_v35 = vld [vmem:[%s5016_s0 + $0xab] sm:$0x4]   ;;  %v2272_v48 = vld [vmem:[%s5016_s0 + $0x5c] sm:$0x2]  }
  0x14   :  { %v2251_v23 = vld [vmem:[%s5016_s0 + $0x1a8] sm:$0x40]   ;;  %v241_v33 = vsel %vm101_vm2, %v2231_v21, %v237_v29  ;;  %v2283_v36 = vld [vmem:[%s5016_s0 + $0xea] sm:$0x8]   ;;  %v445_v42 = vsel %vm97_vm1, %v2282_v35, %v441_v34  ;;  %v2273_v49 = vld [vmem:[%s5016_s0 + $0x9b] sm:$0x4]   ;;  %v406_v52 = vsel %vm93_vm0, %v2272_v48, %v2271_v47 }
  0x15   :  { %v2232_v25 = vld [vmem:[%s5016_s0 + $0x10a] sm:$0x10]   ;;  %v2284_v37 = vld [vmem:[%s5016_s0 + $0x129] sm:$0x10]   ;;  %v322_v38 = vsel %vm113_vm5, %v2251_v23, %v318_v28  ;;  %v449_v46 = vsel %vm101_vm2, %v2283_v36, %v445_v42  ;;  %v2274_v53 = vld [vmem:[%s5016_s0 + $0xda] sm:$0x8]   ;;  %v410_v59 = vsel %vm97_vm1, %v2273_v49, %v406_v52 }
  0x16   :  { %v2233_v26 = vld [vmem:[%s5016_s0 + $0x149] sm:$0x20]   ;;  %v245_v40 = vsel %vm105_vm3, %v2232_v25, %v241_v33  ;;  %v2285_v43 = vld [vmem:[%s5016_s0 + $0x168] sm:$0x20]   ;;  %v453_v51 = vsel %vm105_vm3, %v2284_v37, %v449_v46  ;;  %v2275_v54 = vld [vmem:[%s5016_s0 + $0x119] sm:$0x10]   ;;  %v414_v63 = vsel %vm101_vm2, %v2274_v53, %v410_v59 }
  0x17   :  { %223 = vrot.lane.b32.xlu1 %v222_v0, %s2733_s25  ;;  %v2234_v30 = vld [vmem:[%s5016_s0 + $0x188] sm:$0x40]   ;;  %v249_v45 = vsel %vm109_vm4, %v2233_v26, %v245_v40  ;;  %v457_v57 = vsel %vm109_vm4, %v2285_v43, %v453_v51  ;;  %v2286_v58 = vld [vmem:[%s5016_s0 + $0x1a7] sm:$0x40]   ;;  %v2276_v60 = vld [vmem:[%s5016_s0 + $0x158] sm:$0x20]   ;;  %v418_v2 = vsel %vm105_vm3, %v2275_v54, %v414_v63 }
  0x18   :  { %v2252_v39 = vld [vmem:[%s5016_s0 + $0x1e7] sm:$0x80]   ;;  %v253_v50 = vsel %vm113_vm5, %v2234_v30, %v249_v45  ;;  %v2236_v61 = vld [vmem:[%s5016_s0 + $0x1e] sm:$0x1]   ;;  %v2287_v62 = vld [vmem:[%s5016_s0 + $0x1e6] sm:$0x80]   ;;  %v461_v7 = vsel %vm113_vm5, %v2286_v58, %v457_v57  ;;  %v422_v8 = vsel %vm109_vm4, %v2276_v60, %v418_v2 }
  0x19   :  { %v2235_v41 = vld [vmem:[%s5016_s0 + $0x1c7] sm:$0x80]   ;;  %v326_v55 = vsel %vm117_vm6, %v2252_v39, %v322_v38  ;;  %v2237_v0 = vld [vmem:[%s5016_s0 + $0x5d] sm:$0x2]   ;;  %v2277_v3 = vld [vmem:[%s5016_s0 + $0x197] sm:$0x40]   ;;  %v465_v23 = vsel %vm117_vm6, %v2287_v62, %v461_v7 }
  0x1a   :  { %153 = vrot.lane.b32.xlu0 %v152_v11, %s2733_s25  ;;  %v257_v56 = vsel %vm117_vm6, %v2235_v41, %v253_v50  ;;  %v2238_v1 = vld [vmem:[%s5016_s0 + $0x9c] sm:$0x4]   ;;  %v267_v4 = vsel %vm93_vm0, %v2237_v0, %v2236_v61  ;;  %v2306_v12 = vld [vmem:[%s5016_s0 + $0x1c] sm:$0x1]   ;;  %v426_v17 = vsel %vm113_vm5, %v2277_v3, %v422_v8  ;;  %v2278_v18 = vld [vmem:[%s5016_s0 + $0x1d6] sm:$0x80]  }
  0x1b   :  { %258 = vrot.lane.b32.xlu2 %v257_v56, %s2734_s3  ;;  %v2239_v5 = vld [vmem:[%s5016_s0 + $0xdb] sm:$0x8]   ;;  %v271_v9 = vsel %vm97_vm1, %v2238_v1, %v267_v4  ;;  %v2307_v14 = vld [vmem:[%s5016_s0 + $0x5b] sm:$0x2]   ;;  %v2298_v27 = vld [vmem:[%s5016_s0 + $0xc] sm:$0x1]   ;;  %v430_v35 = vsel %vm117_vm6, %v2278_v18, %v426_v17 }
  0x1c   :  { %v2240_v6 = vld [vmem:[%s5016_s0 + $0x11a] sm:$0x10]   ;;  %v275_v13 = vsel %vm101_vm2, %v2239_v5, %v271_v9  ;;  %v2308_v15 = vld [vmem:[%s5016_s0 + $0x9a] sm:$0x4]   ;;  %v545_v21 = vsel %vm93_vm0, %v2307_v14, %v2306_v12  ;;  %v2299_v28 = vld [vmem:[%s5016_s0 + $0x4b] sm:$0x2]  }
  0x1d   :  { %v2241_v10 = vld [vmem:[%s5016_s0 + $0x159] sm:$0x20]   ;;  %v2309_v16 = vld [vmem:[%s5016_s0 + $0xd9] sm:$0x8]   ;;  %v279_v19 = vsel %vm105_vm3, %v2240_v6, %v275_v13  ;;  %v549_v25 = vsel %vm97_vm1, %v2308_v15, %v545_v21  ;;  %v511_v31 = vsel %vm93_vm0, %v2299_v28, %v2298_v27  ;;  %v2300_v32 = vld [vmem:[%s5016_s0 + $0x8a] sm:$0x4]  }
  0x1e   :  { %v2242_v11 = vld [vmem:[%s5016_s0 + $0x198] sm:$0x40]   ;;  %v2310_v22 = vld [vmem:[%s5016_s0 + $0x118] sm:$0x10]   ;;  %v283_v24 = vsel %vm109_vm4, %v2241_v10, %v279_v19  ;;  %v553_v30 = vsel %vm101_vm2, %v2309_v16, %v549_v25  ;;  %v2301_v33 = vld [vmem:[%s5016_s0 + $0xc9] sm:$0x8]   ;;  %v515_v39 = vsel %vm97_vm1, %v2300_v32, %v511_v31 }
  0x1f   :  { %362 = vrot.lane.b32.xlu1 %v361_v44, %s2734_s3  ;;  %v2243_v20 = vld [vmem:[%s5016_s0 + $0x1d7] sm:$0x80]   ;;  %v2311_v26 = vld [vmem:[%s5016_s0 + $0x157] sm:$0x20]   ;;  %v287_v29 = vsel %vm113_vm5, %v2242_v11, %v283_v24  ;;  %v2302_v34 = vld [vmem:[%s5016_s0 + $0x108] sm:$0x10]   ;;  %v557_v37 = vsel %vm105_vm3, %v2310_v22, %v553_v30  ;;  %v519_v44 = vsel %vm101_vm2, %v2301_v33, %v515_v39 }
  0x20   :  { %v291_v36 = vsel %vm117_vm6, %v2243_v20, %v287_v29  ;;  %v2312_v38 = vld [vmem:[%s5016_s0 + $0x196] sm:$0x40]   ;;  %v2303_v40 = vld [vmem:[%s5016_s0 + $0x147] sm:$0x20]   ;;  %v561_v42 = vsel %vm109_vm4, %v2311_v26, %v557_v37  ;;  %v2263_v45 = vld [vmem:[%s5016_s0 + $0xd] sm:$0x1]   ;;  %v523_v47 = vsel %vm105_vm3, %v2302_v34, %v519_v44 }
  0x21   :  { %v2304_v41 = vld [vmem:[%s5016_s0 + $0x186] sm:$0x40]   ;;  %v2313_v43 = vld [vmem:[%s5016_s0 + $0x1d5] sm:$0x80]   ;;  %v2264_v46 = vld [vmem:[%s5016_s0 + $0x4c] sm:$0x2]   ;;  %v565_v52 = vsel %vm113_vm5, %v2312_v38, %v561_v42  ;;  %v527_v53 = vsel %vm109_vm4, %v2303_v40, %v523_v47 }
  0x22   :  { %327 = vrot.lane.b32.xlu0 %v326_v55, %s2734_s3  ;;  %v372_v48 = vsel %vm93_vm0, %v2264_v46, %v2263_v45  ;;  %v2265_v49 = vld [vmem:[%s5016_s0 + $0x8b] sm:$0x4]   ;;  %v2305_v54 = vld [vmem:[%s5016_s0 + $0x1c5] sm:$0x80]   ;;  %v2333_v59 = vld [vmem:[%s5016_s0 + $0xb] sm:$0x1]   ;;  %v531_v62 = vsel %vm113_vm5, %v2304_v41, %v527_v53  ;;  %v569_v4 = vsel %vm117_vm6, %v2313_v43, %v565_v52 }
  0x23   :  { %292 = vrot.lane.b32.xlu2 %v291_v36, %s2734_s3  ;;  %v2266_v50 = vld [vmem:[%s5016_s0 + $0xca] sm:$0x8]   ;;  %v376_v55 = vsel %vm97_vm1, %v2265_v49, %v372_v48  ;;  %v2334_v60 = vld [vmem:[%s5016_s0 + $0x4a] sm:$0x2]   ;;  %v2324_v8 = vld [vmem:[%s5016_s0 + $0x3c] sm:$0x1]   ;;  %v535_v14 = vsel %vm117_vm6, %v2305_v54, %v531_v62 }
  0x24   :  { %v2267_v51 = vld [vmem:[%s5016_s0 + $0x109] sm:$0x10]   ;;  %v380_v58 = vsel %vm101_vm2, %v2266_v50, %v376_v55  ;;  %v2335_v61 = vld [vmem:[%s5016_s0 + $0x89] sm:$0x4]   ;;  %v650_v1 = vsel %vm93_vm0, %v2334_v60, %v2333_v59  ;;  %v2325_v11 = vld [vmem:[%s5016_s0 + $0x7b] sm:$0x2]  }
  0x25   :  { %v2268_v56 = vld [vmem:[%s5016_s0 + $0x148] sm:$0x20]   ;;  %v384_v63 = vsel %vm105_vm3, %v2267_v51, %v380_v58  ;;  %v2336_v2 = vld [vmem:[%s5016_s0 + $0xc8] sm:$0x8]   ;;  %v654_v6 = vsel %vm97_vm1, %v2335_v61, %v650_v1  ;;  %v2326_v12 = vld [vmem:[%s5016_s0 + $0xba] sm:$0x4]   ;;  %v615_v18 = vsel %vm93_vm0, %v2325_v11, %v2324_v8 }
  0x26   :  { %v2269_v57 = vld [vmem:[%s5016_s0 + $0x187] sm:$0x40]   ;;  %v2337_v3 = vld [vmem:[%s5016_s0 + $0x107] sm:$0x10]   ;;  %v388_v5 = vsel %vm109_vm4, %v2268_v56, %v384_v63  ;;  %v658_v10 = vsel %vm101_vm2, %v2336_v2, %v654_v6  ;;  %v2327_v13 = vld [vmem:[%s5016_s0 + $0xf9] sm:$0x8]  }
  0x27   :  { %466 = vrot.lane.b32.xlu1 %v465_v23, %s2735_s24  ;;  %v2270_v0 = vld [vmem:[%s5016_s0 + $0x1c6] sm:$0x80]   ;;  %v2338_v7 = vld [vmem:[%s5016_s0 + $0x146] sm:$0x20]   ;;  %v392_v9 = vsel %vm113_vm5, %v2269_v57, %v388_v5  ;;  %v662_v16 = vsel %vm105_vm3, %v2337_v3, %v658_v10  ;;  %v2328_v19 = vld [vmem:[%s5016_s0 + $0x138] sm:$0x10]   ;;  %v619_v23 = vsel %vm97_vm1, %v2326_v12, %v615_v18 }
  0x28   :  { %v396_v15 = vsel %vm117_vm6, %v2270_v0, %v392_v9  ;;  %v2339_v17 = vld [vmem:[%s5016_s0 + $0x185] sm:$0x40]   ;;  %v2329_v20 = vld [vmem:[%s5016_s0 + $0x177] sm:$0x20]   ;;  %s2736_s14 = smov 96   ;;  %v666_v21 = vsel %vm109_vm4, %v2338_v7, %v662_v16  ;;  %v623_v26 = vsel %vm101_vm2, %v2327_v13, %v619_v23  ;;  %s2737_s6 = smov 88  }
  0x29   :  { %v2340_v22 = vld [vmem:[%s5016_s0 + $0x1c4] sm:$0x80]   ;;  %v2330_v24 = vld [vmem:[%s5016_s0 + $0x1b6] sm:$0x40]   ;;  %v2289_v25 = vld [vmem:[%s5016_s0 + $0x3d] sm:$0x1]   ;;  %v670_v30 = vsel %vm113_vm5, %v2339_v17, %v666_v21  ;;  %v627_v31 = vsel %vm105_vm3, %v2328_v19, %v623_v26 }
  0x2a   :  { %431 = vrot.lane.b32.xlu0 %v430_v35, %s2735_s24  ;;  %v2290_v27 = vld [vmem:[%s5016_s0 + $0x7c] sm:$0x2]   ;;  %v2331_v32 = vld [vmem:[%s5016_s0 + $0x1f5] sm:$0x80]   ;;  %v631_v36 = vsel %vm109_vm4, %v2329_v20, %v627_v31  ;;  %v2359_v39 = vld [vmem:[%s5016_s0 + $0x3b] sm:$0x1]   ;;  %v674_v47 = vsel %vm117_vm6, %v2340_v22, %v670_v30 }
  0x2b   :  { %397 = vrot.lane.b32.xlu2 %v396_v15, %s2735_s24  ;;  %v2291_v28 = vld [vmem:[%s5016_s0 + $0xbb] sm:$0x4]   ;;  %v476_v33 = vsel %vm93_vm0, %v2290_v27, %v2289_v25  ;;  %v2360_v40 = vld [vmem:[%s5016_s0 + $0x7a] sm:$0x2]   ;;  %v635_v41 = vsel %vm113_vm5, %v2330_v24, %v631_v36  ;;  %v2350_v54 = vld [vmem:[%s5016_s0 + $0x2b] sm:$0x1]  }
  0x2c   :  { %v2292_v29 = vld [vmem:[%s5016_s0 + $0xfa] sm:$0x8]   ;;  %v480_v37 = vsel %vm97_vm1, %v2291_v28, %v476_v33  ;;  %v754_v43 = vsel %vm93_vm0, %v2360_v40, %v2359_v39  ;;  %v2361_v44 = vld [vmem:[%s5016_s0 + $0xb9] sm:$0x4]   ;;  %v2351_v55 = vld [vmem:[%s5016_s0 + $0x6a] sm:$0x2]   ;;  %v639_v57 = vsel %vm117_vm6, %v2331_v32, %v635_v41 }
  0x2d   :  { %v2293_v34 = vld [vmem:[%s5016_s0 + $0x139] sm:$0x10]   ;;  %v484_v42 = vsel %vm101_vm2, %v2292_v29, %v480_v37  ;;  %v2362_v45 = vld [vmem:[%s5016_s0 + $0xf8] sm:$0x8]   ;;  %v758_v50 = vsel %vm97_vm1, %v2361_v44, %v754_v43  ;;  %v2352_v56 = vld [vmem:[%s5016_s0 + $0xa9] sm:$0x4]   ;;  %v719_v61 = vsel %vm93_vm0, %v2351_v55, %v2350_v54 }
  0x2e   :  { %v2294_v35 = vld [vmem:[%s5016_s0 + $0x178] sm:$0x20]   ;;  %v2363_v46 = vld [vmem:[%s5016_s0 + $0x137] sm:$0x10]   ;;  %v488_v48 = vsel %vm105_vm3, %v2293_v34, %v484_v42  ;;  %v762_v53 = vsel %vm101_vm2, %v2362_v45, %v758_v50  ;;  %v2353_v62 = vld [vmem:[%s5016_s0 + $0xe8] sm:$0x8]   ;;  %v723_v3 = vsel %vm97_vm1, %v2352_v56, %v719_v61 }
  0x2f   :  { %570 = vrot.lane.b32.xlu1 %v569_v4, %s2736_s14  ;;  %v2295_v38 = vld [vmem:[%s5016_s0 + $0x1b7] sm:$0x40]   ;;  %v2364_v51 = vld [vmem:[%s5016_s0 + $0x176] sm:$0x20]   ;;  %v492_v52 = vsel %vm109_vm4, %v2294_v35, %v488_v48  ;;  %v766_v59 = vsel %vm105_vm3, %v2363_v46, %v762_v53  ;;  %v2354_v63 = vld [vmem:[%s5016_s0 + $0x127] sm:$0x10]   ;;  %v727_v7 = vsel %vm101_vm2, %v2353_v62, %v723_v3 }
  0x30   :  { %v2296_v49 = vld [vmem:[%s5016_s0 + $0x1f6] sm:$0x80]   ;;  %v496_v58 = vsel %vm113_vm5, %v2295_v38, %v492_v52  ;;  %v2365_v60 = vld [vmem:[%s5016_s0 + $0x1b5] sm:$0x40]   ;;  %v770_v1 = vsel %vm109_vm4, %v2364_v51, %v766_v59  ;;  %v2355_v4 = vld [vmem:[%s5016_s0 + $0x166] sm:$0x20]   ;;  %v731_v12 = vsel %vm105_vm3, %v2354_v63, %v727_v7 }
  0x31   :  { %v500_v0 = vsel %vm117_vm6, %v2296_v49, %v496_v58  ;;  %v2366_v2 = vld [vmem:[%s5016_s0 + $0x1f4] sm:$0x80]   ;;  %v2356_v5 = vld [vmem:[%s5016_s0 + $0x1a5] sm:$0x40]   ;;  %v2315_v6 = vld [vmem:[%s5016_s0 + $0x2c] sm:$0x1]   ;;  %v774_v11 = vsel %vm113_vm5, %v2365_v60, %v770_v1  ;;  %v735_v17 = vsel %vm109_vm4, %v2355_v4, %v731_v12 }
  0x32   :  { %536 = vrot.lane.b32.xlu0 %v535_v14, %s2736_s14  ;;  %v2316_v8 = vld [vmem:[%s5016_s0 + $0x6b] sm:$0x2]   ;;  %v2357_v13 = vld [vmem:[%s5016_s0 + $0x1e4] sm:$0x80]   ;;  %v2385_v20 = vld [vmem:[%s5016_s0 + $0x2a] sm:$0x1]   ;;  %v739_v22 = vsel %vm113_vm5, %v2356_v5, %v735_v17  ;;  %v778_v28 = vsel %vm117_vm6, %v2366_v2, %v774_v11 }
  0x33   :  { %501 = vrot.lane.b32.xlu2 %v500_v0, %s2735_s24  ;;  %v2317_v9 = vld [vmem:[%s5016_s0 + $0xaa] sm:$0x4]   ;;  %v580_v14 = vsel %vm93_vm0, %v2316_v8, %v2315_v6  ;;  %v2386_v21 = vld [vmem:[%s5016_s0 + $0x69] sm:$0x2]   ;;  %v2376_v35 = vld [vmem:[%s5016_s0 + $0x1a] sm:$0x1]   ;;  %v743_v38 = vsel %vm117_vm6, %v2357_v13, %v739_v22 }
  0x34   :  { %v2318_v10 = vld [vmem:[%s5016_s0 + $0xe9] sm:$0x8]   ;;  %v584_v18 = vsel %vm97_vm1, %v2317_v9, %v580_v14  ;;  %v858_v24 = vsel %vm93_vm0, %v2386_v21, %v2385_v20  ;;  %v2387_v25 = vld [vmem:[%s5016_s0 + $0xa8] sm:$0x4]   ;;  %v2377_v36 = vld [vmem:[%s5016_s0 + $0x59] sm:$0x2]  }
  0x35   :  { %v2319_v15 = vld [vmem:[%s5016_s0 + $0x128] sm:$0x10]   ;;  %v588_v23 = vsel %vm101_vm2, %v2318_v10, %v584_v18  ;;  %v2388_v26 = vld [vmem:[%s5016_s0 + $0xe7] sm:$0x8]   ;;  %v862_v31 = vsel %vm97_vm1, %v2387_v25, %v858_v24  ;;  %v2378_v37 = vld [vmem:[%s5016_s0 + $0x98] sm:$0x4]   ;;  %v823_v42 = vsel %vm93_vm0, %v2377_v36, %v2376_v35 }
  0x36   :  { %v2320_v16 = vld [vmem:[%s5016_s0 + $0x167] sm:$0x20]   ;;  %v2389_v27 = vld [vmem:[%s5016_s0 + $0x126] sm:$0x10]   ;;  %v592_v29 = vsel %vm105_vm3, %v2319_v15, %v588_v23  ;;  %v866_v34 = vsel %vm101_vm2, %v2388_v26, %v862_v31  ;;  %v2379_v43 = vld [vmem:[%s5016_s0 + $0xd7] sm:$0x8]   ;;  %v827_v48 = vsel %vm97_vm1, %v2378_v37, %v823_v42 }
  0x37   :  { %675 = vrot.lane.b32.xlu1 %v674_v47, %s2737_s6  ;;  %v2321_v19 = vld [vmem:[%s5016_s0 + $0x1a6] sm:$0x40]   ;;  %v2390_v32 = vld [vmem:[%s5016_s0 + $0x165] sm:$0x20]   ;;  %v596_v33 = vsel %vm109_vm4, %v2320_v16, %v592_v29  ;;  %v870_v40 = vsel %vm105_vm3, %v2389_v27, %v866_v34  ;;  %v2380_v44 = vld [vmem:[%s5016_s0 + $0x116] sm:$0x10]   ;;  %v831_v52 = vsel %vm101_vm2, %v2379_v43, %v827_v48 }
  0x38   :  { %v2322_v30 = vld [vmem:[%s5016_s0 + $0x1e5] sm:$0x80]   ;;  %v600_v39 = vsel %vm113_vm5, %v2321_v19, %v596_v33  ;;  %v2391_v41 = vld [vmem:[%s5016_s0 + $0x1a4] sm:$0x40]   ;;  %v874_v46 = vsel %vm109_vm4, %v2390_v32, %v870_v40  ;;  %v2381_v49 = vld [vmem:[%s5016_s0 + $0x155] sm:$0x20]  }
  0x39   :  { %v604_v45 = vsel %vm117_vm6, %v2322_v30, %v600_v39  ;;  %v2392_v47 = vld [vmem:[%s5016_s0 + $0x1e3] sm:$0x80]   ;;  %v2382_v50 = vld [vmem:[%s5016_s0 + $0x194] sm:$0x40]   ;;  %v2341_v51 = vld [vmem:[%s5016_s0 + $0x1b] sm:$0x1]   ;;  %v878_v56 = vsel %vm113_vm5, %v2391_v41, %v874_v46 }
  0x3a   :  { %640 = vrot.lane.b32.xlu0 %v639_v57, %s2736_s14  ;;  %v2342_v53 = vld [vmem:[%s5016_s0 + $0x5a] sm:$0x2]   ;;  %v835_v57 = vsel %vm105_vm3, %v2380_v44, %v831_v52  ;;  %v2383_v58 = vld [vmem:[%s5016_s0 + $0x1d3] sm:$0x80]   ;;  %v2411_v1 = vld [vmem:[%s5016_s0 + $0x19] sm:$0x1]   ;;  %v882_v9 = vsel %vm117_vm6, %v2392_v47, %v878_v56 }
  0x3b   :  { %605 = vrot.lane.b32.xlu2 %v604_v45, %s2736_s14  ;;  %v2343_v54 = vld [vmem:[%s5016_s0 + $0x99] sm:$0x4]   ;;  %v684_v59 = vsel %vm93_vm0, %v2342_v53, %v2341_v51  ;;  %v839_v62 = vsel %vm109_vm4, %v2381_v49, %v835_v57  ;;  %v2412_v2 = vld [vmem:[%s5016_s0 + $0x58] sm:$0x2]   ;;  %v2403_v16 = vld [vmem:[%s5016_s0 + $0x9] sm:$0x1]  }
  0x3c   :  { %v2344_v55 = vld [vmem:[%s5016_s0 + $0xd8] sm:$0x8]   ;;  %v688_v63 = vsel %vm97_vm1, %v2343_v54, %v684_v59  ;;  %v843_v3 = vsel %vm113_vm5, %v2382_v50, %v839_v62  ;;  %v962_v5 = vsel %vm93_vm0, %v2412_v2, %v2411_v1  ;;  %v2413_v6 = vld [vmem:[%s5016_s0 + $0x97] sm:$0x4]   ;;  %v2404_v17 = vld [vmem:[%s5016_s0 + $0x48] sm:$0x2]  }
  0x3d   :  { %v2345_v60 = vld [vmem:[%s5016_s0 + $0x117] sm:$0x10]   ;;  %v692_v4 = vsel %vm101_vm2, %v2344_v55, %v688_v63  ;;  %v2414_v7 = vld [vmem:[%s5016_s0 + $0xd6] sm:$0x8]   ;;  %v966_v12 = vsel %vm97_vm1, %v2413_v6, %v962_v5  ;;  %v2405_v18 = vld [vmem:[%s5016_s0 + $0x87] sm:$0x4]   ;;  %v847_v19 = vsel %vm117_vm6, %v2383_v58, %v843_v3  ;;  %v928_v23 = vsel %vm93_vm0, %v2404_v17, %v2403_v16 }
  0x3e   :  { %v2346_v61 = vld [vmem:[%s5016_s0 + $0x156] sm:$0x20]   ;;  %v2415_v8 = vld [vmem:[%s5016_s0 + $0x115] sm:$0x10]   ;;  %v696_v10 = vsel %vm105_vm3, %v2345_v60, %v692_v4  ;;  %v970_v15 = vsel %vm101_vm2, %v2414_v7, %v966_v12  ;;  %v2406_v24 = vld [vmem:[%s5016_s0 + $0xc6] sm:$0x8]   ;;  %v932_v29 = vsel %vm97_vm1, %v2405_v18, %v928_v23 }
  0x3f   :  { %779 = vrot.lane.b32.xlu1 %v778_v28, %s2737_s6  ;;  %v2347_v0 = vld [vmem:[%s5016_s0 + $0x195] sm:$0x40]   ;;  %v2416_v13 = vld [vmem:[%s5016_s0 + $0x154] sm:$0x20]   ;;  %v700_v14 = vsel %vm109_vm4, %v2346_v61, %v696_v10  ;;  %v974_v21 = vsel %vm105_vm3, %v2415_v8, %v970_v15  ;;  %v2407_v25 = vld [vmem:[%s5016_s0 + $0x105] sm:$0x10]   ;;  %v936_v33 = vsel %vm101_vm2, %v2406_v24, %v932_v29 }
  0x40   :  { %v2348_v11 = vld [vmem:[%s5016_s0 + $0x1d4] sm:$0x80]   ;;  %v704_v20 = vsel %vm113_vm5, %v2347_v0, %v700_v14  ;;  %v2417_v22 = vld [vmem:[%s5016_s0 + $0x193] sm:$0x40]   ;;  %s2738_s20 = smov 80   ;;  %v978_v27 = vsel %vm109_vm4, %v2416_v13, %v974_v21  ;;  %s2739_s12 = smov 72  }
  0x41   :  { %v708_v26 = vsel %vm117_vm6, %v2348_v11, %v704_v20  ;;  %v2418_v28 = vld [vmem:[%s5016_s0 + $0x1d2] sm:$0x80]   ;;  %v2408_v30 = vld [vmem:[%s5016_s0 + $0x144] sm:$0x20]   ;;  %v2368_v32 = vld [vmem:[%s5016_s0 + $0xa] sm:$0x1]   ;;  %v982_v37 = vsel %vm113_vm5, %v2417_v22, %v978_v27 }
  0x42   :  { %744 = vrot.lane.b32.xlu0 %v743_v38, %s2737_s6  ;;  %v2409_v31 = vld [vmem:[%s5016_s0 + $0x183] sm:$0x40]   ;;  %v2369_v34 = vld [vmem:[%s5016_s0 + $0x49] sm:$0x2]   ;;  %v940_v38 = vsel %vm105_vm3, %v2407_v25, %v936_v33  ;;  %v2438_v46 = vld [vmem:[%s5016_s0 + $0x8] sm:$0x1]   ;;  %v986_v54 = vsel %vm117_vm6, %v2418_v28, %v982_v37 }
  0x43   :  { %709 = vrot.lane.b32.xlu2 %v708_v26, %s2737_s6  ;;  %v2370_v35 = vld [vmem:[%s5016_s0 + $0x88] sm:$0x4]   ;;  %v2410_v39 = vld [vmem:[%s5016_s0 + $0x1c2] sm:$0x80]   ;;  %v789_v40 = vsel %vm93_vm0, %v2369_v34, %v2368_v32  ;;  %v944_v43 = vsel %vm109_vm4, %v2408_v30, %v940_v38  ;;  %v2439_v47 = vld [vmem:[%s5016_s0 + $0x47] sm:$0x2]  }
  0x44   :  { %v2371_v36 = vld [vmem:[%s5016_s0 + $0xc7] sm:$0x8]   ;;  %v793_v44 = vsel %vm97_vm1, %v2370_v35, %v789_v40  ;;  %v948_v48 = vsel %vm113_vm5, %v2409_v31, %v944_v43  ;;  %v1067_v50 = vsel %vm93_vm0, %v2439_v47, %v2438_v46  ;;  %v2440_v51 = vld [vmem:[%s5016_s0 + $0x86] sm:$0x4]   ;;  %v2429_v61 = vld [vmem:[%s5016_s0 + $0x39] sm:$0x1]  }
  0x45   :  { %v2372_v41 = vld [vmem:[%s5016_s0 + $0x106] sm:$0x10]   ;;  %v797_v49 = vsel %vm101_vm2, %v2371_v36, %v793_v44  ;;  %v2441_v52 = vld [vmem:[%s5016_s0 + $0xc5] sm:$0x8]   ;;  %v1071_v57 = vsel %vm97_vm1, %v2440_v51, %v1067_v50  ;;  %v2430_v62 = vld [vmem:[%s5016_s0 + $0x78] sm:$0x2]   ;;  %v952_v0 = vsel %vm117_vm6, %v2410_v39, %v948_v48 }
  0x46   :  { %v2373_v42 = vld [vmem:[%s5016_s0 + $0x145] sm:$0x20]   ;;  %v2442_v53 = vld [vmem:[%s5016_s0 + $0x104] sm:$0x10]   ;;  %v801_v55 = vsel %vm105_vm3, %v2372_v41, %v797_v49  ;;  %v1075_v60 = vsel %vm101_vm2, %v2441_v52, %v1071_v57  ;;  %v2431_v63 = vld [vmem:[%s5016_s0 + $0xb7] sm:$0x4]   ;;  %v1032_v4 = vsel %vm93_vm0, %v2430_v62, %v2429_v61 }
  0x47   :  { %883 = vrot.lane.b32.xlu1 %v882_v9, %s2738_s20  ;;  %v2374_v45 = vld [vmem:[%s5016_s0 + $0x184] sm:$0x40]   ;;  %v2443_v58 = vld [vmem:[%s5016_s0 + $0x143] sm:$0x20]   ;;  %v805_v59 = vsel %vm109_vm4, %v2373_v42, %v801_v55  ;;  %v1079_v2 = vsel %vm105_vm3, %v2442_v53, %v1075_v60  ;;  %v2432_v5 = vld [vmem:[%s5016_s0 + $0xf6] sm:$0x8]   ;;  %v1036_v10 = vsel %vm97_vm1, %v2431_v63, %v1032_v4 }
  0x48   :  { %v2375_v56 = vld [vmem:[%s5016_s0 + $0x1c3] sm:$0x80]   ;;  %v809_v1 = vsel %vm113_vm5, %v2374_v45, %v805_v59  ;;  %v2444_v3 = vld [vmem:[%s5016_s0 + $0x182] sm:$0x40]   ;;  %v2433_v6 = vld [vmem:[%s5016_s0 + $0x135] sm:$0x10]   ;;  %v1083_v8 = vsel %vm109_vm4, %v2443_v58, %v1079_v2  ;;  %v1040_v14 = vsel %vm101_vm2, %v2432_v5, %v1036_v10 }
  0x49   :  { %v813_v7 = vsel %vm117_vm6, %v2375_v56, %v809_v1  ;;  %v2445_v9 = vld [vmem:[%s5016_s0 + $0x1c1] sm:$0x80]   ;;  %v2434_v11 = vld [vmem:[%s5016_s0 + $0x174] sm:$0x20]   ;;  %v2394_v13 = vld [vmem:[%s5016_s0 + $0x3a] sm:$0x1]   ;;  %v1087_v18 = vsel %vm113_vm5, %v2444_v3, %v1083_v8 }
  0x4a   :  { %848 = vrot.lane.b32.xlu0 %v847_v19, %s2738_s20  ;;  %v2435_v12 = vld [vmem:[%s5016_s0 + $0x1b3] sm:$0x40]   ;;  %v2395_v15 = vld [vmem:[%s5016_s0 + $0x79] sm:$0x2]   ;;  %v1044_v19 = vsel %vm105_vm3, %v2433_v6, %v1040_v14  ;;  %v2464_v27 = vld [vmem:[%s5016_s0 + $0x38] sm:$0x1]   ;;  %v1091_v35 = vsel %vm117_vm6, %v2445_v9, %v1087_v18 }
  0x4b   :  { %814 = vrot.lane.b32.xlu2 %v813_v7, %s2738_s20  ;;  %v2396_v16 = vld [vmem:[%s5016_s0 + $0xb8] sm:$0x4]   ;;  %v2436_v20 = vld [vmem:[%s5016_s0 + $0x1f2] sm:$0x80]   ;;  %v893_v21 = vsel %vm93_vm0, %v2395_v15, %v2394_v13  ;;  %v1048_v24 = vsel %vm109_vm4, %v2434_v11, %v1044_v19  ;;  %v2465_v28 = vld [vmem:[%s5016_s0 + $0x77] sm:$0x2]  }
  0x4c   :  { %v2397_v17 = vld [vmem:[%s5016_s0 + $0xf7] sm:$0x8]   ;;  %v897_v25 = vsel %vm97_vm1, %v2396_v16, %v893_v21  ;;  %v1052_v29 = vsel %vm113_vm5, %v2435_v12, %v1048_v24  ;;  %v1171_v31 = vsel %vm93_vm0, %v2465_v28, %v2464_v27  ;;  %v2466_v32 = vld [vmem:[%s5016_s0 + $0xb6] sm:$0x4]   ;;  %v2455_v42 = vld [vmem:[%s5016_s0 + $0x28] sm:$0x1]  }
  0x4d   :  { %v2398_v22 = vld [vmem:[%s5016_s0 + $0x136] sm:$0x10]   ;;  %v901_v30 = vsel %vm101_vm2, %v2397_v17, %v897_v25  ;;  %v2467_v33 = vld [vmem:[%s5016_s0 + $0xf5] sm:$0x8]   ;;  %v1175_v38 = vsel %vm97_vm1, %v2466_v32, %v1171_v31  ;;  %v2456_v43 = vld [vmem:[%s5016_s0 + $0x67] sm:$0x2]   ;;  %v1056_v45 = vsel %vm117_vm6, %v2436_v20, %v1052_v29 }
  0x4e   :  { %v2399_v23 = vld [vmem:[%s5016_s0 + $0x175] sm:$0x20]   ;;  %v2468_v34 = vld [vmem:[%s5016_s0 + $0x134] sm:$0x10]   ;;  %v905_v36 = vsel %vm105_vm3, %v2398_v22, %v901_v30  ;;  %v1179_v41 = vsel %vm101_vm2, %v2467_v33, %v1175_v38  ;;  %v2457_v44 = vld [vmem:[%s5016_s0 + $0xa6] sm:$0x4]   ;;  %v1136_v49 = vsel %vm93_vm0, %v2456_v43, %v2455_v42 }
  0x4f   :  { %987 = vrot.lane.b32.xlu1 %v986_v54, %s2739_s12  ;;  %v2400_v26 = vld [vmem:[%s5016_s0 + $0x1b4] sm:$0x40]   ;;  %v2469_v39 = vld [vmem:[%s5016_s0 + $0x173] sm:$0x20]   ;;  %v909_v40 = vsel %vm109_vm4, %v2399_v23, %v905_v36  ;;  %v1183_v47 = vsel %vm105_vm3, %v2468_v34, %v1179_v41  ;;  %v2458_v50 = vld [vmem:[%s5016_s0 + $0xe5] sm:$0x8]   ;;  %v1140_v55 = vsel %vm97_vm1, %v2457_v44, %v1136_v49 }
  0x50   :  { %v2401_v37 = vld [vmem:[%s5016_s0 + $0x1f3] sm:$0x80]   ;;  %v913_v46 = vsel %vm113_vm5, %v2400_v26, %v909_v40  ;;  %v2470_v48 = vld [vmem:[%s5016_s0 + $0x1b2] sm:$0x40]   ;;  %v2459_v51 = vld [vmem:[%s5016_s0 + $0x124] sm:$0x10]   ;;  %v1187_v53 = vsel %vm109_vm4, %v2469_v39, %v1183_v47  ;;  %v1144_v59 = vsel %vm101_vm2, %v2458_v50, %v1140_v55 }
  0x51   :  { %s2740_s7 = smov 64   ;;  %v917_v52 = vsel %vm117_vm6, %v2401_v37, %v913_v46  ;;  %v2471_v54 = vld [vmem:[%s5016_s0 + $0x1f1] sm:$0x80]   ;;  %v2460_v56 = vld [vmem:[%s5016_s0 + $0x163] sm:$0x20]   ;;  %v1191_v63 = vsel %vm113_vm5, %v2470_v48, %v1187_v53  ;;  %s2741_s21 = smov 56  }
  0x52   :  { %953 = vrot.lane.b32.xlu0 %v952_v0, %s2739_s12  ;;  %v2461_v57 = vld [vmem:[%s5016_s0 + $0x1a2] sm:$0x40]   ;;  %v2420_v58 = vld [vmem:[%s5016_s0 + $0x29] sm:$0x1]   ;;  %v1148_v0 = vsel %vm105_vm3, %v2459_v51, %v1144_v59  ;;  %v2490_v8 = vld [vmem:[%s5016_s0 + $0x27] sm:$0x1]   ;;  %v1195_v16 = vsel %vm117_vm6, %v2471_v54, %v1191_v63 }
  0x53   :  { %918 = vrot.lane.b32.xlu2 %v917_v52, %s2738_s20  ;;  %v2421_v60 = vld [vmem:[%s5016_s0 + $0x68] sm:$0x2]   ;;  %v2462_v1 = vld [vmem:[%s5016_s0 + $0x1e1] sm:$0x80]   ;;  %v1152_v5 = vsel %vm109_vm4, %v2460_v56, %v1148_v0  ;;  %v2491_v9 = vld [vmem:[%s5016_s0 + $0x66] sm:$0x2]  }
  0x54   :  { %v2422_v61 = vld [vmem:[%s5016_s0 + $0xa7] sm:$0x4]   ;;  %v997_v2 = vsel %vm93_vm0, %v2421_v60, %v2420_v58  ;;  %v1156_v10 = vsel %vm113_vm5, %v2461_v57, %v1152_v5  ;;  %v1275_v12 = vsel %vm93_vm0, %v2491_v9, %v2490_v8  ;;  %v2492_v13 = vld [vmem:[%s5016_s0 + $0xa5] sm:$0x4]   ;;  %v2481_v23 = vld [vmem:[%s5016_s0 + $0x17] sm:$0x1]  }
  0x55   :  { %v2423_v62 = vld [vmem:[%s5016_s0 + $0xe6] sm:$0x8]   ;;  %v1001_v6 = vsel %vm97_vm1, %v2422_v61, %v997_v2  ;;  %v2493_v14 = vld [vmem:[%s5016_s0 + $0xe4] sm:$0x8]   ;;  %v1279_v19 = vsel %vm97_vm1, %v2492_v13, %v1275_v12  ;;  %v2482_v24 = vld [vmem:[%s5016_s0 + $0x56] sm:$0x2]   ;;  %v1160_v26 = vsel %vm117_vm6, %v2462_v1, %v1156_v10 }
  0x56   :  { %v2424_v3 = vld [vmem:[%s5016_s0 + $0x125] sm:$0x10]   ;;  %v1005_v11 = vsel %vm101_vm2, %v2423_v62, %v1001_v6  ;;  %v2494_v15 = vld [vmem:[%s5016_s0 + $0x123] sm:$0x10]   ;;  %v1283_v22 = vsel %vm101_vm2, %v2493_v14, %v1279_v19  ;;  %v2483_v25 = vld [vmem:[%s5016_s0 + $0x95] sm:$0x4]   ;;  %v1240_v30 = vsel %vm93_vm0, %v2482_v24, %v2481_v23 }
  0x57   :  { %1092 = vrot.lane.b32.xlu1 %v1091_v35, %s2740_s7  ;;  %v2425_v4 = vld [vmem:[%s5016_s0 + $0x164] sm:$0x20]   ;;  %v1009_v17 = vsel %vm105_vm3, %v2424_v3, %v1005_v11  ;;  %v2495_v20 = vld [vmem:[%s5016_s0 + $0x162] sm:$0x20]   ;;  %v1287_v28 = vsel %vm105_vm3, %v2494_v15, %v1283_v22  ;;  %v2484_v31 = vld [vmem:[%s5016_s0 + $0xd4] sm:$0x8]   ;;  %v1244_v36 = vsel %vm97_vm1, %v2483_v25, %v1240_v30 }
  0x58   :  { %v2426_v7 = vld [vmem:[%s5016_s0 + $0x1a3] sm:$0x40]   ;;  %v1013_v21 = vsel %vm109_vm4, %v2425_v4, %v1009_v17  ;;  %v2496_v29 = vld [vmem:[%s5016_s0 + $0x1a1] sm:$0x40]   ;;  %v2485_v32 = vld [vmem:[%s5016_s0 + $0x113] sm:$0x10]   ;;  %v1291_v34 = vsel %vm109_vm4, %v2495_v20, %v1287_v28  ;;  %v1248_v40 = vsel %vm101_vm2, %v2484_v31, %v1244_v36 }
  0x59   :  { %v2427_v18 = vld [vmem:[%s5016_s0 + $0x1e2] sm:$0x80]   ;;  %v1017_v27 = vsel %vm113_vm5, %v2426_v7, %v1013_v21  ;;  %v2497_v35 = vld [vmem:[%s5016_s0 + $0x1e0] sm:$0x80]   ;;  %v2486_v37 = vld [vmem:[%s5016_s0 + $0x152] sm:$0x20]   ;;  %v1295_v44 = vsel %vm113_vm5, %v2496_v29, %v1291_v34 }
  0x5a   :  { %1057 = vrot.lane.b32.xlu0 %v1056_v45, %s2739_s12  ;;  %v1021_v33 = vsel %vm117_vm6, %v2427_v18, %v1017_v27  ;;  %v2487_v38 = vld [vmem:[%s5016_s0 + $0x191] sm:$0x40]   ;;  %v2446_v39 = vld [vmem:[%s5016_s0 + $0x18] sm:$0x1]   ;;  %v1252_v45 = vsel %vm105_vm3, %v2485_v32, %v1248_v40  ;;  %v2516_v54 = vld [vmem:[%s5016_s0 + $0x16] sm:$0x1]   ;;  %v1299_v60 = vsel %vm117_vm6, %v2497_v35, %v1295_v44 }
  0x5b   :  { %1022 = vrot.lane.b32.xlu2 %v1021_v33, %s2739_s12  ;;  %v2447_v41 = vld [vmem:[%s5016_s0 + $0x57] sm:$0x2]   ;;  %v2488_v46 = vld [vmem:[%s5016_s0 + $0x1d0] sm:$0x80]   ;;  %v1256_v50 = vsel %vm109_vm4, %v2486_v37, %v1252_v45  ;;  %v2517_v57 = vld [vmem:[%s5016_s0 + $0x55] sm:$0x2]  }
  0x5c   :  { %v2448_v42 = vld [vmem:[%s5016_s0 + $0x96] sm:$0x4]   ;;  %v1101_v47 = vsel %vm93_vm0, %v2447_v41, %v2446_v39  ;;  %v1260_v55 = vsel %vm113_vm5, %v2487_v38, %v1256_v50  ;;  %v2518_v58 = vld [vmem:[%s5016_s0 + $0x94] sm:$0x4]   ;;  %v1379_v62 = vsel %vm93_vm0, %v2517_v57, %v2516_v54  ;;  %v2508_v4 = vld [vmem:[%s5016_s0 + $0x6] sm:$0x1]  }
  0x5d   :  { %v2449_v43 = vld [vmem:[%s5016_s0 + $0xd5] sm:$0x8]   ;;  %v1105_v51 = vsel %vm97_vm1, %v2448_v42, %v1101_v47  ;;  %v2519_v59 = vld [vmem:[%s5016_s0 + $0xd3] sm:$0x8]   ;;  %v1383_v2 = vsel %vm97_vm1, %v2518_v58, %v1379_v62  ;;  %v2509_v5 = vld [vmem:[%s5016_s0 + $0x45] sm:$0x2]   ;;  %v1264_v6 = vsel %vm117_vm6, %v2488_v46, %v1260_v55 }
  0x5e   :  { %v2450_v48 = vld [vmem:[%s5016_s0 + $0x114] sm:$0x10]   ;;  %v1109_v56 = vsel %vm101_vm2, %v2449_v43, %v1105_v51  ;;  %v2520_v63 = vld [vmem:[%s5016_s0 + $0x112] sm:$0x10]   ;;  %v1387_v8 = vsel %vm101_vm2, %v2519_v59, %v1383_v2  ;;  %v1345_v9 = vsel %vm93_vm0, %v2509_v5, %v2508_v4  ;;  %v2510_v10 = vld [vmem:[%s5016_s0 + $0x84] sm:$0x4]  }
  0x5f   :  { %1196 = vrot.lane.b32.xlu1 %v1195_v16, %s2740_s7  ;;  %v2451_v49 = vld [vmem:[%s5016_s0 + $0x153] sm:$0x20]   ;;  %v1113_v61 = vsel %vm105_vm3, %v2450_v48, %v1109_v56  ;;  %v2521_v0 = vld [vmem:[%s5016_s0 + $0x151] sm:$0x20]   ;;  %v2511_v11 = vld [vmem:[%s5016_s0 + $0xc3] sm:$0x8]   ;;  %v1391_v14 = vsel %vm105_vm3, %v2520_v63, %v1387_v8  ;;  %v1349_v16 = vsel %vm97_vm1, %v2510_v10, %v1345_v9 }
  0x60   :  { %v2452_v52 = vld [vmem:[%s5016_s0 + $0x192] sm:$0x40]   ;;  %v1117_v1 = vsel %vm109_vm4, %v2451_v49, %v1113_v61  ;;  %v2522_v3 = vld [vmem:[%s5016_s0 + $0x190] sm:$0x40]   ;;  %v2512_v12 = vld [vmem:[%s5016_s0 + $0x102] sm:$0x10]   ;;  %v1395_v19 = vsel %vm109_vm4, %v2521_v0, %v1391_v14  ;;  %v1353_v20 = vsel %vm101_vm2, %v2511_v11, %v1349_v16 }
  0x61   :  { %v2453_v53 = vld [vmem:[%s5016_s0 + $0x1d1] sm:$0x80]   ;;  %v1121_v7 = vsel %vm113_vm5, %v2452_v52, %v1117_v1  ;;  %v2523_v15 = vld [vmem:[%s5016_s0 + $0x1cf] sm:$0x80]   ;;  %v2513_v17 = vld [vmem:[%s5016_s0 + $0x141] sm:$0x20]   ;;  %v1399_v24 = vsel %vm113_vm5, %v2522_v3, %v1395_v19  ;;  %v1357_v25 = vsel %vm105_vm3, %v2512_v12, %v1353_v20 }
  0x62   :  { %1161 = vrot.lane.b32.xlu0 %v1160_v26, %s2740_s7  ;;  %v1125_v13 = vsel %vm117_vm6, %v2453_v53, %v1121_v7  ;;  %v2514_v18 = vld [vmem:[%s5016_s0 + $0x180] sm:$0x40]   ;;  %v2473_v21 = vld [vmem:[%s5016_s0 + $0x7] sm:$0x1]   ;;  %v1361_v30 = vsel %vm109_vm4, %v2513_v17, %v1357_v25  ;;  %v2543_v34 = vld [vmem:[%s5016_s0 + $0x5] sm:$0x1]   ;;  %v1403_v40 = vsel %vm117_vm6, %v2523_v15, %v1399_v24 }
  0x63   :  { %1126 = vrot.lane.b32.xlu2 %v1125_v13, %s2740_s7  ;;  %v2474_v22 = vld [vmem:[%s5016_s0 + $0x46] sm:$0x2]   ;;  %v2515_v26 = vld [vmem:[%s5016_s0 + $0x1bf] sm:$0x80]   ;;  %v1365_v35 = vsel %vm113_vm5, %v2514_v18, %v1361_v30  ;;  %v2544_v37 = vld [vmem:[%s5016_s0 + $0x44] sm:$0x2]  }
  0x64   :  { %v2475_v23 = vld [vmem:[%s5016_s0 + $0x85] sm:$0x4]   ;;  %v1206_v27 = vsel %vm93_vm0, %v2474_v22, %v2473_v21  ;;  %v2545_v38 = vld [vmem:[%s5016_s0 + $0x83] sm:$0x4]   ;;  %v1484_v43 = vsel %vm93_vm0, %v2544_v37, %v2543_v34  ;;  %v2534_v49 = vld [vmem:[%s5016_s0 + $0x36] sm:$0x1]   ;;  %v1369_v51 = vsel %vm117_vm6, %v2515_v26, %v1365_v35 }
  0x65   :  { %v2476_v28 = vld [vmem:[%s5016_s0 + $0xc4] sm:$0x8]   ;;  %v1210_v31 = vsel %vm97_vm1, %v2475_v23, %v1206_v27  ;;  %v2546_v39 = vld [vmem:[%s5016_s0 + $0xc2] sm:$0x8]   ;;  %v1488_v47 = vsel %vm97_vm1, %v2545_v38, %v1484_v43  ;;  %v2535_v50 = vld [vmem:[%s5016_s0 + $0x75] sm:$0x2]  }
  0x66   :  { %v2477_v29 = vld [vmem:[%s5016_s0 + $0x103] sm:$0x10]   ;;  %v1214_v36 = vsel %vm101_vm2, %v2476_v28, %v1210_v31  ;;  %v2547_v44 = vld [vmem:[%s5016_s0 + $0x101] sm:$0x10]   ;;  %v1492_v53 = vsel %vm101_vm2, %v2546_v39, %v1488_v47  ;;  %v1449_v54 = vsel %vm93_vm0, %v2535_v50, %v2534_v49  ;;  %v2536_v55 = vld [vmem:[%s5016_s0 + $0xb4] sm:$0x4]  }
  0x67   :  { %1300 = vrot.lane.b32.xlu1 %v1299_v60, %s2741_s21  ;;  %v2478_v32 = vld [vmem:[%s5016_s0 + $0x142] sm:$0x20]   ;;  %v1218_v41 = vsel %vm105_vm3, %v2477_v29, %v1214_v36  ;;  %v2548_v45 = vld [vmem:[%s5016_s0 + $0x140] sm:$0x20]   ;;  %v2537_v56 = vld [vmem:[%s5016_s0 + $0xf3] sm:$0x8]   ;;  %v1496_v59 = vsel %vm105_vm3, %v2547_v44, %v1492_v53  ;;  %v1453_v61 = vsel %vm97_vm1, %v2536_v55, %v1449_v54 }
  0x68   :  { %v2479_v33 = vld [vmem:[%s5016_s0 + $0x181] sm:$0x40]   ;;  %v1222_v46 = vsel %vm109_vm4, %v2478_v32, %v1218_v41  ;;  %v2549_v48 = vld [vmem:[%s5016_s0 + $0x17f] sm:$0x40]   ;;  %v2538_v57 = vld [vmem:[%s5016_s0 + $0x132] sm:$0x10]   ;;  %v1500_v0 = vsel %vm109_vm4, %v2548_v45, %v1496_v59  ;;  %v1457_v1 = vsel %vm101_vm2, %v2537_v56, %v1453_v61 }
  0x69   :  { %v2480_v42 = vld [vmem:[%s5016_s0 + $0x1c0] sm:$0x80]   ;;  %v1226_v52 = vsel %vm113_vm5, %v2479_v33, %v1222_v46  ;;  %s2742_s13 = smov 48   ;;  %v2550_v60 = vld [vmem:[%s5016_s0 + $0x1be] sm:$0x80]   ;;  %v1504_v5 = vsel %vm113_vm5, %v2549_v48, %v1500_v0  ;;  %s2743_s8 = smov 40  }
  0x6a   :  { %1265 = vrot.lane.b32.xlu0 %v1264_v6, %s2741_s21  ;;  %v1230_v58 = vsel %vm117_vm6, %v2480_v42, %v1226_v52  ;;  %v2539_v62 = vld [vmem:[%s5016_s0 + $0x171] sm:$0x20]   ;;  %v2499_v2 = vld [vmem:[%s5016_s0 + $0x37] sm:$0x1]   ;;  %v1461_v6 = vsel %vm105_vm3, %v2538_v57, %v1457_v1  ;;  %v2569_v15 = vld [vmem:[%s5016_s0 + $0x35] sm:$0x1]   ;;  %v1508_v21 = vsel %vm117_vm6, %v2550_v60, %v1504_v5 }
  0x6b   :  { %v2540_v63 = vld [vmem:[%s5016_s0 + $0x1b0] sm:$0x40]   ;;  %1231 = vrot.lane.b32.xlu2 %v1230_v58, %s2741_s21  ;;  %v2500_v3 = vld [vmem:[%s5016_s0 + $0x76] sm:$0x2]   ;;  %v1465_v11 = vsel %vm109_vm4, %v2539_v62, %v1461_v6  ;;  %v2570_v18 = vld [vmem:[%s5016_s0 + $0x74] sm:$0x2]  }
  0x6c   :  { %v2501_v4 = vld [vmem:[%s5016_s0 + $0xb5] sm:$0x4]   ;;  %v2541_v7 = vld [vmem:[%s5016_s0 + $0x1ef] sm:$0x80]   ;;  %v1310_v8 = vsel %vm93_vm0, %v2500_v3, %v2499_v2  ;;  %v1469_v16 = vsel %vm113_vm5, %v2540_v63, %v1465_v11  ;;  %v2571_v19 = vld [vmem:[%s5016_s0 + $0xb3] sm:$0x4]   ;;  %v1588_v24 = vsel %vm93_vm0, %v2570_v18, %v2569_v15 }
  0x6d   :  { %v2502_v9 = vld [vmem:[%s5016_s0 + $0xf4] sm:$0x8]   ;;  %v1314_v12 = vsel %vm97_vm1, %v2501_v4, %v1310_v8  ;;  %v2572_v20 = vld [vmem:[%s5016_s0 + $0xf2] sm:$0x8]   ;;  %v1592_v28 = vsel %vm97_vm1, %v2571_v19, %v1588_v24  ;;  %v2560_v30 = vld [vmem:[%s5016_s0 + $0x25] sm:$0x1]   ;;  %v1473_v32 = vsel %vm117_vm6, %v2541_v7, %v1469_v16 }
  0x6e   :  { %v2503_v10 = vld [vmem:[%s5016_s0 + $0x133] sm:$0x10]   ;;  %v1318_v17 = vsel %vm101_vm2, %v2502_v9, %v1314_v12  ;;  %v2573_v25 = vld [vmem:[%s5016_s0 + $0x131] sm:$0x10]   ;;  %v2561_v31 = vld [vmem:[%s5016_s0 + $0x64] sm:$0x2]   ;;  %v1596_v34 = vsel %vm101_vm2, %v2572_v20, %v1592_v28 }
  0x6f   :  { %1404 = vrot.lane.b32.xlu1 %v1403_v40, %s2742_s13  ;;  %v2504_v13 = vld [vmem:[%s5016_s0 + $0x172] sm:$0x20]   ;;  %v1322_v22 = vsel %vm105_vm3, %v2503_v10, %v1318_v17  ;;  %v2574_v26 = vld [vmem:[%s5016_s0 + $0x170] sm:$0x20]   ;;  %v1553_v35 = vsel %vm93_vm0, %v2561_v31, %v2560_v30  ;;  %v2562_v36 = vld [vmem:[%s5016_s0 + $0xa3] sm:$0x4]   ;;  %v1600_v40 = vsel %vm105_vm3, %v2573_v25, %v1596_v34 }
  0x70   :  { %v2505_v14 = vld [vmem:[%s5016_s0 + $0x1b1] sm:$0x40]   ;;  %v1326_v27 = vsel %vm109_vm4, %v2504_v13, %v1322_v22  ;;  %v2575_v29 = vld [vmem:[%s5016_s0 + $0x1af] sm:$0x40]   ;;  %v2563_v37 = vld [vmem:[%s5016_s0 + $0xe2] sm:$0x8]   ;;  %v1557_v42 = vsel %vm97_vm1, %v2562_v36, %v1553_v35  ;;  %v1604_v44 = vsel %vm109_vm4, %v2574_v26, %v1600_v40 }
  0x71   :  { %v2506_v23 = vld [vmem:[%s5016_s0 + $0x1f0] sm:$0x80]   ;;  %v1330_v33 = vsel %vm113_vm5, %v2505_v14, %v1326_v27  ;;  %v2564_v38 = vld [vmem:[%s5016_s0 + $0x121] sm:$0x10]   ;;  %v2576_v41 = vld [vmem:[%s5016_s0 + $0x1ee] sm:$0x80]   ;;  %v1561_v45 = vsel %vm101_vm2, %v2563_v37, %v1557_v42  ;;  %v1608_v47 = vsel %vm113_vm5, %v2575_v29, %v1604_v44 }
  0x72   :  { %1370 = vrot.lane.b32.xlu0 %v1369_v51, %s2742_s13  ;;  %v1334_v39 = vsel %vm117_vm6, %v2506_v23, %v1330_v33  ;;  %v2565_v43 = vld [vmem:[%s5016_s0 + $0x160] sm:$0x20]   ;;  %s2_s15 = smov 3  ;;  %s4_s24 = smov 12  ;;  %vm6_vm7 = vcmask 1043458   ;;  %v1565_v48 = vsel %vm105_vm3, %v2564_v38, %v1561_v45  ;;  %vm10_vm8 = vcmask 1045508  }
  0x73   :  { %1335 = vrot.lane.b32.xlu2 %v1334_v39, %s2741_s21  ;;  %v2566_v46 = vld [vmem:[%s5016_s0 + $0x19f] sm:$0x40]   ;;  %s8_s17 = smov 48  ;;  %s12_s18 = smov 192  ;;  %v3_v51 = vld [vmem:[%s5016_s0] ss:$16 sm:%s2_s15]   ;;  %v1569_v52 = vsel %vm109_vm4, %v2565_v43, %v1565_v48  ;;  %v1612_v58 = vsel %vm117_vm6, %v2576_v41, %v1608_v47 }
  0x74   :  { %v2567_v49 = vld [vmem:[%s5016_s0 + $0x1de] sm:$0x80]   ;;  %vm14_vm9 = vcmask 1047558   ;;  %vm16_vm10 = vcmask 64512   ;;  %s21_s23 = smov 3  ;;  %s24_s3 = smov 12  ;;  %v1573_v54 = vsel %vm113_vm5, %v2566_v46, %v1569_v52 }
  0x75   :  { %v4096_v50 = vpop.permute.xlu2 %258   ;;  %v5_v53 = vld [vmem:[%s5016_s0] ss:$16 sm:%s4_s24]   ;;  %s29_s25 = smov 48  ;;  %s34_s7 = smov 192  ;;  %v1577_v2 = vsel %vm117_vm6, %v2567_v49, %v1573_v54  ;;  %v2525_v8 = vld [vmem:[%s5016_s0 + $0x26] sm:$0x1]  }
  0x76   :  { %v7_v55 = vsel %vm6_vm7, %v5_v53, %v3_v51  ;;  %v9_v56 = vld [vmem:[%s5016_s0] ss:$16 sm:%s8_s17]   ;;  %s44_s12 = smov 3  ;;  %s47_s9 = smov 12  ;;  %v2526_v22 = vld [vmem:[%s5016_s0 + $0x65] sm:$0x2]  }
  0x77   :  { %1509 = vrot.lane.b32.xlu1 %v1508_v21, %s2743_s8  ;;  %v13_v57 = vld [vmem:[%s5016_s0] ss:$16 sm:%s12_s18]   ;;  %v11_v59 = vsel %vm10_vm8, %v9_v56, %v7_v55  ;;  %s52_s24 = smov 48  ;;  %s57_s20 = smov 192  ;;  %vm121_vm11 = vcmask 1048512   ;;  %v1414_v24 = vsel %vm93_vm0, %v2526_v22, %v2525_v8  ;;  %vm260_vm12 = vcmask 982912  }
  0x78   :  { %v2175_v60 = vld [vmem:[%s5016_s0 + $0x80] ss:$16 sm:%s21_s23]   ;;  %v15_v62 = vsel %vm14_vm9, %v13_v57, %v11_v59  ;;  %s67_s18 = smov 3  ;;  %s70_s19 = smov 12  ;;  %v2527_v25 = vld [vmem:[%s5016_s0 + $0xa4] sm:$0x4]  }
  0x79   :  { %v2176_v61 = vld [vmem:[%s5016_s0 + $0x80] ss:$16 sm:%s24_s3]   ;;  %17 = vst.msk [vmem:[%s5017_s1] ss:$8 sm:$0xf] %vm16_vm10, %v15_v62   ;;  %s75_s3 = smov 48  ;;  %v1418_v26 = vsel %vm97_vm1, %v2527_v25, %v1414_v24 }
  0x7a   :  { %1474 = vrot.lane.b32.xlu0 %v1473_v32, %s2742_s13  ;;  %v27_v63 = vsel %vm6_vm7, %v2176_v61, %v2175_v60  ;;  %v2177_v0 = vld [vmem:[%s5016_s0 + $0x80] ss:$16 sm:%s29_s25]   ;;  %2174 = vst.msk [vmem:[%s5017_s1 - $0x1f] ss:$8 sm:$0xf0] %vm16_vm10, %v15_v62   ;;  %s80_s28 = smov 192 }
  0x7b   :  { %v2178_v1 = vld [vmem:[%s5016_s0 + $0x80] ss:$16 sm:%s34_s7]   ;;  %v32_v3 = vsel %vm10_vm8, %v2177_v0, %v27_v63  ;;  %v2528_v27 = vld [vmem:[%s5016_s0 + $0xe3] sm:$0x8]   ;;  %v2595_v37 = vld [vmem:[%s5016_s0 + $0x24] sm:$0x1]  }
  0x7c   :  { %v37_v4 = vsel %vm14_vm9, %v2178_v1, %v32_v3  ;;  %v2181_v5 = vld [vmem:[%s5016_s0 + $0x100] ss:$16 sm:%s44_s12]   ;;  %v1422_v28 = vsel %vm101_vm2, %v2528_v27, %v1418_v26  ;;  %v2529_v29 = vld [vmem:[%s5016_s0 + $0x122] sm:$0x10]   ;;  %v2596_v39 = vld [vmem:[%s5016_s0 + $0x63] sm:$0x2]  }
  0x7d   :  { %2179 = vst.msk [vmem:[%s5017_s1 + $0x2] ss:$8 sm:$0xf] %vm16_vm10, %v37_v4   ;;  %v2182_v6 = vld [vmem:[%s5016_s0 + $0x100] ss:$16 sm:%s47_s9]   ;;  %v4159_v9 = vpop.permute.xlu2 %292   ;;  %v1426_v30 = vsel %vm105_vm3, %v2529_v29, %v1422_v28  ;;  %v1692_v43 = vsel %vm93_vm0, %v2596_v39, %v2595_v37  ;;  %s2744_s11 = smov 32  }
  0x7e   :  { %2180 = vst.msk [vmem:[%s5017_s1 - $0x1d] ss:$8 sm:$0xf0] %vm16_vm10, %v37_v4   ;;  %v50_v10 = vsel %vm6_vm7, %v2182_v6, %v2181_v5  ;;  %v2183_v11 = vld [vmem:[%s5016_s0 + $0x100] ss:$16 sm:%s52_s24]   ;;  %vm399_vm13 = vcmask 917312  }
  0x7f   :  { %1613 = vrot.lane.b32.xlu1 %v1612_v58, %s2743_s8  ;;  %v2184_v12 = vld [vmem:[%s5016_s0 + $0x100] ss:$16 sm:%s57_s20]   ;;  %v55_v13 = vsel %vm10_vm8, %v2183_v11, %v50_v10  ;;  %v2530_v31 = vld [vmem:[%s5016_s0 + $0x161] sm:$0x20]   ;;  %s2745_s21 = smov 24   ;;  %vm538_vm14 = vcmask 851712  }
  0x80   :  { %v2187_v14 = vld [vmem:[%s5016_s0 + $0x180] ss:$16 sm:%s67_s18]   ;;  %v60_v17 = vsel %vm14_vm9, %v2184_v12, %v55_v13  ;;  %v2531_v32 = vld [vmem:[%s5016_s0 + $0x1a0] sm:$0x40]   ;;  %v1430_v35 = vsel %vm109_vm4, %v2530_v31, %v1426_v30  ;;  %v2597_v40 = vld [vmem:[%s5016_s0 + $0xa2] sm:$0x4]  }
  0x81   :  { %v189_v7 = vpop.permute.xlu1 %188   ;;  %v2188_v15 = vld [vmem:[%s5016_s0 + $0x180] ss:$16 sm:%s70_s19]   ;;  %2185 = vst.msk [vmem:[%s5017_s1 + $0x4] ss:$8 sm:$0xf] %vm16_vm10, %v60_v17   ;;  %v1434_v38 = vsel %vm113_vm5, %v2531_v32, %v1430_v35  ;;  %v1696_v47 = vsel %vm97_vm1, %v2597_v40, %v1692_v43  ;;  %s2746_s15 = smov 16  }
  0x82   :  { %1578 = vrot.lane.b32.xlu0 %v1577_v2, %s2743_s8  ;;  %v73_v18 = vsel %vm6_vm7, %v2188_v15, %v2187_v14  ;;  %v2189_v19 = vld [vmem:[%s5016_s0 + $0x180] ss:$16 sm:%s75_s3]   ;;  %2186 = vst.msk [vmem:[%s5017_s1 - $0x1b] ss:$8 sm:$0xf0] %vm16_vm10, %v60_v17   ;;  %vm677_vm15 = vcmask 786112  }
  0x83   :  { %v2190_v20 = vld [vmem:[%s5016_s0 + $0x180] ss:$16 sm:%s80_s28]   ;;  %v78_v21 = vsel %vm10_vm8, %v2189_v19, %v73_v18  ;;  %v2532_v36 = vld [vmem:[%s5016_s0 + $0x1df] sm:$0x80]   ;;  %v2598_v44 = vld [vmem:[%s5016_s0 + $0xe1] sm:$0x8]  }
  0x84   :  { %v120_v16 = vpop.permute.xlu0 %119   ;;  %v83_v23 = vsel %vm14_vm9, %v2190_v20, %v78_v21  ;;  %v1438_v42 = vsel %vm117_vm6, %v2532_v36, %v1434_v38  ;;  %v2599_v45 = vld [vmem:[%s5016_s0 + $0x120] sm:$0x10]   ;;  %v1700_v51 = vsel %vm101_vm2, %v2598_v44, %v1696_v47  ;;  %v2587_v52 = vld [vmem:[%s5016_s0 + $0x53] sm:$0x2]   ;;  %v2551_v63 = vld [vmem:[%s5016_s0 + $0x15] sm:$0x1]  }
  0x85   :  { %2191 = vst.msk [vmem:[%s5017_s1 + $0x6] ss:$8 sm:$0xf] %vm16_vm10, %v83_v23   ;;  %v4227_v34 = vpop.permute.xlu2 %397   ;;  %v2600_v46 = vld [vmem:[%s5016_s0 + $0x15f] sm:$0x20]   ;;  %1439 = vrot.lane.b32.xlu2 %v1438_v42, %s2742_s13  ;;  %v1704_v55 = vsel %vm105_vm3, %v2599_v45, %v1700_v51  ;;  %vm816_vm7 = vcmask 720512  }
  0x86   :  { %2192 = vst.msk [vmem:[%s5017_s1 - $0x19] ss:$8 sm:$0xf0] %vm16_vm10, %v83_v23   ;;  %v2601_v48 = vld [vmem:[%s5016_s0 + $0x19e] sm:$0x40]   ;;  %v1708_v60 = vsel %vm109_vm4, %v2600_v46, %v1704_v55  ;;  %s2747_s24 = smov 8  }
  0x87   :  { %2218 = vst.msk [vmem:[%s5017_s1 + $0x10] sm:$0xff] %vm121_vm11, %v189_v7   ;;  %v2602_v49 = vld [vmem:[%s5016_s0 + $0x1dd] sm:$0x80]   ;;  %v2588_v53 = vld [vmem:[%s5016_s0 + $0x92] sm:$0x4]   ;;  %v1712_v0 = vsel %vm113_vm5, %v2601_v48, %v1708_v60  ;;  %vm955_vm8 = vcmask 654912  }
  0x88   :  { %122 = vst.msk [vmem:[%s5017_s1] sm:$0xff] %vm121_vm11, %v120_v16   ;;  %v2589_v54 = vld [vmem:[%s5016_s0 + $0xd1] sm:$0x8]   ;;  %v2552_v2 = vld [vmem:[%s5016_s0 + $0x54] sm:$0x2]   ;;  %v1716_v5 = vsel %vm117_vm6, %v2602_v49, %v1712_v0  ;;  %vm2067_vm9 = vcmask 130112  }
  0x89   :  { %v224_v33 = vpop.permute.xlu1 %223   ;;  %261 = vst.msk [vmem:[%s5017_s1] sm:$0xff] %vm260_vm12, %v4096_v50   ;;  %v2586_v50 = vld [vmem:[%s5016_s0 + $0x14] sm:$0x1]   ;;  %v2553_v3 = vld [vmem:[%s5016_s0 + $0x93] sm:$0x4]   ;;  %v1518_v7 = vsel %vm93_vm0, %v2552_v2, %v2551_v63  ;;  %1717 = vrot.lane.b32.xlu1 %v1716_v5, %s2744_s11 }
  0x8a   :  { %v1657_v56 = vsel %vm93_vm0, %v2587_v52, %v2586_v50  ;;  %v2590_v57 = vld [vmem:[%s5016_s0 + $0x110] sm:$0x10]   ;;  %2227 = vst.msk [vmem:[%s5017_s1 + $0x18] sm:$0xff] %vm121_vm11, %v224_v33   ;;  %v2554_v8 = vld [vmem:[%s5016_s0 + $0xd2] sm:$0x8]   ;;  %v1522_v14 = vsel %vm97_vm1, %v2553_v3, %v1518_v7 }
  0x8b   :  { %v2591_v58 = vld [vmem:[%s5016_s0 + $0x14f] sm:$0x20]   ;;  %v1661_v61 = vsel %vm97_vm1, %v2588_v53, %v1657_v56  ;;  %v2555_v10 = vld [vmem:[%s5016_s0 + $0x111] sm:$0x10]   ;;  %v1526_v18 = vsel %vm101_vm2, %v2554_v8, %v1522_v14  ;;  %v2621_v19 = vld [vmem:[%s5016_s0 + $0x13] sm:$0x1]  }
  0x8c   :  { %v154_v41 = vpop.permute.xlu0 %153   ;;  %v2592_v59 = vld [vmem:[%s5016_s0 + $0x18e] sm:$0x40]   ;;  %v1665_v1 = vsel %vm101_vm2, %v2589_v54, %v1661_v61  ;;  %v2556_v11 = vld [vmem:[%s5016_s0 + $0x150] sm:$0x20]   ;;  %v2622_v20 = vld [vmem:[%s5016_s0 + $0x52] sm:$0x2]   ;;  %v1530_v23 = vsel %vm105_vm3, %v2555_v10, %v1526_v18 }
  0x8d   :  { %v2593_v62 = vld [vmem:[%s5016_s0 + $0x1cd] sm:$0x80]   ;;  %2209 = vst.msk [vmem:[%s5017_s1 + $0x8] sm:$0xff] %vm121_vm11, %v154_v41   ;;  %v1669_v6 = vsel %vm105_vm3, %v2590_v57, %v1665_v1  ;;  %v4331_v12 = vpop.permute.xlu2 %501   ;;  %v2557_v15 = vld [vmem:[%s5016_s0 + $0x18f] sm:$0x40]   ;;  %v1796_v24 = vsel %vm93_vm0, %v2622_v20, %v2621_v19  ;;  %v1534_v28 = vsel %vm109_vm4, %v2556_v11, %v1530_v23 }
  0x8e   :  { %v1673_v13 = vsel %vm109_vm4, %v2591_v58, %v1669_v6  ;;  %v2558_v16 = vld [vmem:[%s5016_s0 + $0x1ce] sm:$0x80]   ;;  %2244 = vst.msk [vmem:[%s5017_s1 + $0x8] sm:$0xff] %vm260_vm12, %v4159_v9   ;;  %v2623_v21 = vld [vmem:[%s5016_s0 + $0x91] sm:$0x4]   ;;  %v1538_v33 = vsel %vm113_vm5, %v2557_v15, %v1534_v28 }
  0x8f   :  { %v1677_v17 = vsel %vm113_vm5, %v2592_v59, %v1673_v13  ;;  %v2624_v25 = vld [vmem:[%s5016_s0 + $0xd0] sm:$0x8]   ;;  %v1800_v29 = vsel %vm97_vm1, %v2623_v21, %v1796_v24  ;;  %v2613_v32 = vld [vmem:[%s5016_s0 + $0x3] sm:$0x1]   ;;  %v1542_v39 = vsel %vm117_vm6, %v2558_v16, %v1538_v33  ;;  %400 = vst.msk [vmem:[%s5017_s1] sm:$0xff] %vm399_vm13, %v4227_v34  }
  0x90   :  { %v1681_v22 = vsel %vm117_vm6, %v2593_v62, %v1677_v17  ;;  %v2625_v26 = vld [vmem:[%s5016_s0 + $0x10f] sm:$0x10]   ;;  %v1804_v35 = vsel %vm101_vm2, %v2624_v25, %v1800_v29  ;;  %v2614_v36 = vld [vmem:[%s5016_s0 + $0x42] sm:$0x2]   ;;  %1543 = vrot.lane.b32.xlu2 %v1542_v39, %s2743_s8  ;;  %v2578_v34 = vld [vmem:[%s5016_s0 + $0x4] sm:$0x1]  }
  0x91   :  { %v363_v4 = vpop.permute.xlu1 %362   ;;  %v2626_v27 = vld [vmem:[%s5016_s0 + $0x14e] sm:$0x20]   ;;  %1682 = vrot.lane.b32.xlu0 %v1681_v22, %s2744_s11  ;;  %v2615_v37 = vld [vmem:[%s5016_s0 + $0x81] sm:$0x4]   ;;  %v1808_v40 = vsel %vm105_vm3, %v2625_v26, %v1804_v35  ;;  %v1762_v41 = vsel %vm93_vm0, %v2614_v36, %v2613_v32  ;;  %v2579_v51 = vld [vmem:[%s5016_s0 + $0x43] sm:$0x2]  }
  0x92   :  { %v2627_v30 = vld [vmem:[%s5016_s0 + $0x18d] sm:$0x40]   ;;  %v2616_v38 = vld [vmem:[%s5016_s0 + $0xc0] sm:$0x8]   ;;  %v1812_v45 = vsel %vm109_vm4, %v2626_v27, %v1808_v40  ;;  %v1766_v46 = vsel %vm97_vm1, %v2615_v37, %v1762_v41  ;;  %2262 = vst.msk [vmem:[%s5017_s1 + $0x18] sm:$0xff] %vm260_vm12, %v363_v4   ;;  %v1623_v56 = vsel %vm93_vm0, %v2579_v51, %v2578_v34 }
  0x93   :  { %v2628_v31 = vld [vmem:[%s5016_s0 + $0x1cc] sm:$0x80]   ;;  %v2617_v42 = vld [vmem:[%s5016_s0 + $0xff] sm:$0x10]   ;;  %v1816_v49 = vsel %vm113_vm5, %v2627_v30, %v1812_v45  ;;  %v1770_v50 = vsel %vm101_vm2, %v2616_v38, %v1766_v46  ;;  %v2580_v52 = vld [vmem:[%s5016_s0 + $0x82] sm:$0x4]  }
  0x94   :  { %v328_v9 = vpop.permute.xlu0 %327   ;;  %v2618_v43 = vld [vmem:[%s5016_s0 + $0x13e] sm:$0x20]   ;;  %v1820_v54 = vsel %vm117_vm6, %v2628_v31, %v1816_v49  ;;  %v1774_v55 = vsel %vm105_vm3, %v2617_v42, %v1770_v50  ;;  %v2581_v57 = vld [vmem:[%s5016_s0 + $0xc1] sm:$0x8]   ;;  %v1627_v61 = vsel %vm97_vm1, %v2580_v52, %v1623_v56  ;;  %v2648_v3 = vld [vmem:[%s5016_s0 + $0x2] sm:$0x1]  }
  0x95   :  { %v2619_v44 = vld [vmem:[%s5016_s0 + $0x17d] sm:$0x40]   ;;  %v4431_v53 = vpop.permute.xlu2 %605   ;;  %2253 = vst.msk [vmem:[%s5017_s1 + $0x10] sm:$0xff] %vm260_vm12, %v328_v9   ;;  %v2582_v58 = vld [vmem:[%s5016_s0 + $0x100] sm:$0x10]   ;;  %1821 = vrot.lane.b32.xlu1 %v1820_v54, %s2745_s21  ;;  %v1778_v60 = vsel %vm109_vm4, %v2618_v43, %v1774_v55  ;;  %v1631_v2 = vsel %vm101_vm2, %v2581_v57, %v1627_v61 }
  0x96   :  { %v2620_v47 = vld [vmem:[%s5016_s0 + $0x1bc] sm:$0x80]   ;;  %v2583_v62 = vld [vmem:[%s5016_s0 + $0x13f] sm:$0x20]   ;;  %v1782_v1 = vsel %vm113_vm5, %v2619_v44, %v1778_v60  ;;  %v2649_v4 = vld [vmem:[%s5016_s0 + $0x41] sm:$0x2]   ;;  %v1635_v7 = vsel %vm105_vm3, %v2582_v58, %v1631_v2 }
  0x97   :  { %v2584_v63 = vld [vmem:[%s5016_s0 + $0x17e] sm:$0x40]   ;;  %v2650_v5 = vld [vmem:[%s5016_s0 + $0x80] sm:$0x4]   ;;  %v1786_v6 = vsel %vm117_vm6, %v2620_v47, %v1782_v1  ;;  %v1901_v8 = vsel %vm93_vm0, %v2649_v4, %v2648_v3  ;;  %v1639_v14 = vsel %vm109_vm4, %v2583_v62, %v1635_v7  ;;  %v2639_v17 = vld [vmem:[%s5016_s0 + $0x33] sm:$0x1]  }
  0x98   :  { %v2585_v0 = vld [vmem:[%s5016_s0 + $0x1bd] sm:$0x80]   ;;  %v2651_v10 = vld [vmem:[%s5016_s0 + $0xbf] sm:$0x8]   ;;  %v1905_v15 = vsel %vm97_vm1, %v2650_v5, %v1901_v8  ;;  %v1643_v18 = vsel %vm113_vm5, %v2584_v63, %v1639_v14  ;;  %v2640_v20 = vld [vmem:[%s5016_s0 + $0x72] sm:$0x2]  }
  0x99   :  { %v467_v48 = vpop.permute.xlu1 %466   ;;  %v2652_v11 = vld [vmem:[%s5016_s0 + $0xfe] sm:$0x10]   ;;  %1787 = vrot.lane.b32.xlu0 %v1786_v6, %s2745_s21  ;;  %v1909_v19 = vsel %vm101_vm2, %v2651_v10, %v1905_v15  ;;  %v2641_v21 = vld [vmem:[%s5016_s0 + $0xb1] sm:$0x4]   ;;  %v1647_v23 = vsel %vm117_vm6, %v2585_v0, %v1643_v18  ;;  %v1866_v25 = vsel %vm93_vm0, %v2640_v20, %v2639_v17  ;;  %2297 = vst.msk [vmem:[%s5017_s1 + $0x18] sm:$0xff] %vm399_vm13, %v4331_v12  }
  0x9a   :  { %v2653_v13 = vld [vmem:[%s5016_s0 + $0x13d] sm:$0x20]   ;;  %v2642_v22 = vld [vmem:[%s5016_s0 + $0xf0] sm:$0x8]   ;;  %v1913_v24 = vsel %vm105_vm3, %v2652_v11, %v1909_v19  ;;  %1648 = vrot.lane.b32.xlu2 %v1647_v23, %s2744_s11  ;;  %v1870_v31 = vsel %vm97_vm1, %v2641_v21, %v1866_v25  ;;  %v2604_v12 = vld [vmem:[%s5016_s0 + $0x34] sm:$0x1]  }
  0x9b   :  { %v2654_v16 = vld [vmem:[%s5016_s0 + $0x17c] sm:$0x40]   ;;  %v2643_v26 = vld [vmem:[%s5016_s0 + $0x12f] sm:$0x10]   ;;  %v1917_v30 = vsel %vm109_vm4, %v2653_v13, %v1913_v24  ;;  %v1874_v36 = vsel %vm101_vm2, %v2642_v22, %v1870_v31  ;;  %2288 = vst.msk [vmem:[%s5017_s1 + $0x10] sm:$0xff] %vm399_vm13, %v467_v48  }
  0x9c   :  { %v432_v59 = vpop.permute.xlu0 %431   ;;  %v2655_v9 = vld [vmem:[%s5016_s0 + $0x1bb] sm:$0x80]   ;;  %v2644_v27 = vld [vmem:[%s5016_s0 + $0x16e] sm:$0x20]   ;;  %v1921_v35 = vsel %vm113_vm5, %v2654_v16, %v1917_v30  ;;  %v2605_v37 = vld [vmem:[%s5016_s0 + $0x73] sm:$0x2]   ;;  %v1878_v41 = vsel %vm105_vm3, %v2643_v26, %v1874_v36 }
  0x9d   :  { %v2645_v28 = vld [vmem:[%s5016_s0 + $0x1ad] sm:$0x40]   ;;  %v4532_v33 = vpop.permute.xlu2 %709   ;;  %v2606_v38 = vld [vmem:[%s5016_s0 + $0xb2] sm:$0x4]   ;;  %v1925_v40 = vsel %vm117_vm6, %v2655_v9, %v1921_v35  ;;  %2279 = vst.msk [vmem:[%s5017_s1 + $0x8] sm:$0xff] %vm399_vm13, %v432_v59   ;;  %v1727_v42 = vsel %vm93_vm0, %v2605_v37, %v2604_v12  ;;  %v1882_v45 = vsel %vm109_vm4, %v2644_v27, %v1878_v41 }
  0x9e   :  { %v2646_v32 = vld [vmem:[%s5016_s0 + $0x1ec] sm:$0x80]   ;;  %v2607_v43 = vld [vmem:[%s5016_s0 + $0xf1] sm:$0x8]   ;;  %1926 = vrot.lane.b32.xlu1 %v1925_v40, %s2746_s15  ;;  %v1731_v46 = vsel %vm97_vm1, %v2606_v38, %v1727_v42  ;;  %v1886_v49 = vsel %vm113_vm5, %v2645_v28, %v1882_v45  ;;  %v2674_v51 = vld [vmem:[%s5016_s0 + $0x32] sm:$0x1]  }
  0x9f   :  { %v2608_v44 = vld [vmem:[%s5016_s0 + $0x130] sm:$0x10]   ;;  %v1735_v50 = vsel %vm101_vm2, %v2607_v43, %v1731_v46  ;;  %v2675_v52 = vld [vmem:[%s5016_s0 + $0x71] sm:$0x2]   ;;  %v1890_v55 = vsel %vm117_vm6, %v2646_v32, %v1886_v49  ;;  %v2665_v1 = vld [vmem:[%s5016_s0 + $0x22] sm:$0x1]  }
  0xa0   :  { %v2609_v47 = vld [vmem:[%s5016_s0 + $0x16f] sm:$0x20]   ;;  %v2676_v54 = vld [vmem:[%s5016_s0 + $0xb0] sm:$0x4]   ;;  %v1739_v56 = vsel %vm105_vm3, %v2608_v44, %v1735_v50  ;;  %v2005_v57 = vsel %vm93_vm0, %v2675_v52, %v2674_v51  ;;  %v2666_v4 = vld [vmem:[%s5016_s0 + $0x61] sm:$0x2]  }
  0xa1   :  { %v4516_v29 = vpop.permute.xlu1 %570   ;;  %v2610_v34 = vld [vmem:[%s5016_s0 + $0x1ae] sm:$0x40]   ;;  %v2677_v58 = vld [vmem:[%s5016_s0 + $0xef] sm:$0x8]   ;;  %1891 = vrot.lane.b32.xlu0 %v1890_v55, %s2745_s21  ;;  %v1743_v61 = vsel %vm109_vm4, %v2609_v47, %v1739_v56  ;;  %v2009_v62 = vsel %vm97_vm1, %v2676_v54, %v2005_v57  ;;  %v2667_v5 = vld [vmem:[%s5016_s0 + $0xa0] sm:$0x4]   ;;  %v1970_v11 = vsel %vm93_vm0, %v2666_v4, %v2665_v1 }
  0xa2   :  { %v2611_v48 = vld [vmem:[%s5016_s0 + $0x1ed] sm:$0x80]   ;;  %v2678_v59 = vld [vmem:[%s5016_s0 + $0x12e] sm:$0x10]   ;;  %v1747_v2 = vsel %vm113_vm5, %v2610_v34, %v1743_v61  ;;  %v2013_v3 = vsel %vm101_vm2, %v2677_v58, %v2009_v62  ;;  %v2668_v6 = vld [vmem:[%s5016_s0 + $0xdf] sm:$0x8]   ;;  %v1974_v17 = vsel %vm97_vm1, %v2667_v5, %v1970_v11 }
  0xa3   :  { %v2679_v60 = vld [vmem:[%s5016_s0 + $0x16d] sm:$0x20]   ;;  %v1751_v8 = vsel %vm117_vm6, %v2611_v48, %v1747_v2  ;;  %v2017_v10 = vsel %vm105_vm3, %v2678_v59, %v2013_v3  ;;  %v2669_v13 = vld [vmem:[%s5016_s0 + $0x11e] sm:$0x10]   ;;  %2323 = vst.msk [vmem:[%s5017_s1 + $0x10] sm:$0xff] %vm538_vm14, %v4431_v53   ;;  %v1978_v21 = vsel %vm101_vm2, %v2668_v6, %v1974_v17 }
  0xa4   :  { %v537_v39 = vpop.permute.xlu0 %536   ;;  %v2680_v63 = vld [vmem:[%s5016_s0 + $0x1ac] sm:$0x40]   ;;  %v2670_v14 = vld [vmem:[%s5016_s0 + $0x15d] sm:$0x20]   ;;  %1752 = vrot.lane.b32.xlu2 %v1751_v8, %s2744_s11  ;;  %v2021_v9 = vsel %vm109_vm4, %v2679_v60, %v2017_v10  ;;  %v2630_v53 = vld [vmem:[%s5016_s0 + $0x23] sm:$0x1]   ;;  %v1982_v25 = vsel %vm105_vm3, %v2669_v13, %v1978_v21 }
  0xa5   :  { %v2681_v0 = vld [vmem:[%s5016_s0 + $0x1eb] sm:$0x80]   ;;  %v2671_v15 = vld [vmem:[%s5016_s0 + $0x19c] sm:$0x40]   ;;  %v4631_v16 = vpop.permute.xlu2 %814   ;;  %v2025_v20 = vsel %vm113_vm5, %v2680_v63, %v2021_v9  ;;  %2314 = vst.msk [vmem:[%s5017_s1 + $0x8] sm:$0xff] %vm538_vm14, %v4516_v29   ;;  %v1986_v29 = vsel %vm109_vm4, %v2670_v14, %v1982_v25 }
  0xa6   :  { %v2672_v18 = vld [vmem:[%s5016_s0 + $0x1db] sm:$0x80]   ;;  %v2631_v22 = vld [vmem:[%s5016_s0 + $0x62] sm:$0x2]   ;;  %v2029_v24 = vsel %vm117_vm6, %v2681_v0, %v2025_v20  ;;  %539 = vst.msk [vmem:[%s5017_s1] sm:$0xff] %vm538_vm14, %v537_v39   ;;  %v1990_v35 = vsel %vm113_vm5, %v2671_v15, %v1986_v29 }
  0xa7   :  { %v2632_v23 = vld [vmem:[%s5016_s0 + $0xa1] sm:$0x4]   ;;  %v1831_v26 = vsel %vm93_vm0, %v2631_v22, %v2630_v53  ;;  %2030 = vrot.lane.b32.xlu1 %v2029_v24, %s2746_s15  ;;  %v2700_v37 = vld [vmem:[%s5016_s0 + $0x21] sm:$0x1]   ;;  %v1994_v40 = vsel %vm117_vm6, %v2672_v18, %v1990_v35  ;;  %v2691_v49 = vld [vmem:[%s5016_s0 + $0x11] sm:$0x1]  }
  0xa8   :  { %v2633_v27 = vld [vmem:[%s5016_s0 + $0xe0] sm:$0x8]   ;;  %v1835_v30 = vsel %vm97_vm1, %v2632_v23, %v1831_v26  ;;  %v2701_v38 = vld [vmem:[%s5016_s0 + $0x60] sm:$0x2]   ;;  %v2692_v54 = vld [vmem:[%s5016_s0 + $0x50] sm:$0x2]  }
  0xa9   :  { %v4617_v7 = vpop.permute.xlu1 %675   ;;  %v2634_v28 = vld [vmem:[%s5016_s0 + $0x11f] sm:$0x10]   ;;  %v1839_v36 = vsel %vm101_vm2, %v2633_v27, %v1835_v30  ;;  %v2702_v39 = vld [vmem:[%s5016_s0 + $0x9f] sm:$0x4]   ;;  %v2109_v42 = vsel %vm93_vm0, %v2701_v38, %v2700_v37  ;;  %1995 = vrot.lane.b32.xlu0 %v1994_v40, %s2746_s15  ;;  %v2693_v55 = vld [vmem:[%s5016_s0 + $0x8f] sm:$0x4]   ;;  %v2074_v60 = vsel %vm93_vm0, %v2692_v54, %v2691_v49 }
  0xaa   :  { %v2635_v31 = vld [vmem:[%s5016_s0 + $0x15e] sm:$0x20]   ;;  %v1843_v41 = vsel %vm105_vm3, %v2634_v28, %v1839_v36  ;;  %v2703_v43 = vld [vmem:[%s5016_s0 + $0xde] sm:$0x8]   ;;  %v2113_v47 = vsel %vm97_vm1, %v2702_v39, %v2109_v42  ;;  %v2694_v56 = vld [vmem:[%s5016_s0 + $0xce] sm:$0x8]   ;;  %v2078_v2 = vsel %vm97_vm1, %v2693_v55, %v2074_v60 }
  0xab   :  { %v2636_v32 = vld [vmem:[%s5016_s0 + $0x19d] sm:$0x40]   ;;  %v2704_v44 = vld [vmem:[%s5016_s0 + $0x11d] sm:$0x10]   ;;  %v1847_v46 = vsel %vm109_vm4, %v2635_v31, %v1843_v41  ;;  %v2117_v52 = vsel %vm101_vm2, %v2703_v43, %v2113_v47  ;;  %v2695_v61 = vld [vmem:[%s5016_s0 + $0x10d] sm:$0x10]   ;;  %v2082_v5 = vsel %vm101_vm2, %v2694_v56, %v2078_v2 }
  0xac   :  { %v4647_v19 = vpop.permute.xlu0 %640   ;;  %v2637_v12 = vld [vmem:[%s5016_s0 + $0x1dc] sm:$0x80]   ;;  %v2705_v45 = vld [vmem:[%s5016_s0 + $0x15c] sm:$0x20]   ;;  %v1851_v51 = vsel %vm113_vm5, %v2636_v32, %v1847_v46  ;;  %v2121_v59 = vsel %vm105_vm3, %v2704_v44, %v2117_v52  ;;  %v2696_v62 = vld [vmem:[%s5016_s0 + $0x14c] sm:$0x20]   ;;  %v2086_v10 = vsel %vm105_vm3, %v2695_v61, %v2082_v5 }
  0xad   :  { %v2706_v34 = vld [vmem:[%s5016_s0 + $0x19b] sm:$0x40]   ;;  %v919_v57 = vpop.permute.xlu2 %918   ;;  %v1855_v58 = vsel %vm117_vm6, %v2637_v12, %v1851_v51  ;;  %v2697_v63 = vld [vmem:[%s5016_s0 + $0x18b] sm:$0x40]   ;;  %v2125_v1 = vsel %vm109_vm4, %v2705_v45, %v2121_v59  ;;  %2349 = vst.msk [vmem:[%s5017_s1 + $0x8] sm:$0xff] %vm677_vm15, %v4532_v33   ;;  %v2090_v15 = vsel %vm109_vm4, %v2696_v62, %v2086_v10 }
  0xae   :  { %v2707_v48 = vld [vmem:[%s5016_s0 + $0x1da] sm:$0x80]   ;;  %1856 = vrot.lane.b32.xlu2 %v1855_v58, %s2745_s21  ;;  %v2698_v3 = vld [vmem:[%s5016_s0 + $0x1ca] sm:$0x80]   ;;  %v2656_v33 = vld [vmem:[%s5016_s0 + $0x12] sm:$0x1]   ;;  %v2129_v4 = vsel %vm113_vm5, %v2706_v34, %v2125_v1 }
  0xaf   :  { %678 = vst.msk [vmem:[%s5017_s1] sm:$0xff] %vm677_vm15, %v4617_v7   ;;  %v2657_v6 = vld [vmem:[%s5016_s0 + $0x51] sm:$0x2]   ;;  %v2133_v8 = vsel %vm117_vm6, %v2707_v48, %v2129_v4  ;;  %v2684_v21 = vld [vmem:[%s5016_s0 + $0x40] sm:$0x2]  }
  0xb0   :  { %v2658_v7 = vld [vmem:[%s5016_s0 + $0x90] sm:$0x4]   ;;  %2332 = vst.msk [vmem:[%s5017_s1 + $0x18] sm:$0xff] %vm538_vm14, %v4647_v19   ;;  %v1935_v11 = vsel %vm93_vm0, %v2657_v6, %v2656_v33  ;;  %2134 = vrot.lane.b32.xlu1 %v2133_v8, %s2747_s24  ;;  %v2094_v19 = vsel %vm113_vm5, %v2697_v63, %v2090_v15  ;;  %v2685_v25 = vld [vmem:[%s5016_s0 + $0x7f] sm:$0x4]  }
  0xb1   :  { %v780_v50 = vpop.permute.xlu1 %779   ;;  %v2659_v13 = vld [vmem:[%s5016_s0 + $0xcf] sm:$0x8]   ;;  %v1939_v9 = vsel %vm97_vm1, %v2658_v7, %v1935_v11  ;;  %817 = vst.msk [vmem:[%s5017_s1] sm:$0xff] %vm816_vm7, %v4631_v16   ;;  %v2683_v16 = vld [vmem:[%s5016_s0 + $0x1] sm:$0x1]   ;;  %v2098_v22 = vsel %vm117_vm6, %v2698_v3, %v2094_v19 }
  0xb2   :  { %v2660_v14 = vld [vmem:[%s5016_s0 + $0x10e] sm:$0x10]   ;;  %v1943_v20 = vsel %vm101_vm2, %v2659_v13, %v1939_v9  ;;  %2367 = vst.msk [vmem:[%s5017_s1 + $0x18] sm:$0xff] %vm677_vm15, %v780_v50   ;;  %v2040_v24 = vsel %vm93_vm0, %v2684_v21, %v2683_v16  ;;  %v2686_v26 = vld [vmem:[%s5016_s0 + $0xbe] sm:$0x8]   ;;  %2099 = vrot.lane.b32.xlu0 %v2098_v22, %s2747_s24 }
  0xb3   :  { %v2661_v17 = vld [vmem:[%s5016_s0 + $0x14d] sm:$0x20]   ;;  %v1947_v23 = vsel %vm105_vm3, %v2660_v14, %v1943_v20  ;;  %v2044_v29 = vsel %vm97_vm1, %v2685_v25, %v2040_v24  ;;  %v2687_v30 = vld [vmem:[%s5016_s0 + $0xfd] sm:$0x10]   ;;  %2402 = vst.msk [vmem:[%s5017_s1 + $0x18] sm:$0xff] %vm816_vm7, %v919_v57  }
  0xb4   :  { %v745_v0 = vpop.permute.xlu0 %744   ;;  %v2662_v18 = vld [vmem:[%s5016_s0 + $0x18c] sm:$0x40]   ;;  %v1951_v28 = vsel %vm109_vm4, %v2661_v17, %v1947_v23  ;;  %v2688_v31 = vld [vmem:[%s5016_s0 + $0x13c] sm:$0x20]   ;;  %v2048_v35 = vsel %vm101_vm2, %v2686_v26, %v2044_v29  ;;  %v2709_v40 = vld [vmem:[%s5016_s0 + $0x31] sm:$0x1]  }
  0xb5   :  { %v2663_v53 = vld [vmem:[%s5016_s0 + $0x1cb] sm:$0x80]   ;;  %2358 = vst.msk [vmem:[%s5017_s1 + $0x10] sm:$0xff] %vm677_vm15, %v745_v0   ;;  %v1023_v32 = vpop.permute.xlu2 %1022   ;;  %v1955_v12 = vsel %vm113_vm5, %v2662_v18, %v1951_v28  ;;  %v2689_v36 = vld [vmem:[%s5016_s0 + $0x17b] sm:$0x40]   ;;  %v2052_v39 = vsel %vm105_vm3, %v2687_v30, %v2048_v35 }
  0xb6   :  { %v1959_v38 = vsel %vm117_vm6, %v2663_v53, %v1955_v12  ;;  %v2710_v41 = vld [vmem:[%s5016_s0 + $0x70] sm:$0x2]   ;;  %v2056_v42 = vsel %vm109_vm4, %v2688_v31, %v2052_v39  ;;  %v2690_v48 = vld [vmem:[%s5016_s0 + $0x1ba] sm:$0x80]  }
  0xb7   :  { %1960 = vrot.lane.b32.xlu2 %v1959_v38, %s2746_s15  ;;  %v2144_v43 = vsel %vm93_vm0, %v2710_v41, %v2709_v40  ;;  %v2711_v44 = vld [vmem:[%s5016_s0 + $0xaf] sm:$0x4]   ;;  %v2060_v34 = vsel %vm113_vm5, %v2689_v36, %v2056_v42  ;;  %vm1094_vm0 = vcmask 589312  }
  0xb8   :  { %v2712_v45 = vld [vmem:[%s5016_s0 + $0xee] sm:$0x8]   ;;  %v2148_v46 = vsel %vm97_vm1, %v2711_v44, %v2144_v43  ;;  %v2064_v54 = vsel %vm117_vm6, %v2690_v48, %v2060_v34  ;;  %vm1233_vm1 = vcmask 523712  }
  0xb9   :  { %v884_v27 = vpop.permute.xlu1 %883   ;;  %v2713_v47 = vld [vmem:[%s5016_s0 + $0x12d] sm:$0x10]   ;;  %v2152_v49 = vsel %vm101_vm2, %v2712_v45, %v2148_v46  ;;  %vm1372_vm2 = vcmask 458112  }
  0xba   :  { %2393 = vst.msk [vmem:[%s5017_s1 + $0x10] sm:$0xff] %vm816_vm7, %v884_v27   ;;  %v2156_v50 = vsel %vm105_vm3, %v2713_v47, %v2152_v49  ;;  %v2714_v51 = vld [vmem:[%s5016_s0 + $0x16c] sm:$0x20]   ;;  %vm1511_vm3 = vcmask 392512  }
  0xbb   :  { %2428 = vst.msk [vmem:[%s5017_s1 + $0x10] sm:$0xff] %vm955_vm8, %v1023_v32   ;;  %v2160_v57 = vsel %vm109_vm4, %v2714_v51, %v2156_v50  ;;  %v2715_v58 = vld [vmem:[%s5016_s0 + $0x1ab] sm:$0x40]   ;;  %vm1650_vm4 = vcmask 326912  }
  0xbc   :  { %v849_v37 = vpop.permute.xlu0 %848   ;;  %v2164_v59 = vsel %vm113_vm5, %v2715_v58, %v2160_v57  ;;  %v2716_v60 = vld [vmem:[%s5016_s0 + $0x1ea] sm:$0x80]   ;;  %vm1789_vm5 = vcmask 261312  }
  0xbd   :  { %2384 = vst.msk [vmem:[%s5017_s1 + $0x8] sm:$0xff] %vm816_vm7, %v849_v37   ;;  %v1127_v55 = vpop.permute.xlu2 %1126   ;;  %v2168_v62 = vsel %vm117_vm6, %v2716_v60, %v2164_v59  ;;  %vm1928_vm6 = vcmask 195712  }
  0xbf   :  { %2065 = vrot.lane.b32.xlu2 %v2064_v54, %s2747_s24 }
  0xc1   :  { %v988_v52 = vpop.permute.xlu1 %987  }
  0xc2   :  { %2419 = vst.msk [vmem:[%s5017_s1 + $0x8] sm:$0xff] %vm955_vm8, %v988_v52  }
  0xc3   :  { %2454 = vst.msk [vmem:[%s5017_s1 + $0x8] sm:$0xff] %vm1094_vm0, %v1127_v55  }
  0xc4   :  { %v954_v56 = vpop.permute.xlu0 %953  }
  0xc5   :  { %956 = vst.msk [vmem:[%s5017_s1] sm:$0xff] %vm955_vm8, %v954_v56   ;;  %v1232_v63 = vpop.permute.xlu2 %1231  }
  0xc7   :  { %2169 = vrot.lane.b32.xlu2 %v2168_v62, %s2747_s24 }
  0xc9   :  { %v1093_v61 = vpop.permute.xlu1 %1092  }
  0xca   :  { %1095 = vst.msk [vmem:[%s5017_s1] sm:$0xff] %vm1094_vm0, %v1093_v61  }
  0xcb   :  { %1234 = vst.msk [vmem:[%s5017_s1] sm:$0xff] %vm1233_vm1, %v1232_v63  }
  0xcc   :  { %v1058_v0 = vpop.permute.xlu0 %1057  }
  0xcd   :  { %2437 = vst.msk [vmem:[%s5017_s1 + $0x18] sm:$0xff] %vm955_vm8, %v1058_v0   ;;  %v1336_v2 = vpop.permute.xlu2 %1335  }
  0xd1   :  { %v1197_v1 = vpop.permute.xlu1 %1196  }
  0xd2   :  { %2472 = vst.msk [vmem:[%s5017_s1 + $0x18] sm:$0xff] %vm1094_vm0, %v1197_v1  }
  0xd3   :  { %2507 = vst.msk [vmem:[%s5017_s1 + $0x18] sm:$0xff] %vm1233_vm1, %v1336_v2  }
  0xd4   :  { %v1162_v3 = vpop.permute.xlu0 %1161  }
  0xd5   :  { %2463 = vst.msk [vmem:[%s5017_s1 + $0x10] sm:$0xff] %vm1094_vm0, %v1162_v3  }
  0xd9   :  { %v1301_v33 = vpop.permute.xlu1 %1300  }
  0xda   :  { %2498 = vst.msk [vmem:[%s5017_s1 + $0x10] sm:$0xff] %vm1233_vm1, %v1301_v33  }
  0xdc   :  { %v1266_v4 = vpop.permute.xlu0 %1265  }
  0xdd   :  { %2489 = vst.msk [vmem:[%s5017_s1 + $0x8] sm:$0xff] %vm1233_vm1, %v1266_v4  }
  0xdf   :  { %v1440_v7 = vpop.permute.xlu2 %1439  }
  0xe0   :  { %2533 = vst.msk [vmem:[%s5017_s1 + $0x10] sm:$0xff] %vm1372_vm2, %v1440_v7  }
  0xe1   :  { %v1405_v5 = vpop.permute.xlu1 %1404  }
  0xe2   :  { %2524 = vst.msk [vmem:[%s5017_s1 + $0x8] sm:$0xff] %vm1372_vm2, %v1405_v5  }
  0xe4   :  { %v1371_v6 = vpop.permute.xlu0 %1370  }
  0xe5   :  { %1373 = vst.msk [vmem:[%s5017_s1] sm:$0xff] %vm1372_vm2, %v1371_v6  }
  0xe9   :  { %v1510_v8 = vpop.permute.xlu1 %1509  }
  0xea   :  { %1512 = vst.msk [vmem:[%s5017_s1] sm:$0xff] %vm1511_vm3, %v1510_v8   ;;  %v1544_v13 = vpop.permute.xlu2 %1543  }
  0xeb   :  { %2559 = vst.msk [vmem:[%s5017_s1 + $0x8] sm:$0xff] %vm1511_vm3, %v1544_v13  }
  0xec   :  { %v1475_v10 = vpop.permute.xlu0 %1474  }
  0xed   :  { %2542 = vst.msk [vmem:[%s5017_s1 + $0x18] sm:$0xff] %vm1372_vm2, %v1475_v10  }
  0xf1   :  { %v1614_v11 = vpop.permute.xlu1 %1613  }
  0xf2   :  { %2577 = vst.msk [vmem:[%s5017_s1 + $0x18] sm:$0xff] %vm1511_vm3, %v1614_v11  }
  0xf4   :  { %v1579_v14 = vpop.permute.xlu0 %1578   ;;  %v1649_v15 = vpop.permute.xlu2 %1648  }
  0xf5   :  { %2568 = vst.msk [vmem:[%s5017_s1 + $0x10] sm:$0xff] %vm1511_vm3, %v1579_v14  }
  0xf6   :  { %1651 = vst.msk [vmem:[%s5017_s1] sm:$0xff] %vm1650_vm4, %v1649_v15  }
  0xfb   :  { %v1718_v17 = vpop.permute.xlu1 %1717  }
  0xfc   :  { %2603 = vst.msk [vmem:[%s5017_s1 + $0x10] sm:$0xff] %vm1650_vm4, %v1718_v17  }
  0xfe   :  { %v1753_v9 = vpop.permute.xlu2 %1752  }
  0xff   :  { %2612 = vst.msk [vmem:[%s5017_s1 + $0x18] sm:$0xff] %vm1650_vm4, %v1753_v9  }
 0x103   :  { %v1683_v18 = vpop.permute.xlu0 %1682  }
 0x104   :  { %2594 = vst.msk [vmem:[%s5017_s1 + $0x8] sm:$0xff] %vm1650_vm4, %v1683_v18  }
 0x107   :  { %v1822_v19 = vpop.permute.xlu1 %1821  }
 0x108   :  { %v1857_v53 = vpop.permute.xlu2 %1856   ;;  %2629 = vst.msk [vmem:[%s5017_s1 + $0x8] sm:$0xff] %vm1789_vm5, %v1822_v19  }
 0x109   :  { %2638 = vst.msk [vmem:[%s5017_s1 + $0x10] sm:$0xff] %vm1789_vm5, %v1857_v53  }
 0x10b   :  { %v1788_v20 = vpop.permute.xlu0 %1787  }
 0x10c   :  { %1790 = vst.msk [vmem:[%s5017_s1] sm:$0xff] %vm1789_vm5, %v1788_v20  }
 0x110   :  { %v1927_v21 = vpop.permute.xlu1 %1926  }
 0x111   :  { %v1961_v16 = vpop.permute.xlu2 %1960   ;;  %1929 = vst.msk [vmem:[%s5017_s1] sm:$0xff] %vm1928_vm6, %v1927_v21  }
 0x112   :  { %2664 = vst.msk [vmem:[%s5017_s1 + $0x8] sm:$0xff] %vm1928_vm6, %v1961_v16  }
 0x113   :  { %v1892_v22 = vpop.permute.xlu0 %1891  }
 0x114   :  { %2647 = vst.msk [vmem:[%s5017_s1 + $0x18] sm:$0xff] %vm1789_vm5, %v1892_v22  }
 0x119   :  { %v2066_v23 = vpop.permute.xlu2 %2065   ;;  %v2031_v24 = vpop.permute.xlu1 %2030  }
 0x11a   :  { %2068 = vst.msk [vmem:[%s5017_s1] sm:$0xff] %vm2067_vm9, %v2066_v23  }
 0x11b   :  { %2682 = vst.msk [vmem:[%s5017_s1 + $0x18] sm:$0xff] %vm1928_vm6, %v2031_v24   ;;  %v1996_v25 = vpop.permute.xlu0 %1995  }
 0x11c   :  { %2673 = vst.msk [vmem:[%s5017_s1 + $0x10] sm:$0xff] %vm1928_vm6, %v1996_v25  }
 0x121   :  { %v2170_v26 = vpop.permute.xlu2 %2169  }
 0x122   :  { %2717 = vst.msk [vmem:[%s5017_s1 + $0x18] sm:$0xff] %vm2067_vm9, %v2170_v26   ;;  %v2135_v27 = vpop.permute.xlu1 %2134  }
 0x123   :  { %2708 = vst.msk [vmem:[%s5017_s1 + $0x10] sm:$0xff] %vm2067_vm9, %v2135_v27  }
 0x124   :  { %v2100_v28 = vpop.permute.xlu0 %2099  }
 0x125   :  { %2699 = vst.msk [vmem:[%s5017_s1 + $0x8] sm:$0xff] %vm2067_vm9, %v2100_v28  }

// kernel: _lambda_.1
= control target key start
LH: loop header
LB: loop body
LE: loop exit
PB: predicated region body
PF: predicated region fallthrough
CT: control target
= control target key end

     0   :  { %vm92_vm0 = vcmask 261120   ;;  %vm494_vm1 = vcmask 162816   ;;  %vm3193_vm3 = vcmask 1043456   ;;  %s7149_s1 = inlined_call_operand.vmem [shape: f32[32,20], index: 1, kind: input, shape index: {}]   ;;  %s7150_s0 = inlined_call_operand.vmem [shape: f32[512,32], index: 0, kind: input, shape index: {}]   ;;  %s7151_s2 = inlined_call_operand.vmem [shape: f32[1,20], index: 2, kind: input, shape index: {}]   ;;  %s7152_s3 = inlined_call_operand.vmem [shape: f32[20,128], index: 3, kind: input, shape index: {}]   ;;  %s7153_s4 = inlined_call_operand.vmem [shape: f32[8,512], index: 4, kind: input, shape index: {}]   ;;  %s7154_s5 = inlined_call_operand.vmem [shape: f32[8,512], index: 5, kind: output, shape index: {}]  }
   0x1   :  { %v87_v0 = vld [vmem:[%s7149_s1 + $0x18] sm:$0xff]  ;;  %v86_v1 = vld [vmem:[%s7149_s1 + $0x10] sm:$0xff]  ;;  %v85_v2 = vld [vmem:[%s7149_s1 + $0x8] sm:$0xff] }
   0x2   :  { %297 = vmatpush.msra.mxu0 %v87_v0  ;;  %3679 = vmatpush.msra.mxu2 %v87_v0  ;;  %v84_v3 = vld [vmem:[%s7149_s1] sm:$0xff]  ;;  %v21_v6 = vld [vmem:[%s7150_s0 + $0x8] sm:$0xff]  ;;  %v22_v8 = vld [vmem:[%s7150_s0 + $0x10] sm:$0xff] }
   0x3   :  { %v20_v4 = vld [vmem:[%s7150_s0] sm:$0xff]  ;;  %v53_v7 = vld [vmem:[%s7150_s0 + $0x108] sm:$0xff]  ;;  %v54_v9 = vld [vmem:[%s7150_s0 + $0x110] sm:$0xff] }
   0x4   :  { %298 = vmatpush.msra.mxu0 %v86_v1  ;;  %3680 = vmatpush.msra.mxu2 %v86_v1  ;;  %v52_v5 = vld [vmem:[%s7150_s0 + $0x100] sm:$0xff]  ;;  %v23_v10 = vld [vmem:[%s7150_s0 + $0x18] sm:$0xff]  ;;  %v25_v14 = vld [vmem:[%s7150_s0 + $0x28] sm:$0xff] }
   0x5   :  { %v55_v11 = vld [vmem:[%s7150_s0 + $0x118] sm:$0xff]  ;;  %v24_v12 = vld [vmem:[%s7150_s0 + $0x20] sm:$0xff]  ;;  %v57_v15 = vld [vmem:[%s7150_s0 + $0x128] sm:$0xff] }
   0x6   :  { %299 = vmatpush.msra.mxu0 %v85_v2  ;;  %3681 = vmatpush.msra.mxu2 %v85_v2  ;;  %v56_v13 = vld [vmem:[%s7150_s0 + $0x120] sm:$0xff]  ;;  %v26_v16 = vld [vmem:[%s7150_s0 + $0x30] sm:$0xff]  ;;  %v27_v18 = vld [vmem:[%s7150_s0 + $0x38] sm:$0xff] }
   0x7   :  { %v58_v17 = vld [vmem:[%s7150_s0 + $0x130] sm:$0xff]  ;;  %v59_v19 = vld [vmem:[%s7150_s0 + $0x138] sm:$0xff]  ;;  %v28_v20 = vld [vmem:[%s7150_s0 + $0x40] sm:$0xff] }
   0x8   :  { %300 = vmatpush.msra.mxu0 %v84_v3  ;;  %3682 = vmatpush.msra.mxu2 %v84_v3  ;;  %v60_v21 = vld [vmem:[%s7150_s0 + $0x140] sm:$0xff]  ;;  %v29_v22 = vld [vmem:[%s7150_s0 + $0x48] sm:$0xff]  ;;  %v30_v24 = vld [vmem:[%s7150_s0 + $0x50] sm:$0xff] }
   0x9   :  { %3550 = vmatmul.msk.f32.vlgmr.msra.gmra.mxu0 %vm92_vm0, %v20_v4  ;;  %3582 = vmatmul.msk.f32.vlgmr.msra.gmra.mxu2 %vm92_vm0, %v52_v5  ;;  %v61_v23 = vld [vmem:[%s7150_s0 + $0x148] sm:$0xff]  ;;  %v62_v25 = vld [vmem:[%s7150_s0 + $0x150] sm:$0xff]  ;;  %v31_v26 = vld [vmem:[%s7150_s0 + $0x58] sm:$0xff] }
   0xa   :  { %v63_v27 = vld [vmem:[%s7150_s0 + $0x158] sm:$0xff]  ;;  %v32_v28 = vld [vmem:[%s7150_s0 + $0x60] sm:$0xff]  ;;  %v33_v30 = vld [vmem:[%s7150_s0 + $0x68] sm:$0xff] }
   0xb   :  { %v64_v29 = vld [vmem:[%s7150_s0 + $0x160] sm:$0xff]  ;;  %v65_v31 = vld [vmem:[%s7150_s0 + $0x168] sm:$0xff]  ;;  %v34_v32 = vld [vmem:[%s7150_s0 + $0x70] sm:$0xff] }
   0xc   :  { %v66_v33 = vld [vmem:[%s7150_s0 + $0x170] sm:$0xff]  ;;  %v35_v34 = vld [vmem:[%s7150_s0 + $0x78] sm:$0xff]  ;;  %v4122_v36 = vld [vmem:[%s7151_s2] ss:$0 sm:$0xff] }
   0xd   :  { %v67_v35 = vld [vmem:[%s7150_s0 + $0x178] sm:$0xff]  ;;  %v36_v38 = vld [vmem:[%s7150_s0 + $0x80] sm:$0xff]  ;;  %v37_v44 = vld [vmem:[%s7150_s0 + $0x88] sm:$0xff] }
   0xe   :  { %v68_v39 = vld [vmem:[%s7150_s0 + $0x180] sm:$0xff]  ;;  %v69_v45 = vld [vmem:[%s7150_s0 + $0x188] sm:$0xff]  ;;  %v38_v51 = vld [vmem:[%s7150_s0 + $0x90] sm:$0xff] }
   0xf   :  { %v70_v52 = vld [vmem:[%s7150_s0 + $0x190] sm:$0xff]  ;;  %v39_v58 = vld [vmem:[%s7150_s0 + $0x98] sm:$0xff]  ;;  %v72_v63 = vld [vmem:[%s7150_s0 + $0x1a0] sm:$0xff] }
  0x10   :  { %v71_v59 = vld [vmem:[%s7150_s0 + $0x198] sm:$0xff]  ;;  %v40_v0 = vld [vmem:[%s7150_s0 + $0xa0] sm:$0xff] }
  0x11   :  { %3551 = vmatmul.msk.f32.gmra.mxu0 %vm92_vm0, %v21_v6  ;;  %3583 = vmatmul.msk.f32.gmra.mxu2 %vm92_vm0, %v53_v7 }
  0x19   :  { %3552 = vmatmul.msk.f32.gmra.mxu0 %vm92_vm0, %v22_v8  ;;  %3584 = vmatmul.msk.f32.gmra.mxu2 %vm92_vm0, %v54_v9  ;;  %v41_v8 = vld [vmem:[%s7150_s0 + $0xa8] sm:$0xff] }
  0x1a   :  { %v73_v9 = vld [vmem:[%s7150_s0 + $0x1a8] sm:$0xff] }
  0x21   :  { %3553 = vmatmul.msk.f32.gmra.mxu0 %vm92_vm0, %v23_v10  ;;  %3585 = vmatmul.msk.f32.gmra.mxu2 %vm92_vm0, %v55_v11 }
  0x29   :  { %3554 = vmatmul.msk.f32.gmra.mxu0 %vm92_vm0, %v24_v12  ;;  %3586 = vmatmul.msk.f32.gmra.mxu2 %vm92_vm0, %v56_v13 }
  0x31   :  { %3555 = vmatmul.msk.f32.gmra.mxu0 %vm92_vm0, %v25_v14  ;;  %3587 = vmatmul.msk.f32.gmra.mxu2 %vm92_vm0, %v57_v15 }
  0x39   :  { %3556 = vmatmul.msk.f32.gmra.mxu0 %vm92_vm0, %v26_v16  ;;  %3588 = vmatmul.msk.f32.gmra.mxu2 %vm92_vm0, %v58_v17 }
  0x41   :  { %3557 = vmatmul.msk.f32.gmra.mxu0 %vm92_vm0, %v27_v18  ;;  %3589 = vmatmul.msk.f32.gmra.mxu2 %vm92_vm0, %v59_v19  ;;  %v42_v18 = vld [vmem:[%s7150_s0 + $0xb0] sm:$0xff] }
  0x49   :  { %3558 = vmatmul.msk.f32.gmra.mxu0 %vm92_vm0, %v28_v20  ;;  %3590 = vmatmul.msk.f32.gmra.mxu2 %vm92_vm0, %v60_v21 }
  0x51   :  { %3559 = vmatmul.msk.f32.gmra.mxu0 %vm92_vm0, %v29_v22  ;;  %3591 = vmatmul.msk.f32.gmra.mxu2 %vm92_vm0, %v61_v23 }
  0x59   :  { %3560 = vmatmul.msk.f32.gmra.mxu0 %vm92_vm0, %v30_v24  ;;  %3592 = vmatmul.msk.f32.gmra.mxu2 %vm92_vm0, %v62_v25  ;;  %v43_v25 = vld [vmem:[%s7150_s0 + $0xb8] sm:$0xff] }
  0x61   :  { %3561 = vmatmul.msk.f32.gmra.mxu0 %vm92_vm0, %v31_v26  ;;  %3593 = vmatmul.msk.f32.gmra.mxu2 %vm92_vm0, %v63_v27 }
  0x69   :  { %3562 = vmatmul.msk.f32.gmra.mxu0 %vm92_vm0, %v32_v28  ;;  %3594 = vmatmul.msk.f32.gmra.mxu2 %vm92_vm0, %v64_v29 }
  0x71   :  { %3563 = vmatmul.msk.f32.gmra.mxu0 %vm92_vm0, %v33_v30  ;;  %3595 = vmatmul.msk.f32.gmra.mxu2 %vm92_vm0, %v65_v31 }
  0x79   :  { %3564 = vmatmul.msk.f32.gmra.mxu0 %vm92_vm0, %v34_v32  ;;  %3596 = vmatmul.msk.f32.gmra.mxu2 %vm92_vm0, %v66_v33  ;;  %v44_v32 = vld [vmem:[%s7150_s0 + $0xc0] sm:$0xff] }
  0x81   :  { %3565 = vmatmul.msk.f32.gmra.mxu0 %vm92_vm0, %v35_v34  ;;  %3597 = vmatmul.msk.f32.gmra.mxu2 %vm92_vm0, %v67_v35 }
  0x86   :  { %v302_v37 = vpop.f32.mrf.mxu0 }
  0x87   :  { %v4131_v40 = vadd.f32 %v4122_v36, %v302_v37 }
  0x89   :  { %3566 = vmatmul.msk.f32.gmra.mxu0 %vm92_vm0, %v36_v38  ;;  %v495_v41 = vsel %vm494_vm1, %v4131_v40, 0.0  ;;  %3598 = vmatmul.msk.f32.gmra.mxu2 %vm92_vm0, %v68_v39 }
  0x8a   :  { %496 = vadd.xlane.f32.xlu0 %v495_v41  ;;  %v45_v41 = vld [vmem:[%s7150_s0 + $0xc8] sm:$0xff] }
  0x8c   :  { %v4137_v42 = vpop.f32.mrf.mxu2 }
  0x8e   :  { %v305_v43 = vpop.f32.mrf.mxu0 }
  0x8f   :  { %v4146_v46 = vadd.f32 %v4122_v36, %v305_v43 }
  0x91   :  { %3567 = vmatmul.msk.f32.gmra.mxu0 %vm92_vm0, %v37_v44  ;;  %v498_v47 = vsel %vm494_vm1, %v4146_v46, 0.0  ;;  %3599 = vmatmul.msk.f32.gmra.mxu2 %vm92_vm0, %v69_v45 }
  0x92   :  { %499 = vadd.xlane.f32.xlu0 %v498_v47 }
  0x94   :  { %v401_v48 = vpop.f32.mrf.mxu2 }
  0x95   :  { %v4153_v49 = vadd.f32 %v4122_v36, %v401_v48  ;;  %v46_v48 = vld [vmem:[%s7150_s0 + $0xd0] sm:$0xff] }
  0x96   :  { %v308_v50 = vpop.f32.mrf.mxu0 }
  0x97   :  { %v594_v53 = vsel %vm494_vm1, %v4153_v49, 0.0  ;;  %v4164_v54 = vadd.f32 %v4122_v36, %v308_v50 }
  0x98   :  { %595 = vadd.xlane.f32.xlu1 %v594_v53 }
  0x99   :  { %3568 = vmatmul.msk.f32.gmra.mxu0 %vm92_vm0, %v38_v51  ;;  %3600 = vmatmul.msk.f32.gmra.mxu2 %vm92_vm0, %v70_v52  ;;  %v501_v56 = vsel %vm494_vm1, %v4164_v54, 0.0 }
  0x9c   :  { %v404_v55 = vpop.f32.mrf.mxu2 }
  0x9d   :  { %v4179_v60 = vadd.f32 %v4122_v36, %v404_v55 }
  0x9e   :  { %v311_v57 = vpop.f32.mrf.mxu0 }
  0x9f   :  { %v597_v1 = vsel %vm494_vm1, %v4179_v60, 0.0  ;;  %v4197_v4 = vadd.f32 %v4122_v36, %v311_v57 }
  0xa0   :  { %502 = vadd.xlane.f32.xlu1 %v501_v56 }
  0xa1   :  { %3569 = vmatmul.msk.f32.gmra.mxu0 %vm92_vm0, %v39_v58  ;;  %3601 = vmatmul.msk.f32.gmra.mxu2 %vm92_vm0, %v71_v59  ;;  %v504_v11 = vsel %vm494_vm1, %v4197_v4, 0.0 }
  0xa4   :  { %v407_v61 = vpop.f32.mrf.mxu2 }
  0xa5   :  { %v4220_v14 = vadd.f32 %v4122_v36, %v407_v61  ;;  %v3948_v61 = vmov 20.0  }
  0xa6   :  { %v314_v62 = vpop.f32.mrf.mxu0  ;;  %3688 = vrcp.f32 %v3948_v61 }
  0xa7   :  { %v4190_v2 = vadd.f32 %v4122_v36, %v314_v62  ;;  %v600_v19 = vsel %vm494_vm1, %v4220_v14, 0.0 }
  0xa8   :  { %598 = vadd.xlane.f32.xlu1 %v597_v1 }
  0xa9   :  { %v507_v3 = vsel %vm494_vm1, %v4190_v2, 0.0  ;;  %3602 = vmatmul.msk.f32.gmra.mxu2 %vm92_vm0, %v72_v63  ;;  %3570 = vmatmul.msk.f32.gmra.mxu0 %vm92_vm0, %v40_v0 }
  0xaa   :  { %508 = vadd.xlane.f32.xlu2 %v507_v3 }
  0xac   :  { %v410_v5 = vpop.f32.mrf.mxu2  ;;  %v3689_v1 = vpop.eup %3688 }
  0xad   :  { %v4200_v6 = vadd.f32 %v4122_v36, %v410_v5  ;;  %v688_v5 = vmul.f32 20.0, %v3689_v1  ;;  %vm692_vm2 = vweird.f32 %v3689_v1 }
  0xae   :  { %v317_v7 = vpop.f32.mrf.mxu0 }
  0xaf   :  { %v4209_v10 = vadd.f32 %v4122_v36, %v317_v7  ;;  %v603_v12 = vsel %vm494_vm1, %v4200_v6, 0.0 }
  0xb0   :  { %505 = vadd.xlane.f32.xlu1 %v504_v11  ;;  %604 = vadd.xlane.f32.xlu0 %v603_v12  ;;  %v689_v12 = vsub.f32 1.0, %v688_v5 }
  0xb1   :  { %v510_v13 = vsel %vm494_vm1, %v4209_v10, 0.0  ;;  %3571 = vmatmul.msk.f32.gmra.mxu0 %vm92_vm0, %v41_v8  ;;  %3603 = vmatmul.msk.f32.gmra.mxu2 %vm92_vm0, %v73_v9 }
  0xb2   :  { %511 = vadd.xlane.f32.xlu2 %v510_v13 }
  0xb4   :  { %v413_v15 = vpop.f32.mrf.mxu2 }
  0xb5   :  { %v4223_v16 = vadd.f32 %v4122_v36, %v413_v15 }
  0xb6   :  { %v320_v17 = vpop.f32.mrf.mxu0 }
  0xb7   :  { %v606_v20 = vsel %vm494_vm1, %v4223_v16, 0.0  ;;  %v4233_v21 = vadd.f32 %v4122_v36, %v320_v17  ;;  %v690_v17 = vmul.f32 %v3689_v1, %v689_v12 }
  0xb8   :  { %601 = vadd.xlane.f32.xlu1 %v600_v19  ;;  %607 = vadd.xlane.f32.xlu0 %v606_v20 }
  0xb9   :  { %3572 = vmatmul.msk.f32.gmra.mxu0 %vm92_vm0, %v42_v18  ;;  %v513_v23 = vsel %vm494_vm1, %v4233_v21, 0.0  ;;  %v74_v18 = vld [vmem:[%s7150_s0 + $0x1b0] sm:$0xff] }
  0xba   :  { %3604 = vmatmul.msk.f32.gmra.mxu2 %vm92_vm0, %v74_v18 }
  0xbc   :  { %v416_v22 = vpop.f32.mrf.mxu2 }
  0xbd   :  { %v4247_v28 = vadd.f32 %v4122_v36, %v416_v22 }
  0xbe   :  { %v323_v24 = vpop.f32.mrf.mxu0 }
  0xbf   :  { %v4242_v26 = vadd.f32 %v4122_v36, %v323_v24  ;;  %v609_v30 = vsel %vm494_vm1, %v4247_v28, 0.0  ;;  %v691_v24 = vadd.f32 %v3689_v1, %v690_v17 }
  0xc0   :  { %514 = vadd.xlane.f32.xlu0 %v513_v23 }
  0xc1   :  { %v516_v27 = vsel %vm494_vm1, %v4242_v26, 0.0  ;;  %3573 = vmatmul.msk.f32.gmra.mxu0 %vm92_vm0, %v43_v25 }
  0xc2   :  { %517 = vadd.xlane.f32.xlu1 %v516_v27 }
  0xc4   :  { %v419_v29 = vpop.f32.mrf.mxu2 }
  0xc5   :  { %v4261_v35 = vadd.f32 %v4122_v36, %v419_v29  ;;  %v4326_v29 = vsel %vm692_vm2, %v3689_v1, %v691_v24 }
  0xc6   :  { %v326_v31 = vpop.f32.mrf.mxu0 }
  0xc7   :  { %v4256_v33 = vadd.f32 %v4122_v36, %v326_v31  ;;  %v612_v38 = vsel %vm494_vm1, %v4261_v35, 0.0 }
  0xc8   :  { %610 = vadd.xlane.f32.xlu0 %v609_v30 }
  0xc9   :  { %v519_v34 = vsel %vm494_vm1, %v4256_v33, 0.0  ;;  %3574 = vmatmul.msk.f32.gmra.mxu0 %vm92_vm0, %v44_v32 }
  0xca   :  { %520 = vadd.xlane.f32.xlu2 %v519_v34 }
  0xcc   :  { %v422_v37 = vpop.f32.mrf.mxu2 }
  0xcd   :  { %v4270_v43 = vadd.f32 %v4122_v36, %v422_v37 }
  0xce   :  { %v329_v39 = vpop.f32.mrf.mxu0 }
  0xcf   :  { %v615_v45 = vsel %vm494_vm1, %v4270_v43, 0.0  ;;  %v4285_v52 = vadd.f32 %v4122_v36, %v329_v39 }
  0xd0   :  { %613 = vadd.xlane.f32.xlu0 %v612_v38 }
  0xd1   :  { %3575 = vmatmul.msk.f32.gmra.mxu0 %vm92_vm0, %v45_v41  ;;  %v522_v57 = vsel %vm494_vm1, %v4285_v52, 0.0 }
  0xd4   :  { %v425_v44 = vpop.f32.mrf.mxu2 }
  0xd5   :  { %v4293_v58 = vadd.f32 %v4122_v36, %v425_v44 }
  0xd6   :  { %v332_v47 = vpop.f32.mrf.mxu0 }
  0xd7   :  { %v4279_v50 = vadd.f32 %v4122_v36, %v332_v47  ;;  %v618_v63 = vsel %vm494_vm1, %v4293_v58, 0.0 }
  0xd8   :  { %616 = vadd.xlane.f32.xlu0 %v615_v45 }
  0xd9   :  { %v525_v51 = vsel %vm494_vm1, %v4279_v50, 0.0  ;;  %3576 = vmatmul.msk.f32.gmra.mxu0 %vm92_vm0, %v46_v48 }
  0xda   :  { %526 = vadd.xlane.f32.xlu1 %v525_v51 }
  0xdc   :  { %v428_v53 = vpop.f32.mrf.mxu2 }
  0xdd   :  { %v4300_v3 = vadd.f32 %v4122_v36, %v428_v53 }
  0xde   :  { %v335_v55 = vpop.f32.mrf.mxu0 }
  0xdf   :  { %v4288_v56 = vadd.f32 %v4122_v36, %v335_v55  ;;  %v621_v8 = vsel %vm494_vm1, %v4300_v3, 0.0 }
  0xe0   :  { %523 = vadd.xlane.f32.xlu0 %v522_v57 }
  0xe1   :  { %v528_v59 = vsel %vm494_vm1, %v4288_v56, 0.0 }
  0xe2   :  { %529 = vadd.xlane.f32.xlu2 %v528_v59 }
  0xe4   :  { %v431_v62 = vpop.f32.mrf.mxu2 }
  0xe5   :  { %v4308_v13 = vadd.f32 %v4122_v36, %v431_v62 }
  0xe6   :  { %v338_v0 = vpop.f32.mrf.mxu0 }
  0xe7   :  { %v624_v20 = vsel %vm494_vm1, %v4308_v13, 0.0  ;;  %v4324_v27 = vadd.f32 %v4122_v36, %v338_v0 }
  0xe8   :  { %619 = vadd.xlane.f32.xlu0 %v618_v63 }
  0xe9   :  { %v531_v37 = vsel %vm494_vm1, %v4324_v27, 0.0 }
  0xec   :  { %v434_v7 = vpop.f32.mrf.mxu2 }
  0xed   :  { %v4335_v39 = vadd.f32 %v4122_v36, %v434_v7 }
  0xee   :  { %v341_v9 = vpop.f32.mrf.mxu0 }
  0xef   :  { %v4305_v11 = vadd.f32 %v4122_v36, %v341_v9  ;;  %v627_v48 = vsel %vm494_vm1, %v4335_v39, 0.0 }
  0xf0   :  { %622 = vadd.xlane.f32.xlu0 %v621_v8 }
  0xf1   :  { %v534_v15 = vsel %vm494_vm1, %v4305_v11, 0.0 }
  0xf2   :  { %535 = vadd.xlane.f32.xlu1 %v534_v15  ;;  %v47_v15 = vld [vmem:[%s7150_s0 + $0xd8] sm:$0xff] }
  0xf3   :  { %3577 = vmatmul.msk.f32.gmra.mxu0 %vm92_vm0, %v47_v15 }
  0xf4   :  { %v437_v19 = vpop.f32.mrf.mxu2 }
  0xf5   :  { %v4350_v57 = vadd.f32 %v4122_v36, %v437_v19 }
  0xf6   :  { %v344_v22 = vpop.f32.mrf.mxu0 }
  0xf7   :  { %v4319_v23 = vadd.f32 %v4122_v36, %v344_v22 }
  0xf8   :  { %625 = vadd.xlane.f32.xlu0 %v624_v20 }
  0xf9   :  { %v537_v25 = vsel %vm494_vm1, %v4319_v23, 0.0 }
  0xfa   :  { %538 = vadd.xlane.f32.xlu2 %v537_v25 }
  0xfc   :  { %v440_v30 = vpop.f32.mrf.mxu2 }
  0xfd   :  { %v497_v31 = vpop.xlane.xlu0 %496  ;;  %v4364_v8 = vadd.f32 %v4122_v36, %v440_v30  ;;  %v48_v30 = vld [vmem:[%s7150_s0 + $0xe0] sm:$0xff] }
  0xfe   :  { %v694_v32 = vmul.f32 %v4326_v29, %v497_v31  ;;  %v347_v34 = vpop.f32.mrf.mxu0  ;;  %3578 = vmatmul.msk.f32.gmra.mxu0 %vm92_vm0, %v48_v30 }
  0xff   :  { %v633_v19 = vsel %vm494_vm1, %v4364_v8, 0.0  ;;  %v4383_v25 = vadd.f32 %v4122_v36, %v347_v34 }
 0x100   :  { %v4332_v38 = vsub.f32 %v4131_v40, %v694_v32  ;;  %532 = vadd.xlane.f32.xlu0 %v531_v37 }
 0x102   :  { %v822_v41 = vmul.f32 %v4332_v38, %v4332_v38 }
 0x104   :  { %v886_v44 = vsel %vm494_vm1, %v822_v41, 0.0  ;;  %v443_v45 = vpop.f32.mrf.mxu2 }
 0x105   :  { %887 = vadd.xlane.f32.xlu2 %v886_v44  ;;  %v500_v47 = vpop.xlane.xlu0 %499 }
 0x106   :  { %v695_v51 = vmul.f32 %v4326_v29, %v500_v47  ;;  %v350_v53 = vpop.f32.mrf.mxu0 }
 0x107   :  { %v4344_v40 = vadd.f32 %v4122_v36, %v350_v53  ;;  %v4405_v53 = vadd.f32 %v4122_v36, %v443_v45 }
 0x108   :  { %v4347_v55 = vsub.f32 %v4146_v46, %v695_v51  ;;  %628 = vadd.xlane.f32.xlu0 %v627_v48  ;;  %v630_v46 = vsel %vm494_vm1, %v4350_v57, 0.0  ;;  %v540_v48 = vsel %vm494_vm1, %v4383_v25, 0.0 }
 0x109   :  { %v543_v59 = vsel %vm494_vm1, %v4344_v40, 0.0  ;;  %v636_v45 = vsel %vm494_vm1, %v4405_v53, 0.0 }
 0x10a   :  { %544 = vadd.xlane.f32.xlu1 %v543_v59  ;;  %v823_v61 = vmul.f32 %v4347_v55, %v4347_v55 }
 0x10b   :  { %v596_v62 = vpop.xlane.xlu1 %595 }
 0x10c   :  { %v889_v63 = vsel %vm494_vm1, %v823_v61, 0.0  ;;  %v446_v0 = vpop.f32.mrf.mxu2  ;;  %v727_v7 = vmul.f32 %v4326_v29, %v596_v62 }
 0x10d   :  { %890 = vadd.xlane.f32.xlu2 %v889_v63 }
 0x10e   :  { %v353_v1 = vpop.f32.mrf.mxu0  ;;  %v4372_v17 = vsub.f32 %v4153_v49, %v727_v7 }
 0x10f   :  { %v4360_v5 = vadd.f32 %v4122_v36, %v353_v1 }
 0x110   :  { %631 = vadd.xlane.f32.xlu0 %v630_v46  ;;  %v855_v24 = vmul.f32 %v4372_v17, %v4372_v17 }
 0x111   :  { %v546_v9 = vsel %vm494_vm1, %v4360_v5, 0.0 }
 0x112   :  { %v985_v32 = vsel %vm494_vm1, %v855_v24, 0.0 }
 0x113   :  { %v503_v12 = vpop.xlane.xlu1 %502 }
 0x114   :  { %v449_v18 = vpop.f32.mrf.mxu2  ;;  %v696_v22 = vmul.f32 %v4326_v29, %v503_v12 }
 0x115   :  { %547 = vadd.xlane.f32.xlu2 %v546_v9 }
 0x116   :  { %v4377_v20 = vpop.f32.mrf.mxu0  ;;  %v4389_v31 = vsub.f32 %v4164_v54, %v696_v22 }
 0x118   :  { %634 = vadd.xlane.f32.xlu0 %v633_v19  ;;  %v824_v51 = vmul.f32 %v4389_v31, %v4389_v31  ;;  %v4427_v19 = vadd.f32 %v4122_v36, %v446_v0 }
 0x11a   :  { %v892_v1 = vsel %vm494_vm1, %v824_v51, 0.0  ;;  %v4451_v51 = vadd.f32 %v4122_v36, %v449_v18 }
 0x11b   :  { %v599_v49 = vpop.xlane.xlu1 %598 }
 0x11c   :  { %v4392_v37 = vpop.f32.mrf.mxu2  ;;  %v728_v54 = vmul.f32 %v4326_v29, %v599_v49 }
 0x11d   :  { %v509_v41 = vpop.xlane.xlu2 %508  ;;  %986 = vadd.xlane.f32.xlu2 %v985_v32  ;;  %v75_v32 = vld [vmem:[%s7150_s0 + $0x1b8] sm:$0xff] }
 0x11e   :  { %v698_v44 = vmul.f32 %v4326_v29, %v509_v41  ;;  %v359_v34 = vpop.f32.mrf.mxu0  ;;  %v4413_v46 = vsub.f32 %v4179_v60, %v728_v54  ;;  %3605 = vmatmul.msk.f32.gmra.mxu2 %vm92_vm0, %v75_v32  ;;  %v49_v32 = vld [vmem:[%s7150_s0 + $0xe8] sm:$0xff] }
 0x11f   :  { %v4397_v47 = vadd.f32 %v4122_v36, %v359_v34  ;;  %3579 = vmatmul.msk.f32.gmra.mxu0 %vm92_vm0, %v49_v32 }
 0x120   :  { %541 = vadd.xlane.f32.xlu0 %v540_v48  ;;  %v4408_v59 = vsub.f32 %v4190_v2, %v698_v44  ;;  %v856_v60 = vmul.f32 %v4413_v46, %v4413_v46 }
 0x121   :  { %v552_v61 = vsel %vm494_vm1, %v4397_v47, 0.0 }
 0x122   :  { %553 = vadd.xlane.f32.xlu1 %v552_v61  ;;  %v826_v2 = vmul.f32 %v4408_v59, %v4408_v59  ;;  %v988_v44 = vsel %vm494_vm1, %v856_v60, 0.0 }
 0x123   :  { %v506_v62 = vpop.xlane.xlu1 %505  ;;  %v605_v63 = vpop.xlane.xlu0 %604 }
 0x124   :  { %v4421_v12 = vpop.f32.mrf.mxu2  ;;  %v697_v15 = vmul.f32 %v4326_v29, %v506_v62  ;;  %v898_v24 = vsel %vm494_vm1, %v826_v2, 0.0 }
 0x125   :  { %v512_v7 = vpop.xlane.xlu2 %511  ;;  %893 = vadd.xlane.f32.xlu2 %v892_v1 }
 0x126   :  { %v699_v9 = vmul.f32 %v4326_v29, %v512_v7  ;;  %v4433_v49 = vpop.f32.mrf.mxu0  ;;  %v4439_v41 = vsub.f32 %v4197_v4, %v697_v15  ;;  %v76_v7 = vld [vmem:[%s7150_s0 + $0x1c0] sm:$0xff]  ;;  %v642_v15 = vsel %vm494_vm1, %v4451_v51, 0.0 }
 0x127   :  { %3606 = vmatmul.msk.f32.gmra.mxu2 %vm92_vm0, %v76_v7 }
 0x128   :  { %637 = vadd.xlane.f32.xlu0 %v636_v45  ;;  %v4430_v22 = vsub.f32 %v4209_v10, %v699_v9  ;;  %v639_v10 = vsel %vm494_vm1, %v4427_v19, 0.0  ;;  %v825_v54 = vmul.f32 %v4439_v41, %v4439_v41 }
 0x12a   :  { %899 = vadd.xlane.f32.xlu1 %v898_v24  ;;  %v827_v34 = vmul.f32 %v4430_v22, %v4430_v22  ;;  %v895_v2 = vsel %vm494_vm1, %v825_v54, 0.0  ;;  %v730_v24 = vmul.f32 %v4326_v29, %v605_v63 }
 0x12b   :  { %v608_v30 = vpop.xlane.xlu0 %607  ;;  %v602_v0 = vpop.xlane.xlu1 %601 }
 0x12c   :  { %v729_v48 = vmul.f32 %v4326_v29, %v602_v0  ;;  %v458_v4 = vpop.f32.mrf.mxu2  ;;  %v901_v61 = vsel %vm494_vm1, %v827_v34, 0.0  ;;  %v4487_v34 = vsub.f32 %v4200_v6, %v730_v24 }
 0x12d   :  { %989 = vadd.xlane.f32.xlu2 %v988_v44  ;;  %v4455_v1 = vadd.f32 %v4122_v36, %v458_v4 }
 0x12e   :  { %v4461_v45 = vsub.f32 %v4220_v14, %v729_v48  ;;  %v4464_v9 = vpop.f32.mrf.mxu0  ;;  %v858_v6 = vmul.f32 %v4487_v34, %v4487_v34 }
 0x12f   :  { %v651_v60 = vsel %vm494_vm1, %v4455_v1, 0.0 }
 0x130   :  { %640 = vadd.xlane.f32.xlu0 %v639_v10  ;;  %v857_v14 = vmul.f32 %v4461_v45, %v4461_v45  ;;  %v4484_v10 = vadd.f32 %v4122_v36, %v4377_v20  ;;  %v731_v20 = vmul.f32 %v4326_v29, %v608_v30  ;;  %v4510_v30 = vadd.f32 %v4122_v36, %v4392_v37 }
 0x132   :  { %902 = vadd.xlane.f32.xlu1 %v901_v61  ;;  %v991_v48 = vsel %vm494_vm1, %v857_v14, 0.0  ;;  %v549_v61 = vsel %vm494_vm1, %v4484_v10, 0.0  ;;  %v4516_v24 = vsub.f32 %v4223_v16, %v731_v20  ;;  %v645_v37 = vsel %vm494_vm1, %v4510_v30, 0.0  ;;  %v51_v16 = vld [vmem:[%s7150_s0 + $0xf8] sm:$0xff] }
 0x133   :  { %v515_v62 = vpop.xlane.xlu0 %514 }
 0x134   :  { %v700_v18 = vmul.f32 %v4326_v29, %v515_v62  ;;  %v50_v62 = vld [vmem:[%s7150_s0 + $0xf0] sm:$0xff] }
 0x135   :  { %896 = vadd.xlane.f32.xlu2 %v895_v2  ;;  %v518_v0 = vpop.xlane.xlu1 %517  ;;  %3580 = vmatmul.msk.f32.gmra.mxu0 %vm92_vm0, %v50_v62  ;;  %v78_v62 = vld [vmem:[%s7150_s0 + $0x1d0] sm:$0xff] }
 0x136   :  { %v4479_v44 = vsub.f32 %v4233_v21, %v700_v18  ;;  %v701_v54 = vmul.f32 %v4326_v29, %v518_v0  ;;  %v4493_v4 = vpop.f32.mrf.mxu0  ;;  %v859_v0 = vmul.f32 %v4516_v24, %v4516_v24 }
 0x138   :  { %643 = vadd.xlane.f32.xlu0 %v642_v15  ;;  %v828_v21 = vmul.f32 %v4479_v44, %v4479_v44  ;;  %v4504_v7 = vsub.f32 %v4242_v26, %v701_v54  ;;  %v994_v26 = vsel %vm494_vm1, %v858_v6, 0.0  ;;  %v461_v6 = vpop.f32.mrf.mxu2 }
 0x13a   :  { %652 = vadd.xlane.f32.xlu1 %v651_v60  ;;  %v904_v2 = vsel %vm494_vm1, %v828_v21, 0.0  ;;  %v77_v60 = vld [vmem:[%s7150_s0 + $0x1c8] sm:$0xff]  ;;  %v829_v32 = vmul.f32 %v4504_v7, %v4504_v7 }
 0x13b   :  { %v611_v63 = vpop.xlane.xlu0 %610  ;;  %3607 = vmatmul.msk.f32.gmra.mxu2 %vm92_vm0, %v77_v60 }
 0x13c   :  { %v907_v21 = vsel %vm494_vm1, %v829_v32, 0.0  ;;  %v732_v60 = vmul.f32 %v4326_v29, %v611_v63 }
 0x13d   :  { %992 = vadd.xlane.f32.xlu2 %v991_v48  ;;  %v521_v18 = vpop.xlane.xlu2 %520  ;;  %3581 = vmatmul.msk.f32.gmra.mxu0 %vm92_vm0, %v51_v16 }
 0x13e   :  { %v702_v14 = vmul.f32 %v4326_v29, %v521_v18  ;;  %v371_v48 = vpop.f32.mrf.mxu0  ;;  %v4549_v18 = vadd.f32 %v4122_v36, %v461_v6  ;;  %v4565_v63 = vsub.f32 %v4247_v28, %v732_v60 }
 0x140   :  { %550 = vadd.xlane.f32.xlu0 %v549_v61  ;;  %v4531_v54 = vsub.f32 %v4256_v33, %v702_v14  ;;  %v4537_v61 = vadd.f32 %v4122_v36, %v4421_v12  ;;  %v654_v14 = vsel %vm494_vm1, %v4549_v18, 0.0  ;;  %7201 = vst [vmem:[#allocation3_spill] sm:$0xff] %v4565_v63  ;;  %v860_v28 = vmul.f32 %v4565_v63, %v4565_v63 }
 0x142   :  { %905 = vadd.xlane.f32.xlu1 %v904_v2  ;;  %7200 = vst [vmem:[#allocation2_spill] sm:$0xff] %v4531_v54  ;;  %v997_v2 = vsel %vm494_vm1, %v859_v0, 0.0  ;;  %v830_v33 = vmul.f32 %v4531_v54, %v4531_v54  ;;  %v648_v12 = vsel %vm494_vm1, %v4537_v61, 0.0 }
 0x143   :  { %v614_v15 = vpop.xlane.xlu0 %613  ;;  %3608 = vmatmul.msk.f32.gmra.mxu2 %vm92_vm0, %v78_v62 }
 0x145   :  { %995 = vadd.xlane.f32.xlu2 %v994_v26  ;;  %v910_v26 = vsel %vm494_vm1, %v830_v33, 0.0 }
 0x146   :  { %v374_v32 = vpop.f32.mrf.mxu0 }
 0x148   :  { %646 = vadd.xlane.f32.xlu0 %v645_v37  ;;  %v4559_v37 = vadd.f32 %v4122_v36, %v4433_v49 }
 0x14a   :  { %908 = vadd.xlane.f32.xlu1 %v907_v21  ;;  %v79_v21 = vld [vmem:[%s7150_s0 + $0x1d8] sm:$0xff]  ;;  %v555_v49 = vsel %vm494_vm1, %v4559_v37, 0.0 }
 0x14b   :  { %v4539_v20 = vpop.xlane.xlu0 %616  ;;  %3609 = vmatmul.msk.f32.gmra.mxu2 %vm92_vm0, %v79_v21 }
 0x14d   :  { %998 = vadd.xlane.f32.xlu2 %v997_v2  ;;  %v527_v0 = vpop.xlane.xlu1 %526 }
 0x14e   :  { %v704_v62 = vmul.f32 %v4326_v29, %v527_v0  ;;  %v80_v0 = vld [vmem:[%s7150_s0 + $0x1e0] sm:$0xff]  ;;  %v377_v21 = vpop.f32.mrf.mxu0 }
 0x150   :  { %649 = vadd.xlane.f32.xlu0 %v648_v12  ;;  %v4580_v12 = vsub.f32 %v4279_v50, %v704_v62  ;;  %v4595_v50 = vadd.f32 %v4122_v36, %v371_v48 }
 0x152   :  { %911 = vadd.xlane.f32.xlu1 %v910_v26  ;;  %7203 = vst [vmem:[#allocation5_spill] sm:$0xff] %v4580_v12  ;;  %v4585_v26 = vadd.f32 %v4122_v36, %v4464_v9  ;;  %v564_v48 = vsel %vm494_vm1, %v4595_v50, 0.0 }
 0x153   :  { %v524_v16 = vpop.xlane.xlu0 %523  ;;  %3610 = vmatmul.msk.f32.gmra.mxu2 %vm92_vm0, %v80_v0 }
 0x154   :  { %v703_v6 = vmul.f32 %v4326_v29, %v524_v16  ;;  %v1000_v16 = vsel %vm494_vm1, %v860_v28, 0.0  ;;  %v558_v62 = vsel %vm494_vm1, %v4585_v26, 0.0 }
 0x155   :  { %655 = vadd.xlane.f32.xlu2 %v654_v14 }
 0x156   :  { %v4571_v2 = vsub.f32 %v4285_v52, %v703_v6  ;;  %v530_v52 = vpop.xlane.xlu2 %529  ;;  %v832_v6 = vmul.f32 %v4580_v12, %v4580_v12 }
 0x157   :  { %v705_v9 = vmul.f32 %v4326_v29, %v530_v52 }
 0x158   :  { %7202 = vst [vmem:[#allocation4_spill] sm:$0xff] %v4571_v2  ;;  %556 = vadd.xlane.f32.xlu0 %v555_v49  ;;  %v831_v33 = vmul.f32 %v4571_v2, %v4571_v2  ;;  %v733_v49 = vmul.f32 %v4326_v29, %v614_v15  ;;  %v916_v28 = vsel %vm494_vm1, %v832_v6, 0.0  ;;  %v81_v15 = vld [vmem:[%s7150_s0 + $0x1e8] sm:$0xff] }
 0x15a   :  { %v913_v60 = vsel %vm494_vm1, %v831_v33, 0.0  ;;  %v4604_v33 = vsub.f32 %v4288_v56, %v705_v9  ;;  %v4619_v0 = vsub.f32 %v4261_v35, %v733_v49  ;;  %v82_v49 = vld [vmem:[%s7150_s0 + $0x1f0] sm:$0xff] }
 0x15b   :  { %914 = vadd.xlane.f32.xlu1 %v913_v60  ;;  %v4587_v14 = vpop.xlane.xlu0 %619  ;;  %v4611_v60 = vadd.f32 %v4122_v36, %v4493_v4  ;;  %3611 = vmatmul.msk.f32.gmra.mxu2 %vm92_vm0, %v81_v15  ;;  %v4642_v15 = vadd.f32 %v4122_v36, %v374_v32 }
 0x15c   :  { %7204 = vst [vmem:[#allocation6_spill] sm:$0xff] %v4604_v33  ;;  %v833_v56 = vmul.f32 %v4604_v33, %v4604_v33  ;;  %v861_v9 = vmul.f32 %v4619_v0, %v4619_v0 }
 0x15d   :  { %1001 = vadd.xlane.f32.xlu2 %v1000_v16  ;;  %7205 = vst [vmem:[#allocation7_spill] sm:$0xff] %v4619_v0  ;;  %v380_v16 = vpop.f32.mrf.mxu0  ;;  %v561_v4 = vsel %vm494_vm1, %v4611_v60, 0.0 }
 0x15e   :  { %v4629_v6 = vadd.f32 %v4122_v36, %v380_v16  ;;  %v919_v35 = vsel %vm494_vm1, %v833_v56, 0.0  ;;  %v734_v56 = vmul.f32 %v4326_v29, %v4539_v20 }
 0x160   :  { %559 = vadd.xlane.f32.xlu0 %v558_v62 }
 0x163   :  { %917 = vadd.xlane.f32.xlu1 %v916_v28  ;;  %v4613_v52 = vpop.xlane.xlu0 %622  ;;  %v1003_v28 = vsel %vm494_vm1, %v861_v9, 0.0  ;;  %3612 = vmatmul.msk.f32.gmra.mxu2 %vm92_vm0, %v82_v49  ;;  %v83_v9 = vld [vmem:[%s7150_s0 + $0x1f8] sm:$0xff]  ;;  %v4652_v49 = vsub.f32 %v4270_v43, %v734_v56 }
 0x165   :  { %565 = vadd.xlane.f32.xlu2 %v564_v48  ;;  %v573_v48 = vsel %vm494_vm1, %v4629_v6, 0.0  ;;  %7206 = vst [vmem:[#allocation8_spill] sm:$0xff] %v4652_v49  ;;  %v862_v12 = vmul.f32 %v4652_v49, %v4652_v49 }
 0x168   :  { %562 = vadd.xlane.f32.xlu0 %v561_v4  ;;  %v567_v4 = vsel %vm494_vm1, %v4642_v15, 0.0 }
 0x16b   :  { %920 = vadd.xlane.f32.xlu1 %v919_v35  ;;  %v4632_v62 = vpop.xlane.xlu0 %625  ;;  %v536_v35 = vpop.xlane.xlu1 %535  ;;  %3613 = vmatmul.msk.f32.gmra.mxu2 %vm92_vm0, %v83_v9 }
 0x16c   :  { %v707_v20 = vmul.f32 %v4326_v29, %v536_v35 }
 0x16d   :  { %1004 = vadd.xlane.f32.xlu2 %v1003_v28  ;;  %v539_v16 = vpop.xlane.xlu2 %538 }
 0x16e   :  { %v4667_v43 = vsub.f32 %v4305_v11, %v707_v20  ;;  %v708_v35 = vmul.f32 %v4326_v29, %v539_v16  ;;  %v735_v11 = vmul.f32 %v4326_v29, %v4587_v14 }
 0x170   :  { %574 = vadd.xlane.f32.xlu0 %v573_v48  ;;  %7208 = vst [vmem:[#allocation10_spill] sm:$0xff] %v4667_v43  ;;  %v835_v9 = vmul.f32 %v4667_v43, %v4667_v43  ;;  %v4691_v16 = vsub.f32 %v4319_v23, %v708_v35  ;;  %v2998_v23 = vld [vmem:[%s7152_s3] sm:$0xff] }
 0x172   :  { %7209 = vst [vmem:[#allocation11_spill] sm:$0xff] %v4691_v16 }
 0x173   :  { %v533_v33 = vpop.xlane.xlu0 %532 }
 0x174   :  { %v706_v32 = vmul.f32 %v4326_v29, %v533_v33 }
 0x175   :  { %568 = vadd.xlane.f32.xlu2 %v567_v4  ;;  %v4675_v4 = vadd.f32 %v4122_v36, %v377_v21  ;;  %v2999_v21 = vld [vmem:[%s7152_s3 + $0x8] sm:$0xff] }
 0x176   :  { %v4658_v28 = vsub.f32 %v4324_v27, %v706_v32  ;;  %v1006_v27 = vsel %vm494_vm1, %v862_v12, 0.0 }
 0x178   :  { %7207 = vst [vmem:[#allocation9_spill] sm:$0xff] %v4658_v28  ;;  %v888_v48 = vpop.xlane.xlu2 %887  ;;  %v834_v0 = vmul.f32 %v4658_v28, %v4658_v28 }
 0x179   :  { %v4664_v2 = vmul.f32 0.05263158, %v888_v48  ;;  %v925_v48 = vsel %vm494_vm1, %v835_v9, 0.0 }
 0x17a   :  { %v922_v33 = vsel %vm494_vm1, %v834_v0, 0.0  ;;  %v3000_v0 = vld [vmem:[%s7152_s3 + $0x10] sm:$0xf] }
 0x17b   :  { %3690 = vrsqrt.f32 %v4664_v2  ;;  %923 = vadd.xlane.f32.xlu1 %v922_v33  ;;  %v4671_v56 = vpop.xlane.xlu0 %628  ;;  %3614 = vmatpush.msk.msra.mxu1 %vm3193_vm3, %v3000_v0  ;;  %v570_v33 = vsel %vm494_vm1, %v4675_v4, 0.0  ;;  %vm1149_vm4 = vcmp.eq.f32.partialorder %v4664_v2, inf  ;;  %vm1151_vm5 = vcmp.eq.f32.partialorder %v4664_v2, 0.0 }
 0x17c   :  { %3683 = vmatpush.msk.msra.mxu3 %vm3193_vm3, %v3000_v0 }
 0x17d   :  { %1007 = vadd.xlane.f32.xlu2 %v1006_v27  ;;  %3211 = vmatpush.msra.mxu1 %v2999_v21  ;;  %v4698_v27 = vsub.f32 %v4293_v58, %v735_v11  ;;  %v736_v11 = vmul.f32 %v4326_v29, %v4613_v52 }
 0x17e   :  { %3684 = vmatpush.msra.mxu3 %v2999_v21 }
 0x17f   :  { %7210 = vst [vmem:[#allocation12_spill] sm:$0xff] %v4698_v27  ;;  %3212 = vmatpush.msra.mxu1 %v2998_v23  ;;  %v863_v58 = vmul.f32 %v4698_v27, %v4698_v27 }
 0x180   :  { %v891_v32 = vpop.xlane.xlu2 %890  ;;  %3685 = vmatpush.msra.mxu3 %v2998_v23 }
 0x181   :  { %v3691_v12 = vpop.eup %3690  ;;  %v4685_v20 = vmul.f32 0.05263158, %v891_v32  ;;  %v836_v32 = vmul.f32 %v4691_v16, %v4691_v16  ;;  %v1009_v23 = vsel %vm494_vm1, %v863_v58, 0.0 }
 0x182   :  { %v1143_v14 = vmul.f32 %v3691_v12, %v4664_v2 }
 0x183   :  { %3692 = vrsqrt.f32 %v4685_v20  ;;  %926 = vadd.xlane.f32.xlu1 %v925_v48  ;;  %v632_v0 = vpop.xlane.xlu0 %631  ;;  %vm1161_vm6 = vcmp.eq.f32.partialorder %v4685_v20, inf  ;;  %vm1163_vm7 = vcmp.eq.f32.partialorder %v4685_v20, 0.0 }
 0x184   :  { %v1144_v35 = vmul.f32 %v3691_v12, %v1143_v14  ;;  %v928_v14 = vsel %vm494_vm1, %v836_v32, 0.0 }
 0x185   :  { %571 = vadd.xlane.f32.xlu2 %v570_v33 }
 0x186   :  { %v1145_v9 = vmul.f32 0.5, %v1144_v35  ;;  %v4714_v35 = vsub.f32 %v4300_v3, %v736_v11  ;;  %v737_v3 = vmul.f32 %v4326_v29, %v4632_v62 }
 0x188   :  { %v1146_v21 = vsub.f32 1.5, %v1145_v9  ;;  %v548_v48 = vpop.xlane.xlu2 %547  ;;  %7211 = vst [vmem:[#allocation13_spill] sm:$0xff] %v4714_v35  ;;  %v545_v9 = vpop.xlane.xlu1 %544 }
 0x189   :  { %v3693_v43 = vpop.eup %3692 }
 0x18a   :  { %v1147_v49 = vmul.f32 %v3691_v12, %v1146_v21  ;;  %v1155_v28 = vmul.f32 %v3693_v43, %v4685_v20  ;;  %v1152_v12 = vand.u32 2147483648, %v4664_v2 }
 0x18b   :  { %929 = vadd.xlane.f32.xlu1 %v928_v14  ;;  %v635_v33 = vpop.xlane.xlu0 %634 }
 0x18c   :  { %v1148_v27 = vmul.f32 %v1147_v49, %v4664_v2  ;;  %v1156_v16 = vmul.f32 %v3693_v43, %v1155_v28  ;;  %v740_v52 = vmul.f32 %v4326_v29, %v635_v33  ;;  %v864_v33 = vmul.f32 %v4714_v35, %v4714_v35 }
 0x18d   :  { %1010 = vadd.xlane.f32.xlu2 %v1009_v23  ;;  %v464_v23 = vpop.f32.mrf.mxu2 }
 0x18e   :  { %v1157_v21 = vmul.f32 0.5, %v1156_v16  ;;  %v4721_v32 = vsub.f32 %v4364_v8, %v740_v52  ;;  %v1150_v58 = vsel %vm1149_vm4, %v4664_v2, %v1148_v27  ;;  %v738_v8 = vmul.f32 %v4326_v29, %v4671_v56 }
 0x18f   :  { %v1153_v49 = vsel %vm1151_vm5, %v1152_v12, %v1150_v58  ;;  %v710_v27 = vmul.f32 %v4326_v29, %v545_v9  ;;  %v739_v52 = vmul.f32 %v4326_v29, %v632_v0 }
 0x190   :  { %7212 = vst [vmem:[#allocation14_spill] sm:$0xff] %v4721_v32  ;;  %v1158_v28 = vsub.f32 1.5, %v1157_v21  ;;  %v987_v11 = vpop.xlane.xlu2 %986  ;;  %v868_v14 = vmul.f32 %v4721_v32, %v4721_v32  ;;  %v4731_v16 = vadd.f32 1e-06, %v1153_v49  ;;  %v4742_v21 = vsub.f32 %v4308_v13, %v737_v3 }
 0x191   :  { %v4736_v2 = vmul.f32 0.05263158, %v987_v11  ;;  %v1012_v49 = vsel %vm494_vm1, %v864_v33, 0.0  ;;  %v4752_v0 = vsub.f32 %v4335_v39, %v738_v8  ;;  %v1164_v3 = vand.u32 2147483648, %v4685_v20 }
 0x192   :  { %v1159_v62 = vmul.f32 %v3693_v43, %v1158_v28  ;;  %v1024_v12 = vsel %vm494_vm1, %v868_v14, 0.0  ;;  %3694 = vrcp.f32 %v4731_v16  ;;  %7213 = vst [vmem:[#allocation15_spill] sm:$0xff] %v4742_v21  ;;  %v4749_v43 = vadd.f32 %v4122_v36, %v464_v23 }
 0x193   :  { %3696 = vrsqrt.f32 %v4736_v2  ;;  %1025 = vadd.xlane.f32.xlu0 %v1024_v12  ;;  %v542_v58 = vpop.xlane.xlu0 %541  ;;  %7215 = vst [vmem:[#allocation17_spill] sm:$0xff] %v4752_v0  ;;  %v4755_v28 = vsub.f32 %v4344_v40, %v710_v27  ;;  %v4762_v11 = vsub.f32 %v4350_v57, %v739_v52  ;;  %v711_v39 = vmul.f32 %v4326_v29, %v548_v48 }
 0x194   :  { %v1160_v56 = vmul.f32 %v1159_v62, %v4685_v20  ;;  %v709_v9 = vmul.f32 %v4326_v29, %v542_v58  ;;  %7214 = vst [vmem:[#allocation16_spill] sm:$0xff] %v4749_v43  ;;  %v865_v40 = vmul.f32 %v4742_v21, %v4742_v21  ;;  %v4774_v23 = vadd.f32 %v4122_v36, %v4137_v42 }
 0x195   :  { %7216 = vst [vmem:[#allocation18_spill] sm:$0xff] %v4755_v28  ;;  %v4757_v13 = vpop.xlane.xlu1 %553  ;;  %1013 = vadd.xlane.f32.xlu2 %v1012_v49  ;;  %v866_v58 = vmul.f32 %v4752_v0, %v4752_v0  ;;  %v838_v36 = vmul.f32 %v4755_v28, %v4755_v28  ;;  %v4795_v49 = vsub.f32 %v4360_v5, %v711_v39  ;;  %v1983_v28 = vand.u32 2147483647, %v4731_v16 }
 0x196   :  { %7217 = vst [vmem:[#allocation19_spill] sm:$0xff] %v4762_v11  ;;  %v4765_v14 = vsub.f32 %v4383_v25, %v709_v9  ;;  %v1162_v33 = vsel %vm1161_vm6, %v4685_v20, %v1160_v56  ;;  %v657_v25 = vsel %vm494_vm1, %v4749_v43, 0.0  ;;  %v867_v9 = vmul.f32 %v4762_v11, %v4762_v11 }
 0x197   :  { %v1165_v8 = vsel %vm1163_vm7, %v1164_v3, %v1162_v33  ;;  %7219 = vst [vmem:[#allocation21_spill] sm:$0xff] %v4774_v23  ;;  %v1015_v33 = vsel %vm494_vm1, %v865_v40, 0.0  ;;  %v1985_v11 = vand.u32 2147483648, %v4731_v16  ;;  %v1018_v39 = vsel %vm494_vm1, %v866_v58, 0.0 }
 0x198   :  { %7218 = vst [vmem:[#allocation20_spill] sm:$0xff] %v4765_v14  ;;  %v3695_v27 = vpop.eup %3694  ;;  %v894_v57 = vpop.xlane.xlu2 %893  ;;  %v837_v62 = vmul.f32 %v4765_v14, %v4765_v14  ;;  %v4780_v52 = vadd.f32 1e-06, %v1165_v8  ;;  %vm1979_vm9 = vweird.f32 %v4731_v16  ;;  %vm1545_vm10 = vcmp.eq.f32.partialorder %v4736_v2, inf }
 0x199   :  { %v3697_v20 = vpop.eup %3696  ;;  %v4782_v48 = vmul.f32 0.05263158, %v894_v57  ;;  %v1975_v12 = vmul.f32 %v3695_v27, %v4731_v16  ;;  %7220 = vst [vmem:[#allocation22_spill] sm:$0xff] %v4795_v49  ;;  %v4799_v57 = vpop.f32.mrf.mxu0  ;;  %vm1980_vm8 = vweird.f32 %v3695_v27  ;;  %vm1984_vm12 = vcmp.eq.f32.partialorder %v1983_v28, 8.507059e+37 }
 0x19a   :  { %v1539_v42 = vmul.f32 %v3697_v20, %v4736_v2  ;;  %v931_v56 = vsel %vm494_vm1, %v837_v62, 0.0  ;;  %3698 = vrcp.f32 %v4780_v52  ;;  %vm1981_vm11 = vmor %vm1979_vm9, %vm1980_vm8  ;;  %vm1547_vm14 = vcmp.eq.f32.partialorder %v4736_v2, 0.0 }
 0x19b   :  { %3700 = vrsqrt.f32 %v4782_v48  ;;  %658 = vadd.xlane.f32.xlu0 %v657_v25  ;;  %932 = vadd.xlane.f32.xlu1 %v931_v56  ;;  %v638_v3 = vpop.xlane.xlu0 %637  ;;  %v1976_v8 = vsub.f32 1.0, %v1975_v12  ;;  %v4806_v25 = vsel %vm494_vm1, %v838_v36, 0.0  ;;  %v4814_v56 = vsel %vm494_vm1, %v867_v9, 0.0 }
 0x19c   :  { %v1540_v32 = vmul.f32 %v3697_v20, %v1539_v42  ;;  %v741_v62 = vmul.f32 %v4326_v29, %v638_v3  ;;  %vm1994_vm15 = vweird.f32 %v4780_v52  ;;  %vm1173_vm3 = vcmp.eq.f32.partialorder %v4782_v48, inf }
 0x19d   :  { %v900_v0 = vpop.xlane.xlu1 %899  ;;  %1016 = vadd.xlane.f32.xlu2 %v1015_v33  ;;  %v1977_v5 = vmul.f32 %v3695_v27, %v1976_v8  ;;  %v4819_v33 = vmul.f32 %v4795_v49, %v4795_v49  ;;  %vm1175_vm4 = vcmp.eq.f32.partialorder %v4782_v48, 0.0 }
 0x19e   :  { %v1541_v40 = vmul.f32 0.5, %v1540_v32  ;;  %v4809_v12 = vsub.f32 %v4405_v53, %v741_v62  ;;  %v4811_v42 = vmul.f32 0.05263158, %v900_v0  ;;  %v1986_v0 = vor.u32 1.1754944e-38, %v1985_v11 }
 0x19f   :  { %v1978_v3 = vadd.f32 %v3695_v27, %v1977_v5 }
 0x1a0   :  { %7221 = vst [vmem:[#allocation23_spill] sm:$0xff] %v4809_v12  ;;  %v3699_v58 = vpop.eup %3698  ;;  %v1542_v36 = vsub.f32 1.5, %v1541_v40  ;;  %v990_v32 = vpop.xlane.xlu2 %989  ;;  %v869_v53 = vmul.f32 %v4809_v12, %v4809_v12  ;;  %3702 = vrsqrt.f32 %v4811_v42  ;;  %v713_v12 = vmul.f32 %v4326_v29, %v4757_v13 }
 0x1a1   :  { %v3701_v9 = vpop.eup %3700  ;;  %v4826_v16 = vmul.f32 0.05263158, %v990_v32  ;;  %v1982_v8 = vsel %vm1981_vm11, %v3695_v27, %v1978_v3  ;;  %v1990_v62 = vmul.f32 %v3699_v58, %v4780_v52  ;;  %vm1995_vm13 = vweird.f32 %v3699_v58 }
 0x1a2   :  { %v1543_v5 = vmul.f32 %v3697_v20, %v1542_v36  ;;  %v1167_v49 = vmul.f32 %v3701_v9, %v4782_v48  ;;  %v1027_v40 = vsel %vm494_vm1, %v869_v53, 0.0  ;;  %v1987_v21 = vsel %vm1984_vm12, %v1986_v0, %v1982_v8  ;;  %vm1996_vm0 = vmor %vm1994_vm15, %vm1995_vm13 }
 0x1a3   :  { %3704 = vrsqrt.f32 %v4826_v16  ;;  %1028 = vadd.xlane.f32.xlu1 %v1027_v40  ;;  %v641_v28 = vpop.xlane.xlu0 %640  ;;  %v2934_v11 = vmul.f32 %v1987_v21, %v4332_v38  ;;  %v1991_v32 = vsub.f32 1.0, %v1990_v62  ;;  %v2000_v20 = vand.u32 2147483648, %v4780_v52  ;;  %v386_v40 = vpop.f32.mrf.mxu0 }
 0x1a4   :  { %v1544_v27 = vmul.f32 %v1543_v5, %v4736_v2  ;;  %v1168_v3 = vmul.f32 %v3701_v9, %v1167_v49  ;;  %v1548_v36 = vand.u32 2147483648, %v4736_v2  ;;  %v742_v53 = vmul.f32 %v4326_v29, %v641_v28 }
 0x1a5   :  { %v903_v0 = vpop.xlane.xlu1 %902  ;;  %3615 = vmatmul.msk.f32.vlgmr.msra.gmra.mxu1 %vm494_vm1, %v2934_v11  ;;  %1019 = vadd.xlane.f32.xlu2 %v1018_v39  ;;  %v1992_v13 = vmul.f32 %v3699_v58, %v1991_v32  ;;  %v1998_v8 = vand.u32 2147483647, %v4780_v52  ;;  %v4850_v5 = vsub.f32 %v4397_v47, %v713_v12  ;;  %vm1557_vm5 = vcmp.eq.f32.partialorder %v4826_v16, inf }
 0x1a6   :  { %v1169_v38 = vmul.f32 0.5, %v1168_v3  ;;  %v4841_v21 = vmul.f32 0.05263158, %v903_v0  ;;  %v1546_v49 = vsel %vm1545_vm10, %v4736_v2, %v1544_v27  ;;  %v4847_v62 = vpop.eup %3702  ;;  %v2001_v3 = vor.u32 1.1754944e-38, %v2000_v20  ;;  %v4856_v0 = vld [vmem:[%s7151_s2] ss:$0 sm:$0xff] }
 0x1a7   :  { %7222 = vst [vmem:[#allocation24_spill] sm:$0xff] %v4850_v5  ;;  %v1993_v39 = vadd.f32 %v3699_v58, %v1992_v13  ;;  %v1549_v28 = vsel %vm1547_vm14, %v1548_v36, %v1546_v49  ;;  %v4859_v2 = vadd.f32 %v4856_v0, %v386_v40  ;;  %v4864_v12 = vsub.f32 %v4427_v19, %v742_v53 }
 0x1a8   :  { %v1170_v11 = vsub.f32 1.5, %v1169_v38  ;;  %v897_v32 = vpop.xlane.xlu2 %896  ;;  %v4861_v27 = vadd.f32 1e-06, %v1549_v28  ;;  %vm1999_vm2 = vcmp.eq.f32.partialorder %v1998_v8, 8.507059e+37  ;;  %3706 = vrsqrt.f32 %v4841_v21 }
 0x1a9   :  { %7223 = vst [vmem:[#allocation25_spill] sm:$0xff] %v4859_v2  ;;  %v3705_v47 = vpop.eup %3704  ;;  %v4866_v52 = vmul.f32 0.05263158, %v897_v32  ;;  %v1997_v36 = vsel %vm1996_vm0, %v3699_v58, %v1993_v39  ;;  %v1191_v40 = vmul.f32 %v4847_v62, %v4811_v42  ;;  %v841_v58 = vmul.f32 %v4850_v5, %v4850_v5 }
 0x1aa   :  { %7224 = vst [vmem:[#allocation26_spill] sm:$0xff] %v4864_v12  ;;  %v1171_v13 = vmul.f32 %v3701_v9, %v1170_v11  ;;  %v1551_v20 = vmul.f32 %v3705_v47, %v4826_v16  ;;  %v2002_v38 = vsel %vm1999_vm2, %v2001_v3, %v1997_v36  ;;  %v4890_v28 = vsel %vm494_vm1, %v4774_v23, 0.0 }
 0x1ab   :  { %3708 = vrsqrt.f32 %v4866_v52  ;;  %935 = vadd.xlane.f32.xlu1 %v4806_v25  ;;  %v644_v49 = vpop.xlane.xlu0 %643  ;;  %v2935_v19 = vmul.f32 %v2002_v38, %v4347_v55  ;;  %v937_v25 = vsel %vm494_vm1, %v4819_v33, 0.0  ;;  %v1176_v55 = vand.u32 2147483648, %v4782_v48 }
 0x1ac   :  { %v1172_v9 = vmul.f32 %v1171_v13, %v4782_v48  ;;  %v1552_v53 = vmul.f32 %v3705_v47, %v1551_v20  ;;  %v743_v8 = vmul.f32 %v4326_v29, %v644_v49  ;;  %3710 = vrcp.f32 %v4861_v27 }
 0x1ad   :  { %v4880_v39 = vpop.xlane.xlu1 %652  ;;  %3616 = vmatmul.msk.f32.gmra.mxu1 %vm494_vm1, %v2935_v19  ;;  %1022 = vadd.xlane.f32.xlu2 %v4814_v56  ;;  %v870_v3 = vmul.f32 %v4864_v12, %v4864_v12  ;;  %v1192_v36 = vmul.f32 %v4847_v62, %v1191_v40  ;;  %v4901_v33 = vsel %vm494_vm1, %v4859_v2, 0.0  ;;  %v4904_v13 = vsel %vm494_vm1, %v841_v58, 0.0 }
 0x1ae   :  { %v1553_v11 = vmul.f32 0.5, %v1552_v53  ;;  %v4893_v32 = vsub.f32 %v4451_v51, %v743_v8  ;;  %v1174_v56 = vsel %vm1173_vm3, %v4782_v48, %v1172_v9  ;;  %v4907_v20 = vpop.eup %3706  ;;  %v4916_v53 = vadd.f32 %v4856_v0, %v4799_v57 }
 0x1af   :  { %v1177_v19 = vsel %vm1175_vm4, %v1176_v55, %v1174_v56  ;;  %vm1559_vm6 = vcmp.eq.f32.partialorder %v4826_v16, 0.0  ;;  %v1030_v55 = vsel %vm494_vm1, %v870_v3, 0.0  ;;  %v1193_v56 = vmul.f32 0.5, %v1192_v36 }
 0x1b0   :  { %7225 = vst [vmem:[#allocation27_spill] sm:$0xff] %v4893_v32  ;;  %v1554_v51 = vsub.f32 1.5, %v1553_v11  ;;  %v993_v38 = vpop.xlane.xlu2 %992  ;;  %v871_v49 = vmul.f32 %v4893_v32, %v4893_v32  ;;  %v4918_v58 = vadd.f32 1e-06, %v1177_v19  ;;  %vm2474_vm7 = vweird.f32 %v4861_v27 }
 0x1b1   :  { %v3709_v40 = vpop.eup %3708  ;;  %v4912_v9 = vmul.f32 0.05263158, %v993_v38  ;;  %7226 = vst [vmem:[#allocation28_spill] sm:$0xff] %v4916_v53  ;;  %v1203_v38 = vmul.f32 %v4907_v20, %v4841_v21  ;;  %v2478_v36 = vand.u32 2147483647, %v4861_v27  ;;  %v746_v2 = vmul.f32 %v4326_v29, %v4880_v39 }
 0x1b2   :  { %v3711_v48 = vpop.eup %3710  ;;  %v1555_v8 = vmul.f32 %v3705_v47, %v1554_v51  ;;  %v1179_v11 = vmul.f32 %v3709_v40, %v4866_v52  ;;  %v1033_v32 = vsel %vm494_vm1, %v871_v49, 0.0  ;;  %vm1185_vm12 = vcmp.eq.f32.partialorder %v4866_v52, inf }
 0x1b3   :  { %3712 = vrsqrt.f32 %v4912_v9  ;;  %938 = vadd.xlane.f32.xlu1 %v937_v25  ;;  %1034 = vadd.xlane.f32.xlu0 %v1033_v32  ;;  %v551_v57 = vpop.xlane.xlu0 %550  ;;  %v2470_v19 = vmul.f32 %v3711_v48, %v4861_v27  ;;  %v1560_v25 = vand.u32 2147483648, %v4826_v16  ;;  %vm2475_vm8 = vweird.f32 %v3711_v48 }
 0x1b4   :  { %v1556_v23 = vmul.f32 %v1555_v8, %v4826_v16  ;;  %v1180_v47 = vmul.f32 %v3709_v40, %v1179_v11  ;;  %v712_v51 = vmul.f32 %v4326_v29, %v551_v57  ;;  %3714 = vrcp.f32 %v4918_v58  ;;  %vm2476_vm10 = vmor %vm2474_vm7, %vm2475_vm8 }
 0x1b5   :  { %v906_v49 = vpop.xlane.xlu1 %905  ;;  %1031 = vadd.xlane.f32.xlu2 %v1030_v55  ;;  %v2471_v3 = vsub.f32 1.0, %v2470_v19  ;;  %v2480_v8 = vand.u32 2147483648, %v4861_v27  ;;  %v1194_v11 = vsub.f32 1.5, %v1193_v56  ;;  %v1204_v19 = vmul.f32 %v4907_v20, %v1203_v38 }
 0x1b6   :  { %v1181_v32 = vmul.f32 0.5, %v1180_v47  ;;  %v4935_v12 = vsub.f32 %v4484_v10, %v712_v51  ;;  %v4937_v5 = vmul.f32 0.05263158, %v906_v49  ;;  %v1558_v55 = vsel %vm1557_vm5, %v4826_v16, %v1556_v23 }
 0x1b7   :  { %v2472_v57 = vmul.f32 %v3711_v48, %v2471_v3  ;;  %vm4951_vm9 = vcmp.eq.f32.partialorder %v2478_v36, 8.507059e+37  ;;  %v1561_v23 = vsel %vm1559_vm6, %v1560_v25, %v1558_v55  ;;  %v1205_v55 = vmul.f32 0.5, %v1204_v19 }
 0x1b8   :  { %7227 = vst [vmem:[#allocation29_spill] sm:$0xff] %v4935_v12  ;;  %v1182_v14 = vsub.f32 1.5, %v1181_v32  ;;  %3716 = vrsqrt.f32 %v4937_v5  ;;  %v996_v47 = vpop.xlane.xlu2 %995  ;;  %v840_v10 = vmul.f32 %v4935_v12, %v4935_v12  ;;  %v4963_v12 = vadd.f32 1e-06, %v1561_v23 }
 0x1b9   :  { %v4947_v51 = vpop.eup %3712  ;;  %v4949_v49 = vmul.f32 0.05263158, %v996_v47  ;;  %v2473_v56 = vadd.f32 %v3711_v48, %v2472_v57  ;;  %v2481_v47 = vor.u32 1.1754944e-38, %v2480_v8  ;;  %v1195_v8 = vmul.f32 %v4847_v62, %v1194_v11 }
 0x1ba   :  { %v3715_v38 = vpop.eup %3714  ;;  %v1563_v32 = vmul.f32 %v4947_v51, %v4912_v9  ;;  %v940_v35 = vsel %vm494_vm1, %v840_v10, 0.0  ;;  %v1183_v36 = vmul.f32 %v3709_v40, %v1182_v14  ;;  %v2015_v3 = vand.u32 2147483648, %v4918_v58 }
 0x1bb   :  { %3718 = vrsqrt.f32 %v4949_v49  ;;  %941 = vadd.xlane.f32.xlu1 %v940_v35  ;;  %v647_v57 = vpop.xlane.xlu0 %646  ;;  %v2477_v16 = vsel %vm2476_vm10, %v3711_v48, %v2473_v56  ;;  %v2005_v25 = vmul.f32 %v3715_v38, %v4918_v58  ;;  %v2013_v56 = vand.u32 2147483647, %v4918_v58 }
 0x1bc   :  { %v2482_v10 = vsel %vm4951_vm9, %v2481_v47, %v2477_v16  ;;  %3720 = vrcp.f32 %v4963_v12  ;;  %v1564_v19 = vmul.f32 %v4947_v51, %v1563_v32  ;;  %v1184_v62 = vmul.f32 %v1183_v36, %v4866_v52 }
 0x1bd   :  { %v2967_v14 = vmul.f32 %v2482_v10, %v4372_v17  ;;  %v909_v40 = vpop.xlane.xlu1 %908  ;;  %580 = vadd.xlane.f32.xlu2 %v4901_v33  ;;  %v2006_v35 = vsub.f32 1.0, %v2005_v25  ;;  %vm2010_vm11 = vweird.f32 %v3715_v38  ;;  %v1206_v11 = vsub.f32 1.5, %v1205_v55 }
 0x1be   :  { %v4976_v48 = vpop.eup %3716  ;;  %v4979_v39 = vmul.f32 0.05263158, %v909_v40  ;;  %v4988_v23 = vsub.f32 %v4455_v1, %v746_v2  ;;  %vm2009_vm13 = vweird.f32 %v4918_v58  ;;  %v4999_v10 = vmul.f32 %v1195_v8, %v4811_v42 }
 0x1bf   :  { %v1215_v17 = vmul.f32 %v4976_v48, %v4937_v5  ;;  %3648 = vmatmul.msk.f32.vlgmr.msra.gmra.mxu3 %vm494_vm1, %v2967_v14  ;;  %v2007_v33 = vmul.f32 %v3715_v38, %v2006_v35  ;;  %v1565_v55 = vmul.f32 0.5, %v1564_v19  ;;  %vm2011_vm14 = vmor %vm2009_vm13, %vm2010_vm11  ;;  %v2016_v2 = vor.u32 1.1754944e-38, %v2015_v3 }
 0x1c0   :  { %7230 = vst [vmem:[#allocation30_spill] sm:$0xff] %v4988_v23  ;;  %3722 = vrsqrt.f32 %v4979_v39  ;;  %v999_v32 = vpop.xlane.xlu2 %998  ;;  %vm2014_vm15 = vcmp.eq.f32.partialorder %v2013_v56, 8.507059e+37  ;;  %v1186_v58 = vsel %vm1185_vm12, %v4866_v52, %v1184_v62  ;;  %v1188_v3 = vand.u32 2147483648, %v4866_v52 }
 0x1c1   :  { %v4992_v47 = vpop.eup %3718  ;;  %v1216_v36 = vmul.f32 %v4976_v48, %v1215_v17  ;;  %v4995_v16 = vmul.f32 0.05263158, %v999_v32  ;;  %v2008_v25 = vadd.f32 %v3715_v38, %v2007_v33  ;;  %v576_v17 = vsel %vm494_vm1, %v4916_v53, 0.0  ;;  %v467_v32 = vpop.f32.mrf.mxu2 }
 0x1c2   :  { %v1575_v1 = vmul.f32 %v4992_v47, %v4949_v49  ;;  %v5003_v14 = vpop.eup %3720  ;;  %vm1197_vm0 = vcmp.eq.f32.partialorder %v4811_v42, inf  ;;  %vm1187_vm2 = vcmp.eq.f32.partialorder %v4866_v52, 0.0  ;;  %v744_v27 = vmul.f32 %v4326_v29, %v647_v57 }
 0x1c3   :  { %944 = vadd.xlane.f32.xlu1 %v4904_v13  ;;  %v650_v40 = vpop.xlane.xlu0 %649  ;;  %v2012_v35 = vsel %vm2011_vm14, %v3715_v38, %v2008_v25  ;;  %v1217_v8 = vmul.f32 0.5, %v1216_v36  ;;  %3724 = vrsqrt.f32 %v4995_v16  ;;  %v1207_v13 = vmul.f32 %v4907_v20, %v1206_v11 }
 0x1c4   :  { %v2017_v19 = vsel %vm2014_vm15, %v2016_v2, %v2012_v35  ;;  %v2485_v33 = vmul.f32 %v5003_v14, %v4963_v12  ;;  %v1566_v36 = vsub.f32 1.5, %v1565_v55  ;;  %v1576_v25 = vmul.f32 %v4992_v47, %v1575_v1 }
 0x1c5   :  { %v2936_v38 = vmul.f32 %v2017_v19, %v4389_v31  ;;  %v912_v56 = vpop.xlane.xlu1 %911  ;;  %v1189_v35 = vsel %vm1187_vm2, %v1188_v3, %v1186_v58  ;;  %v2493_v20 = vand.u32 2147483647, %v4963_v12  ;;  %vm1199_vm3 = vcmp.eq.f32.partialorder %v4811_v42, 0.0 }
 0x1c6   :  { %v5019_v62 = vpop.eup %3722  ;;  %v5022_v2 = vmul.f32 0.05263158, %v912_v56  ;;  %v2486_v31 = vsub.f32 1.0, %v2485_v33  ;;  %v5027_v11 = vadd.f32 1e-06, %v1189_v35  ;;  %v1218_v52 = vsub.f32 1.5, %v1217_v8 }
 0x1c7   :  { %3617 = vmatmul.msk.f32.gmra.mxu1 %vm494_vm1, %v2936_v38  ;;  %v2495_v1 = vand.u32 2147483648, %v4963_v12  ;;  %v5033_v19 = vadd.f32 %v4856_v0, %v467_v32  ;;  %v5036_v57 = vmul.f32 %v1207_v13, %v4841_v21  ;;  %v1227_v58 = vmul.f32 %v5019_v62, %v4979_v39 }
 0x1c8   :  { %3726 = vrsqrt.f32 %v5022_v2  ;;  %v656_v55 = vpop.xlane.xlu2 %655  ;;  %v2487_v3 = vmul.f32 %v5003_v14, %v2486_v31  ;;  %vm2490_vm4 = vweird.f32 %v5003_v14  ;;  %v1567_v8 = vmul.f32 %v4947_v51, %v1566_v36 }
 0x1c9   :  { %7231 = vst [vmem:[#allocation31_spill] sm:$0xff] %v5033_v19  ;;  %v5042_v38 = vpop.eup %3724  ;;  %v1577_v56 = vmul.f32 0.5, %v1576_v25  ;;  %vm2489_vm5 = vweird.f32 %v4963_v12  ;;  %3728 = vrcp.f32 %v5027_v11  ;;  %v5048_v33 = vsub.f32 %v4510_v30, %v744_v27 }
 0x1ca   :  { %v745_v13 = vmul.f32 %v4326_v29, %v650_v40  ;;  %v2488_v35 = vadd.f32 %v5003_v14, %v2487_v3  ;;  %vm2494_vm6 = vcmp.eq.f32.partialorder %v2493_v20, 8.507059e+37  ;;  %v1219_v31 = vmul.f32 %v4976_v48, %v1218_v52  ;;  %vm2491_vm7 = vmor %vm2489_vm5, %vm2490_vm4 }
 0x1cb   :  { %577 = vadd.xlane.f32.xlu1 %v576_v17  ;;  %v557_v32 = vpop.xlane.xlu0 %556  ;;  %v2496_v51 = vor.u32 1.1754944e-38, %v2495_v1  ;;  %v660_v12 = vsel %vm494_vm1, %v5033_v19, 0.0  ;;  %v1228_v36 = vmul.f32 %v5019_v62, %v1227_v58  ;;  %v1587_v30 = vmul.f32 %v5042_v38, %v4995_v16 }
 0x1cc   :  { %v714_v53 = vmul.f32 %v4326_v29, %v557_v32  ;;  %v2492_v27 = vsel %vm2491_vm7, %v5003_v14, %v2488_v35  ;;  %v1198_v40 = vsel %vm1197_vm0, %v4811_v42, %v4999_v10  ;;  %v1568_v17 = vmul.f32 %v1567_v8, %v4912_v9 }
 0x1cd   :  { %v1578_v25 = vsub.f32 1.5, %v1577_v56  ;;  %v2497_v52 = vsel %vm2494_vm6, %v2496_v51, %v2492_v27  ;;  %v5071_v58 = vsub.f32 %v4537_v61, %v745_v13  ;;  %v5079_v35 = vmul.f32 %v1219_v31, %v4937_v5 }
 0x1ce   :  { %v5064_v48 = vpop.eup %3726  ;;  %v5068_v20 = vsub.f32 %v4559_v37, %v714_v53  ;;  %v915_v1 = vpop.xlane.xlu1 %914  ;;  %v2968_v3 = vmul.f32 %v2497_v52, %v4413_v46  ;;  %v7234_v56 = vand.u32 2147483648, %v4811_v42  ;;  %vm1569_vm8 = vcmp.eq.f32.partialorder %v4912_v9, inf }
 0x1cf   :  { %7233 = vst [vmem:[#allocation33_spill] sm:$0xff] %v5071_v58  ;;  %v1239_v14 = vmul.f32 %v5064_v48, %v5022_v2  ;;  %v5076_v32 = vmul.f32 0.05263158, %v915_v1  ;;  %v3729_v10 = vpop.eup %3728  ;;  %v470_v53 = vpop.f32.mrf.mxu2  ;;  %v5088_v13 = vmul.f32 0.5, %v1228_v36  ;;  %v1588_v46 = vmul.f32 %v5042_v38, %v1587_v30 }
 0x1d0   :  { %7232 = vst [vmem:[#allocation32_spill] sm:$0xff] %v5068_v20  ;;  %v1002_v8 = vpop.xlane.xlu2 %1001  ;;  %v842_v37 = vmul.f32 %v5068_v20, %v5068_v20  ;;  %v1201_v61 = vsel %vm1199_vm3, %v7234_v56, %v1198_v40  ;;  %3649 = vmatmul.msk.f32.gmra.mxu3 %vm494_vm1, %v2968_v3  ;;  %v1579_v51 = vmul.f32 %v4992_v47, %v1578_v25  ;;  %vm2024_vm9 = vweird.f32 %v5027_v11  ;;  %v389_v56 = vpop.f32.mrf.mxu0 }
 0x1d1   :  { %3730 = vrsqrt.f32 %v5076_v32  ;;  %v5093_v31 = vmul.f32 0.05263158, %v1002_v8  ;;  %v5097_v27 = vmul.f32 %v4326_v29, %v656_v55  ;;  %v2020_v40 = vmul.f32 %v3729_v10, %v5027_v11 }
 0x1d2   :  { %v946_v42 = vsel %vm494_vm1, %v842_v37, 0.0  ;;  %v1240_v36 = vmul.f32 %v5064_v48, %v1239_v14  ;;  %v5104_v52 = vadd.f32 %v4856_v0, %v470_v53  ;;  %v5106_v1 = vadd.f32 1e-06, %v1201_v61 }
 0x1d3   :  { %3732 = vrsqrt.f32 %v5093_v31  ;;  %661 = vadd.xlane.f32.xlu1 %v660_v12  ;;  %947 = vadd.xlane.f32.xlu2 %v946_v42  ;;  %v560_v30 = vpop.xlane.xlu0 %559  ;;  %v2021_v55 = vsub.f32 1.0, %v2020_v40  ;;  %v2028_v25 = vand.u32 2147483647, %v5027_v11  ;;  %v1230_v3 = vsub.f32 1.5, %v5088_v13 }
 0x1d4   :  { %7235 = vst [vmem:[#allocation34_spill] sm:$0xff] %v5104_v52  ;;  %v715_v47 = vmul.f32 %v4326_v29, %v560_v30  ;;  %v1589_v14 = vmul.f32 0.5, %v1588_v46  ;;  %v2030_v8 = vand.u32 2147483648, %v5027_v11  ;;  %3734 = vrcp.f32 %v5106_v1 }
 0x1d5   :  { %v2022_v37 = vmul.f32 %v3729_v10, %v2021_v55  ;;  %vm2025_vm10 = vweird.f32 %v3729_v10  ;;  %v1570_v61 = vsel %vm1569_vm8, %v4912_v9, %v1568_v17  ;;  %v1241_v40 = vmul.f32 0.5, %v1240_v36 }
 0x1d6   :  { %v5115_v12 = vsub.f32 %v4585_v26, %v715_v47  ;;  %v918_v53 = vpop.xlane.xlu1 %917  ;;  %v663_v46 = vsel %vm494_vm1, %v5104_v52, 0.0  ;;  %v1572_v30 = vand.u32 2147483648, %v4912_v9  ;;  %vm1571_vm11 = vcmp.eq.f32.partialorder %v4912_v9, 0.0  ;;  %vm2026_vm12 = vmor %vm2024_vm9, %vm2025_vm10 }
 0x1d7   :  { %v5120_v42 = vpop.eup %3730  ;;  %v5122_v13 = vmul.f32 0.05263158, %v918_v53  ;;  %v2023_v47 = vadd.f32 %v3729_v10, %v2022_v37  ;;  %vm2029_vm13 = vcmp.eq.f32.partialorder %v2028_v25, 8.507059e+37  ;;  %v2031_v36 = vor.u32 1.1754944e-38, %v2030_v8 }
 0x1d8   :  { %7236 = vst [vmem:[#allocation35_spill] sm:$0xff] %v5115_v12  ;;  %v1251_v26 = vmul.f32 %v5120_v42, %v5076_v32  ;;  %v566_v55 = vpop.xlane.xlu2 %565  ;;  %v843_v20 = vmul.f32 %v5115_v12, %v5115_v12  ;;  %v1573_v53 = vsel %vm1571_vm11, %v1572_v30, %v1570_v61  ;;  %v1590_v52 = vsub.f32 1.5, %v1589_v14 }
 0x1d9   :  { %v5132_v17 = vpop.eup %3732  ;;  %3736 = vrsqrt.f32 %v5122_v13  ;;  %v2027_v19 = vsel %vm2026_vm12, %v3729_v10, %v2023_v47  ;;  %v5142_v9 = vmul.f32 %v1579_v51, %v4949_v49  ;;  %v1242_v63 = vsub.f32 1.5, %v1241_v40 }
 0x1da   :  { %v1599_v37 = vmul.f32 %v5132_v17, %v5093_v31  ;;  %v949_v12 = vsel %vm494_vm1, %v843_v20, 0.0  ;;  %v3735_v43 = vpop.eup %3734  ;;  %v2032_v54 = vsel %vm2029_vm13, %v2031_v36, %v2027_v19  ;;  %v5144_v25 = vadd.f32 1e-06, %v1573_v53  ;;  %v5183_v36 = vpop.f32.mrf.mxu0 }
 0x1db   :  { %664 = vadd.xlane.f32.xlu2 %v663_v46  ;;  %950 = vadd.xlane.f32.xlu0 %v949_v12  ;;  %v563_v11 = vpop.xlane.xlu0 %562  ;;  %v1252_v8 = vmul.f32 %v5120_v42, %v1251_v26  ;;  %v2937_v14 = vmul.f32 %v2032_v54, %v4439_v41  ;;  %v2043_v10 = vand.u32 2147483647, %v5106_v1  ;;  %v5151_v20 = vmul.f32 %v5019_v62, %v1230_v3 }
 0x1dc   :  { %v716_v61 = vmul.f32 %v4326_v29, %v563_v11  ;;  %v5154_v51 = vadd.f32 %v4856_v0, %v389_v56  ;;  %v2035_v19 = vmul.f32 %v3735_v43, %v5106_v1  ;;  %3738 = vrcp.f32 %v5144_v25 }
 0x1dd   :  { %v5159_v12 = vmul.f32 %v5042_v38, %v1590_v52  ;;  %v1600_v40 = vmul.f32 %v5132_v17, %v1599_v37  ;;  %3618 = vmatmul.msk.f32.gmra.mxu1 %vm494_vm1, %v2937_v14  ;;  %vm2039_vm14 = vweird.f32 %v5106_v1  ;;  %v2045_v41 = vand.u32 2147483648, %v5106_v1 }
 0x1de   :  { %v921_v54 = vpop.xlane.xlu1 %920  ;;  %v5168_v3 = vsub.f32 %v4611_v60, %v716_v61  ;;  %v2036_v56 = vsub.f32 1.0, %v2035_v19  ;;  %v873_v38 = vmul.f32 %v5071_v58, %v5071_v58  ;;  %v5175_v52 = vmul.f32 %v5064_v48, %v1242_v63 }
 0x1df   :  { %v5165_v62 = vpop.eup %3736  ;;  %v5170_v46 = vmul.f32 0.05263158, %v921_v54  ;;  %v1253_v30 = vmul.f32 0.5, %v1252_v8  ;;  %vm5179_vm15 = vcmp.eq.f32.partialorder %v2043_v10, 8.507059e+37  ;;  %vm2040_vm0 = vweird.f32 %v3735_v43 }
 0x1e0   :  { %v1263_v26 = vmul.f32 %v5165_v62, %v5122_v13  ;;  %v1005_v60 = vpop.xlane.xlu2 %1004  ;;  %v2037_v53 = vmul.f32 %v3735_v43, %v2036_v56  ;;  %v1601_v11 = vmul.f32 0.5, %v1600_v40  ;;  %v2046_v48 = vor.u32 1.1754944e-38, %v2045_v41  ;;  %vm2041_vm2 = vmor %vm2039_vm14, %vm2040_vm0 }
 0x1e1   :  { %3740 = vrsqrt.f32 %v5170_v46  ;;  %v5186_v37 = vmul.f32 0.05263158, %v1005_v60  ;;  %v1039_v8 = vsel %vm494_vm1, %v873_v38, 0.0  ;;  %v582_v10 = vsel %vm494_vm1, %v5154_v51, 0.0 }
 0x1e2   :  { %v1264_v63 = vmul.f32 %v5165_v62, %v1263_v26  ;;  %v3739_v14 = vpop.eup %3738  ;;  %v2038_v61 = vadd.f32 %v3735_v43, %v2037_v53  ;;  %v844_v19 = vmul.f32 %v5168_v3, %v5168_v3  ;;  %v1254_v54 = vsub.f32 1.5, %v1253_v30 }
 0x1e3   :  { %3742 = vrsqrt.f32 %v5186_v37  ;;  %1040 = vadd.xlane.f32.xlu2 %v1039_v8  ;;  %v717_v56 = vmul.f32 %v4326_v29, %v566_v55  ;;  %v2500_v40 = vmul.f32 %v3739_v14, %v5144_v25  ;;  %vm2504_vm3 = vweird.f32 %v5144_v25  ;;  %583 = vadd.xlane.f32.xlu0 %v582_v10 }
 0x1e4   :  { %v2042_v41 = vsel %vm2041_vm2, %v3735_v43, %v2038_v61  ;;  %v2508_v38 = vand.u32 2147483647, %v5144_v25  ;;  %v952_v26 = vsel %vm494_vm1, %v844_v19, 0.0  ;;  %vm1209_vm4 = vcmp.eq.f32.partialorder %v4841_v21, inf }
 0x1e5   :  { %v2047_v30 = vsel %vm5179_vm15, %v2046_v48, %v2042_v41  ;;  %v2501_v55 = vsub.f32 1.0, %v2500_v40  ;;  %v2510_v60 = vand.u32 2147483648, %v5144_v25  ;;  %953 = vadd.xlane.f32.xlu1 %v952_v26  ;;  %v1210_v1 = vsel %vm1209_vm4, %v4841_v21, %v5036_v57  ;;  %v473_v41 = vpop.f32.mrf.mxu2 }
 0x1e6   :  { %v1602_v8 = vsub.f32 1.5, %v1601_v11  ;;  %v1265_v43 = vmul.f32 0.5, %v1264_v63  ;;  %v2938_v61 = vmul.f32 %v2047_v30, %v4408_v59  ;;  %v1212_v10 = vand.u32 2147483648, %v4841_v21 }
 0x1e7   :  { %v5209_v53 = vpop.eup %3740  ;;  %v2502_v19 = vmul.f32 %v3739_v14, %v2501_v55  ;;  %vm2505_vm5 = vweird.f32 %v3739_v14  ;;  %vm1211_vm6 = vcmp.eq.f32.partialorder %v4841_v21, 0.0  ;;  %vm1581_vm7 = vcmp.eq.f32.partialorder %v4949_v49, inf  ;;  %v395_v21 = vpop.f32.mrf.mxu0 }
 0x1e8   :  { %v1255_v48 = vmul.f32 %v5120_v42, %v1254_v54  ;;  %3619 = vmatmul.msk.f32.gmra.mxu1 %vm494_vm1, %v2938_v61  ;;  %v1213_v57 = vsel %vm1211_vm6, %v1212_v10, %v1210_v1  ;;  %v1582_v11 = vsel %vm1581_vm7, %v4949_v49, %v5142_v9  ;;  %v1584_v59 = vand.u32 2147483648, %v4949_v49  ;;  %vm2506_vm10 = vmor %vm2504_vm3, %vm2505_vm5  ;;  %v569_v30 = vpop.xlane.xlu2 %568 }
 0x1e9   :  { %v5215_v47 = vpop.eup %3742  ;;  %v2503_v63 = vadd.f32 %v3739_v14, %v2502_v19  ;;  %vm2509_vm8 = vcmp.eq.f32.partialorder %v2508_v38, 8.507059e+37  ;;  %v1275_v40 = vmul.f32 %v5209_v53, %v5170_v46  ;;  %vm1583_vm9 = vcmp.eq.f32.partialorder %v4949_v49, 0.0 }
 0x1ea   :  { %v2511_v42 = vor.u32 1.1754944e-38, %v2510_v60  ;;  %v1611_v54 = vmul.f32 %v5215_v47, %v5186_v37  ;;  %v5230_v9 = vadd.f32 1e-06, %v1213_v57  ;;  %v1585_v26 = vsel %vm1583_vm9, %v1584_v59, %v1582_v11 }
 0x1eb   :  { %v1603_v38 = vmul.f32 %v5132_v17, %v1602_v8  ;;  %v1266_v55 = vsub.f32 1.5, %v1265_v43  ;;  %v2507_v1 = vsel %vm2506_vm10, %v3739_v14, %v2503_v63  ;;  %v5233_v61 = vadd.f32 1e-06, %v1585_v26  ;;  %v575_v43 = vpop.xlane.xlu0 %574 }
 0x1ec   :  { %v2512_v49 = vsel %vm2509_vm8, %v2511_v42, %v2507_v1  ;;  %3744 = vrcp.f32 %v5230_v9  ;;  %v5237_v25 = vadd.f32 %v4856_v0, %v395_v21  ;;  %v5240_v60 = vadd.f32 %v4856_v0, %v473_v41 }
 0x1ed   :  { %v5244_v10 = vmul.f32 %v5151_v20, %v4979_v39  ;;  %v5248_v17 = vsub.f32 %v4549_v18, %v5097_v27  ;;  %v2969_v14 = vmul.f32 %v2512_v49, %v4461_v45  ;;  %v1276_v8 = vmul.f32 %v5209_v53, %v1275_v40 }
 0x1ee   :  { %v1592_v19 = vmul.f32 %v5159_v12, %v4995_v16  ;;  %v5256_v57 = vmul.f32 %v5175_v52, %v5022_v2  ;;  %v1612_v11 = vmul.f32 %v5215_v47, %v1611_v54  ;;  %3746 = vrcp.f32 %v5233_v61 }
 0x1ef   :  { %7239 = vst [vmem:[#allocation36_spill] sm:$0xff] %v5248_v17  ;;  %v5261_v20 = vmul.f32 %v1255_v48, %v5076_v32  ;;  %v5264_v18 = vmul.f32 %v1603_v38, %v5093_v31  ;;  %v5267_v45 = vsub.f32 %v4595_v50, %v717_v56  ;;  %3650 = vmatmul.msk.f32.gmra.mxu3 %vm494_vm1, %v2969_v14  ;;  %v588_v48 = vsel %vm494_vm1, %v5237_v25, 0.0  ;;  %v924_v38 = vpop.xlane.xlu1 %923 }
 0x1f0   :  { %v5272_v27 = vadd.f32 %v4856_v0, %v5183_v36  ;;  %v5275_v12 = vmul.f32 %v5165_v62, %v1266_v55  ;;  %v5278_v52 = vmul.f32 %v4326_v29, %v575_v43  ;;  %v666_v59 = vsel %vm494_vm1, %v5240_v60, 0.0  ;;  %589 = vadd.xlane.f32.xlu2 %v588_v48  ;;  %v1008_v49 = vpop.xlane.xlu2 %1007 }
 0x1f1   :  { %v5284_v50 = vmul.f32 0.5, %v1276_v8  ;;  %vm2054_vm11 = vweird.f32 %v5230_v9  ;;  %v2058_v56 = vand.u32 2147483647, %v5230_v9  ;;  %667 = vadd.xlane.f32.xlu0 %v666_v59  ;;  %v872_v62 = vmul.f32 %v5048_v33, %v5048_v33 }
 0x1f2   :  { %v3745_v36 = vpop.eup %3744  ;;  %v5290_v63 = vmul.f32 0.5, %v1612_v11  ;;  %v2060_v40 = vand.u32 2147483648, %v5230_v9  ;;  %v2523_v21 = vand.u32 2147483647, %v5233_v61  ;;  %v718_v41 = vmul.f32 %v4326_v29, %v569_v30  ;;  %v5303_v30 = vpop.f32.mrf.mxu2 }
 0x1f3   :  { %v2050_v42 = vmul.f32 %v3745_v36, %v5230_v9  ;;  %v1036_v54 = vsel %vm494_vm1, %v872_v62, 0.0  ;;  %vm1221_vm12 = vcmp.eq.f32.partialorder %v4937_v5, inf  ;;  %v1224_v26 = vand.u32 2147483648, %v4937_v5 }
 0x1f4   :  { %v3747_v55 = vpop.eup %3746  ;;  %vm2055_vm13 = vweird.f32 %v3745_v36  ;;  %1037 = vadd.xlane.f32.xlu1 %v1036_v54  ;;  %v1222_v1 = vsel %vm1221_vm12, %v4937_v5, %v5079_v35  ;;  %vm1223_vm14 = vcmp.eq.f32.partialorder %v4937_v5, 0.0  ;;  %vm1593_vm15 = vcmp.eq.f32.partialorder %v4995_v16, inf }
 0x1f5   :  { %v2051_v14 = vsub.f32 1.0, %v2050_v42  ;;  %v2515_v8 = vmul.f32 %v3747_v55, %v5233_v61  ;;  %v1225_v43 = vsel %vm1223_vm14, %v1224_v26, %v1222_v1  ;;  %v1596_v11 = vand.u32 2147483648, %v4995_v16  ;;  %vm2056_vm3 = vmor %vm2054_vm11, %vm2055_vm13 }
 0x1f6   :  { %v5307_v48 = vadd.f32 1e-06, %v1225_v43  ;;  %v1594_v59 = vsel %vm1593_vm15, %v4995_v16, %v1592_v19  ;;  %vm1595_vm0 = vcmp.eq.f32.partialorder %v4995_v16, 0.0  ;;  %v5311_v35 = vmul.f32 0.05263158, %v924_v38 }
 0x1f7   :  { %v2052_v5 = vmul.f32 %v3745_v36, %v2051_v14  ;;  %v2516_v62 = vsub.f32 1.0, %v2515_v8  ;;  %v1597_v54 = vsel %vm1595_vm0, %v1596_v11, %v1594_v59  ;;  %v5313_v58 = vmul.f32 0.05263158, %v1008_v49 }
 0x1f8   :  { %vm2520_vm2 = vweird.f32 %v3747_v55  ;;  %v2525_v42 = vand.u32 2147483648, %v5233_v61  ;;  %v5317_v26 = vsub.f32 %v4642_v15, %v718_v41  ;;  %3748 = vrcp.f32 %v5307_v48 }
 0x1f9   :  { %v2053_v1 = vadd.f32 %v3745_v36, %v2052_v5  ;;  %v2517_v43 = vmul.f32 %v3747_v55, %v2516_v62  ;;  %v5320_v19 = vadd.f32 1e-06, %v1597_v54  ;;  %3750 = vrsqrt.f32 %v5311_v35  ;;  %v927_v62 = vpop.xlane.xlu1 %926 }
 0x1fa   :  { %vm2059_vm4 = vcmp.eq.f32.partialorder %v2058_v56, 8.507059e+37  ;;  %v2061_v16 = vor.u32 1.1754944e-38, %v2060_v40  ;;  %3752 = vrsqrt.f32 %v5313_v58  ;;  %v845_v15 = vmul.f32 %v5267_v45, %v5267_v45  ;;  %v479_v54 = vpop.f32.mrf.mxu2 }
 0x1fb   :  { %v2057_v41 = vsel %vm2056_vm3, %v3745_v36, %v2053_v1  ;;  %v2518_v38 = vadd.f32 %v3747_v55, %v2517_v43  ;;  %vm2519_vm5 = vweird.f32 %v5233_v61  ;;  %3754 = vrcp.f32 %v5320_v19 }
 0x1fc   :  { %v2062_v49 = vsel %vm2059_vm4, %v2061_v16, %v2057_v41  ;;  %vm2521_vm6 = vmor %vm2519_vm5, %vm2520_vm2  ;;  %vm2524_vm7 = vcmp.eq.f32.partialorder %v2523_v21, 8.507059e+37  ;;  %v2526_v14 = vor.u32 1.1754944e-38, %v2525_v42  ;;  %v955_v9 = vsel %vm494_vm1, %v845_v15, 0.0 }
 0x1fd   :  { %v2939_v56 = vmul.f32 %v2062_v49, %v4430_v22  ;;  %v2522_v40 = vsel %vm2521_vm6, %v3747_v55, %v2518_v38  ;;  %956 = vadd.xlane.f32.xlu2 %v955_v9  ;;  %v846_v8 = vmul.f32 %v5317_v26, %v5317_v26  ;;  %v585_v36 = vsel %vm494_vm1, %v5272_v27, 0.0 }
 0x1fe   :  { %v3749_v61 = vpop.eup %3748  ;;  %v1278_v11 = vsub.f32 1.5, %v5284_v50  ;;  %v1614_v59 = vsub.f32 1.5, %v5290_v63  ;;  %v2527_v5 = vsel %vm2524_vm7, %v2526_v14, %v2522_v40  ;;  %v2073_v21 = vand.u32 2147483647, %v5307_v48  ;;  %586 = vadd.xlane.f32.xlu1 %v585_v36 }
 0x1ff   :  { %v5341_v22 = vpop.eup %3750  ;;  %3620 = vmatmul.msk.f32.gmra.mxu1 %vm494_vm1, %v2939_v56  ;;  %v2970_v55 = vmul.f32 %v2527_v5, %v4487_v34  ;;  %v2065_v42 = vmul.f32 %v3749_v61, %v5307_v48  ;;  %v958_v1 = vsel %vm494_vm1, %v846_v8, 0.0  ;;  %vm1233_vm8 = vcmp.eq.f32.partialorder %v4979_v39, inf }
 0x200   :  { %v5348_v50 = vpop.eup %3752  ;;  %v2075_v63 = vand.u32 2147483648, %v5307_v48  ;;  %v1287_v43 = vmul.f32 %v5341_v22, %v5311_v35  ;;  %959 = vadd.xlane.f32.xlu0 %v958_v1  ;;  %v1234_v16 = vsel %vm1233_vm8, %v4979_v39, %v5244_v10  ;;  %v1236_v15 = vand.u32 2147483648, %v4979_v39 }
 0x201   :  { %v3755_v34 = vpop.eup %3754  ;;  %3651 = vmatmul.msk.f32.gmra.mxu3 %vm494_vm1, %v2970_v55  ;;  %v2066_v41 = vsub.f32 1.0, %v2065_v42  ;;  %vm1235_vm9 = vcmp.eq.f32.partialorder %v4979_v39, 0.0  ;;  %v5358_v38 = vmul.f32 0.05263158, %v927_v62  ;;  %v5361_v49 = vadd.f32 %v4856_v0, %v479_v54  ;;  %v572_v0 = vpop.xlane.xlu2 %571 }
 0x202   :  { %v2530_v14 = vmul.f32 %v3755_v34, %v5320_v19  ;;  %v1288_v9 = vmul.f32 %v5341_v22, %v1287_v43  ;;  %v1623_v10 = vmul.f32 %v5348_v50, %v5313_v58  ;;  %v1237_v56 = vsel %vm1235_vm9, %v1236_v15, %v1234_v16 }
 0x203   :  { %v2067_v40 = vmul.f32 %v3749_v61, %v2066_v41  ;;  %vm2070_vm10 = vweird.f32 %v3749_v61  ;;  %v5367_v8 = vadd.f32 1e-06, %v1237_v56  ;;  %3756 = vrsqrt.f32 %v5358_v38 }
 0x204   :  { %vm2069_vm11 = vweird.f32 %v5307_v48  ;;  %v2076_v39 = vor.u32 1.1754944e-38, %v2075_v63  ;;  %v2531_v36 = vsub.f32 1.0, %v2530_v14  ;;  %v672_v5 = vsel %vm494_vm1, %v5361_v49, 0.0 }
 0x205   :  { %v2068_v62 = vadd.f32 %v3749_v61, %v2067_v40  ;;  %v2538_v54 = vand.u32 2147483647, %v5320_v19  ;;  %v2540_v55 = vand.u32 2147483648, %v5320_v19  ;;  %3758 = vrcp.f32 %v5367_v8  ;;  %673 = vadd.xlane.f32.xlu2 %v672_v5  ;;  %vm2071_vm12 = vmor %vm2069_vm11, %vm2070_vm10 }
 0x206   :  { %v2532_v42 = vmul.f32 %v3755_v34, %v2531_v36  ;;  %vm2535_vm13 = vweird.f32 %v3755_v34  ;;  %v5376_v1 = vmul.f32 0.5, %v1288_v9  ;;  %v1624_v48 = vmul.f32 %v5348_v50, %v1623_v10  ;;  %v482_v36 = vpop.f32.mrf.mxu2 }
 0x207   :  { %v2072_v63 = vsel %vm2071_vm12, %v3749_v61, %v2068_v62  ;;  %vm2074_vm14 = vcmp.eq.f32.partialorder %v2073_v21, 8.507059e+37  ;;  %v719_v43 = vmul.f32 %v4326_v29, %v572_v0  ;;  %v874_v16 = vmul.f32 %v4988_v23, %v4988_v23 }
 0x208   :  { %v5383_v15 = vmul.f32 %v5209_v53, %v1278_v11  ;;  %v2077_v41 = vsel %vm2074_vm14, %v2076_v39, %v2072_v63  ;;  %v2533_v14 = vadd.f32 %v3755_v34, %v2532_v42  ;;  %vm2534_vm15 = vweird.f32 %v5320_v19 }
 0x209   :  { %v5386_v56 = vpop.eup %3756  ;;  %v5389_v9 = vmul.f32 %v5215_v47, %v1614_v59  ;;  %v2940_v61 = vmul.f32 %v2077_v41, %v4479_v44  ;;  %vm2536_vm0 = vmor %vm2534_vm15, %vm2535_vm13  ;;  %v2541_v21 = vor.u32 1.1754944e-38, %v2540_v55  ;;  %v1042_v10 = vsel %vm494_vm1, %v874_v16, 0.0  ;;  %v930_v44 = vpop.xlane.xlu1 %929 }
 0x20a   :  { %v2537_v40 = vsel %vm2536_vm0, %v3755_v34, %v2533_v14  ;;  %vm2539_vm2 = vcmp.eq.f32.partialorder %v2538_v54, 8.507059e+37  ;;  %v1290_v53 = vsub.f32 1.5, %v5376_v1  ;;  %v5394_v11 = vmul.f32 0.5, %v1624_v48  ;;  %1043 = vadd.xlane.f32.xlu0 %v1042_v10  ;;  %v1011_v1 = vpop.xlane.xlu2 %1010 }
 0x20b   :  { %v3759_v39 = vpop.eup %3758  ;;  %3621 = vmatmul.msk.f32.gmra.mxu1 %vm494_vm1, %v2940_v61  ;;  %v2542_v19 = vsel %vm2539_vm2, %v2541_v21, %v2537_v40  ;;  %v2088_v47 = vand.u32 2147483647, %v5367_v8  ;;  %v5399_v59 = vsub.f32 %v4675_v4, %v719_v43  ;;  %vm1245_vm3 = vcmp.eq.f32.partialorder %v5022_v2, inf }
 0x20c   :  { %v2971_v34 = vmul.f32 %v2542_v19, %v4516_v24  ;;  %v2080_v0 = vmul.f32 %v3759_v39, %v5367_v8  ;;  %v1299_v5 = vmul.f32 %v5386_v56, %v5358_v38  ;;  %v1246_v62 = vsel %vm1245_vm3, %v5022_v2, %v5256_v57 }
 0x20d   :  { %7240 = vst [vmem:[#allocation37_spill] sm:$0xff] %v5399_v59  ;;  %vm1247_vm4 = vcmp.eq.f32.partialorder %v5022_v2, 0.0  ;;  %v1248_v54 = vand.u32 2147483648, %v5022_v2  ;;  %vm1605_vm5 = vcmp.eq.f32.partialorder %v5093_v31, inf  ;;  %v1608_v4 = vand.u32 2147483648, %v5093_v31 }
 0x20e   :  { %3652 = vmatmul.msk.f32.gmra.mxu3 %vm494_vm1, %v2971_v34  ;;  %v2081_v55 = vsub.f32 1.0, %v2080_v0  ;;  %v1606_v24 = vsel %vm1605_vm5, %v5093_v31, %v5264_v18  ;;  %vm1607_vm6 = vcmp.eq.f32.partialorder %v5093_v31, 0.0  ;;  %v5416_v42 = vmul.f32 0.05263158, %v930_v44  ;;  %v5422_v2 = vld [vmem:[%s7151_s2] ss:$0 sm:$0xff] }
 0x20f   :  { %v2090_v57 = vand.u32 2147483648, %v5367_v8  ;;  %v1249_v48 = vsel %vm1247_vm4, %v1248_v54, %v1246_v62  ;;  %v1609_v63 = vsel %vm1607_vm6, %v1608_v4, %v1606_v24  ;;  %v5425_v43 = vadd.f32 %v5422_v2, %v482_v36 }
 0x210   :  { %v2082_v16 = vmul.f32 %v3759_v39, %v2081_v55  ;;  %vm2085_vm7 = vweird.f32 %v3759_v39  ;;  %v5427_v18 = vadd.f32 1e-06, %v1249_v48  ;;  %v5429_v31 = vadd.f32 1e-06, %v1609_v63 }
 0x211   :  { %v1300_v41 = vmul.f32 %v5386_v56, %v1299_v5  ;;  %3760 = vrsqrt.f32 %v5416_v42  ;;  %v5433_v14 = vmul.f32 0.05263158, %v1011_v1  ;;  %v675_v61 = vsel %vm494_vm1, %v5425_v43, 0.0 }
 0x212   :  { %v2083_v21 = vadd.f32 %v3759_v39, %v2082_v16  ;;  %vm2084_vm8 = vweird.f32 %v5367_v8  ;;  %3762 = vrcp.f32 %v5427_v18  ;;  %v847_v10 = vmul.f32 %v5399_v59, %v5399_v59  ;;  %676 = vadd.xlane.f32.xlu2 %v675_v61  ;;  %592 = vadd.xlane.f32.xlu0 %v4890_v28  ;;  %v1026_v28 = vpop.xlane.xlu0 %1025 }
 0x213   :  { %v5444_v40 = vmul.f32 %v5275_v12, %v5122_v13  ;;  %v5448_v19 = vsub.f32 %v4629_v6, %v5278_v52  ;;  %vm2086_vm9 = vmor %vm2084_vm8, %vm2085_vm7  ;;  %v2091_v44 = vor.u32 1.1754944e-38, %v2090_v57  ;;  %3764 = vrcp.f32 %v5429_v31  ;;  %v485_v6 = vpop.f32.mrf.mxu2  ;;  %v1014_v57 = vpop.xlane.xlu2 %1013 }
 0x214   :  { %v1291_v8 = vmul.f32 %v5341_v22, %v1290_v53  ;;  %v1626_v36 = vsub.f32 1.5, %v5394_v11  ;;  %v2087_v34 = vsel %vm2086_vm9, %v3759_v39, %v2083_v21  ;;  %vm2089_vm10 = vcmp.eq.f32.partialorder %v2088_v47, 8.507059e+37 }
 0x215   :  { %7241 = vst [vmem:[#allocation38_spill] sm:$0xff] %v5448_v19  ;;  %v5456_v12 = vmul.f32 %v5383_v15, %v5170_v46  ;;  %v2092_v0 = vsel %vm2089_vm10, %v2091_v44, %v2087_v34  ;;  %v1301_v5 = vmul.f32 0.5, %v1300_v41  ;;  %3766 = vrsqrt.f32 %v5433_v14 }
 0x216   :  { %v5461_v52 = vmul.f32 %v5389_v9, %v5186_v37  ;;  %v2941_v22 = vmul.f32 %v2092_v0, %v4504_v7  ;;  %v961_v53 = vsel %vm494_vm1, %v847_v10, 0.0  ;;  %vm1257_vm11 = vcmp.eq.f32.partialorder %v5076_v32, inf }
 0x217   :  { %v5466_v11 = vpop.eup %3760  ;;  %v5470_v15 = vadd.f32 %v5422_v2, %v5303_v30  ;;  %962 = vadd.xlane.f32.xlu1 %v961_v53  ;;  %v1258_v39 = vsel %vm1257_vm11, %v5076_v32, %v5261_v20  ;;  %v1260_v47 = vand.u32 2147483648, %v5076_v32  ;;  %v5475_v9 = vmul.f32 0.05263158, %v1026_v28 }
 0x218   :  { %v3763_v62 = vpop.eup %3762  ;;  %v5478_v7 = vmul.f32 %v1291_v8, %v5311_v35  ;;  %v5481_v54 = vmul.f32 %v5348_v50, %v1626_v36  ;;  %3622 = vmatmul.msk.f32.gmra.mxu1 %vm494_vm1, %v2941_v22  ;;  %vm1259_vm12 = vcmp.eq.f32.partialorder %v5076_v32, 0.0  ;;  %v5486_v30 = vadd.f32 %v5422_v2, %v485_v6 }
 0x219   :  { %v3765_v4 = vpop.eup %3764  ;;  %v1302_v20 = vsub.f32 1.5, %v1301_v5  ;;  %v2095_v55 = vmul.f32 %v3763_v62, %v5427_v18  ;;  %v1311_v24 = vmul.f32 %v5466_v11, %v5416_v42  ;;  %v1261_v1 = vsel %vm1259_vm12, %v1260_v47, %v1258_v39 }
 0x21a   :  { %v2103_v48 = vand.u32 2147483647, %v5427_v18  ;;  %v2105_v50 = vand.u32 2147483648, %v5427_v18  ;;  %v2545_v63 = vmul.f32 %v3765_v4, %v5429_v31  ;;  %v5494_v16 = vadd.f32 1e-06, %v1261_v1 }
 0x21b   :  { %v5496_v32 = vpop.eup %3766  ;;  %v2096_v41 = vsub.f32 1.0, %v2095_v55  ;;  %v2553_v61 = vand.u32 2147483647, %v5429_v31  ;;  %3768 = vrsqrt.f32 %v5475_v9  ;;  %v678_v21 = vsel %vm494_vm1, %v5486_v30, 0.0 }
 0x21c   :  { %v2546_v10 = vsub.f32 1.0, %v2545_v63  ;;  %3770 = vrcp.f32 %v5494_v16  ;;  %v5503_v44 = vmul.f32 0.05263158, %v1014_v57  ;;  %v669_v8 = vsel %vm494_vm1, %v5470_v15, 0.0  ;;  %679 = vadd.xlane.f32.xlu2 %v678_v21 }
 0x21d   :  { %v2097_v36 = vmul.f32 %v3763_v62, %v2096_v41  ;;  %vm2100_vm13 = vweird.f32 %v3763_v62  ;;  %v2555_v34 = vand.u32 2147483648, %v5429_v31  ;;  %v1312_v28 = vmul.f32 %v5466_v11, %v1311_v24 }
 0x21e   :  { %v5510_v0 = vmul.f32 %v5386_v56, %v1302_v20  ;;  %v2547_v5 = vmul.f32 %v3765_v4, %v2546_v10  ;;  %vm2550_vm14 = vweird.f32 %v3765_v4  ;;  %v1635_v6 = vmul.f32 %v5496_v32, %v5433_v14 }
 0x21f   :  { %v2098_v22 = vadd.f32 %v3763_v62, %v2097_v36  ;;  %vm2099_vm15 = vweird.f32 %v5427_v18  ;;  %vm2104_vm0 = vcmp.eq.f32.partialorder %v2103_v48, 8.507059e+37  ;;  %vm2549_vm2 = vweird.f32 %v5429_v31  ;;  %670 = vadd.xlane.f32.xlu1 %v669_v8  ;;  %v7242_v48 = vld [vmem:[#allocation2_spill] sm:$0xff] }
 0x220   :  { %vm2101_vm3 = vmor %vm2099_vm15, %vm2100_vm13  ;;  %v2106_v53 = vor.u32 1.1754944e-38, %v2105_v50  ;;  %v2548_v39 = vadd.f32 %v3765_v4, %v2547_v5  ;;  %vm2554_vm4 = vcmp.eq.f32.partialorder %v2553_v61, 8.507059e+37  ;;  %3772 = vrsqrt.f32 %v5503_v44  ;;  %v7243_v61 = vld [vmem:[#allocation3_spill] sm:$0xff] }
 0x221   :  { %v5517_v56 = vpop.eup %3768  ;;  %v2102_v47 = vsel %vm2101_vm3, %v3763_v62, %v2098_v22  ;;  %vm2551_vm5 = vmor %vm2549_vm2, %vm2550_vm14  ;;  %v2556_v20 = vor.u32 1.1754944e-38, %v2555_v34  ;;  %v1313_v55 = vmul.f32 0.5, %v1312_v28  ;;  %vm1269_vm6 = vcmp.eq.f32.partialorder %v5122_v13, inf  ;;  %v488_v28 = vpop.f32.mrf.mxu2 }
 0x222   :  { %v3771_v24 = vpop.eup %3770  ;;  %v2107_v18 = vsel %vm2104_vm0, %v2106_v53, %v2102_v47  ;;  %v2552_v1 = vsel %vm2551_vm5, %v3765_v4, %v2548_v39  ;;  %v1636_v31 = vmul.f32 %v5496_v32, %v1635_v6  ;;  %v1270_v57 = vsel %vm1269_vm6, %v5122_v13, %v5444_v40  ;;  %v933_v4 = vpop.xlane.xlu1 %932 }
 0x223   :  { %v2942_v50 = vmul.f32 %v2107_v18, %v7242_v48  ;;  %v2557_v63 = vsel %vm2554_vm4, %v2556_v20, %v2552_v1  ;;  %v2110_v41 = vmul.f32 %v3771_v24, %v5494_v16  ;;  %v1272_v62 = vand.u32 2147483648, %v5122_v13  ;;  %v1017_v53 = vpop.xlane.xlu2 %1016  ;;  %v659_v1 = vpop.xlane.xlu0 %658 }
 0x224   :  { %v2972_v21 = vmul.f32 %v2557_v63, %v7243_v61  ;;  %v1695_v10 = vmul.f32 %v5517_v56, %v5475_v9  ;;  %vm1271_vm7 = vcmp.eq.f32.partialorder %v5122_v13, 0.0  ;;  %vm1617_vm8 = vcmp.eq.f32.partialorder %v5186_v37, inf }
 0x225   :  { %3623 = vmatmul.msk.f32.gmra.mxu1 %vm494_vm1, %v2942_v50  ;;  %v2111_v40 = vsub.f32 1.0, %v2110_v41  ;;  %v1273_v8 = vsel %vm1271_vm7, %v1272_v62, %v1270_v57  ;;  %v1618_v36 = vsel %vm1617_vm8, %v5186_v37, %v5461_v52  ;;  %v1620_v34 = vand.u32 2147483648, %v5186_v37 }
 0x226   :  { %v5535_v5 = vpop.eup %3772  ;;  %3653 = vmatmul.msk.f32.gmra.mxu3 %vm494_vm1, %v2972_v21  ;;  %v2118_v6 = vand.u32 2147483647, %v5494_v16  ;;  %v2120_v13 = vand.u32 2147483648, %v5494_v16  ;;  %v5540_v22 = vadd.f32 1e-06, %v1273_v8  ;;  %vm1619_vm9 = vcmp.eq.f32.partialorder %v5186_v37, 0.0 }
 0x227   :  { %v2112_v39 = vmul.f32 %v3771_v24, %v2111_v40  ;;  %vm2115_vm10 = vweird.f32 %v3771_v24  ;;  %v1621_v47 = vsel %vm1619_vm9, %v1620_v34, %v1618_v36  ;;  %v5543_v52 = vmul.f32 0.05263158, %v933_v4 }
 0x228   :  { %v1314_v20 = vsub.f32 1.5, %v1313_v55  ;;  %v5545_v18 = vmul.f32 0.5, %v1636_v31  ;;  %vm2114_vm11 = vweird.f32 %v5494_v16  ;;  %3774 = vrcp.f32 %v5540_v22 }
 0x229   :  { %v2113_v57 = vadd.f32 %v3771_v24, %v2112_v39  ;;  %v1696_v48 = vmul.f32 %v5517_v56, %v1695_v10  ;;  %v1647_v37 = vmul.f32 %v5535_v5, %v5503_v44  ;;  %v5552_v50 = vadd.f32 1e-06, %v1621_v47  ;;  %vm2116_vm12 = vmor %vm2114_vm11, %vm2115_vm10  ;;  %v7244_v10 = vld [vmem:[#allocation4_spill] sm:$0xff] }
 0x22a   :  { %v5556_v63 = vmul.f32 %v5481_v54, %v5313_v58  ;;  %vm2119_vm13 = vcmp.eq.f32.partialorder %v2118_v6, 8.507059e+37  ;;  %v2121_v55 = vor.u32 1.1754944e-38, %v2120_v13  ;;  %3776 = vrsqrt.f32 %v5543_v52  ;;  %v7245_v39 = vld [vmem:[#allocation16_spill] sm:$0xff] }
 0x22b   :  { %v2117_v16 = vsel %vm2116_vm12, %v3771_v24, %v2113_v57  ;;  %v2135_v31 = vand.u32 2147483648, %v5540_v22  ;;  %3778 = vrcp.f32 %v5552_v50  ;;  %v748_v41 = vmul.f32 %v4326_v29, %v659_v1 }
 0x22c   :  { %v5564_v62 = vmul.f32 %v5510_v0, %v5358_v38  ;;  %v5567_v61 = vmul.f32 %v5466_v11, %v1314_v20  ;;  %v2122_v21 = vsel %vm2119_vm13, %v2121_v55, %v2117_v16  ;;  %v5571_v40 = vmul.f32 0.5, %v1696_v48  ;;  %v491_v20 = vpop.f32.mrf.mxu2 }
 0x22d   :  { %v2943_v4 = vmul.f32 %v2122_v21, %v7244_v10  ;;  %v1648_v24 = vmul.f32 %v5535_v5, %v1647_v37  ;;  %v5575_v8 = vadd.f32 %v5422_v2, %v488_v28  ;;  %vm2129_vm14 = vweird.f32 %v5540_v22  ;;  %v1029_v28 = vpop.xlane.xlu1 %1028  ;;  %v1020_v37 = vpop.xlane.xlu2 %1019 }
 0x22e   :  { %v3775_v36 = vpop.eup %3774  ;;  %v2133_v0 = vand.u32 2147483647, %v5540_v22  ;;  %v5579_v34 = vmul.f32 0.05263158, %v1017_v53  ;;  %v875_v11 = vmul.f32 %v5248_v17, %v5248_v17  ;;  %v2136_v13 = vor.u32 1.1754944e-38, %v2135_v31 }
 0x22f   :  { %3624 = vmatmul.msk.f32.gmra.mxu1 %vm494_vm1, %v2943_v4  ;;  %v2125_v6 = vmul.f32 %v3775_v36, %v5540_v22  ;;  %v5586_v47 = vsub.f32 %v7245_v39, %v748_v41  ;;  %vm1281_vm15 = vcmp.eq.f32.partialorder %v5170_v46, inf  ;;  %v681_v57 = vsel %vm494_vm1, %v5575_v8, 0.0 }
 0x230   :  { %v5589_v1 = vpop.eup %3776  ;;  %3780 = vrsqrt.f32 %v5579_v34  ;;  %v1045_v53 = vsel %vm494_vm1, %v875_v11, 0.0  ;;  %v1282_v48 = vsel %vm1281_vm15, %v5170_v46, %v5456_v12  ;;  %v2568_v31 = vand.u32 2147483647, %v5552_v50  ;;  %682 = vadd.xlane.f32.xlu2 %v681_v57 }
 0x231   :  { %7246 = vst [vmem:[#allocation2_spill] sm:$0xff] %v5586_v47  ;;  %v3779_v55 = vpop.eup %3778  ;;  %v2126_v16 = vsub.f32 1.0, %v2125_v6  ;;  %v1323_v41 = vmul.f32 %v5589_v1, %v5543_v52  ;;  %1046 = vadd.xlane.f32.xlu1 %v1045_v53  ;;  %v1284_v21 = vand.u32 2147483648, %v5170_v46  ;;  %vm1283_vm0 = vcmp.eq.f32.partialorder %v5170_v46, 0.0 }
 0x232   :  { %v2560_v10 = vmul.f32 %v3779_v55, %v5552_v50  ;;  %v5603_v4 = vmul.f32 0.05263158, %v1029_v28  ;;  %v5606_v12 = vadd.f32 %v5422_v2, %v491_v20  ;;  %vm2130_vm2 = vweird.f32 %v3775_v36 }
 0x233   :  { %v2127_v11 = vmul.f32 %v3775_v36, %v2126_v16  ;;  %v1285_v6 = vsel %vm1283_vm0, %v1284_v21, %v1282_v48  ;;  %v5608_v39 = vmul.f32 0.05263158, %v1020_v37  ;;  %v876_v53 = vmul.f32 %v5586_v47, %v5586_v47  ;;  %vm2131_vm4 = vmor %vm2129_vm14, %vm2130_vm2 }
 0x234   :  { %v2561_v54 = vsub.f32 1.0, %v2560_v10  ;;  %v5610_v17 = vadd.f32 1e-06, %v1285_v6  ;;  %3782 = vrsqrt.f32 %v5603_v4  ;;  %vm2565_vm3 = vweird.f32 %v3779_v55 }
 0x235   :  { %v2128_v57 = vadd.f32 %v3775_v36, %v2127_v11  ;;  %v2570_v46 = vand.u32 2147483648, %v5552_v50  ;;  %3784 = vrsqrt.f32 %v5608_v39  ;;  %v1324_v20 = vmul.f32 %v5589_v1, %v1323_v41  ;;  %v7247_v41 = vld [vmem:[#allocation5_spill] sm:$0xff] }
 0x236   :  { %v5617_v2 = vpop.eup %3780  ;;  %v2562_v28 = vmul.f32 %v3779_v55, %v2561_v54  ;;  %3786 = vrcp.f32 %v5610_v17  ;;  %v684_v48 = vsel %vm494_vm1, %v5606_v12, 0.0  ;;  %v1698_v37 = vsub.f32 1.5, %v5571_v40 }
 0x237   :  { %v2132_v16 = vsel %vm2131_vm4, %v3775_v36, %v2128_v57  ;;  %vm2134_vm5 = vcmp.eq.f32.partialorder %v2133_v0, 8.507059e+37  ;;  %v1659_v21 = vmul.f32 %v5617_v2, %v5579_v34  ;;  %vm2564_vm6 = vweird.f32 %v5552_v50 }
 0x238   :  { %v2137_v10 = vsel %vm2134_vm5, %v2136_v13, %v2132_v16  ;;  %v2563_v11 = vadd.f32 %v3779_v55, %v2562_v28  ;;  %v1048_v22 = vsel %vm494_vm1, %v876_v53, 0.0  ;;  %v1649_v54 = vmul.f32 0.5, %v1648_v24  ;;  %vm2566_vm7 = vmor %vm2564_vm6, %vm2565_vm3  ;;  %685 = vadd.xlane.f32.xlu2 %v684_v48  ;;  %v7249_v48 = vld [vmem:[#allocation7_spill] sm:$0xff] }
 0x239   :  { %v2944_v6 = vmul.f32 %v2137_v10, %v7247_v41  ;;  %v2571_v47 = vor.u32 1.1754944e-38, %v2570_v46  ;;  %v1660_v59 = vmul.f32 %v5617_v2, %v1659_v21  ;;  %1049 = vadd.xlane.f32.xlu1 %v1048_v22  ;;  %v5637_v36 = vmul.f32 %v5567_v61, %v5416_v42 }
 0x23a   :  { %v5633_v40 = vpop.eup %3782  ;;  %v2567_v0 = vsel %vm2566_vm7, %v3779_v55, %v2563_v11  ;;  %vm2569_vm8 = vcmp.eq.f32.partialorder %v2568_v31, 8.507059e+37  ;;  %v1325_v50 = vmul.f32 0.5, %v1324_v20  ;;  %v7248_v24 = vsub.f32 1.5, %v5545_v18 }
 0x23b   :  { %v5639_v13 = vpop.eup %3784  ;;  %v1699_v57 = vmul.f32 %v5517_v56, %v1698_v37  ;;  %3625 = vmatmul.msk.f32.gmra.mxu1 %vm494_vm1, %v2944_v6  ;;  %v2572_v46 = vsel %vm2569_vm8, %v2571_v47, %v2567_v0  ;;  %vm1293_vm9 = vcmp.eq.f32.partialorder %v5311_v35, inf  ;;  %v1661_v16 = vmul.f32 0.5, %v1660_v59  ;;  %v936_v56 = vpop.xlane.xlu1 %935 }
 0x23c   :  { %v1639_v53 = vmul.f32 %v5496_v32, %v7248_v24  ;;  %v3787_v28 = vpop.eup %3786  ;;  %v2973_v61 = vmul.f32 %v2572_v46, %v7249_v48  ;;  %v1294_v55 = vsel %vm1293_vm9, %v5311_v35, %v5478_v7  ;;  %v1296_v31 = vand.u32 2147483648, %v5311_v35  ;;  %v1023_v7 = vpop.xlane.xlu2 %1022 }
 0x23d   :  { %v1650_v20 = vsub.f32 1.5, %v1649_v54  ;;  %v2140_v18 = vmul.f32 %v3787_v28, %v5610_v17  ;;  %v2148_v32 = vand.u32 2147483647, %v5610_v17  ;;  %vm1295_vm10 = vcmp.eq.f32.partialorder %v5311_v35, 0.0 }
 0x23e   :  { %3654 = vmatmul.msk.f32.gmra.mxu3 %vm494_vm1, %v2973_v61  ;;  %v1326_v47 = vsub.f32 1.5, %v1325_v50  ;;  %v2150_v37 = vand.u32 2147483648, %v5610_v17  ;;  %v1707_v59 = vmul.f32 %v5633_v40, %v5603_v4  ;;  %v1297_v21 = vsel %vm1295_vm10, %v1296_v31, %v1294_v55 }
 0x23f   :  { %v2141_v10 = vsub.f32 1.0, %v2140_v18  ;;  %v1671_v11 = vmul.f32 %v5639_v13, %v5608_v39  ;;  %v5660_v22 = vadd.f32 1e-06, %v1297_v21  ;;  %vm1629_vm11 = vcmp.eq.f32.partialorder %v5313_v58, inf }
 0x240   :  { %v1662_v35 = vsub.f32 1.5, %v1661_v16  ;;  %vm2145_vm12 = vweird.f32 %v3787_v28  ;;  %v1630_v54 = vsel %vm1629_vm11, %v5313_v58, %v5556_v63  ;;  %v5665_v41 = vmul.f32 0.05263158, %v936_v56  ;;  %v7250_v56 = vld [vmem:[#allocation6_spill] sm:$0xff] }
 0x241   :  { %v2142_v6 = vmul.f32 %v3787_v28, %v2141_v10  ;;  %3788 = vrcp.f32 %v5660_v22  ;;  %v1632_v0 = vand.u32 2147483648, %v5313_v58  ;;  %v5669_v50 = vmul.f32 0.05263158, %v1023_v7 }
 0x242   :  { %v1651_v24 = vmul.f32 %v5535_v5, %v1650_v20  ;;  %vm2144_vm13 = vweird.f32 %v5610_v17  ;;  %v1708_v46 = vmul.f32 %v5633_v40, %v1707_v59  ;;  %vm1631_vm14 = vcmp.eq.f32.partialorder %v5313_v58, 0.0 }
 0x243   :  { %v2143_v48 = vadd.f32 %v3787_v28, %v2142_v6  ;;  %v1672_v63 = vmul.f32 %v5639_v13, %v1671_v11  ;;  %v1633_v61 = vsel %vm1631_vm14, %v1632_v0, %v1630_v54  ;;  %3790 = vrsqrt.f32 %v5665_v41  ;;  %vm2146_vm15 = vmor %vm2144_vm13, %vm2145_vm12  ;;  %v939_v59 = vpop.xlane.xlu1 %938 }
 0x244   :  { %v1327_v16 = vmul.f32 %v5589_v1, %v1326_v47  ;;  %vm2149_vm0 = vcmp.eq.f32.partialorder %v2148_v32, 8.507059e+37  ;;  %v2151_v55 = vor.u32 1.1754944e-38, %v2150_v37  ;;  %v5679_v31 = vadd.f32 1e-06, %v1633_v61 }
 0x245   :  { %v1663_v17 = vmul.f32 %v5617_v2, %v1662_v35  ;;  %v2147_v5 = vsel %vm2146_vm15, %v3787_v28, %v2143_v48  ;;  %3792 = vrsqrt.f32 %v5669_v50  ;;  %v848_v58 = vmul.f32 %v5448_v19, %v5448_v19 }
 0x246   :  { %v5686_v20 = vmul.f32 %v1639_v53, %v5433_v14  ;;  %v5689_v18 = vmul.f32 %v1699_v57, %v5475_v9  ;;  %v2152_v1 = vsel %vm2149_vm0, %v2151_v55, %v2147_v5  ;;  %3794 = vrcp.f32 %v5679_v31 }
 0x247   :  { %v3789_v32 = vpop.eup %3788  ;;  %v2945_v47 = vmul.f32 %v2152_v1, %v7250_v56  ;;  %v1709_v37 = vmul.f32 0.5, %v1708_v46  ;;  %v5693_v2 = vmul.f32 0.5, %v1672_v63  ;;  %v964_v28 = vsel %vm494_vm1, %v848_v58, 0.0  ;;  %v1035_v46 = vpop.xlane.xlu0 %1034 }
 0x248   :  { %v5697_v21 = vmul.f32 %v1651_v24, %v5503_v44  ;;  %v5700_v53 = vmul.f32 %v1327_v16, %v5543_v52  ;;  %v2155_v57 = vmul.f32 %v3789_v32, %v5660_v22  ;;  %965 = vadd.xlane.f32.xlu2 %v964_v28  ;;  %vm1305_vm2 = vcmp.eq.f32.partialorder %v5358_v38, inf  ;;  %v1032_v56 = vpop.xlane.xlu2 %1031 }
 0x249   :  { %v5704_v7 = vpop.eup %3790  ;;  %v5707_v10 = vmul.f32 %v1663_v17, %v5579_v34  ;;  %3626 = vmatmul.msk.f32.gmra.mxu1 %vm494_vm1, %v2945_v47  ;;  %v2163_v11 = vand.u32 2147483647, %v5660_v22  ;;  %v1306_v35 = vsel %vm1305_vm2, %v5358_v38, %v5564_v62  ;;  %v1308_v54 = vand.u32 2147483648, %v5358_v38 }
 0x24a   :  { %v2156_v6 = vsub.f32 1.0, %v2155_v57  ;;  %v2165_v0 = vand.u32 2147483648, %v5660_v22  ;;  %vm1307_vm3 = vcmp.eq.f32.partialorder %v5358_v38, 0.0  ;;  %v5716_v24 = vmul.f32 0.05263158, %v939_v59 }
 0x24b   :  { %v5718_v48 = vpop.eup %3792  ;;  %v1710_v63 = vsub.f32 1.5, %v1709_v37  ;;  %v1674_v61 = vsub.f32 1.5, %v5693_v2  ;;  %v1335_v16 = vmul.f32 %v5704_v7, %v5665_v41  ;;  %v1309_v55 = vsel %vm1307_vm3, %v1308_v54, %v1306_v35 }
 0x24c   :  { %v3795_v62 = vpop.eup %3794  ;;  %v2157_v17 = vmul.f32 %v3789_v32, %v2156_v6  ;;  %vm2160_vm4 = vweird.f32 %v3789_v32  ;;  %v1683_v5 = vmul.f32 %v5718_v48, %v5669_v50  ;;  %v5725_v58 = vadd.f32 1e-06, %v1309_v55  ;;  %v7251_v55 = vld [vmem:[#allocation9_spill] sm:$0xff] }
 0x24d   :  { %vm2159_vm5 = vweird.f32 %v5660_v22  ;;  %v2575_v38 = vmul.f32 %v3795_v62, %v5679_v31  ;;  %3796 = vrsqrt.f32 %v5716_v24  ;;  %v5730_v1 = vmul.f32 0.05263158, %v1035_v46 }
 0x24e   :  { %v2158_v47 = vadd.f32 %v3789_v32, %v2157_v17  ;;  %vm2164_vm6 = vcmp.eq.f32.partialorder %v2163_v11, 8.507059e+37  ;;  %v2166_v37 = vor.u32 1.1754944e-38, %v2165_v0  ;;  %3798 = vrcp.f32 %v5725_v58  ;;  %vm2161_vm7 = vmor %vm2159_vm5, %vm2160_vm4 }
 0x24f   :  { %v2576_v28 = vsub.f32 1.0, %v2575_v38  ;;  %v2583_v59 = vand.u32 2147483647, %v5679_v31  ;;  %v2585_v57 = vand.u32 2147483648, %v5679_v31  ;;  %v1336_v22 = vmul.f32 %v5704_v7, %v1335_v16 }
 0x250   :  { %v2162_v35 = vsel %vm2161_vm7, %v3789_v32, %v2158_v47  ;;  %v1684_v54 = vmul.f32 %v5718_v48, %v1683_v5  ;;  %v5737_v6 = vmul.f32 0.05263158, %v1032_v56  ;;  %vm1317_vm8 = vcmp.eq.f32.partialorder %v5416_v42, inf }
 0x251   :  { %v2167_v46 = vsel %vm2164_vm6, %v2166_v37, %v2162_v35  ;;  %v2577_v11 = vmul.f32 %v3795_v62, %v2576_v28  ;;  %vm2580_vm9 = vweird.f32 %v3795_v62  ;;  %3800 = vrsqrt.f32 %v5730_v1 }
 0x252   :  { %v1711_v0 = vmul.f32 %v5633_v40, %v1710_v63  ;;  %v2946_v17 = vmul.f32 %v2167_v46, %v7251_v55  ;;  %vm2579_vm10 = vweird.f32 %v5679_v31  ;;  %v1318_v32 = vsel %vm1317_vm8, %v5416_v42, %v5637_v36  ;;  %v7252_v46 = vld [vmem:[#allocation8_spill] sm:$0xff] }
 0x253   :  { %v5746_v16 = vpop.eup %3796  ;;  %v2578_v5 = vadd.f32 %v3795_v62, %v2577_v11  ;;  %vm2584_vm11 = vcmp.eq.f32.partialorder %v2583_v59, 8.507059e+37  ;;  %v1337_v38 = vmul.f32 0.5, %v1336_v22  ;;  %v1320_v56 = vand.u32 2147483648, %v5416_v42  ;;  %vm2581_vm12 = vmor %vm2579_vm10, %vm2580_vm9 }
 0x254   :  { %v3799_v47 = vpop.eup %3798  ;;  %3627 = vmatmul.msk.f32.gmra.mxu1 %vm494_vm1, %v2946_v17  ;;  %v2586_v37 = vor.u32 1.1754944e-38, %v2585_v57  ;;  %v1685_v40 = vmul.f32 0.5, %v1684_v54  ;;  %v1347_v63 = vmul.f32 %v5746_v16, %v5716_v24  ;;  %vm1319_vm13 = vcmp.eq.f32.partialorder %v5416_v42, 0.0  ;;  %v942_v57 = vpop.xlane.xlu1 %941 }
 0x255   :  { %v2582_v31 = vsel %vm2581_vm12, %v3795_v62, %v2578_v5  ;;  %v2170_v36 = vmul.f32 %v3799_v47, %v5725_v58  ;;  %3802 = vrsqrt.f32 %v5737_v6  ;;  %v1321_v28 = vsel %vm1319_vm13, %v1320_v56, %v1318_v32 }
 0x256   :  { %v2587_v59 = vsel %vm2584_vm11, %v2586_v37, %v2582_v31  ;;  %v2180_v22 = vand.u32 2147483648, %v5725_v58  ;;  %v5756_v35 = vadd.f32 1e-06, %v1321_v28  ;;  %vm1641_vm14 = vcmp.eq.f32.partialorder %v5433_v14, inf }
 0x257   :  { %v5759_v54 = vpop.eup %3800  ;;  %v2974_v11 = vmul.f32 %v2587_v59, %v7252_v46  ;;  %v1338_v55 = vsub.f32 1.5, %v1337_v38  ;;  %v2171_v42 = vsub.f32 1.0, %v2170_v36  ;;  %v1642_v62 = vsel %vm1641_vm14, %v5433_v14, %v5686_v20 }
 0x258   :  { %v1686_v17 = vsub.f32 1.5, %v1685_v40  ;;  %v1348_v32 = vmul.f32 %v5746_v16, %v1347_v63  ;;  %3804 = vrcp.f32 %v5756_v35  ;;  %v1644_v5 = vand.u32 2147483648, %v5433_v14 }
 0x259   :  { %3655 = vmatmul.msk.f32.gmra.mxu3 %vm494_vm1, %v2974_v11  ;;  %v2172_v56 = vmul.f32 %v3799_v47, %v2171_v42  ;;  %vm2175_vm15 = vweird.f32 %v3799_v47  ;;  %v2178_v37 = vand.u32 2147483647, %v5725_v58  ;;  %vm1643_vm0 = vcmp.eq.f32.partialorder %v5433_v14, 0.0 }
 0x25a   :  { %v1675_v38 = vmul.f32 %v5639_v13, %v1674_v61  ;;  %v1731_v20 = vmul.f32 %v5759_v54, %v5730_v1  ;;  %v1645_v40 = vsel %vm1643_vm0, %v1644_v5, %v1642_v62  ;;  %v5775_v63 = vmul.f32 0.05263158, %v942_v57 }
 0x25b   :  { %v5777_v31 = vpop.eup %3802  ;;  %v1339_v36 = vmul.f32 %v5704_v7, %v1338_v55  ;;  %v2173_v28 = vadd.f32 %v3799_v47, %v2172_v56  ;;  %vm2174_vm2 = vweird.f32 %v5725_v58  ;;  %v2181_v59 = vor.u32 1.1754944e-38, %v2180_v22 }
 0x25c   :  { %v1687_v14 = vmul.f32 %v5718_v48, %v1686_v17  ;;  %vm2176_vm3 = vmor %vm2174_vm2, %vm2175_vm15  ;;  %v1349_v2 = vmul.f32 0.5, %v1348_v32  ;;  %v5782_v46 = vadd.f32 1e-06, %v1645_v40  ;;  %3806 = vrsqrt.f32 %v5775_v63  ;;  %v945_v5 = vpop.xlane.xlu1 %944 }
 0x25d   :  { %v5786_v13 = vmul.f32 %v1711_v0, %v5603_v4  ;;  %v2177_v61 = vsel %vm2176_vm3, %v3799_v47, %v2173_v28  ;;  %vm2179_vm4 = vcmp.eq.f32.partialorder %v2178_v37, 8.507059e+37  ;;  %v2193_v57 = vand.u32 2147483647, %v5756_v35  ;;  %v7253_v0 = vld [vmem:[#allocation10_spill] sm:$0xff] }
 0x25e   :  { %v3805_v7 = vpop.eup %3804  ;;  %v2182_v11 = vsel %vm2179_vm4, %v2181_v59, %v2177_v61  ;;  %v1732_v58 = vmul.f32 %v5759_v54, %v1731_v20  ;;  %v1719_v48 = vmul.f32 %v5777_v31, %v5737_v6  ;;  %3808 = vrcp.f32 %v5782_v46 }
 0x25f   :  { %v5794_v22 = vmul.f32 %v1675_v38, %v5608_v39  ;;  %v5797_v55 = vmul.f32 %v1339_v36, %v5665_v41  ;;  %v2947_v47 = vmul.f32 %v2182_v11, %v7253_v0  ;;  %v2185_v42 = vmul.f32 %v3805_v7, %v5756_v35  ;;  %v581_v38 = vpop.xlane.xlu2 %580 }
 0x260   :  { %v5802_v62 = vmul.f32 %v1687_v14, %v5669_v50  ;;  %v1350_v17 = vsub.f32 1.5, %v1349_v2  ;;  %v2195_v32 = vand.u32 2147483648, %v5756_v35  ;;  %vm1653_vm5 = vcmp.eq.f32.partialorder %v5503_v44, inf }
 0x261   :  { %3628 = vmatmul.msk.f32.gmra.mxu1 %vm494_vm1, %v2947_v47  ;;  %v2186_v56 = vsub.f32 1.0, %v2185_v42  ;;  %vm2189_vm6 = vweird.f32 %v5756_v35  ;;  %vm5808_vm7 = vcmp.eq.f32.partialorder %v2193_v57, 8.507059e+37  ;;  %v1654_v20 = vsel %vm1653_vm5, %v5503_v44, %v5697_v21 }
 0x262   :  { %v5814_v40 = vpop.eup %3806  ;;  %v5816_v36 = vmul.f32 0.5, %v1732_v58  ;;  %v1720_v28 = vmul.f32 %v5777_v31, %v1719_v48  ;;  %vm2190_vm8 = vweird.f32 %v3805_v7  ;;  %v1656_v59 = vand.u32 2147483648, %v5503_v44 }
 0x263   :  { %v2187_v14 = vmul.f32 %v3805_v7, %v2186_v56  ;;  %v1359_v2 = vmul.f32 %v5814_v40, %v5775_v63  ;;  %vm1655_vm9 = vcmp.eq.f32.partialorder %v5503_v44, 0.0  ;;  %v5823_v61 = vmul.f32 0.05263158, %v945_v5  ;;  %vm2191_vm11 = vmor %vm2189_vm6, %vm2190_vm8 }
 0x264   :  { %v3809_v57 = vpop.eup %3808  ;;  %v1351_v21 = vmul.f32 %v5746_v16, %v1350_v17  ;;  %v2196_v11 = vor.u32 1.1754944e-38, %v2195_v32  ;;  %v722_v58 = vmul.f32 %v4326_v29, %v581_v38  ;;  %v1657_v0 = vsel %vm1655_vm9, %v1656_v59, %v1654_v20  ;;  %v7256_v59 = vld [vmem:[#allocation11_spill] sm:$0xff] }
 0x265   :  { %v2188_v47 = vadd.f32 %v3805_v7, %v2187_v14  ;;  %v2590_v48 = vmul.f32 %v3809_v57, %v5782_v46  ;;  %vm1329_vm10 = vcmp.eq.f32.partialorder %v5543_v52, inf  ;;  %v1332_v42 = vand.u32 2147483648, %v5543_v52 }
 0x266   :  { %v1360_v44 = vmul.f32 %v5814_v40, %v1359_v2  ;;  %v5834_v5 = vadd.f32 1e-06, %v1657_v0  ;;  %v1330_v16 = vsel %vm1329_vm10, %v5543_v52, %v5700_v53  ;;  %vm1331_vm12 = vcmp.eq.f32.partialorder %v5543_v52, 0.0 }
 0x267   :  { %v2192_v17 = vsel %vm2191_vm11, %v3805_v7, %v2188_v47  ;;  %v2591_v32 = vsub.f32 1.0, %v2590_v48  ;;  %3810 = vrsqrt.f32 %v5823_v61  ;;  %v1333_v56 = vsel %vm1331_vm12, %v1332_v42, %v1330_v16 }
 0x268   :  { %v2197_v38 = vsel %vm5808_vm7, %v2196_v11, %v2192_v17  ;;  %v2598_v35 = vand.u32 2147483647, %v5782_v46  ;;  %v2600_v20 = vand.u32 2147483648, %v5782_v46  ;;  %3812 = vrcp.f32 %v5834_v5  ;;  %v578_v17 = vpop.xlane.xlu1 %577 }
 0x269   :  { %v2948_v14 = vmul.f32 %v2197_v38, %v7256_v59  ;;  %v2592_v2 = vmul.f32 %v3809_v57, %v2591_v32  ;;  %vm2595_vm13 = vweird.f32 %v3809_v57  ;;  %vm1665_vm14 = vcmp.eq.f32.partialorder %v5579_v34, inf  ;;  %v7257_v59 = vld [vmem:[#allocation12_spill] sm:$0xff] }
 0x26a   :  { %v1361_v53 = vmul.f32 0.5, %v1360_v44  ;;  %v5848_v7 = vadd.f32 1e-06, %v1333_v56  ;;  %v1666_v37 = vsel %vm1665_vm14, %v5579_v34, %v5707_v10  ;;  %v5852_v11 = vmul.f32 0.5, %v1720_v28 }
 0x26b   :  { %3629 = vmatmul.msk.f32.gmra.mxu1 %vm494_vm1, %v2948_v14  ;;  %v2593_v0 = vadd.f32 %v3809_v57, %v2592_v2  ;;  %vm2594_vm15 = vweird.f32 %v5782_v46  ;;  %v1668_v47 = vand.u32 2147483648, %v5579_v34  ;;  %v5858_v48 = vmul.f32 %v1351_v21, %v5716_v24 }
 0x26c   :  { %vm2596_vm0 = vmor %vm2594_vm15, %vm2595_vm13  ;;  %v2601_v42 = vor.u32 1.1754944e-38, %v2600_v20  ;;  %3814 = vrcp.f32 %v5848_v7  ;;  %vm1667_vm2 = vcmp.eq.f32.partialorder %v5579_v34, 0.0  ;;  %vm2599_vm3 = vcmp.eq.f32.partialorder %v2598_v35, 8.507059e+37  ;;  %v7258_v35 = vld [vmem:[#allocation25_spill] sm:$0xff] }
 0x26d   :  { %v5862_v44 = vpop.eup %3810  ;;  %v2597_v10 = vsel %vm2596_vm0, %v3809_v57, %v2593_v0  ;;  %v2613_v28 = vand.u32 2147483647, %v5834_v5  ;;  %v1669_v16 = vsel %vm1667_vm2, %v1668_v47, %v1666_v37  ;;  %v1362_v56 = vsub.f32 1.5, %v1361_v53 }
 0x26e   :  { %v3813_v46 = vpop.eup %3812  ;;  %v2602_v32 = vsel %vm2599_vm3, %v2601_v42, %v2597_v10  ;;  %v2615_v21 = vand.u32 2147483648, %v5834_v5  ;;  %v5866_v38 = vadd.f32 1e-06, %v1669_v16  ;;  %v2208_v57 = vand.u32 2147483647, %v5848_v7 }
 0x26f   :  { %v2975_v14 = vmul.f32 %v2602_v32, %v7257_v59  ;;  %v2605_v34 = vmul.f32 %v3813_v46, %v5834_v5  ;;  %v5873_v2 = vsub.f32 %v7258_v35, %v722_v58  ;;  %vm2609_vm4 = vweird.f32 %v5834_v5  ;;  %v948_v58 = vpop.xlane.xlu2 %947  ;;  %v7263_v35 = vld [vmem:[#allocation28_spill] sm:$0xff] }
 0x270   :  { %v2210_v37 = vand.u32 2147483648, %v5848_v7  ;;  %3816 = vrcp.f32 %v5866_v38  ;;  %vm5879_vm5 = vcmp.eq.f32.partialorder %v2613_v28, 8.507059e+37  ;;  %v1371_v47 = vmul.f32 %v5862_v44, %v5823_v61 }
 0x271   :  { %3656 = vmatmul.msk.f32.gmra.mxu3 %vm494_vm1, %v2975_v14  ;;  %v2606_v53 = vsub.f32 1.0, %v2605_v34  ;;  %v721_v42 = vmul.f32 %v4326_v29, %v578_v17  ;;  %v5887_v16 = vmul.f32 %v5814_v40, %v1362_v56  ;;  %v2616_v32 = vor.u32 1.1754944e-38, %v2615_v21 }
 0x272   :  { %v3815_v10 = vpop.eup %3814  ;;  %vm2204_vm6 = vweird.f32 %v5848_v7  ;;  %vm1677_vm7 = vcmp.eq.f32.partialorder %v5608_v39, inf  ;;  %vm2610_vm8 = vweird.f32 %v3813_v46  ;;  %vm5892_vm9 = vcmp.eq.f32.partialorder %v2208_v57, 8.507059e+37 }
 0x273   :  { %v2607_v59 = vmul.f32 %v3813_v46, %v2606_v53  ;;  %v2200_v28 = vmul.f32 %v3815_v10, %v5848_v7  ;;  %v1678_v17 = vsel %vm1677_vm7, %v5608_v39, %v5794_v22  ;;  %v2211_v34 = vor.u32 1.1754944e-38, %v2210_v37  ;;  %vm2611_vm11 = vmor %vm2609_vm4, %vm2610_vm8 }
 0x274   :  { %v5899_v40 = vsub.f32 %v7263_v35, %v721_v42  ;;  %v1680_v56 = vand.u32 2147483648, %v5608_v39  ;;  %v5902_v21 = vmul.f32 0.05263158, %v948_v58  ;;  %v1372_v53 = vmul.f32 %v5862_v44, %v1371_v47 }
 0x275   :  { %v2608_v52 = vadd.f32 %v3813_v46, %v2607_v59  ;;  %v2201_v20 = vsub.f32 1.0, %v2200_v28  ;;  %vm1679_vm10 = vcmp.eq.f32.partialorder %v5608_v39, 0.0  ;;  %v2628_v22 = vand.u32 2147483647, %v5866_v38  ;;  %v662_v59 = vpop.xlane.xlu1 %661  ;;  %v5913_v28 = vpop.f32.mrf.mxu1 }
 0x276   :  { %7264 = vst [vmem:[#allocation3_spill] sm:$0xff] %v5899_v40  ;;  %v3817_v57 = vpop.eup %3816  ;;  %v1681_v37 = vsel %vm1679_vm10, %v1680_v56, %v1678_v17  ;;  %3818 = vrsqrt.f32 %v5902_v21  ;;  %v849_v42 = vmul.f32 %v5899_v40, %v5899_v40  ;;  %vm2205_vm12 = vweird.f32 %v3815_v10  ;;  %v7265_v56 = vld [vmem:[#allocation13_spill] sm:$0xff] }
 0x277   :  { %v2612_v58 = vsel %vm2611_vm11, %v3813_v46, %v2608_v52  ;;  %v2202_v35 = vmul.f32 %v3815_v10, %v2201_v20  ;;  %v2620_v47 = vmul.f32 %v3817_v57, %v5866_v38  ;;  %v2630_v5 = vand.u32 2147483648, %v5866_v38  ;;  %vm2206_vm14 = vmor %vm2204_vm6, %vm2205_vm12 }
 0x278   :  { %v2617_v39 = vsel %vm5879_vm5, %v2616_v32, %v2612_v58  ;;  %v5918_v19 = vadd.f32 1e-06, %v1681_v37  ;;  %v967_v17 = vsel %vm494_vm1, %v849_v42, 0.0  ;;  %vm1341_vm13 = vcmp.eq.f32.partialorder %v5665_v41, inf }
 0x279   :  { %v2976_v23 = vmul.f32 %v2617_v39, %v7265_v56  ;;  %v2203_v40 = vadd.f32 %v3815_v10, %v2202_v35  ;;  %v2621_v52 = vsub.f32 1.0, %v2620_v47  ;;  %968 = vadd.xlane.f32.xlu0 %v967_v17  ;;  %vm2624_vm15 = vweird.f32 %v5866_v38 }
 0x27a   :  { %3820 = vrcp.f32 %v5918_v19  ;;  %v749_v46 = vmul.f32 %v4326_v29, %v662_v59  ;;  %v1342_v20 = vsel %vm1341_vm13, %v5665_v41, %v5797_v55  ;;  %vm2625_vm0 = vweird.f32 %v3817_v57  ;;  %v7268_v55 = vld [vmem:[#allocation20_spill] sm:$0xff]  ;;  %v7269_v59 = vld [vmem:[#allocation31_spill] sm:$0xff] }
 0x27b   :  { %3657 = vmatmul.msk.f32.gmra.mxu3 %vm494_vm1, %v2976_v23  ;;  %v2207_v0 = vsel %vm2206_vm14, %v3815_v10, %v2203_v40  ;;  %v2622_v32 = vmul.f32 %v3817_v57, %v2621_v52  ;;  %v1344_v37 = vand.u32 2147483648, %v5665_v41  ;;  %v5934_v7 = vmul.f32 0.5, %v1372_v53  ;;  %vm2626_vm4 = vmor %vm2624_vm15, %vm2625_vm0 }
 0x27c   :  { %v5932_v42 = vpop.eup %3818  ;;  %v2212_v58 = vsel %vm5892_vm9, %v2211_v34, %v2207_v0  ;;  %vm5938_vm2 = vcmp.eq.f32.partialorder %v2628_v22, 8.507059e+37  ;;  %vm1343_vm3 = vcmp.eq.f32.partialorder %v5665_v41, 0.0  ;;  %v2631_v40 = vor.u32 1.1754944e-38, %v2630_v5  ;;  %v665_v34 = vpop.xlane.xlu2 %664  ;;  %v7272_v0 = vld [vmem:[#allocation15_spill] sm:$0xff] }
 0x27d   :  { %v2949_v23 = vmul.f32 %v2212_v58, %v7268_v55  ;;  %v2623_v10 = vadd.f32 %v3817_v57, %v2622_v32  ;;  %v1345_v47 = vsel %vm1343_vm3, %v1344_v37, %v1342_v20  ;;  %v2643_v53 = vand.u32 2147483647, %v5918_v19  ;;  %v951_v37 = vpop.xlane.xlu0 %950  ;;  %v5973_v58 = vpop.f32.mrf.mxu1 }
 0x27e   :  { %v5948_v39 = vsub.f32 %v7269_v59, %v749_v46  ;;  %v5950_v14 = vadd.f32 1e-06, %v1345_v47  ;;  %vm1689_vm5 = vcmp.eq.f32.partialorder %v5669_v50, inf  ;;  %v1383_v22 = vmul.f32 %v5932_v42, %v5902_v21 }
 0x27f   :  { %3630 = vmatmul.msk.f32.gmra.mxu1 %vm494_vm1, %v2949_v23  ;;  %v2627_v41 = vsel %vm2626_vm4, %v3817_v57, %v2623_v10  ;;  %v1690_v38 = vsel %vm1689_vm5, %v5669_v50, %v5802_v62  ;;  %v850_v5 = vmul.f32 %v5873_v2, %v5873_v2  ;;  %v2645_v52 = vand.u32 2147483648, %v5918_v19 }
 0x280   :  { %7270 = vst [vmem:[#allocation4_spill] sm:$0xff] %v5948_v39  ;;  %v3821_v17 = vpop.eup %3820  ;;  %v2632_v56 = vsel %vm5938_vm2, %v2631_v40, %v2627_v41  ;;  %3822 = vrcp.f32 %v5950_v14  ;;  %v1692_v46 = vand.u32 2147483648, %v5669_v50  ;;  %v7271_v57 = vsub.f32 1.5, %v5852_v11 }
 0x281   :  { %v2977_v62 = vmul.f32 %v2632_v56, %v7272_v0  ;;  %v2635_v32 = vmul.f32 %v3821_v17, %v5918_v19  ;;  %vm1691_vm6 = vcmp.eq.f32.partialorder %v5669_v50, 0.0  ;;  %v5977_v35 = vmul.f32 %v5887_v16, %v5775_v63 }
 0x282   :  { %v5968_v20 = vmul.f32 %v5777_v31, %v7271_v57  ;;  %v1374_v55 = vsub.f32 1.5, %v5934_v7  ;;  %vm2639_vm7 = vweird.f32 %v5918_v19  ;;  %v1693_v11 = vsel %vm1691_vm6, %v1692_v46, %v1690_v38 }
 0x283   :  { %3658 = vmatmul.msk.f32.gmra.mxu3 %vm494_vm1, %v2977_v62  ;;  %v2636_v31 = vsub.f32 1.0, %v2635_v32  ;;  %v1384_v23 = vmul.f32 %v5932_v42, %v1383_v22  ;;  %v5983_v10 = vadd.f32 1e-06, %v1693_v11  ;;  %v970_v50 = vsel %vm494_vm1, %v850_v5, 0.0 }
 0x284   :  { %vm5986_vm8 = vcmp.eq.f32.partialorder %v2643_v53, 8.507059e+37  ;;  %v2646_v16 = vor.u32 1.1754944e-38, %v2645_v52  ;;  %971 = vadd.xlane.f32.xlu0 %v970_v50  ;;  %v877_v47 = vmul.f32 %v5948_v39, %v5948_v39  ;;  %v5992_v59 = vmul.f32 0.05263158, %v951_v37  ;;  %v1041_v0 = vpop.xlane.xlu2 %1040  ;;  %v7275_v50 = vld [vmem:[#allocation17_spill] sm:$0xff] }
 0x285   :  { %v2637_v41 = vmul.f32 %v3821_v17, %v2636_v31  ;;  %vm2640_vm9 = vweird.f32 %v3821_v17  ;;  %3824 = vrcp.f32 %v5983_v10  ;;  %v750_v22 = vmul.f32 %v4326_v29, %v665_v34  ;;  %v6012_v11 = vpop.f32.mrf.mxu1 }
 0x286   :  { %v3823_v38 = vpop.eup %3822  ;;  %vm2219_vm10 = vweird.f32 %v5950_v14  ;;  %v2223_v53 = vand.u32 2147483647, %v5950_v14  ;;  %v1051_v5 = vsel %vm494_vm1, %v877_v47, 0.0  ;;  %3826 = vrsqrt.f32 %v5992_v59  ;;  %vm2641_vm12 = vmor %vm2639_vm7, %vm2640_vm9 }
 0x287   :  { %v2638_v56 = vadd.f32 %v3821_v17, %v2637_v41  ;;  %v6000_v52 = vmul.f32 0.5, %v1384_v23  ;;  %v2215_v46 = vmul.f32 %v3823_v38, %v5950_v14  ;;  %1052 = vadd.xlane.f32.xlu1 %v1051_v5  ;;  %vm1353_vm11 = vcmp.eq.f32.partialorder %v5716_v24, inf }
 0x288   :  { %vm2220_vm13 = vweird.f32 %v3823_v38  ;;  %v2225_v34 = vand.u32 2147483648, %v5950_v14  ;;  %v1354_v57 = vsel %vm1353_vm11, %v5716_v24, %v5858_v48  ;;  %vm1355_vm14 = vcmp.eq.f32.partialorder %v5716_v24, 0.0 }
 0x289   :  { %v2642_v62 = vsel %vm2641_vm12, %v3821_v17, %v2638_v56  ;;  %v2216_v32 = vsub.f32 1.0, %v2215_v46  ;;  %v1356_v37 = vand.u32 2147483648, %v5716_v24  ;;  %vm1701_vm15 = vcmp.eq.f32.partialorder %v5475_v9, inf  ;;  %vm2221_vm3 = vmor %vm2219_vm10, %vm2220_vm13 }
 0x28a   :  { %v2647_v19 = vsel %vm5986_vm8, %v2646_v16, %v2642_v62  ;;  %v1702_v31 = vsel %vm1701_vm15, %v5475_v9, %v5689_v18  ;;  %vm1703_vm0 = vcmp.eq.f32.partialorder %v5475_v9, 0.0  ;;  %v1704_v48 = vand.u32 2147483648, %v5475_v9  ;;  %v7278_v62 = vld [vmem:[#allocation34_spill] sm:$0xff] }
 0x28b   :  { %v3825_v23 = vpop.eup %3824  ;;  %v2978_v17 = vmul.f32 %v2647_v19, %v7275_v50  ;;  %v2217_v47 = vmul.f32 %v3823_v38, %v2216_v32  ;;  %v1357_v41 = vsel %vm1355_vm14, %v1356_v37, %v1354_v57  ;;  %v6021_v24 = vmul.f32 0.05263158, %v1041_v0 }
 0x28c   :  { %v6023_v5 = vpop.eup %3826  ;;  %vm6025_vm2 = vcmp.eq.f32.partialorder %v2223_v53, 8.507059e+37  ;;  %v2650_v40 = vmul.f32 %v3825_v23, %v5983_v10  ;;  %v6030_v18 = vadd.f32 1e-06, %v1357_v41  ;;  %v1705_v16 = vsel %vm1703_vm0, %v1704_v48, %v1702_v31  ;;  %v954_v48 = vpop.xlane.xlu1 %953 }
 0x28d   :  { %3659 = vmatmul.msk.f32.gmra.mxu3 %vm494_vm1, %v2978_v17  ;;  %v2218_v9 = vadd.f32 %v3823_v38, %v2217_v47  ;;  %v1395_v46 = vmul.f32 %v6023_v5, %v5992_v59  ;;  %v6035_v57 = vadd.f32 1e-06, %v1705_v16  ;;  %3828 = vrsqrt.f32 %v6021_v24  ;;  %v6061_v56 = vpop.f32.mrf.mxu1 }
 0x28e   :  { %v2226_v53 = vor.u32 1.1754944e-38, %v2225_v34  ;;  %v2651_v0 = vsub.f32 1.0, %v2650_v40  ;;  %v6042_v32 = vsub.f32 %v7278_v62, %v750_v22  ;;  %3830 = vrcp.f32 %v6030_v18  ;;  %v584_v62 = vpop.xlane.xlu0 %583 }
 0x28f   :  { %v2222_v37 = vsel %vm2221_vm3, %v3823_v38, %v2218_v9  ;;  %v2658_v19 = vand.u32 2147483647, %v5983_v10  ;;  %v2660_v31 = vand.u32 2147483648, %v5983_v10  ;;  %3832 = vrcp.f32 %v6035_v57  ;;  %v7280_v38 = vld [vmem:[#allocation18_spill] sm:$0xff] }
 0x290   :  { %7279 = vst [vmem:[#allocation16_spill] sm:$0xff] %v6042_v32  ;;  %v2227_v50 = vsel %vm6025_vm2, %v2226_v53, %v2222_v37  ;;  %v2652_v14 = vmul.f32 %v3825_v23, %v2651_v0  ;;  %vm2655_vm4 = vweird.f32 %v3825_v23  ;;  %v1396_v34 = vmul.f32 %v6023_v5, %v1395_v46 }
 0x291   :  { %v6054_v22 = vmul.f32 %v5862_v44, %v1374_v55  ;;  %v2950_v17 = vmul.f32 %v2227_v50, %v7280_v38  ;;  %v2238_v47 = vand.u32 2147483647, %v6030_v18  ;;  %v2240_v41 = vand.u32 2147483648, %v6030_v18 }
 0x292   :  { %v2653_v16 = vadd.f32 %v3825_v23, %v2652_v14  ;;  %vm2654_vm5 = vweird.f32 %v5983_v10  ;;  %v6063_v9 = vmul.f32 0.05263158, %v954_v48  ;;  %vm2659_vm7 = vcmp.eq.f32.partialorder %v2658_v19, 8.507059e+37  ;;  %v7283_v14 = vld [vmem:[#allocation19_spill] sm:$0xff] }
 0x293   :  { %v6065_v46 = vpop.eup %3828  ;;  %3631 = vmatmul.msk.f32.gmra.mxu1 %vm494_vm1, %v2950_v17  ;;  %vm2656_vm6 = vmor %vm2654_vm5, %vm2655_vm4  ;;  %v2661_v44 = vor.u32 1.1754944e-38, %v2660_v31  ;;  %vm2234_vm8 = vweird.f32 %v6030_v18  ;;  %v878_v7 = vmul.f32 %v6042_v32, %v6042_v32  ;;  %v6071_v0 = vmul.f32 0.5, %v1396_v34 }
 0x294   :  { %v3831_v55 = vpop.eup %3830  ;;  %v2657_v53 = vsel %vm2656_vm6, %v3825_v23, %v2653_v16  ;;  %vm2669_vm9 = vweird.f32 %v6035_v57  ;;  %v1755_v10 = vmul.f32 %v6065_v46, %v6021_v24  ;;  %3834 = vrsqrt.f32 %v6063_v9 }
 0x295   :  { %v3833_v37 = vpop.eup %3832  ;;  %v2662_v19 = vsel %vm2659_vm7, %v2661_v44, %v2657_v53  ;;  %v2230_v31 = vmul.f32 %v3831_v55, %v6030_v18  ;;  %vm6078_vm10 = vcmp.eq.f32.partialorder %v2238_v47, 8.507059e+37  ;;  %v2241_v50 = vor.u32 1.1754944e-38, %v2240_v41 }
 0x296   :  { %v2673_v23 = vand.u32 2147483647, %v6035_v57  ;;  %v2979_v34 = vmul.f32 %v2662_v19, %v7283_v14  ;;  %v2665_v38 = vmul.f32 %v3833_v37, %v6035_v57  ;;  %v2675_v17 = vand.u32 2147483648, %v6035_v57 }
 0x297   :  { %v1756_v16 = vmul.f32 %v6065_v46, %v1755_v10  ;;  %v2231_v40 = vsub.f32 1.0, %v2230_v31  ;;  %v1054_v44 = vsel %vm494_vm1, %v878_v7, 0.0  ;;  %v723_v53 = vmul.f32 %v4326_v29, %v584_v62  ;;  %v590_v7 = vpop.xlane.xlu2 %589 }
 0x298   :  { %vm1365_vm11 = vcmp.eq.f32.partialorder %v5775_v63, inf  ;;  %3660 = vmatmul.msk.f32.gmra.mxu3 %vm494_vm1, %v2979_v34  ;;  %vm2235_vm12 = vweird.f32 %v3831_v55  ;;  %v2666_v47 = vsub.f32 1.0, %v2665_v38  ;;  %vm2670_vm13 = vweird.f32 %v3833_v37  ;;  %1055 = vadd.xlane.f32.xlu1 %v1054_v44 }
 0x299   :  { %v1366_v41 = vsel %vm1365_vm11, %v5775_v63, %v5977_v35  ;;  %v2232_v19 = vmul.f32 %v3831_v55, %v2231_v40  ;;  %v1757_v14 = vmul.f32 0.5, %v1756_v16  ;;  %v1368_v10 = vand.u32 2147483648, %v5775_v63  ;;  %vm2236_vm2 = vmor %vm2234_vm8, %vm2235_vm12 }
 0x29a   :  { %vm1713_vm14 = vcmp.eq.f32.partialorder %v5603_v4, inf  ;;  %v6095_v31 = vpop.eup %3834  ;;  %v2667_v62 = vmul.f32 %v3833_v37, %v2666_v47  ;;  %vm1367_vm15 = vcmp.eq.f32.partialorder %v5775_v63, 0.0  ;;  %v1716_v38 = vand.u32 2147483648, %v5603_v4  ;;  %v6108_v63 = vpop.f32.mrf.mxu1  ;;  %vm2671_vm3 = vmor %vm2669_vm9, %vm2670_vm13 }
 0x29b   :  { %v1714_v34 = vsel %vm1713_vm14, %v5603_v4, %v5786_v13  ;;  %v2233_v44 = vadd.f32 %v3831_v55, %v2232_v19  ;;  %v1407_v35 = vmul.f32 %v6095_v31, %v6063_v9  ;;  %v1369_v40 = vsel %vm1367_vm15, %v1368_v10, %v1366_v41  ;;  %v7285_v10 = vld [vmem:[#allocation22_spill] sm:$0xff] }
 0x29c   :  { %vm1715_vm0 = vcmp.eq.f32.partialorder %v5603_v4, 0.0  ;;  %v1398_v16 = vsub.f32 1.5, %v6071_v0  ;;  %v2668_v47 = vadd.f32 %v3833_v37, %v2667_v62  ;;  %v6110_v32 = vadd.f32 1e-06, %v1369_v40 }
 0x29d   :  { %v1717_v13 = vsel %vm1715_vm0, %v1716_v38, %v1714_v34  ;;  %v2237_v39 = vsel %vm2236_vm2, %v3831_v55, %v2233_v44  ;;  %vm2674_vm4 = vcmp.eq.f32.partialorder %v2673_v23, 8.507059e+37  ;;  %v2676_v41 = vor.u32 1.1754944e-38, %v2675_v17  ;;  %v1038_v38 = vpop.xlane.xlu1 %1037  ;;  %v668_v23 = vpop.xlane.xlu0 %667  ;;  %v7286_v17 = vld [vmem:[#allocation14_spill] sm:$0xff] }
 0x29e   :  { %v6115_v4 = vadd.f32 1e-06, %v1717_v13  ;;  %v2242_v0 = vsel %vm6078_vm10, %v2241_v50, %v2237_v39  ;;  %v2672_v18 = vsel %vm2671_vm3, %v3833_v37, %v2668_v47  ;;  %v6120_v19 = vsub.f32 %v5154_v51, %v723_v53 }
 0x29f   :  { %3836 = vrcp.f32 %v6110_v32  ;;  %v2951_v62 = vmul.f32 %v2242_v0, %v7285_v10  ;;  %v2677_v55 = vsel %vm2674_vm4, %v2676_v41, %v2672_v18  ;;  %v1758_v34 = vsub.f32 1.5, %v1757_v14 }
 0x2a0   :  { %7284 = vst [vmem:[#allocation5_spill] sm:$0xff] %v6120_v19  ;;  %v1408_v57 = vmul.f32 %v6095_v31, %v1407_v35  ;;  %v2980_v44 = vmul.f32 %v2677_v55, %v7286_v17  ;;  %3838 = vrcp.f32 %v6115_v4  ;;  %v7287_v39 = vsub.f32 1.5, %v5816_v36 }
 0x2a1   :  { %v1724_v51 = vmul.f32 %v5968_v20, %v5737_v6  ;;  %v1376_v48 = vmul.f32 %v6054_v22, %v5823_v61  ;;  %v7288_v50 = vsub.f32 1.5, %v6000_v52  ;;  %3632 = vmatmul.msk.f32.gmra.mxu1 %vm494_vm1, %v2951_v62  ;;  %v6143_v14 = vmul.f32 %v6023_v5, %v1398_v16  ;;  %v957_v22 = vpop.xlane.xlu2 %956 }
 0x2a2   :  { %v6130_v37 = vmul.f32 %v5759_v54, %v7287_v39  ;;  %3661 = vmatmul.msk.f32.gmra.mxu3 %vm494_vm1, %v2980_v44  ;;  %v6147_v54 = vmul.f32 %v4326_v29, %v590_v7  ;;  %v6149_v36 = vmul.f32 0.05263158, %v1038_v38  ;;  %v851_v20 = vmul.f32 %v6120_v19, %v6120_v19  ;;  %v6170_v41 = vpop.f32.mrf.mxu1 }
 0x2a3   :  { %v6139_v53 = vmul.f32 %v5932_v42, %v7288_v50  ;;  %v6154_v52 = vmul.f32 %v6065_v46, %v1758_v34  ;;  %v6156_v42 = vmul.f32 0.5, %v1408_v57  ;;  %vm2249_vm5 = vweird.f32 %v6110_v32 }
 0x2a4   :  { %v751_v5 = vmul.f32 %v4326_v29, %v668_v23  ;;  %v2253_v40 = vand.u32 2147483647, %v6110_v32  ;;  %v2255_v7 = vand.u32 2147483648, %v6110_v32  ;;  %3840 = vrsqrt.f32 %v6149_v36 }
 0x2a5   :  { %v3837_v35 = vpop.eup %3836  ;;  %v973_v16 = vsel %vm494_vm1, %v851_v20, 0.0  ;;  %vm2684_vm6 = vweird.f32 %v6115_v4  ;;  %vm1377_vm7 = vcmp.eq.f32.partialorder %v5823_v61, inf  ;;  %vm1379_vm8 = vcmp.eq.f32.partialorder %v5823_v61, 0.0  ;;  %v960_v44 = vpop.xlane.xlu0 %959 }
 0x2a6   :  { %v2245_v47 = vmul.f32 %v3837_v35, %v6110_v32  ;;  %974 = vadd.xlane.f32.xlu0 %v973_v16  ;;  %v6167_v46 = vsub.f32 %v5240_v60, %v751_v5  ;;  %v3839_v13 = vpop.eup %3838  ;;  %v1378_v0 = vsel %vm1377_vm7, %v5823_v61, %v1376_v48  ;;  %v1380_v18 = vand.u32 2147483648, %v5823_v61  ;;  %v587_v5 = vpop.xlane.xlu1 %586 }
 0x2a7   :  { %vm1725_vm9 = vcmp.eq.f32.partialorder %v5737_v6, inf  ;;  %vm2250_vm10 = vweird.f32 %v3837_v35  ;;  %v2680_v62 = vmul.f32 %v3839_v13, %v6115_v4  ;;  %vm1727_vm11 = vcmp.eq.f32.partialorder %v5737_v6, 0.0 }
 0x2a8   :  { %7289 = vst [vmem:[#allocation7_spill] sm:$0xff] %v6167_v46  ;;  %v2246_v10 = vsub.f32 1.0, %v2245_v47  ;;  %v1726_v60 = vsel %vm1725_vm9, %v5737_v6, %v1724_v51  ;;  %v1381_v55 = vsel %vm1379_vm8, %v1380_v18, %v1378_v0  ;;  %v1728_v34 = vand.u32 2147483648, %v5737_v6  ;;  %vm2251_vm13 = vmor %vm2249_vm5, %vm2250_vm10 }
 0x2a9   :  { %v6180_v57 = vmul.f32 0.05263158, %v957_v22  ;;  %v2681_v23 = vsub.f32 1.0, %v2680_v62  ;;  %v6182_v17 = vadd.f32 1e-06, %v1381_v55  ;;  %v879_v61 = vmul.f32 %v6167_v46, %v6167_v46 }
 0x2aa   :  { %v2247_v38 = vmul.f32 %v3837_v35, %v2246_v10  ;;  %v6186_v39 = vpop.eup %3840  ;;  %v2688_v48 = vand.u32 2147483647, %v6115_v4  ;;  %v2690_v51 = vand.u32 2147483648, %v6115_v4  ;;  %v1729_v50 = vsel %vm1727_vm11, %v1728_v34, %v1726_v60  ;;  %v6202_v60 = vpop.xlane.xlu2 %673  ;;  %v7290_v34 = vld [vmem:[#allocation29_spill] sm:$0xff] }
 0x2ab   :  { %3842 = vrsqrt.f32 %v6180_v57  ;;  %v2682_v20 = vmul.f32 %v3839_v13, %v2681_v23  ;;  %vm2685_vm12 = vweird.f32 %v3839_v13  ;;  %v2256_v22 = vor.u32 1.1754944e-38, %v2255_v7 }
 0x2ac   :  { %v2248_v6 = vadd.f32 %v3837_v35, %v2247_v38  ;;  %3844 = vrcp.f32 %v6182_v17  ;;  %v1743_v16 = vmul.f32 %v6186_v39, %v6149_v36  ;;  %v6197_v47 = vadd.f32 1e-06, %v1729_v50  ;;  %vm2686_vm15 = vmor %vm2684_vm6, %vm2685_vm12 }
 0x2ad   :  { %v6199_v0 = vmul.f32 0.05263158, %v960_v44  ;;  %vm2254_vm14 = vcmp.eq.f32.partialorder %v2253_v40, 8.507059e+37  ;;  %v2683_v10 = vadd.f32 %v3839_v13, %v2682_v20  ;;  %v1057_v62 = vsel %vm494_vm1, %v879_v61, 0.0 }
 0x2ae   :  { %v2252_v18 = vsel %vm2251_vm13, %v3837_v35, %v2248_v6  ;;  %v2691_v32 = vor.u32 1.1754944e-38, %v2690_v51  ;;  %3846 = vrcp.f32 %v6197_v47  ;;  %v724_v7 = vmul.f32 %v4326_v29, %v587_v5  ;;  %1058 = vadd.xlane.f32.xlu1 %v1057_v62  ;;  %v6216_v51 = vpop.f32.mrf.mxu1 }
 0x2af   :  { %v2257_v55 = vsel %vm2254_vm14, %v2256_v22, %v2252_v18  ;;  %v2687_v23 = vsel %vm2686_vm15, %v3839_v13, %v2683_v10  ;;  %vm2689_vm0 = vcmp.eq.f32.partialorder %v2688_v48, 8.507059e+37  ;;  %v2270_v35 = vand.u32 2147483648, %v6182_v17  ;;  %v7291_v48 = vld [vmem:[#allocation23_spill] sm:$0xff] }
 0x2b0   :  { %v2952_v38 = vmul.f32 %v2257_v55, %v7290_v34  ;;  %v1736_v61 = vmul.f32 %v6130_v37, %v5730_v1  ;;  %v2692_v44 = vsel %vm2689_vm0, %v2691_v32, %v2687_v23  ;;  %v1744_v4 = vmul.f32 %v6186_v39, %v1743_v16  ;;  %v1044_v32 = vpop.xlane.xlu0 %1043 }
 0x2b1   :  { %v6210_v40 = vpop.eup %3842  ;;  %3848 = vrsqrt.f32 %v6199_v0  ;;  %v6220_v6 = vmul.f32 %v6139_v53, %v5902_v21  ;;  %v6224_v13 = vmul.f32 %v6143_v14, %v5992_v59  ;;  %v2981_v37 = vmul.f32 %v2692_v44, %v7291_v48 }
 0x2b2   :  { %v3845_v50 = vpop.eup %3844  ;;  %3633 = vmatmul.msk.f32.gmra.mxu1 %vm494_vm1, %v2952_v38  ;;  %v1419_v20 = vmul.f32 %v6210_v40, %v6180_v57  ;;  %v6232_v5 = vmul.f32 %v6154_v52, %v6021_v24  ;;  %v6236_v22 = vsub.f32 %v5237_v25, %v6147_v54  ;;  %v6240_v14 = vsub.f32 %v5272_v27, %v724_v7 }
 0x2b3   :  { %v2260_v53 = vmul.f32 %v3845_v50, %v6182_v17  ;;  %v1410_v16 = vsub.f32 1.5, %v6156_v42  ;;  %3662 = vmatmul.msk.f32.gmra.mxu3 %vm494_vm1, %v2981_v37  ;;  %vm2264_vm2 = vweird.f32 %v6182_v17  ;;  %v2268_v18 = vand.u32 2147483647, %v6182_v17  ;;  %v7293_v17 = vld [vmem:[#allocation24_spill] sm:$0xff] }
 0x2b4   :  { %7292 = vst [vmem:[#allocation6_spill] sm:$0xff] %v6240_v14  ;;  %v2271_v10 = vor.u32 1.1754944e-38, %v2270_v35  ;;  %v3847_v52 = vpop.eup %3846  ;;  %v1745_v62 = vmul.f32 0.5, %v1744_v4  ;;  %v2703_v25 = vand.u32 2147483647, %v6197_v47  ;;  %v1420_v54 = vmul.f32 %v6210_v40, %v1419_v20  ;;  %v963_v35 = vpop.xlane.xlu1 %962 }
 0x2b5   :  { %v2261_v55 = vsub.f32 1.0, %v2260_v53  ;;  %vm2265_vm3 = vweird.f32 %v3845_v50  ;;  %v2695_v27 = vmul.f32 %v3847_v52, %v6197_v47  ;;  %vm1737_vm4 = vcmp.eq.f32.partialorder %v5730_v1, inf  ;;  %v6260_v20 = vpop.xlane.xlu2 %676 }
 0x2b6   :  { %v1740_v42 = vand.u32 2147483648, %v5730_v1  ;;  %v1738_v38 = vsel %vm1737_vm4, %v5730_v1, %v1736_v61  ;;  %vm1739_vm5 = vcmp.eq.f32.partialorder %v5730_v1, 0.0  ;;  %v852_v23 = vmul.f32 %v6240_v14, %v6240_v14  ;;  %vm2266_vm6 = vmor %vm2264_vm2, %vm2265_vm3 }
 0x2b7   :  { %v6251_v7 = vpop.eup %3848  ;;  %v2262_v34 = vmul.f32 %v3845_v50, %v2261_v55  ;;  %v2696_v44 = vsub.f32 1.0, %v2695_v27  ;;  %v2705_v4 = vand.u32 2147483648, %v6197_v47  ;;  %v1421_v46 = vmul.f32 0.5, %v1420_v54  ;;  %v6272_v54 = vpop.f32.mrf.mxu1 }
 0x2b8   :  { %v1431_v48 = vmul.f32 %v6251_v7, %v6199_v0  ;;  %v1741_v37 = vsel %vm1739_vm5, %v1740_v42, %v1738_v38  ;;  %v976_v61 = vsel %vm494_vm1, %v852_v23, 0.0  ;;  %v1746_v1 = vsub.f32 1.5, %v1745_v62 }
 0x2b9   :  { %v2263_v53 = vadd.f32 %v3845_v50, %v2262_v34  ;;  %v6262_v55 = vadd.f32 1e-06, %v1741_v37  ;;  %v2697_v27 = vmul.f32 %v3847_v52, %v2696_v44  ;;  %vm2700_vm7 = vweird.f32 %v3847_v52  ;;  %977 = vadd.xlane.f32.xlu0 %v976_v61 }
 0x2ba   :  { %v6268_v14 = vmul.f32 0.05263158, %v1044_v32  ;;  %vm2269_vm8 = vcmp.eq.f32.partialorder %v2268_v18, 8.507059e+37  ;;  %v1432_v42 = vmul.f32 %v6251_v7, %v1431_v48  ;;  %v1411_v34 = vmul.f32 %v6095_v31, %v1410_v16 }
 0x2bb   :  { %v2267_v19 = vsel %vm2266_vm6, %v3845_v50, %v2263_v53  ;;  %3850 = vrcp.f32 %v6262_v55  ;;  %v2698_v38 = vadd.f32 %v3847_v52, %v2697_v27  ;;  %vm2699_vm9 = vweird.f32 %v6197_v47 }
 0x2bc   :  { %v2272_v62 = vsel %vm2269_vm8, %v2271_v10, %v2267_v19  ;;  %vm2701_vm10 = vmor %vm2699_vm9, %vm2700_vm7  ;;  %v2706_v44 = vor.u32 1.1754944e-38, %v2705_v4  ;;  %v1422_v32 = vsub.f32 1.5, %v1421_v46  ;;  %3852 = vrsqrt.f32 %v6268_v14  ;;  %v593_v10 = vpop.xlane.xlu0 %592  ;;  %v671_v4 = vpop.xlane.xlu1 %670  ;;  %v7294_v46 = vld [vmem:[#allocation26_spill] sm:$0xff] }
 0x2bd   :  { %v2953_v23 = vmul.f32 %v2272_v62, %v7293_v17  ;;  %v1747_v50 = vmul.f32 %v6186_v39, %v1746_v1  ;;  %v2702_v18 = vsel %vm2701_vm10, %v3847_v52, %v2698_v38  ;;  %vm2704_vm11 = vcmp.eq.f32.partialorder %v2703_v25, 8.507059e+37 }
 0x2be   :  { %vm1389_vm12 = vcmp.eq.f32.partialorder %v5902_v21, inf  ;;  %v2707_v31 = vsel %vm2704_vm11, %v2706_v44, %v2702_v18  ;;  %v1433_v19 = vmul.f32 0.5, %v1432_v42  ;;  %v1392_v16 = vand.u32 2147483648, %v5902_v21 }
 0x2bf   :  { %3634 = vmatmul.msk.f32.gmra.mxu1 %vm494_vm1, %v2953_v23  ;;  %v1390_v47 = vsel %vm1389_vm12, %v5902_v21, %v6220_v6  ;;  %v2982_v48 = vmul.f32 %v2707_v31, %v7294_v46  ;;  %v753_v39 = vmul.f32 %v4326_v29, %v6202_v60  ;;  %vm1391_vm13 = vcmp.eq.f32.partialorder %v5902_v21, 0.0 }
 0x2c0   :  { %v6288_v52 = vmul.f32 0.05263158, %v963_v35  ;;  %v6291_v37 = vmul.f32 %v1411_v34, %v6063_v9  ;;  %v1423_v53 = vmul.f32 %v6210_v40, %v1422_v32  ;;  %v2718_v6 = vand.u32 2147483647, %v6262_v55  ;;  %v680_v35 = vpop.xlane.xlu2 %679 }
 0x2c1   :  { %v3851_v25 = vpop.eup %3850  ;;  %v1393_v61 = vsel %vm1391_vm13, %v1392_v16, %v1390_v47  ;;  %3663 = vmatmul.msk.f32.gmra.mxu3 %vm494_vm1, %v2982_v48  ;;  %v853_v21 = vmul.f32 %v6236_v22, %v6236_v22  ;;  %v726_v60 = vmul.f32 %v4326_v29, %v593_v10  ;;  %v1434_v34 = vsub.f32 1.5, %v1433_v19  ;;  %v7297_v19 = vld [vmem:[#allocation21_spill] sm:$0xff] }
 0x2c2   :  { %v2710_v1 = vmul.f32 %v3851_v25, %v6262_v55  ;;  %v6297_v27 = vadd.f32 1e-06, %v1393_v61  ;;  %v6302_v42 = vpop.eup %3852  ;;  %v2720_v62 = vand.u32 2147483648, %v6262_v55  ;;  %3854 = vrsqrt.f32 %v6288_v52 }
 0x2c3   :  { %v6308_v38 = vmul.f32 %v1747_v50, %v6149_v36  ;;  %v6311_v23 = vsub.f32 %v5361_v49, %v753_v39  ;;  %v6315_v44 = vmul.f32 %v1423_v53, %v6180_v57  ;;  %vm2714_vm14 = vweird.f32 %v6262_v55  ;;  %v6324_v50 = vpop.f32.mrf.mxu1 }
 0x2c4   :  { %v2711_v17 = vsub.f32 1.0, %v2710_v1  ;;  %3856 = vrcp.f32 %v6297_v27  ;;  %vm6318_vm15 = vcmp.eq.f32.partialorder %v2718_v6, 8.507059e+37  ;;  %v1767_v18 = vmul.f32 %v6302_v42, %v6268_v14  ;;  %v1047_v48 = vpop.xlane.xlu1 %1046 }
 0x2c5   :  { %vm2715_vm0 = vweird.f32 %v3851_v25  ;;  %v979_v49 = vsel %vm494_vm1, %v853_v21, 0.0  ;;  %v6328_v47 = vsub.f32 %v7297_v19, %v726_v60  ;;  %v6331_v16 = vmul.f32 %v6251_v7, %v1434_v34 }
 0x2c6   :  { %v2712_v31 = vmul.f32 %v3851_v25, %v2711_v17  ;;  %v2721_v10 = vor.u32 1.1754944e-38, %v2720_v62  ;;  %v6335_v46 = vmul.f32 %v4326_v29, %v6260_v20  ;;  %980 = vadd.xlane.f32.xlu0 %v979_v49  ;;  %vm1401_vm2 = vcmp.eq.f32.partialorder %v5992_v59, inf  ;;  %vm2716_vm3 = vmor %vm2714_vm14, %vm2715_vm0 }
 0x2c7   :  { %7298 = vst [vmem:[#allocation9_spill] sm:$0xff] %v6328_v47  ;;  %v2283_v53 = vand.u32 2147483647, %v6297_v27  ;;  %v752_v6 = vmul.f32 %v4326_v29, %v671_v4  ;;  %v1402_v61 = vsel %vm1401_vm2, %v5992_v59, %v6224_v13  ;;  %v1768_v7 = vmul.f32 %v6302_v42, %v1767_v18 }
 0x2c8   :  { %v2713_v39 = vadd.f32 %v3851_v25, %v2712_v31  ;;  %v6342_v1 = vpop.eup %3854  ;;  %vm1403_vm4 = vcmp.eq.f32.partialorder %v5992_v59, 0.0  ;;  %v1404_v20 = vand.u32 2147483648, %v5992_v59  ;;  %v854_v21 = vmul.f32 %v6328_v47, %v6328_v47  ;;  %v7299_v31 = vld [vmem:[#allocation27_spill] sm:$0xff] }
 0x2c9   :  { %v1443_v4 = vmul.f32 %v6342_v1, %v6288_v52  ;;  %v755_v13 = vmul.f32 %v4326_v29, %v680_v35  ;;  %v881_v55 = vmul.f32 %v6311_v23, %v6311_v23  ;;  %v6359_v59 = vmul.f32 0.05263158, %v1047_v48  ;;  %v683_v35 = vpop.xlane.xlu2 %682 }
 0x2ca   :  { %v3857_v60 = vpop.eup %3856  ;;  %v2717_v34 = vsel %vm2716_vm3, %v3851_v25, %v2713_v39  ;;  %v1405_v18 = vsel %vm1403_vm4, %v1404_v20, %v1402_v61  ;;  %v2285_v25 = vand.u32 2147483648, %v6297_v27  ;;  %v1769_v40 = vmul.f32 0.5, %v1768_v7 }
 0x2cb   :  { %v2722_v62 = vsel %vm6318_vm15, %v2721_v10, %v2717_v34  ;;  %v2275_v17 = vmul.f32 %v3857_v60, %v6297_v27  ;;  %v1444_v19 = vmul.f32 %v6342_v1, %v1443_v4  ;;  %v6364_v39 = vadd.f32 1e-06, %v1405_v18 }
 0x2cc   :  { %v2983_v49 = vmul.f32 %v2722_v62, %v7299_v31  ;;  %vm2279_vm5 = vweird.f32 %v6297_v27  ;;  %v982_v32 = vsel %vm494_vm1, %v854_v21, 0.0  ;;  %vm6369_vm6 = vcmp.eq.f32.partialorder %v2283_v53, 8.507059e+37  ;;  %v6381_v21 = vpop.f32.mrf.mxu1 }
 0x2cd   :  { %v2276_v47 = vsub.f32 1.0, %v2275_v17  ;;  %v6374_v48 = vsub.f32 %v5470_v15, %v752_v6  ;;  %3858 = vrcp.f32 %v6364_v39  ;;  %v1063_v61 = vsel %vm494_vm1, %v881_v55, 0.0  ;;  %983 = vadd.xlane.f32.xlu2 %v982_v32  ;;  %v1050_v6 = vpop.xlane.xlu1 %1049 }
 0x2ce   :  { %3664 = vmatmul.msk.f32.gmra.mxu3 %vm494_vm1, %v2983_v49  ;;  %vm2280_vm7 = vweird.f32 %v3857_v60  ;;  %v6379_v20 = vsub.f32 %v5486_v30, %v755_v13  ;;  %1064 = vadd.xlane.f32.xlu0 %v1063_v61  ;;  %3860 = vrsqrt.f32 %v6359_v59  ;;  %v2286_v53 = vor.u32 1.1754944e-38, %v2285_v25 }
 0x2cf   :  { %v2277_v7 = vmul.f32 %v3857_v60, %v2276_v47  ;;  %v1445_v34 = vmul.f32 0.5, %v1444_v19  ;;  %vm1413_vm8 = vcmp.eq.f32.partialorder %v6063_v9, inf  ;;  %v1416_v15 = vand.u32 2147483648, %v6063_v9  ;;  %vm2281_vm10 = vmor %vm2279_vm5, %vm2280_vm7 }
 0x2d0   :  { %v1770_v4 = vsub.f32 1.5, %v1769_v40  ;;  %v1414_v47 = vsel %vm1413_vm8, %v6063_v9, %v6291_v37  ;;  %vm1415_vm9 = vcmp.eq.f32.partialorder %v6063_v9, 0.0  ;;  %v2298_v30 = vand.u32 2147483647, %v6364_v39 }
 0x2d1   :  { %v2278_v55 = vadd.f32 %v3857_v60, %v2277_v7  ;;  %v1417_v13 = vsel %vm1415_vm9, %v1416_v15, %v1414_v47  ;;  %v880_v62 = vmul.f32 %v6374_v48, %v6374_v48  ;;  %v756_v17 = vmul.f32 %v4326_v29, %v683_v35  ;;  %v7302_v35 = vld [vmem:[#allocation32_spill] sm:$0xff] }
 0x2d2   :  { %v6395_v31 = vadd.f32 1e-06, %v1417_v13  ;;  %v883_v40 = vmul.f32 %v6379_v20, %v6379_v20  ;;  %v6399_v37 = vmul.f32 0.05263158, %v1050_v6  ;;  %v1446_v49 = vsub.f32 1.5, %v1445_v34 }
 0x2d3   :  { %v2282_v18 = vsel %vm2281_vm10, %v3857_v60, %v2278_v55  ;;  %v3859_v9 = vpop.eup %3858  ;;  %v2300_v25 = vand.u32 2147483648, %v6364_v39  ;;  %v1060_v19 = vsel %vm494_vm1, %v880_v62, 0.0  ;;  %v6409_v60 = vmul.f32 %v6331_v16, %v6199_v0  ;;  %v686_v16 = vpop.xlane.xlu2 %685 }
 0x2d4   :  { %v2287_v27 = vsel %vm6369_vm6, %v2286_v53, %v2282_v18  ;;  %v6405_v32 = vpop.eup %3860  ;;  %v2290_v7 = vmul.f32 %v3859_v9, %v6364_v39  ;;  %3862 = vrcp.f32 %v6395_v31  ;;  %1061 = vadd.xlane.f32.xlu1 %v1060_v19  ;;  %v6415_v10 = vmul.f32 %v6302_v42, %v1770_v4  ;;  %v6436_v4 = vpop.f32.mrf.mxu1 }
 0x2d5   :  { %v2954_v61 = vmul.f32 %v2287_v27, %v7302_v35  ;;  %v6419_v53 = vsub.f32 %v5425_v43, %v6335_v46  ;;  %vm2294_vm11 = vweird.f32 %v6364_v39  ;;  %v6423_v34 = vsub.f32 %v5575_v8, %v756_v17 }
 0x2d6   :  { %v2291_v15 = vsub.f32 1.0, %v2290_v7  ;;  %v1779_v6 = vmul.f32 %v6405_v32, %v6359_v59  ;;  %v1069_v55 = vsel %vm494_vm1, %v883_v40, 0.0  ;;  %3864 = vrsqrt.f32 %v6399_v37 }
 0x2d7   :  { %3635 = vmatmul.msk.f32.gmra.mxu1 %vm494_vm1, %v2954_v61  ;;  %v1447_v42 = vmul.f32 %v6342_v1, %v1446_v49  ;;  %vm6431_vm12 = vcmp.eq.f32.partialorder %v2298_v30, 8.507059e+37  ;;  %v2301_v46 = vor.u32 1.1754944e-38, %v2300_v25  ;;  %1070 = vadd.xlane.f32.xlu2 %v1069_v55  ;;  %vm1749_vm13 = vcmp.eq.f32.partialorder %v6149_v36, inf }
 0x2d8   :  { %v2292_v8 = vmul.f32 %v3859_v9, %v2291_v15  ;;  %vm2295_vm14 = vweird.f32 %v3859_v9  ;;  %v1750_v47 = vsel %vm1749_vm13, %v6149_v36, %v6308_v38  ;;  %v1752_v13 = vand.u32 2147483648, %v6149_v36 }
 0x2d9   :  { %v2313_v62 = vand.u32 2147483647, %v6395_v31  ;;  %vm1751_vm15 = vcmp.eq.f32.partialorder %v6149_v36, 0.0  ;;  %v882_v1 = vmul.f32 %v6419_v53, %v6419_v53  ;;  %v884_v30 = vmul.f32 %v6423_v34, %v6423_v34  ;;  %vm2296_vm0 = vmor %vm2294_vm11, %vm2295_vm14 }
 0x2da   :  { %v3863_v17 = vpop.eup %3862  ;;  %v2293_v18 = vadd.f32 %v3859_v9, %v2292_v8  ;;  %v1780_v40 = vmul.f32 %v6405_v32, %v1779_v6  ;;  %v2315_v27 = vand.u32 2147483648, %v6395_v31  ;;  %v1753_v49 = vsel %vm1751_vm15, %v1752_v13, %v1750_v47 }
 0x2db   :  { %v6450_v38 = vmul.f32 %v1447_v42, %v6288_v52  ;;  %v2305_v36 = vmul.f32 %v3863_v17, %v6395_v31  ;;  %vm2309_vm2 = vweird.f32 %v6395_v31  ;;  %v6456_v25 = vadd.f32 1e-06, %v1753_v49 }
 0x2dc   :  { %v3865_v19 = vpop.eup %3864  ;;  %v2297_v35 = vsel %vm2296_vm0, %v3859_v9, %v2293_v18  ;;  %v1066_v61 = vsel %vm494_vm1, %v882_v1, 0.0  ;;  %v757_v7 = vmul.f32 %v4326_v29, %v686_v16  ;;  %v1072_v15 = vsel %vm494_vm1, %v884_v30, 0.0  ;;  %v7307_v9 = vld [vmem:[#allocation35_spill] sm:$0xff] }
 0x2dd   :  { %v2302_v6 = vsel %vm6431_vm12, %v2301_v46, %v2297_v35  ;;  %v2306_v55 = vsub.f32 1.0, %v2305_v36  ;;  %vm6463_vm3 = vcmp.eq.f32.partialorder %v2313_v62, 8.507059e+37  ;;  %v1791_v42 = vmul.f32 %v3865_v19, %v6399_v37  ;;  %1067 = vadd.xlane.f32.xlu1 %v1066_v61  ;;  %1073 = vadd.xlane.f32.xlu0 %v1072_v15  ;;  %v966_v46 = vpop.xlane.xlu2 %965 }
 0x2de   :  { %vm1437_vm4 = vcmp.eq.f32.partialorder %v6199_v0, inf  ;;  %v2955_v8 = vmul.f32 %v2302_v6, %v7307_v9  ;;  %v1781_v47 = vmul.f32 0.5, %v1780_v40  ;;  %v2316_v29 = vor.u32 1.1754944e-38, %v2315_v27 }
 0x2df   :  { %3866 = vrcp.f32 %v6456_v25  ;;  %v2307_v16 = vmul.f32 %v3863_v17, %v2306_v55  ;;  %vm2310_vm5 = vweird.f32 %v3863_v17  ;;  %v1792_v43 = vmul.f32 %v3865_v19, %v1791_v42 }
 0x2e0   :  { %vm1425_vm6 = vcmp.eq.f32.partialorder %v6180_v57, inf  ;;  %3636 = vmatmul.msk.f32.gmra.mxu1 %vm494_vm1, %v2955_v8  ;;  %v6474_v13 = vsub.f32 %v5606_v12, %v757_v7  ;;  %v1428_v1 = vand.u32 2147483648, %v6180_v57  ;;  %vm1761_vm7 = vcmp.eq.f32.partialorder %v6021_v24, inf  ;;  %vm2311_vm10 = vmor %vm2309_vm2, %vm2310_vm5  ;;  %v6487_v12 = vpop.f32.mrf.mxu1 }
 0x2e1   :  { %v1426_v62 = vsel %vm1425_vm6, %v6180_v57, %v6315_v44  ;;  %vm1439_vm8 = vcmp.eq.f32.partialorder %v6199_v0, 0.0  ;;  %v2308_v30 = vadd.f32 %v3863_v17, %v2307_v16  ;;  %v1793_v18 = vmul.f32 0.5, %v1792_v43 }
 0x2e2   :  { %vm1427_vm9 = vcmp.eq.f32.partialorder %v6180_v57, 0.0  ;;  %v1762_v40 = vsel %vm1761_vm7, %v6021_v24, %v6232_v5  ;;  %v1782_v27 = vsub.f32 1.5, %v1781_v47  ;;  %v1764_v49 = vand.u32 2147483648, %v6021_v24 }
 0x2e3   :  { %v1429_v44 = vsel %vm1427_vm9, %v1428_v1, %v1426_v62  ;;  %v6490_v36 = vmul.f32 0.05263158, %v966_v46  ;;  %v2312_v35 = vsel %vm2311_vm10, %v3863_v17, %v2308_v30  ;;  %v1794_v61 = vsub.f32 1.5, %v1793_v18 }
 0x2e4   :  { %v6492_v7 = vadd.f32 1e-06, %v1429_v44  ;;  %vm1763_vm11 = vcmp.eq.f32.partialorder %v6021_v24, 0.0  ;;  %v2317_v5 = vsel %vm6463_vm3, %v2316_v29, %v2312_v35  ;;  %v885_v31 = vmul.f32 %v6474_v13, %v6474_v13 }
 0x2e5   :  { %v3867_v57 = vpop.eup %3866  ;;  %v1765_v15 = vsel %vm1763_vm11, %v1764_v49, %v1762_v40  ;;  %3868 = vrsqrt.f32 %v6490_v36  ;;  %vm1449_vm12 = vcmp.eq.f32.partialorder %v6288_v52, inf  ;;  %v1452_v6 = vand.u32 2147483648, %v6288_v52 }
 0x2e6   :  { %v2956_v17 = vmul.f32 %v2317_v5, %v5168_v3  ;;  %v2725_v55 = vmul.f32 %v3867_v57, %v6456_v25  ;;  %vm1451_vm13 = vcmp.eq.f32.partialorder %v6288_v52, 0.0  ;;  %v1783_v24 = vmul.f32 %v6405_v32, %v1782_v27 }
 0x2e7   :  { %v2733_v39 = vand.u32 2147483647, %v6456_v25  ;;  %v2735_v42 = vand.u32 2147483648, %v6456_v25  ;;  %3870 = vrcp.f32 %v6492_v7  ;;  %v1438_v9 = vsel %vm1437_vm4, %v6199_v0, %v6409_v60 }
 0x2e8   :  { %v1772_v3 = vmul.f32 %v6415_v10, %v6268_v14  ;;  %v2726_v8 = vsub.f32 1.0, %v2725_v55  ;;  %v6515_v47 = vadd.f32 1e-06, %v1765_v15  ;;  %v1450_v32 = vsel %vm1449_vm12, %v6288_v52, %v6450_v38  ;;  %3637 = vmatmul.msk.f32.gmra.mxu1 %vm494_vm1, %v2956_v17  ;;  %v6550_v35 = vpop.f32.mrf.mxu1 }
 0x2e9   :  { %v1795_v29 = vmul.f32 %v3865_v19, %v1794_v61  ;;  %vm2729_vm14 = vweird.f32 %v6456_v25  ;;  %v1075_v16 = vsel %vm494_vm1, %v885_v31, 0.0  ;;  %vm2730_vm15 = vweird.f32 %v3867_v57  ;;  %v6553_v61 = vpop.f32.mrf.mxu3 }
 0x2ea   :  { %v2727_v43 = vmul.f32 %v3867_v57, %v2726_v8  ;;  %v2328_v60 = vand.u32 2147483647, %v6492_v7  ;;  %3872 = vrcp.f32 %v6515_v47  ;;  %1076 = vadd.xlane.f32.xlu1 %v1075_v16  ;;  %v6527_v46 = vmul.f32 %v1783_v24, %v6359_v59  ;;  %vm2731_vm3 = vmor %vm2729_vm14, %vm2730_vm15 }
 0x2eb   :  { %v6524_v10 = vpop.eup %3868  ;;  %vm6529_vm0 = vcmp.eq.f32.partialorder %v2733_v39, 8.507059e+37  ;;  %v2736_v19 = vor.u32 1.1754944e-38, %v2735_v42  ;;  %v7310_v62 = vand.u32 2147483648, %v6199_v0  ;;  %vm2324_vm2 = vweird.f32 %v6492_v7 }
 0x2ec   :  { %v2728_v30 = vadd.f32 %v3867_v57, %v2727_v43  ;;  %v1455_v18 = vmul.f32 %v6524_v10, %v6490_v36  ;;  %v6543_v44 = vmul.f32 %v1795_v29, %v6399_v37  ;;  %v2330_v49 = vand.u32 2147483648, %v6492_v7 }
 0x2ed   :  { %v1441_v1 = vsel %vm1439_vm8, %v7310_v62, %v1438_v9  ;;  %v3871_v27 = vpop.eup %3870  ;;  %v2748_v0 = vand.u32 2147483647, %v6515_v47  ;;  %vm1773_vm4 = vcmp.eq.f32.partialorder %v6268_v14, inf  ;;  %vm6556_vm5 = vcmp.eq.f32.partialorder %v2328_v60, 8.507059e+37 }
 0x2ee   :  { %v6540_v40 = vadd.f32 1e-06, %v1441_v1  ;;  %v2732_v5 = vsel %vm2731_vm3, %v3867_v57, %v2728_v30  ;;  %v2320_v15 = vmul.f32 %v3871_v27, %v6492_v7  ;;  %v1456_v25 = vmul.f32 %v6524_v10, %v1455_v18 }
 0x2ef   :  { %v1774_v17 = vsel %vm1773_vm4, %v6268_v14, %v1772_v3  ;;  %v2737_v55 = vsel %vm6529_vm0, %v2736_v19, %v2732_v5  ;;  %vm1775_vm6 = vcmp.eq.f32.partialorder %v6268_v14, 0.0  ;;  %v1776_v24 = vand.u32 2147483648, %v6268_v14 }
 0x2f0   :  { %3874 = vrcp.f32 %v6540_v40  ;;  %v3873_v57 = vpop.eup %3872  ;;  %v2984_v39 = vmul.f32 %v2737_v55, %v5048_v33  ;;  %v2321_v42 = vsub.f32 1.0, %v2320_v15  ;;  %v1457_v9 = vmul.f32 0.5, %v1456_v25  ;;  %v6598_v55 = vpop.f32.mrf.mxu1 }
 0x2f1   :  { %v1453_v8 = vsel %vm1451_vm13, %v1452_v6, %v1450_v32  ;;  %v2331_v29 = vor.u32 1.1754944e-38, %v2330_v49  ;;  %v2740_v3 = vmul.f32 %v3873_v57, %v6515_v47  ;;  %v2750_v16 = vand.u32 2147483648, %v6515_v47  ;;  %v6588_v49 = vpop.f32.mrf.mxu3 }
 0x2f2   :  { %v1777_v43 = vsel %vm1775_vm6, %v1776_v24, %v1774_v17  ;;  %3665 = vmatmul.msk.f32.gmra.mxu3 %vm494_vm1, %v2984_v39  ;;  %v2322_v60 = vmul.f32 %v3871_v27, %v2321_v42  ;;  %vm2325_vm7 = vweird.f32 %v3871_v27  ;;  %v2343_v14 = vand.u32 2147483647, %v6540_v40 }
 0x2f3   :  { %v6574_v38 = vadd.f32 1e-06, %v1777_v43  ;;  %v2741_v33 = vsub.f32 1.0, %v2740_v3  ;;  %vm2744_vm8 = vweird.f32 %v6515_v47  ;;  %v2345_v52 = vand.u32 2147483648, %v6540_v40  ;;  %vm2326_vm10 = vmor %vm2324_vm2, %vm2325_vm7  ;;  %v7317_v3 = vld [vmem:[#allocation33_spill] sm:$0xff] }
 0x2f4   :  { %v6578_v6 = vadd.f32 1e-06, %v1453_v8  ;;  %v2323_v32 = vadd.f32 %v3871_v27, %v2322_v60  ;;  %vm6580_vm9 = vcmp.eq.f32.partialorder %v2748_v0, 8.507059e+37  ;;  %v1458_v62 = vsub.f32 1.5, %v1457_v9 }
 0x2f5   :  { %3876 = vrcp.f32 %v6574_v38  ;;  %v2742_v30 = vmul.f32 %v3873_v57, %v2741_v33  ;;  %vm2745_vm11 = vweird.f32 %v3873_v57  ;;  %v2751_v18 = vor.u32 1.1754944e-38, %v2750_v16 }
 0x2f6   :  { %v3875_v1 = vpop.eup %3874  ;;  %3878 = vrcp.f32 %v6578_v6  ;;  %v2327_v5 = vsel %vm2326_vm10, %v3871_v27, %v2323_v32  ;;  %vm2339_vm12 = vweird.f32 %v6540_v40  ;;  %vm6592_vm13 = vcmp.eq.f32.partialorder %v2343_v14, 8.507059e+37  ;;  %vm2746_vm15 = vmor %vm2744_vm8, %vm2745_vm11  ;;  %v969_v32 = vpop.xlane.xlu0 %968 }
 0x2f7   :  { %v2335_v0 = vmul.f32 %v3875_v1, %v6540_v40  ;;  %v2332_v7 = vsel %vm6556_vm5, %v2331_v29, %v2327_v5  ;;  %v2743_v25 = vadd.f32 %v3873_v57, %v2742_v30  ;;  %v2346_v17 = vor.u32 1.1754944e-38, %v2345_v52 }
 0x2f8   :  { %vm1785_vm14 = vcmp.eq.f32.partialorder %v6359_v59, inf  ;;  %v2957_v24 = vmul.f32 %v2332_v7, %v5267_v45  ;;  %v1459_v27 = vmul.f32 %v6524_v10, %v1458_v62  ;;  %vm1787_vm0 = vcmp.eq.f32.partialorder %v6359_v59, 0.0 }
 0x2f9   :  { %v2336_v39 = vsub.f32 1.0, %v2335_v0  ;;  %v2747_v42 = vsel %vm2746_vm15, %v3873_v57, %v2743_v25  ;;  %vm2759_vm2 = vweird.f32 %v6574_v38  ;;  %v2763_v31 = vand.u32 2147483647, %v6574_v38  ;;  %v6626_v62 = vpop.f32.mrf.mxu3 }
 0x2fa   :  { %v2765_v9 = vand.u32 2147483648, %v6574_v38  ;;  %3638 = vmatmul.msk.f32.gmra.mxu1 %vm494_vm1, %v2957_v24  ;;  %v2752_v45 = vsel %vm6580_vm9, %v2751_v18, %v2747_v42  ;;  %vm2340_vm3 = vweird.f32 %v3875_v1  ;;  %v1786_v10 = vsel %vm1785_vm14, %v6359_v59, %v6527_v46 }
 0x2fb   :  { %v3877_v8 = vpop.eup %3876  ;;  %v2337_v47 = vmul.f32 %v3875_v1, %v2336_v39  ;;  %v2985_v57 = vmul.f32 %v2752_v45, %v7317_v3  ;;  %v2358_v43 = vand.u32 2147483647, %v6578_v6  ;;  %v1788_v60 = vand.u32 2147483648, %v6359_v59  ;;  %vm2341_vm5 = vmor %vm2339_vm12, %vm2340_vm3 }
 0x2fc   :  { %v3879_v29 = vpop.eup %3878  ;;  %v2755_v16 = vmul.f32 %v3877_v8, %v6574_v38  ;;  %v2360_v52 = vand.u32 2147483648, %v6578_v6  ;;  %vm1797_vm4 = vcmp.eq.f32.partialorder %v6399_v37, inf  ;;  %vm2760_vm6 = vweird.f32 %v3877_v8  ;;  %v7318_v38 = vld [vmem:[#allocation30_spill] sm:$0xff] }
 0x2fd   :  { %v2338_v14 = vadd.f32 %v3875_v1, %v2337_v47  ;;  %v2350_v33 = vmul.f32 %v3879_v29, %v6578_v6  ;;  %3666 = vmatmul.msk.f32.gmra.mxu3 %vm494_vm1, %v2985_v57  ;;  %vm2355_vm7 = vweird.f32 %v3879_v29  ;;  %v1789_v19 = vsel %vm1787_vm0, %v1788_v60, %v1786_v10  ;;  %vm2761_vm9 = vmor %vm2759_vm2, %vm2760_vm6 }
 0x2fe   :  { %v2756_v46 = vsub.f32 1.0, %v2755_v16  ;;  %v6628_v5 = vadd.f32 1e-06, %v1789_v19  ;;  %v1798_v0 = vsel %vm1797_vm4, %v6399_v37, %v6543_v44  ;;  %v1800_v25 = vand.u32 2147483648, %v6399_v37  ;;  %v6641_v44 = vpop.f32.mrf.mxu1  ;;  %v972_v57 = vpop.xlane.xlu0 %971 }
 0x2ff   :  { %v2342_v30 = vsel %vm2341_vm5, %v3875_v1, %v2338_v14  ;;  %v2351_v18 = vsub.f32 1.0, %v2350_v33  ;;  %v6635_v24 = vmul.f32 0.05263158, %v969_v32  ;;  %vm1799_vm8 = vcmp.eq.f32.partialorder %v6399_v37, 0.0  ;;  %v1053_v32 = vpop.xlane.xlu1 %1052 }
 0x300   :  { %v2347_v7 = vsel %vm6592_vm13, %v2346_v17, %v2342_v30  ;;  %v2757_v40 = vmul.f32 %v3877_v8, %v2756_v46  ;;  %3880 = vrcp.f32 %v6628_v5  ;;  %v1460_v1 = vmul.f32 %v1459_v27, %v6490_v36  ;;  %3406 = vxpose.xlu2.b32.start [1/16] (narrow) %v5913_v28, 8 }
 0x301   :  { %v2958_v59 = vmul.f32 %v2347_v7, %v5317_v26  ;;  %v2352_v39 = vmul.f32 %v3879_v29, %v2351_v18  ;;  %v2766_v45 = vor.u32 1.1754944e-38, %v2765_v9  ;;  %v1801_v15 = vsel %vm1799_vm8, %v1800_v25, %v1798_v0 }
 0x302   :  { %v2758_v42 = vadd.f32 %v3877_v8, %v2757_v40  ;;  %vm2354_vm10 = vweird.f32 %v6578_v6  ;;  %v6649_v17 = vadd.f32 1e-06, %v1801_v15  ;;  %3882 = vrsqrt.f32 %v6635_v24 }
 0x303   :  { %3639 = vmatmul.msk.f32.gmra.mxu1 %vm494_vm1, %v2958_v59  ;;  %v2353_v26 = vadd.f32 %v3879_v29, %v2352_v39  ;;  %vm2764_vm11 = vcmp.eq.f32.partialorder %v2763_v31, 8.507059e+37  ;;  %vm2356_vm12 = vmor %vm2354_vm10, %vm2355_vm7  ;;  %v2361_v27 = vor.u32 1.1754944e-38, %v2360_v52  ;;  %vm2359_vm13 = vcmp.eq.f32.partialorder %v2358_v43, 8.507059e+37  ;;  %v7319_v43 = vld [vmem:[#allocation37_spill] sm:$0xff] }
 0x304   :  { %v2762_v37 = vsel %vm2761_vm9, %v3877_v8, %v2758_v42  ;;  %3884 = vrcp.f32 %v6649_v17  ;;  %vm1461_vm14 = vcmp.eq.f32.partialorder %v6490_v36, inf  ;;  %v1464_v8 = vand.u32 2147483648, %v6490_v36 }
 0x305   :  { %v2767_v28 = vsel %vm2764_vm11, %v2766_v45, %v2762_v37  ;;  %v2357_v9 = vsel %vm2356_vm12, %v3879_v29, %v2353_v26  ;;  %v1462_v3 = vsel %vm1461_vm14, %v6490_v36, %v1460_v1  ;;  %v6662_v29 = vpop.f32.mrf.mxu3  ;;  %vm1463_vm15 = vcmp.eq.f32.partialorder %v6490_v36, 0.0 }
 0x306   :  { %v2986_v47 = vmul.f32 %v2767_v28, %v7318_v38  ;;  %v2362_v10 = vsel %vm2359_vm13, %v2361_v27, %v2357_v9  ;;  %v3881_v6 = vpop.eup %3880  ;;  %v6667_v33 = vpop.f32.mrf.mxu1  ;;  %v6671_v46 = vmul.f32 0.05263158, %v972_v57  ;;  %v1465_v19 = vsel %vm1463_vm15, %v1464_v8, %v1462_v3  ;;  %v7320_v28 = vld [vmem:[#allocation36_spill] sm:$0xff] }
 0x307   :  { %v2770_v31 = vmul.f32 %v3881_v6, %v6628_v5  ;;  %v2959_v60 = vmul.f32 %v2362_v10, %v7319_v43  ;;  %v2778_v18 = vand.u32 2147483647, %v6628_v5  ;;  %v2780_v36 = vand.u32 2147483648, %v6628_v5 }
 0x308   :  { %3667 = vmatmul.msk.f32.gmra.mxu3 %vm494_vm1, %v2986_v47  ;;  %v6660_v16 = vpop.eup %3882  ;;  %3407 = vxpose.xlu2.b32.cont [2/16] (narrow) %v5973_v58, 8  ;;  %v6676_v0 = vadd.f32 1e-06, %v1465_v19  ;;  %vm2775_vm0 = vweird.f32 %v3881_v6  ;;  %v6680_v25 = vmul.f32 0.05263158, %v1053_v32  ;;  %vm2774_vm2 = vweird.f32 %v6628_v5  ;;  %v7321_v19 = vld [vmem:[#allocation2_spill] sm:$0xff] }
 0x309   :  { %v2771_v14 = vsub.f32 1.0, %v2770_v31  ;;  %v1467_v52 = vmul.f32 %v6660_v16, %v6635_v24  ;;  %vm2776_vm3 = vmor %vm2774_vm2, %vm2775_vm0  ;;  %vm2779_vm4 = vcmp.eq.f32.partialorder %v2778_v18, 8.507059e+37  ;;  %v2781_v1 = vor.u32 1.1754944e-38, %v2780_v36 }
 0x30a   :  { %v3885_v30 = vpop.eup %3884  ;;  %3886 = vrcp.f32 %v6676_v0  ;;  %v2795_v42 = vand.u32 2147483648, %v6649_v17  ;;  %v2793_v26 = vand.u32 2147483647, %v6649_v17  ;;  %vm2789_vm6 = vweird.f32 %v6649_v17 }
 0x30b   :  { %3640 = vmatmul.msk.f32.gmra.mxu1 %vm494_vm1, %v2959_v60  ;;  %v2772_v7 = vmul.f32 %v3881_v6, %v2771_v14  ;;  %v2785_v58 = vmul.f32 %v3885_v30, %v6649_v17  ;;  %v1468_v40 = vmul.f32 %v6660_v16, %v1467_v52  ;;  %3888 = vrsqrt.f32 %v6671_v46  ;;  %v1056_v43 = vpop.xlane.xlu1 %1055 }
 0x30c   :  { %vm2790_vm5 = vweird.f32 %v3885_v30  ;;  %3890 = vrsqrt.f32 %v6680_v25  ;;  %vm2794_vm8 = vcmp.eq.f32.partialorder %v2793_v26, 8.507059e+37  ;;  %v2373_v14 = vand.u32 2147483647, %v6676_v0 }
 0x30d   :  { %v2773_v59 = vadd.f32 %v3881_v6, %v2772_v7  ;;  %v2786_v39 = vsub.f32 1.0, %v2785_v58  ;;  %v1469_v27 = vmul.f32 0.5, %v1468_v40  ;;  %v6691_v10 = vpop.f32.mrf.mxu3  ;;  %vm2791_vm7 = vmor %vm2789_vm6, %vm2790_vm5  ;;  %v2375_v52 = vand.u32 2147483648, %v6676_v0 }
 0x30e   :  { %v6699_v7 = vmul.f32 0.05263158, %v1056_v43  ;;  %vm2369_vm10 = vweird.f32 %v6676_v0  ;;  %vm2374_vm12 = vcmp.eq.f32.partialorder %v2373_v14, 8.507059e+37  ;;  %vm1473_vm13 = vcmp.eq.f32.partialorder %v6635_v24, inf }
 0x30f   :  { %v2777_v45 = vsel %vm2776_vm3, %v3881_v6, %v2773_v59  ;;  %v2787_v15 = vmul.f32 %v3885_v30, %v2786_v39  ;;  %v2796_v6 = vor.u32 1.1754944e-38, %v2795_v42  ;;  %v1470_v17 = vsub.f32 1.5, %v1469_v27 }
 0x310   :  { %v2782_v37 = vsel %vm2779_vm4, %v2781_v1, %v2777_v45  ;;  %3408 = vxpose.xlu2.b32.cont [3/16] (narrow) %v6012_v11, 8  ;;  %v3262_v5 = vpop.f32.mrf.mxu1  ;;  %v3887_v47 = vpop.eup %3886  ;;  %v2376_v42 = vor.u32 1.1754944e-38, %v2375_v52  ;;  %3892 = vrsqrt.f32 %v6699_v7  ;;  %vm1475_vm14 = vcmp.eq.f32.partialorder %v6635_v24, 0.0 }
 0x311   :  { %v2987_v9 = vmul.f32 %v2782_v37, %v7320_v28  ;;  %v2788_v38 = vadd.f32 %v3885_v30, %v2787_v15  ;;  %3438 = vxpose.xlu0.b32.start [1/16] (narrow) %v3262_v5, 8  ;;  %v3889_v3 = vpop.eup %3888  ;;  %v2365_v8 = vmul.f32 %v3887_v47, %v6676_v0  ;;  %vm2370_vm9 = vweird.f32 %v3887_v47 }
 0x312   :  { %v1479_v60 = vmul.f32 %v3889_v3, %v6671_v46  ;;  %v3891_v32 = vpop.eup %3890  ;;  %vm2371_vm11 = vmor %vm2369_vm10, %vm2370_vm9  ;;  %v1476_v5 = vand.u32 2147483648, %v6635_v24  ;;  %vm1485_vm15 = vcmp.eq.f32.partialorder %v6671_v46, inf  ;;  %vm1487_vm0 = vcmp.eq.f32.partialorder %v6671_v46, 0.0 }
 0x313   :  { %3668 = vmatmul.msk.f32.gmra.mxu3 %vm494_vm1, %v2987_v9  ;;  %v2792_v57 = vsel %vm2791_vm7, %v3885_v30, %v2788_v38  ;;  %v2366_v11 = vsub.f32 1.0, %v2365_v8  ;;  %v1471_v30 = vmul.f32 %v6660_v16, %v1470_v17  ;;  %v1803_v39 = vmul.f32 %v3891_v32, %v6680_v25 }
 0x314   :  { %v2797_v31 = vsel %vm2794_vm8, %v2796_v6, %v2792_v57  ;;  %v1480_v1 = vmul.f32 %v3889_v3, %v1479_v60  ;;  %vm1809_vm3 = vcmp.eq.f32.partialorder %v6680_v25, inf  ;;  %vm1811_vm6 = vcmp.eq.f32.partialorder %v6680_v25, 0.0 }
 0x315   :  { %v2988_v18 = vmul.f32 %v2797_v31, %v7321_v19  ;;  %v2367_v36 = vmul.f32 %v3887_v47, %v2366_v11  ;;  %v6704_v59 = vpop.f32.mrf.mxu3  ;;  %v1472_v16 = vmul.f32 %v1471_v30, %v6635_v24  ;;  %v1804_v37 = vmul.f32 %v3891_v32, %v1803_v39 }
 0x316   :  { %v1481_v27 = vmul.f32 0.5, %v1480_v1  ;;  %v3893_v38 = vpop.eup %3892  ;;  %vm1821_vm9 = vcmp.eq.f32.partialorder %v6699_v7, inf  ;;  %vm1823_vm10 = vcmp.eq.f32.partialorder %v6699_v7, 0.0 }
 0x317   :  { %v2368_v58 = vadd.f32 %v3887_v47, %v2367_v36  ;;  %v1474_v9 = vsel %vm1473_vm13, %v6635_v24, %v1472_v16  ;;  %v1805_v6 = vmul.f32 0.5, %v1804_v37  ;;  %v1815_v17 = vmul.f32 %v3893_v38, %v6699_v7 }
 0x318   :  { %3409 = vxpose.xlu2.b32.cont [4/16] (narrow) %v6061_v56, 8  ;;  %v7322_v56 = vld [vmem:[#allocation38_spill] sm:$0xff]  ;;  %v1482_v57 = vsub.f32 1.5, %v1481_v27  ;;  %v1477_v31 = vsel %vm1475_vm14, %v1476_v5, %v1474_v9 }
 0x319   :  { %v975_v40 = vpop.xlane.xlu0 %974  ;;  %v2372_v15 = vsel %vm2371_vm11, %v3887_v47, %v2368_v58  ;;  %v1937_v43 = vadd.f32 1e-06, %v1477_v31  ;;  %v1806_v11 = vsub.f32 1.5, %v1805_v6  ;;  %v1816_v19 = vmul.f32 %v3893_v38, %v1815_v17 }
 0x31a   :  { %v6707_v45 = vmul.f32 0.05263158, %v975_v40  ;;  %v2377_v0 = vsel %vm2374_vm12, %v2376_v42, %v2372_v15  ;;  %v1483_v60 = vmul.f32 %v3889_v3, %v1482_v57  ;;  %v1812_v31 = vand.u32 2147483648, %v6680_v25 }
 0x31b   :  { %3669 = vmatmul.msk.f32.gmra.mxu3 %vm494_vm1, %v2988_v18  ;;  %v2960_v26 = vmul.f32 %v2377_v0, %v7322_v56  ;;  %v1807_v18 = vmul.f32 %v3891_v32, %v1806_v11  ;;  %v1817_v40 = vmul.f32 0.5, %v1816_v19  ;;  %v2388_v56 = vand.u32 2147483647, %v1937_v43 }
 0x31c   :  { %3894 = vrsqrt.f32 %v6707_v45  ;;  %v1484_v24 = vmul.f32 %v1483_v60, %v6671_v46  ;;  %vm2384_vm4 = vweird.f32 %v1937_v43  ;;  %vm1497_vm8 = vcmp.eq.f32.partialorder %v6707_v45, inf }
 0x31d   :  { %3641 = vmatmul.msk.f32.gmra.mxu1 %vm494_vm1, %v2960_v26  ;;  %v6719_v47 = vpop.f32.mrf.mxu3  ;;  %3896 = vrcp.f32 %v1937_v43  ;;  %v1808_v39 = vmul.f32 %v1807_v18, %v6680_v25  ;;  %v1818_v0 = vsub.f32 1.5, %v1817_v40  ;;  %v2390_v26 = vand.u32 2147483648, %v1937_v43 }
 0x31e   :  { %v3265_v28 = vpop.f32.mrf.mxu1  ;;  %v1486_v1 = vsel %vm1485_vm15, %v6671_v46, %v1484_v24  ;;  %vm2389_vm7 = vcmp.eq.f32.partialorder %v2388_v56, 8.507059e+37  ;;  %v7323_v24 = vld [vmem:[#allocation3_spill] sm:$0xff] }
 0x31f   :  { %3439 = vxpose.xlu0.b32.cont [2/16] (narrow) %v3265_v28, 8  ;;  %v1819_v11 = vmul.f32 %v3893_v38, %v1818_v0 }
 0x320   :  { %3410 = vxpose.xlu2.b32.cont [5/16] (narrow) %v6108_v63, 8 }
 0x321   :  { %v1059_v52 = vpop.xlane.xlu1 %1058  ;;  %v1820_v38 = vmul.f32 %v1819_v11, %v6699_v7 }
 0x322   :  { %v3895_v8 = vpop.eup %3894  ;;  %v6728_v30 = vmul.f32 0.05263158, %v1059_v52 }
 0x323   :  { %v1491_v14 = vmul.f32 %v3895_v8, %v6707_v45  ;;  %v3897_v58 = vpop.eup %3896  ;;  %v1822_v56 = vsel %vm1821_vm9, %v6699_v7, %v1820_v38 }
 0x324   :  { %v2380_v3 = vmul.f32 %v3897_v58, %v1937_v43  ;;  %3898 = vrsqrt.f32 %v6728_v30  ;;  %vm2385_vm2 = vweird.f32 %v3897_v58 }
 0x325   :  { %v6725_v63 = vpop.f32.mrf.mxu3  ;;  %v1492_v36 = vmul.f32 %v3895_v8, %v1491_v14  ;;  %vm2386_vm5 = vmor %vm2384_vm4, %vm2385_vm2 }
 0x326   :  { %v2381_v16 = vsub.f32 1.0, %v2380_v3 }
 0x327   :  { %v1493_v42 = vmul.f32 0.5, %v1492_v36 }
 0x328   :  { %3411 = vxpose.xlu2.b32.cont [6/16] (narrow) %v6170_v41, 8  ;;  %v1488_v41 = vand.u32 2147483648, %v6671_v46  ;;  %v2382_v37 = vmul.f32 %v3897_v58, %v2381_v16  ;;  %v1810_v46 = vsel %vm1809_vm3, %v6680_v25, %v1808_v39  ;;  %vm1499_vm3 = vcmp.eq.f32.partialorder %v6707_v45, 0.0 }
 0x329   :  { %v1494_v9 = vsub.f32 1.5, %v1493_v42  ;;  %v1813_v14 = vsel %vm1811_vm6, %v1812_v31, %v1810_v46  ;;  %vm1833_vm6 = vcmp.eq.f32.partialorder %v6728_v30, inf }
 0x32a   :  { %v1489_v27 = vsel %vm1487_vm0, %v1488_v41, %v1486_v1  ;;  %v2383_v57 = vadd.f32 %v3897_v58, %v2382_v37  ;;  %v6746_v17 = vpop.eup %3898  ;;  %v6751_v18 = vadd.f32 1e-06, %v1813_v14 }
 0x32b   :  { %v6742_v6 = vadd.f32 1e-06, %v1489_v27  ;;  %v1495_v52 = vmul.f32 %v3895_v8, %v1494_v9  ;;  %v1827_v43 = vmul.f32 %v6746_v17, %v6728_v30 }
 0x32c   :  { %v978_v15 = vpop.xlane.xlu0 %977  ;;  %v2387_v60 = vsel %vm2386_vm5, %v3897_v58, %v2383_v57  ;;  %vm2804_vm0 = vweird.f32 %v6751_v18 }
 0x32d   :  { %v6738_v28 = vpop.f32.mrf.mxu3  ;;  %v6740_v5 = vmul.f32 0.05263158, %v978_v15  ;;  %3900 = vrcp.f32 %v6742_v6  ;;  %v1496_v8 = vmul.f32 %v1495_v52, %v6707_v45  ;;  %v1828_v40 = vmul.f32 %v6746_v17, %v1827_v43 }
 0x32e   :  { %v2403_v57 = vand.u32 2147483647, %v6742_v6  ;;  %vm2399_vm12 = vweird.f32 %v6742_v6  ;;  %v2810_v52 = vand.u32 2147483648, %v6751_v18 }
 0x32f   :  { %v3268_v32 = vpop.f32.mrf.mxu1  ;;  %3902 = vrsqrt.f32 %v6740_v5  ;;  %v1498_v16 = vsel %vm1497_vm8, %v6707_v45, %v1496_v8  ;;  %vm1835_vm8 = vcmp.eq.f32.partialorder %v6728_v30, 0.0 }
 0x330   :  { %3440 = vxpose.xlu0.b32.cont [3/16] (narrow) %v3268_v32, 8  ;;  %3412 = vxpose.xlu2.b32.cont [7/16] (narrow) %v6216_v51, 8  ;;  %v2391_v51 = vor.u32 1.1754944e-38, %v2390_v26  ;;  %3904 = vrcp.f32 %v6751_v18  ;;  %v1824_v32 = vand.u32 2147483648, %v6699_v7  ;;  %v1829_v26 = vmul.f32 0.5, %v1828_v40 }
 0x331   :  { %vm2404_vm15 = vcmp.eq.f32.partialorder %v2403_v57, 8.507059e+37 }
 0x332   :  { %v2392_v19 = vsel %vm2389_vm7, %v2391_v51, %v2387_v60  ;;  %v1825_v9 = vsel %vm1823_vm10, %v1824_v32, %v1822_v56  ;;  %v2808_v60 = vand.u32 2147483647, %v6751_v18 }
 0x333   :  { %v2961_v36 = vmul.f32 %v2392_v19, %v7323_v24  ;;  %v3901_v25 = vpop.eup %3900  ;;  %v6781_v31 = vadd.f32 1e-06, %v1825_v9 }
 0x334   :  { %v2395_v39 = vmul.f32 %v3901_v25, %v6742_v6  ;;  %vm2400_vm11 = vweird.f32 %v3901_v25  ;;  %vm2809_vm4 = vcmp.eq.f32.partialorder %v2808_v60, 8.507059e+37 }
 0x335   :  { %3642 = vmatmul.msk.f32.gmra.mxu1 %vm494_vm1, %v2961_v36  ;;  %v6765_v1 = vpop.eup %3902  ;;  %v6767_v42 = vpop.f32.mrf.mxu3  ;;  %vm2401_vm13 = vmor %vm2399_vm12, %vm2400_vm11  ;;  %vm2819_vm7 = vweird.f32 %v6781_v31  ;;  %vm1509_vm11 = vcmp.eq.f32.partialorder %v6740_v5, inf  ;;  %vm1511_vm12 = vcmp.eq.f32.partialorder %v6740_v5, 0.0 }
 0x336   :  { %v3905_v15 = vpop.eup %3904  ;;  %v2396_v0 = vsub.f32 1.0, %v2395_v39  ;;  %v1503_v37 = vmul.f32 %v6765_v1, %v6740_v5 }
 0x337   :  { %v2800_v27 = vmul.f32 %v3905_v15, %v6751_v18  ;;  %vm2805_vm14 = vweird.f32 %v3905_v15 }
 0x338   :  { %3413 = vxpose.xlu2.b32.cont [8/16] (narrow) %v6272_v54, 8  ;;  %v2405_v54 = vand.u32 2147483648, %v6742_v6  ;;  %v2397_v46 = vmul.f32 %v3901_v25, %v2396_v0  ;;  %v1504_v36 = vmul.f32 %v6765_v1, %v1503_v37  ;;  %vm2806_vm2 = vmor %vm2804_vm0, %vm2805_vm14  ;;  %v2811_v0 = vor.u32 1.1754944e-38, %v2810_v52 }
 0x339   :  { %v981_v58 = vpop.xlane.xlu0 %980  ;;  %v2801_v11 = vsub.f32 1.0, %v2800_v27 }
 0x33a   :  { %v6762_v3 = vmul.f32 0.05263158, %v981_v58  ;;  %v2406_v51 = vor.u32 1.1754944e-38, %v2405_v54  ;;  %v2398_v14 = vadd.f32 %v3901_v25, %v2397_v46  ;;  %v1500_v54 = vand.u32 2147483648, %v6707_v45 }
 0x33b   :  { %v2802_v6 = vmul.f32 %v3905_v15, %v2801_v11 }
 0x33c   :  { %v3271_v41 = vpop.f32.mrf.mxu1  ;;  %3906 = vrsqrt.f32 %v6762_v3  ;;  %v2402_v8 = vsel %vm2401_vm13, %v3901_v25, %v2398_v14  ;;  %v1505_v25 = vmul.f32 0.5, %v1504_v36  ;;  %v1501_v9 = vsel %vm1499_vm3, %v1500_v54, %v1498_v16 }
 0x33d   :  { %3441 = vxpose.xlu0.b32.cont [4/16] (narrow) %v3271_v41, 8  ;;  %3908 = vrcp.f32 %v6781_v31  ;;  %v2407_v40 = vsel %vm2404_vm15, %v2406_v51, %v2402_v8  ;;  %v2803_v39 = vadd.f32 %v3905_v15, %v2802_v6  ;;  %v6800_v41 = vpop.f32.mrf.mxu3  ;;  %v2825_v6 = vand.u32 2147483648, %v6781_v31 }
 0x33e   :  { %v2962_v32 = vmul.f32 %v2407_v40, %v5873_v2  ;;  %v7324_v2 = vld [vmem:[#allocation4_spill] sm:$0xff]  ;;  %v2823_v8 = vand.u32 2147483647, %v6781_v31  ;;  %vm1521_vm13 = vcmp.eq.f32.partialorder %v6762_v3, inf  ;;  %vm1523_vm14 = vcmp.eq.f32.partialorder %v6762_v3, 0.0 }
 0x33f   :  { %v2807_v56 = vsel %vm2806_vm2, %v3905_v15, %v2803_v39  ;;  %v6816_v15 = vadd.f32 1e-06, %v1501_v9 }
 0x340   :  { %3414 = vxpose.xlu2.b32.cont [9/16] (narrow) %v6324_v50, 8  ;;  %v984_v7 = vpop.xlane.xlu2 %983  ;;  %v1830_v50 = vsub.f32 1.5, %v1829_v26  ;;  %3643 = vmatmul.msk.f32.gmra.mxu1 %vm494_vm1, %v2962_v32  ;;  %v2812_v18 = vsel %vm2809_vm4, %v2811_v0, %v2807_v56  ;;  %vm2824_vm10 = vcmp.eq.f32.partialorder %v2823_v8, 8.507059e+37 }
 0x341   :  { %v6787_v19 = vmul.f32 0.05263158, %v984_v7  ;;  %v1065_v43 = vpop.xlane.xlu0 %1064  ;;  %v2989_v57 = vmul.f32 %v2812_v18, %v7324_v2  ;;  %vm2414_vm3 = vweird.f32 %v6816_v15 }
 0x342   :  { %v6790_v24 = vpop.eup %3906  ;;  %v6794_v38 = vmul.f32 0.05263158, %v1065_v43  ;;  %v1831_v37 = vmul.f32 %v6746_v17, %v1830_v50  ;;  %v1506_v17 = vsub.f32 1.5, %v1505_v25 }
 0x343   :  { %3910 = vrsqrt.f32 %v6787_v19  ;;  %v1515_v58 = vmul.f32 %v6790_v24, %v6762_v3  ;;  %v3909_v26 = vpop.eup %3908  ;;  %3670 = vmatmul.msk.f32.gmra.mxu3 %vm494_vm1, %v2989_v57  ;;  %vm1533_vm15 = vcmp.eq.f32.partialorder %v6787_v19, inf  ;;  %vm1535_vm2 = vcmp.eq.f32.partialorder %v6787_v19, 0.0 }
 0x344   :  { %3912 = vrsqrt.f32 %v6794_v38  ;;  %v2815_v11 = vmul.f32 %v3909_v26, %v6781_v31  ;;  %v1832_v14 = vmul.f32 %v1831_v37, %v6728_v30  ;;  %vm2820_vm5 = vweird.f32 %v3909_v26 }
 0x345   :  { %v1516_v46 = vmul.f32 %v6790_v24, %v1515_v58  ;;  %v1507_v58 = vmul.f32 %v6765_v1, %v1506_v17  ;;  %v6835_v39 = vpop.f32.mrf.mxu3  ;;  %vm2821_vm9 = vmor %vm2819_vm7, %vm2820_vm5  ;;  %v2826_v1 = vor.u32 1.1754944e-38, %v2825_v6  ;;  %v1512_v6 = vand.u32 2147483648, %v6740_v5 }
 0x346   :  { %v2816_v52 = vsub.f32 1.0, %v2815_v11  ;;  %v1834_v25 = vsel %vm1833_vm6, %v6728_v30, %v1832_v14  ;;  %vm1857_vm6 = vcmp.eq.f32.partialorder %v6794_v38, inf }
 0x347   :  { %v1062_v27 = vpop.xlane.xlu1 %1061  ;;  %v1508_v2 = vmul.f32 %v1507_v58, %v6740_v5 }
 0x348   :  { %v6810_v51 = vmul.f32 0.05263158, %v1062_v27  ;;  %3415 = vxpose.xlu2.b32.cont [10/16] (narrow) %v6381_v21, 8  ;;  %v1517_v21 = vmul.f32 0.5, %v1516_v46  ;;  %v2817_v50 = vmul.f32 %v3909_v26, %v2816_v52  ;;  %v1836_v46 = vand.u32 2147483648, %v6728_v30 }
 0x349   :  { %v6814_v45 = vpop.eup %3910  ;;  %v1510_v58 = vsel %vm1509_vm11, %v6740_v5, %v1508_v2 }
 0x34a   :  { %v1527_v16 = vmul.f32 %v6814_v45, %v6787_v19  ;;  %3914 = vrsqrt.f32 %v6810_v51  ;;  %v1071_v60 = vpop.xlane.xlu2 %1070  ;;  %v6822_v7 = vpop.eup %3912  ;;  %v2818_v32 = vadd.f32 %v3909_v26, %v2817_v50  ;;  %v1518_v56 = vsub.f32 1.5, %v1517_v21 }
 0x34b   :  { %v6825_v43 = vmul.f32 0.05263158, %v1071_v60  ;;  %3916 = vrcp.f32 %v6816_v15  ;;  %v1851_v40 = vmul.f32 %v6822_v7, %v6794_v38  ;;  %v7325_v60 = vld [vmem:[#allocation16_spill] sm:$0xff]  ;;  %v1837_v21 = vsel %vm1835_vm8, %v1836_v46, %v1834_v25 }
 0x34c   :  { %v1528_v36 = vmul.f32 %v6814_v45, %v1527_v16  ;;  %v2822_v27 = vsel %vm2821_vm9, %v3909_v26, %v2818_v32  ;;  %v1519_v52 = vmul.f32 %v6790_v24, %v1518_v56  ;;  %v1524_v50 = vand.u32 2147483648, %v6762_v3 }
 0x34d   :  { %3918 = vrsqrt.f32 %v6825_v43  ;;  %v1852_v57 = vmul.f32 %v6822_v7, %v1851_v40  ;;  %v2827_v11 = vsel %vm2824_vm10, %v2826_v1, %v2822_v27  ;;  %v6875_v25 = vadd.f32 1e-06, %v1837_v21  ;;  %v6885_v27 = vpop.f32.mrf.mxu3 }
 0x34e   :  { %v1529_v54 = vmul.f32 0.5, %v1528_v36  ;;  %v2990_v14 = vmul.f32 %v2827_v11, %v7325_v60  ;;  %v1520_v56 = vmul.f32 %v1519_v52, %v6762_v3  ;;  %v2418_v46 = vand.u32 2147483647, %v6816_v15 }
 0x34f   :  { %v1853_v24 = vmul.f32 0.5, %v1852_v57  ;;  %v1513_v2 = vsel %vm1511_vm12, %v1512_v6, %v1510_v58  ;;  %v1536_v21 = vand.u32 2147483648, %v6787_v19  ;;  %vm1845_vm7 = vcmp.eq.f32.partialorder %v6810_v51, inf }
 0x350   :  { %v6839_v0 = vpop.eup %3914  ;;  %v1068_v37 = vpop.xlane.xlu1 %1067  ;;  %3416 = vxpose.xlu2.b32.cont [11/16] (narrow) %v6436_v4, 8  ;;  %v1530_v16 = vsub.f32 1.5, %v1529_v54  ;;  %3671 = vmatmul.msk.f32.gmra.mxu3 %vm494_vm1, %v2990_v14  ;;  %v1522_v52 = vsel %vm1521_vm13, %v6762_v3, %v1520_v56  ;;  %vm2419_vm5 = vcmp.eq.f32.partialorder %v2418_v46, 8.507059e+37  ;;  %v7326_v56 = vld [vmem:[#allocation5_spill] sm:$0xff]  ;;  %v1860_v46 = vand.u32 2147483648, %v6794_v38 }
 0x351   :  { %v1839_v18 = vmul.f32 %v6839_v0, %v6810_v51  ;;  %v6846_v31 = vmul.f32 0.05263158, %v1068_v37  ;;  %v6848_v9 = vpop.eup %3916  ;;  %v1074_v26 = vpop.xlane.xlu0 %1073  ;;  %v2420_v37 = vand.u32 2147483648, %v6816_v15  ;;  %v1854_v57 = vsub.f32 1.5, %v1853_v24 }
 0x352   :  { %v2410_v8 = vmul.f32 %v6848_v9, %v6816_v15  ;;  %v6870_v54 = vmul.f32 0.05263158, %v1074_v26  ;;  %v1531_v30 = vmul.f32 %v6814_v45, %v1530_v16  ;;  %vm2415_vm0 = vweird.f32 %v6848_v9 }
 0x353   :  { %v1840_v4 = vmul.f32 %v6839_v0, %v1839_v18  ;;  %3920 = vrsqrt.f32 %v6846_v31  ;;  %v6861_v36 = vpop.eup %3918  ;;  %vm2416_vm4 = vmor %vm2414_vm3, %vm2415_vm0  ;;  %v2421_v60 = vor.u32 1.1754944e-38, %v2420_v37  ;;  %v6901_v26 = vadd.f32 1e-06, %v1513_v2 }
 0x354   :  { %v3274_v17 = vpop.f32.mrf.mxu1  ;;  %v2411_v32 = vsub.f32 1.0, %v2410_v8  ;;  %v1875_v1 = vmul.f32 %v6861_v36, %v6825_v43  ;;  %3922 = vrsqrt.f32 %v6870_v54  ;;  %v1855_v58 = vmul.f32 %v6822_v7, %v1854_v57 }
 0x355   :  { %3442 = vxpose.xlu0.b32.cont [5/16] (narrow) %v3274_v17, 8  ;;  %v1841_v40 = vmul.f32 0.5, %v1840_v4  ;;  %3924 = vrcp.f32 %v6875_v25  ;;  %vm1847_vm8 = vcmp.eq.f32.partialorder %v6810_v51, 0.0  ;;  %vm1859_vm9 = vcmp.eq.f32.partialorder %v6794_v38, 0.0 }
 0x356   :  { %v2412_v45 = vmul.f32 %v6848_v9, %v2411_v32  ;;  %v1876_v4 = vmul.f32 %v6861_v36, %v1875_v1  ;;  %3926 = vrcp.f32 %v6901_v26  ;;  %v1856_v57 = vmul.f32 %v1855_v58, %v6794_v38 }
 0x357   :  { %v1842_v11 = vsub.f32 1.5, %v1841_v40  ;;  %vm2834_vm11 = vweird.f32 %v6875_v25  ;;  %vm1881_vm3 = vcmp.eq.f32.partialorder %v6825_v43, inf }
 0x358   :  { %3417 = vxpose.xlu2.b32.cont [12/16] (narrow) %v6487_v12, 8  ;;  %v1532_v12 = vmul.f32 %v1531_v30, %v6787_v19  ;;  %v2413_v16 = vadd.f32 %v6848_v9, %v2412_v45  ;;  %v1877_v45 = vmul.f32 0.5, %v1876_v4 }
 0x359   :  { %v6883_v18 = vpop.eup %3920  ;;  %v1843_v24 = vmul.f32 %v6839_v0, %v1842_v11  ;;  %v1525_v0 = vsel %vm1523_vm14, %v1524_v50, %v1522_v52  ;;  %v6935_v50 = vpop.f32.mrf.mxu3 }
 0x35a   :  { %v1863_v17 = vmul.f32 %v6883_v18, %v6846_v31  ;;  %v2417_v8 = vsel %vm2416_vm4, %v6848_v9, %v2413_v16  ;;  %v6908_v15 = vpop.eup %3922  ;;  %v1534_v32 = vsel %vm1533_vm15, %v6787_v19, %v1532_v12  ;;  %v2840_v12 = vand.u32 2147483648, %v6875_v25 }
 0x35b   :  { %v2422_v40 = vsel %vm2419_vm5, %v2421_v60, %v2417_v8  ;;  %v1887_v9 = vmul.f32 %v6908_v15, %v6870_v54  ;;  %v3925_v37 = vpop.eup %3924  ;;  %v1844_v11 = vmul.f32 %v1843_v24, %v6810_v51  ;;  %v6938_v16 = vadd.f32 1e-06, %v1525_v0 }
 0x35c   :  { %v1864_v5 = vmul.f32 %v6883_v18, %v1863_v17  ;;  %v2963_v1 = vmul.f32 %v2422_v40, %v7326_v56  ;;  %v2830_v2 = vmul.f32 %v3925_v37, %v6875_v25  ;;  %v1537_v4 = vsel %vm1535_vm2, %v1536_v21, %v1534_v32 }
 0x35d   :  { %v1077_v14 = vpop.xlane.xlu1 %1076  ;;  %v3277_v6 = vpop.f32.mrf.mxu1  ;;  %v1888_v3 = vmul.f32 %v6908_v15, %v1887_v9  ;;  %v1884_v60 = vand.u32 2147483648, %v6825_v43  ;;  %v6944_v52 = vadd.f32 1e-06, %v1537_v4  ;;  %vm2835_vm10 = vweird.f32 %v3925_v37 }
 0x35e   :  { %3443 = vxpose.xlu0.b32.cont [6/16] (narrow) %v3277_v6, 8  ;;  %v6912_v30 = vmul.f32 0.05263158, %v1077_v14  ;;  %v1865_v7 = vmul.f32 0.5, %v1864_v5  ;;  %3644 = vmatmul.msk.f32.gmra.mxu1 %vm494_vm1, %v2963_v1  ;;  %v2831_v17 = vsub.f32 1.0, %v2830_v2  ;;  %v1878_v5 = vsub.f32 1.5, %v1877_v45  ;;  %v3927_v6 = vpop.eup %3926  ;;  %vm2836_vm12 = vmor %vm2834_vm11, %vm2835_vm10 }
 0x35f   :  { %v2838_v24 = vand.u32 2147483647, %v6875_v25  ;;  %v1858_v19 = vsel %vm1857_vm6, %v6794_v38, %v1856_v57  ;;  %v1889_v21 = vmul.f32 0.5, %v1888_v3  ;;  %v2425_v32 = vmul.f32 %v3927_v6, %v6901_v26 }
 0x360   :  { %3928 = vrsqrt.f32 %v6912_v30  ;;  %3418 = vxpose.xlu2.b32.cont [13/16] (narrow) %v6550_v35, 8  ;;  %v1848_v35 = vand.u32 2147483648, %v6810_v51  ;;  %v1866_v14 = vsub.f32 1.5, %v1865_v7  ;;  %v2832_v58 = vmul.f32 %v3925_v37, %v2831_v17 }
 0x361   :  { %3930 = vrcp.f32 %v6938_v16  ;;  %v1846_v56 = vsel %vm1845_vm7, %v6810_v51, %v1844_v11  ;;  %v2841_v9 = vor.u32 1.1754944e-38, %v2840_v12  ;;  %v2426_v0 = vsub.f32 1.0, %v2425_v32 }
 0x362   :  { %v2833_v1 = vadd.f32 %v3925_v37, %v2832_v58  ;;  %v1867_v7 = vmul.f32 %v6883_v18, %v1866_v14  ;;  %v2433_v2 = vand.u32 2147483647, %v6901_v26  ;;  %3932 = vrcp.f32 %v6944_v52  ;;  %v7327_v18 = vld [vmem:[#allocation7_spill] sm:$0xff] }
 0x363   :  { %v1879_v25 = vmul.f32 %v6861_v36, %v1878_v5  ;;  %vm2839_vm13 = vcmp.eq.f32.partialorder %v2838_v24, 8.507059e+37  ;;  %v2435_v11 = vand.u32 2147483648, %v6901_v26  ;;  %v1890_v3 = vsub.f32 1.5, %v1889_v21  ;;  %v6977_v24 = vpop.f32.mrf.mxu3 }
 0x364   :  { %v2837_v57 = vsel %vm2836_vm12, %v3925_v37, %v2833_v1  ;;  %v2427_v12 = vmul.f32 %v3927_v6, %v2426_v0  ;;  %vm2430_vm14 = vweird.f32 %v3927_v6  ;;  %vm2429_vm15 = vweird.f32 %v6901_v26 }
 0x365   :  { %v3280_v8 = vpop.f32.mrf.mxu1  ;;  %v2842_v17 = vsel %vm2839_vm13, %v2841_v9, %v2837_v57  ;;  %v1868_v36 = vmul.f32 %v1867_v7, %v6846_v31  ;;  %vm6972_vm0 = vcmp.eq.f32.partialorder %v2433_v2, 8.507059e+37  ;;  %vm2431_vm2 = vmor %vm2429_vm15, %vm2430_vm14  ;;  %v2436_v21 = vor.u32 1.1754944e-38, %v2435_v11 }
 0x366   :  { %v6948_v40 = vpop.eup %3928  ;;  %3444 = vxpose.xlu0.b32.cont [7/16] (narrow) %v3280_v8, 8  ;;  %v2991_v14 = vmul.f32 %v2842_v17, %v7327_v18  ;;  %v2428_v37 = vadd.f32 %v3927_v6, %v2427_v12  ;;  %v2448_v26 = vand.u32 2147483647, %v6938_v16  ;;  %v1861_v51 = vsel %vm1859_vm9, %v1860_v46, %v1858_v19  ;;  %v7330_v46 = vld [vmem:[#allocation6_spill] sm:$0xff] }
 0x367   :  { %v1899_v45 = vmul.f32 %v6948_v40, %v6912_v30  ;;  %v3931_v4 = vpop.eup %3930  ;;  %v2450_v2 = vand.u32 2147483648, %v6938_v16  ;;  %vm1869_vm5 = vcmp.eq.f32.partialorder %v6846_v31, inf  ;;  %vm1871_vm6 = vcmp.eq.f32.partialorder %v6846_v31, 0.0 }
 0x368   :  { %3419 = vxpose.xlu2.b32.cont [14/16] (narrow) %v6598_v55, 8  ;;  %v1849_v55 = vsel %vm1847_vm8, %v1848_v35, %v1846_v56  ;;  %v2440_v58 = vmul.f32 %v3931_v4, %v6938_v16  ;;  %3672 = vmatmul.msk.f32.gmra.mxu3 %vm494_vm1, %v2991_v14  ;;  %v6987_v35 = vpop.eup %3932  ;;  %v1891_v56 = vmul.f32 %v6908_v15, %v1890_v3  ;;  %vm2445_vm4 = vweird.f32 %v3931_v4 }
 0x369   :  { %v1900_v8 = vmul.f32 %v6948_v40, %v1899_v45  ;;  %v6981_v32 = vadd.f32 1e-06, %v1849_v55  ;;  %v2432_v1 = vsel %vm2431_vm2, %v3927_v6, %v2428_v37  ;;  %v6990_v45 = vadd.f32 1e-06, %v1861_v51 }
 0x36a   :  { %v2441_v9 = vsub.f32 1.0, %v2440_v58  ;;  %v2437_v0 = vsel %vm6972_vm0, %v2436_v21, %v2432_v1  ;;  %v2455_v38 = vmul.f32 %v6987_v35, %v6944_v52  ;;  %v1872_v15 = vand.u32 2147483648, %v6846_v31 }
 0x36b   :  { %v1901_v7 = vmul.f32 0.5, %v1900_v8  ;;  %v2964_v19 = vmul.f32 %v2437_v0, %v7330_v46  ;;  %3934 = vrcp.f32 %v6981_v32  ;;  %vm1883_vm7 = vcmp.eq.f32.partialorder %v6825_v43, 0.0 }
 0x36c   :  { %v2442_v57 = vmul.f32 %v3931_v4, %v2441_v9  ;;  %v2456_v6 = vsub.f32 1.0, %v2455_v38  ;;  %v1870_v11 = vsel %vm1869_vm5, %v6846_v31, %v1868_v36  ;;  %vm2444_vm8 = vweird.f32 %v6938_v16 }
 0x36d   :  { %3645 = vmatmul.msk.f32.gmra.mxu1 %vm494_vm1, %v2964_v19  ;;  %3936 = vrcp.f32 %v6990_v45  ;;  %vm2446_vm9 = vmor %vm2444_vm8, %vm2445_vm4  ;;  %vm2449_vm10 = vcmp.eq.f32.partialorder %v2448_v26, 8.507059e+37  ;;  %v2451_v17 = vor.u32 1.1754944e-38, %v2450_v2  ;;  %v1892_v18 = vmul.f32 %v1891_v56, %v6870_v54 }
 0x36e   :  { %v2443_v3 = vadd.f32 %v3931_v4, %v2442_v57  ;;  %v2457_v12 = vmul.f32 %v6987_v35, %v2456_v6  ;;  %v1902_v14 = vsub.f32 1.5, %v1901_v7  ;;  %vm2460_vm11 = vweird.f32 %v6987_v35 }
 0x36f   :  { %v2465_v16 = vand.u32 2147483648, %v6944_v52  ;;  %v1873_v37 = vsel %vm1871_vm6, %v1872_v15, %v1870_v11  ;;  %vm2459_vm12 = vweird.f32 %v6944_v52  ;;  %v2463_v21 = vand.u32 2147483647, %v6944_v52 }
 0x370   :  { %3420 = vxpose.xlu2.b32.cont [15/16] (narrow) %v6641_v44, 8  ;;  %v1880_v44 = vmul.f32 %v1879_v25, %v6825_v43  ;;  %v2447_v8 = vsel %vm2446_vm9, %v3931_v4, %v2443_v3  ;;  %v2458_v36 = vadd.f32 %v6987_v35, %v2457_v12  ;;  %v7020_v26 = vadd.f32 1e-06, %v1873_v37  ;;  %v3358_v4 = vpop.f32.mrf.mxu3  ;;  %vm7027_vm15 = vmor %vm2459_vm12, %vm2460_vm11 }
 0x371   :  { %v2452_v55 = vsel %vm2449_vm10, %v2451_v17, %v2447_v8  ;;  %v3935_v25 = vpop.eup %3934  ;;  %vm1893_vm13 = vcmp.eq.f32.partialorder %v6870_v54, inf  ;;  %vm1895_vm14 = vcmp.eq.f32.partialorder %v6870_v54, 0.0  ;;  %v1896_v51 = vand.u32 2147483648, %v6870_v54 }
 0x372   :  { %v2965_v58 = vmul.f32 %v2452_v55, %v6236_v22  ;;  %v2845_v22 = vmul.f32 %v3935_v25, %v6981_v32  ;;  %v1882_v52 = vsel %vm1881_vm3, %v6825_v43, %v1880_v44  ;;  %v1903_v1 = vmul.f32 %v6948_v40, %v1902_v14  ;;  %v7333_v43 = vld [vmem:[#allocation9_spill] sm:$0xff] }
 0x373   :  { %v7032_v56 = vpop.eup %3936  ;;  %v2462_v9 = vsel %vm7027_vm15, %v6987_v35, %v2458_v36  ;;  %3938 = vrcp.f32 %v7020_v26  ;;  %v1894_v7 = vsel %vm1893_vm13, %v6870_v54, %v1892_v18  ;;  %v2466_v0 = vor.u32 1.1754944e-38, %v2465_v16 }
 0x374   :  { %v2846_v2 = vsub.f32 1.0, %v2845_v22  ;;  %v2860_v38 = vmul.f32 %v7032_v56, %v6990_v45  ;;  %vm2464_vm0 = vcmp.eq.f32.partialorder %v2463_v21, 8.507059e+37  ;;  %vm2850_vm2 = vweird.f32 %v3935_v25 }
 0x375   :  { %3646 = vmatmul.msk.f32.gmra.mxu1 %vm494_vm1, %v2965_v58  ;;  %v2853_v40 = vand.u32 2147483647, %v6981_v32  ;;  %v2855_v46 = vand.u32 2147483648, %v6981_v32  ;;  %v2467_v35 = vsel %vm2464_vm0, %v2466_v0, %v2462_v9  ;;  %v1885_v57 = vsel %vm1883_vm7, %v1884_v60, %v1882_v52 }
 0x376   :  { %v2847_v19 = vmul.f32 %v3935_v25, %v2846_v2  ;;  %v1904_v15 = vmul.f32 %v1903_v1, %v6912_v30  ;;  %vm1905_vm3 = vcmp.eq.f32.partialorder %v6912_v30, inf  ;;  %v1908_v6 = vand.u32 2147483648, %v6912_v30 }
 0x377   :  { %v3283_v5 = vpop.f32.mrf.mxu1  ;;  %v7056_v11 = vadd.f32 1e-06, %v1885_v57  ;;  %vm2849_vm4 = vweird.f32 %v6981_v32  ;;  %v1897_v17 = vsel %vm1895_vm14, %v1896_v51, %v1894_v7  ;;  %v2966_v60 = vmul.f32 %v2467_v35, %v7333_v43 }
 0x378   :  { %3445 = vxpose.xlu0.b32.cont [8/16] (narrow) %v3283_v5, 8  ;;  %3421 = vxpose.xlu2.b32.end [16/16] (narrow) %v6667_v33, 8  ;;  %v2861_v33 = vsub.f32 1.0, %v2860_v38  ;;  %v2848_v3 = vadd.f32 %v3935_v25, %v2847_v19  ;;  %vm2851_vm5 = vmor %vm2849_vm4, %vm2850_vm2  ;;  %vm2854_vm6 = vcmp.eq.f32.partialorder %v2853_v40, 8.507059e+37  ;;  %v2856_v14 = vor.u32 1.1754944e-38, %v2855_v46  ;;  %v3361_v5 = vpop.f32.mrf.mxu3 }
 0x379   :  { %v3939_v12 = vpop.eup %3938  ;;  %3940 = vrcp.f32 %v7056_v11  ;;  %vm2865_vm7 = vweird.f32 %v7032_v56  ;;  %v1906_v54 = vsel %vm1905_vm3, %v6912_v30, %v1904_v15  ;;  %v2870_v16 = vand.u32 2147483648, %v6990_v45 }
 0x37a   :  { %v2862_v44 = vmul.f32 %v7032_v56, %v2861_v33  ;;  %v2852_v8 = vsel %vm2851_vm5, %v3935_v25, %v2848_v3  ;;  %v2875_v32 = vmul.f32 %v3939_v12, %v7020_v26  ;;  %v7072_v37 = vadd.f32 1e-06, %v1897_v17 }
 0x37b   :  { %v2857_v36 = vsel %vm2854_vm6, %v2856_v14, %v2852_v8  ;;  %vm2864_vm8 = vweird.f32 %v6990_v45  ;;  %v2868_v25 = vand.u32 2147483647, %v6990_v45  ;;  %vm1907_vm9 = vcmp.eq.f32.partialorder %v6912_v30, 0.0 }
 0x37c   :  { %v2863_v55 = vadd.f32 %v7032_v56, %v2862_v44  ;;  %v2992_v58 = vmul.f32 %v2857_v36, %v6374_v48  ;;  %v2876_v21 = vsub.f32 1.0, %v2875_v32  ;;  %vm2866_vm10 = vmor %vm2864_vm8, %vm2865_vm7  ;;  %3942 = vrcp.f32 %v7072_v37 }
 0x37d   :  { %3647 = vmatmul.msk.f32.gmra.mxu1 %vm494_vm1, %v2966_v60  ;;  %v1909_v31 = vsel %vm1907_vm9, %v1908_v6, %v1906_v54  ;;  %v2871_v48 = vor.u32 1.1754944e-38, %v2870_v16  ;;  %vm2869_vm11 = vcmp.eq.f32.partialorder %v2868_v25, 8.507059e+37  ;;  %vm2880_vm12 = vweird.f32 %v3939_v12 }
 0x37e   :  { %3673 = vmatmul.msk.f32.gmra.mxu3 %vm494_vm1, %v2992_v58  ;;  %v2877_v51 = vmul.f32 %v3939_v12, %v2876_v21  ;;  %v7083_v9 = vadd.f32 1e-06, %v1909_v31  ;;  %v2885_v2 = vand.u32 2147483648, %v7020_v26  ;;  %vm2879_vm13 = vweird.f32 %v7020_v26 }
 0x37f   :  { %v3941_v22 = vpop.eup %3940  ;;  %v2883_v40 = vand.u32 2147483647, %v7020_v26  ;;  %vm2881_vm14 = vmor %vm2879_vm13, %vm2880_vm12  ;;  %v2900_v3 = vand.u32 2147483648, %v7056_v11  ;;  %vm2894_vm2 = vweird.f32 %v7056_v11  ;;  %v2898_v44 = vand.u32 2147483647, %v7056_v11 }
 0x380   :  { %v3286_v18 = vpop.f32.mrf.mxu1  ;;  %3502 = vxpose.xlu2.b32.start [1/16] (narrow) %v3358_v4, 8  ;;  %v2867_v4 = vsel %vm2866_vm10, %v7032_v56, %v2863_v55  ;;  %v2890_v52 = vmul.f32 %v3941_v22, %v7056_v11  ;;  %v2878_v30 = vadd.f32 %v3939_v12, %v2877_v51  ;;  %v3364_v56 = vpop.f32.mrf.mxu3  ;;  %3944 = vrcp.f32 %v7083_v9 }
 0x381   :  { %3446 = vxpose.xlu0.b32.cont [9/16] (narrow) %v3286_v18, 8  ;;  %v2872_v1 = vsel %vm2869_vm11, %v2871_v48, %v2867_v4  ;;  %v2886_v33 = vor.u32 1.1754944e-38, %v2885_v2  ;;  %vm2884_vm15 = vcmp.eq.f32.partialorder %v2883_v40, 8.507059e+37  ;;  %vm2895_vm0 = vweird.f32 %v3941_v22 }
 0x382   :  { %v2891_v7 = vsub.f32 1.0, %v2890_v52  ;;  %v3943_v0 = vpop.eup %3942  ;;  %v2993_v38 = vmul.f32 %v2872_v1, %v6311_v23  ;;  %v2882_v46 = vsel %vm2881_vm14, %v3939_v12, %v2878_v30  ;;  %vm2896_vm3 = vmor %vm2894_vm2, %vm2895_vm0  ;;  %v2901_v60 = vor.u32 1.1754944e-38, %v2900_v3 }
 0x383   :  { %v2905_v19 = vmul.f32 %v3943_v0, %v7072_v37  ;;  %v2887_v57 = vsel %vm2884_vm15, %v2886_v33, %v2882_v46  ;;  %vm2899_vm4 = vcmp.eq.f32.partialorder %v2898_v44, 8.507059e+37  ;;  %vm2910_vm5 = vweird.f32 %v3943_v0 }
 0x384   :  { %v2892_v35 = vmul.f32 %v3941_v22, %v2891_v7  ;;  %v2994_v26 = vmul.f32 %v2887_v57, %v6419_v53  ;;  %v2915_v53 = vand.u32 2147483648, %v7072_v37  ;;  %vm2909_vm6 = vweird.f32 %v7072_v37 }
 0x385   :  { %v2906_v6 = vsub.f32 1.0, %v2905_v19  ;;  %v2913_v11 = vand.u32 2147483647, %v7072_v37  ;;  %vm2911_vm7 = vmor %vm2909_vm6, %vm2910_vm5  ;;  %v2930_v4 = vand.u32 2147483648, %v7083_v9  ;;  %vm2924_vm10 = vweird.f32 %v7083_v9 }
 0x386   :  { %3674 = vmatmul.msk.f32.gmra.mxu3 %vm494_vm1, %v2993_v38  ;;  %v2893_v15 = vadd.f32 %v3941_v22, %v2892_v35  ;;  %v3945_v23 = vpop.eup %3944  ;;  %v2928_v37 = vand.u32 2147483647, %v7083_v9 }
 0x387   :  { %v2907_v18 = vmul.f32 %v3943_v0, %v2906_v6  ;;  %v2920_v43 = vmul.f32 %v3945_v23, %v7083_v9  ;;  %vm2914_vm8 = vcmp.eq.f32.partialorder %v2913_v11, 8.507059e+37  ;;  %vm2925_vm9 = vweird.f32 %v3945_v23 }
 0x388   :  { %v3289_v45 = vpop.f32.mrf.mxu1  ;;  %3503 = vxpose.xlu2.b32.cont [2/16] (narrow) %v3361_v5, 8  ;;  %v3367_v17 = vpop.f32.mrf.mxu3  ;;  %v2897_v12 = vsel %vm2896_vm3, %v3941_v22, %v2893_v15  ;;  %v2916_v5 = vor.u32 1.1754944e-38, %v2915_v53  ;;  %vm2926_vm11 = vmor %vm2924_vm10, %vm2925_vm9  ;;  %v2931_v31 = vor.u32 1.1754944e-38, %v2930_v4  ;;  %vm2929_vm12 = vcmp.eq.f32.partialorder %v2928_v37, 8.507059e+37 }
 0x389   :  { %3447 = vxpose.xlu0.b32.cont [10/16] (narrow) %v3289_v45, 8  ;;  %v2902_v14 = vsel %vm2899_vm4, %v2901_v60, %v2897_v12  ;;  %v2908_v8 = vadd.f32 %v3943_v0, %v2907_v18  ;;  %v2921_v55 = vsub.f32 1.0, %v2920_v43 }
 0x38a   :  { %v2995_v32 = vmul.f32 %v2902_v14, %v6379_v20 }
 0x38b   :  { %v2912_v36 = vsel %vm2911_vm7, %v3943_v0, %v2908_v8  ;;  %v2922_v16 = vmul.f32 %v3945_v23, %v2921_v55 }
 0x38c   :  { %v2917_v25 = vsel %vm2914_vm8, %v2916_v5, %v2912_v36 }
 0x38d   :  { %v2923_v21 = vadd.f32 %v3945_v23, %v2922_v16  ;;  %v2996_v20 = vmul.f32 %v2917_v25, %v6423_v34 }
 0x38e   :  { %3675 = vmatmul.msk.f32.gmra.mxu3 %vm494_vm1, %v2994_v26 }
 0x38f   :  { %v2927_v51 = vsel %vm2926_vm11, %v3945_v23, %v2923_v21 }
 0x390   :  { %3504 = vxpose.xlu2.b32.cont [3/16] (narrow) %v3364_v56, 8  ;;  %v3370_v58 = vpop.f32.mrf.mxu3  ;;  %v2932_v48 = vsel %vm2929_vm12, %v2931_v31, %v2927_v51 }
 0x391   :  { %v2997_v52 = vmul.f32 %v2932_v48, %v6474_v13 }
 0x396   :  { %3676 = vmatmul.msk.f32.gmra.mxu3 %vm494_vm1, %v2995_v32 }
 0x398   :  { %3505 = vxpose.xlu2.b32.cont [4/16] (narrow) %v3367_v17, 8  ;;  %v3373_v22 = vpop.f32.mrf.mxu3 }
 0x39a   :  { %v3292_v54 = vpop.f32.mrf.mxu1 }
 0x39b   :  { %3448 = vxpose.xlu0.b32.cont [11/16] (narrow) %v3292_v54, 8 }
 0x39e   :  { %3677 = vmatmul.msk.f32.gmra.mxu3 %vm494_vm1, %v2996_v20 }
 0x3a0   :  { %3506 = vxpose.xlu2.b32.cont [5/16] (narrow) %v3370_v58, 8  ;;  %v3376_v45 = vpop.f32.mrf.mxu3 }
 0x3a6   :  { %3678 = vmatmul.msk.f32.gmra.mxu3 %vm494_vm1, %v2997_v52 }
 0x3a8   :  { %3507 = vxpose.xlu2.b32.cont [6/16] (narrow) %v3373_v22, 8 }
 0x3b0   :  { %3508 = vxpose.xlu2.b32.cont [7/16] (narrow) %v3376_v45, 8 }
 0x3b2   :  { %v3295_v34 = vpop.f32.mrf.mxu1 }
 0x3b3   :  { %3449 = vxpose.xlu0.b32.cont [12/16] (narrow) %v3295_v34, 8 }
 0x3bd   :  { %v3298_v1 = vpop.f32.mrf.mxu1 }
 0x3be   :  { %3450 = vxpose.xlu0.b32.cont [13/16] (narrow) %v3298_v1, 8 }
 0x3c6   :  { %v3379_v9 = vpop.f32.mrf.mxu3 }
 0x3c7   :  { %3509 = vxpose.xlu2.b32.cont [8/16] (narrow) %v3379_v9, 8 }
 0x3d3   :  { %v3382_v30 = vpop.f32.mrf.mxu3 }
 0x3d4   :  { %3510 = vxpose.xlu2.b32.cont [9/16] (narrow) %v3382_v30, 8 }
 0x3db   :  { %v3301_v7 = vpop.f32.mrf.mxu1 }
 0x3dc   :  { %3451 = vxpose.xlu0.b32.cont [14/16] (narrow) %v3301_v7, 8 }
 0x3ea   :  { %v3304_v0 = vpop.f32.mrf.mxu1 }
 0x3eb   :  { %v3385_v2 = vpop.f32.mrf.mxu3  ;;  %3452 = vxpose.xlu0.b32.cont [15/16] (narrow) %v3304_v0, 8 }
 0x3ec   :  { %3511 = vxpose.xlu2.b32.cont [10/16] (narrow) %v3385_v2, 8 }
 0x3f2   :  { %v3307_v56 = vpop.f32.mrf.mxu1 }
 0x3f3   :  { %3453 = vxpose.xlu0.b32.end [16/16] (narrow) %v3307_v56, 8 }
 0x3fa   :  { %v3310_v13 = vpop.f32.mrf.mxu1 }
 0x3fb   :  { %3470 = vxpose.xlu1.b32.start [1/16] (narrow) %v3310_v13, 8 }
 0x401   :  { %v3388_v38 = vpop.f32.mrf.mxu3 }
 0x402   :  { %3512 = vxpose.xlu2.b32.cont [11/16] (narrow) %v3388_v38, 8 }
 0x403   :  { %3471 = vxpose.xlu1.b32.cont [2/16] (narrow) %v6553_v61, 8  ;;  %v3534_v61 = vld [vmem:[%s7153_s4] sm:$0xff] }
 0x409   :  { %v3391_v40 = vpop.f32.mrf.mxu3 }
 0x40a   :  { %3513 = vxpose.xlu2.b32.cont [12/16] (narrow) %v3391_v40, 8 }
 0x40b   :  { %3472 = vxpose.xlu1.b32.cont [3/16] (narrow) %v6588_v49, 8  ;;  %v3422_v49 = vpop.trf.xlu2 }
 0x411   :  { %v3394_v46 = vpop.f32.mrf.mxu3 }
 0x412   :  { %3514 = vxpose.xlu2.b32.cont [13/16] (narrow) %v3394_v46, 8 }
 0x413   :  { %3473 = vxpose.xlu1.b32.cont [4/16] (narrow) %v6626_v62, 8  ;;  %v3538_v62 = vadd.f32 %v3534_v61, %v3422_v49 }
 0x415   :  { %3542 = vst [vmem:[%s7154_s5] sm:$0xff] %v3538_v62 }
 0x419   :  { %v3397_v35 = vpop.f32.mrf.mxu3 }
 0x41a   :  { %3515 = vxpose.xlu2.b32.cont [14/16] (narrow) %v3397_v35, 8 }
 0x41b   :  { %3474 = vxpose.xlu1.b32.cont [5/16] (narrow) %v6662_v29, 8  ;;  %v3537_v29 = vld [vmem:[%s7153_s4 + $0x18] sm:$0xff] }
 0x421   :  { %v3400_v19 = vpop.f32.mrf.mxu3 }
 0x422   :  { %3516 = vxpose.xlu2.b32.cont [15/16] (narrow) %v3400_v19, 8 }
 0x423   :  { %3475 = vxpose.xlu1.b32.cont [6/16] (narrow) %v6691_v10, 8 }
 0x429   :  { %v3403_v33 = vpop.f32.mrf.mxu3 }
 0x42a   :  { %3517 = vxpose.xlu2.b32.end [16/16] (narrow) %v3403_v33, 8 }
 0x42b   :  { %3476 = vxpose.xlu1.b32.cont [7/16] (narrow) %v6704_v59, 8  ;;  %v3535_v59 = vld [vmem:[%s7153_s4 + $0x8] sm:$0xff] }
 0x433   :  { %3477 = vxpose.xlu1.b32.cont [8/16] (narrow) %v6719_v47, 8  ;;  %v3454_v47 = vpop.trf.xlu0 }
 0x43b   :  { %3478 = vxpose.xlu1.b32.cont [9/16] (narrow) %v6725_v63, 8 }
 0x443   :  { %3479 = vxpose.xlu1.b32.cont [10/16] (narrow) %v6738_v28, 8  ;;  %v3539_v28 = vadd.f32 %v3535_v59, %v3454_v47 }
 0x445   :  { %3543 = vst [vmem:[%s7154_s5 + $0x8] sm:$0xff] %v3539_v28 }
 0x44b   :  { %3480 = vxpose.xlu1.b32.cont [11/16] (narrow) %v6767_v42, 8  ;;  %v3518_v10 = vpop.trf.xlu2  ;;  %v3536_v42 = vld [vmem:[%s7153_s4 + $0x10] sm:$0xff] }
 0x44c   :  { %v3541_v63 = vadd.f32 %v3537_v29, %v3518_v10 }
 0x44e   :  { %3545 = vst [vmem:[%s7154_s5 + $0x18] sm:$0xff] %v3541_v63 }
 0x453   :  { %3481 = vxpose.xlu1.b32.cont [12/16] (narrow) %v6800_v41, 8 }
 0x45b   :  { %3482 = vxpose.xlu1.b32.cont [13/16] (narrow) %v6835_v39, 8 }
 0x463   :  { %3483 = vxpose.xlu1.b32.cont [14/16] (narrow) %v6885_v27, 8 }
 0x46b   :  { %3484 = vxpose.xlu1.b32.cont [15/16] (narrow) %v6935_v50, 8 }
 0x473   :  { %3485 = vxpose.xlu1.b32.end [16/16] (narrow) %v6977_v24, 8 }
 0x49f   :  { %v3486_v41 = vpop.trf.xlu1 }
 0x4a0   :  { %v3540_v39 = vadd.f32 %v3536_v42, %v3486_v41 }
 0x4a2   :  { %3544 = vst [vmem:[%s7154_s5 + $0x10] sm:$0xff] %v3540_v39 }

</bundles_post_ra>
